<compile_context>
chip_gen: v7x
topology: tpu7x:2x2x1
jax: 0.10.0
libtpu: 0.0.40
codegen_flags: <defaults>
</compile_context>

<pallas_src>
import math
import functools

import jax
import jax.numpy as jnp
from jax.experimental import pallas as pl
from jax.experimental.pallas import tpu as pltpu

EPS = 1e-5          # BatchNorm3d default eps
K5 = 5              # basic-block conv kernel size
P5 = K5 // 2        # 'same' padding


def _vmem_limit_bytes():
    try:
        info = pltpu.get_tpu_info()
        cap = int(getattr(info, "vmem_capacity_bytes", 128 * 1024 * 1024))
    except Exception:
        cap = 128 * 1024 * 1024
    return max(32 * 1024 * 1024, int(cap * 0.7))


VMEM_LIMIT = _vmem_limit_bytes()
BLOCK_BUDGET = VMEM_LIMIT // 2          # target working set per grid step


def _compiler_params():
    return pltpu.CompilerParams(dimension_semantics=("parallel", "parallel"),
                                vmem_limit_bytes=VMEM_LIMIT)


# ----------------------------------------------------------------------------
# tiling helpers
# ----------------------------------------------------------------------------
def _largest_divisor_leq(n, cap):
    cap = int(max(1, min(n, cap)))
    for t in range(cap, 0, -1):
        if n % t == 0:
            return t
    return 1


def _down_depth_tile(do, c1, c2, hwp, budget):
    per = (8 * c1 + c2) * hwp * 2 * 2 + c2 * hwp * 4
    return _largest_divisor_leq(do, budget // max(per, 1))


def _final_depth_tile(do, c, hwp, budget):
    per = (2 * 2 + 4) * c * hwp * 2
    return _largest_divisor_leq(do, budget // max(per, 1))


def _conv5_depth_tile(do, c, hwp, lc, budget):
    plane = c * hwp * 2
    fixed = (25 * c * lc * 2 + c * lc * 4 + 2 * K5 * c * 25 * c * 2
             + 16 * plane + (1 << 20))
    per_td = 5 * plane                    # in x2 buf + out x2 buf + xpad
    cap = max(2, (budget - fixed) // per_td) if budget > fixed else 2
    if do <= cap:
        return do
    best = None
    for t in range(2, min(do, cap) + 1, 2):   # NS > 1 requires an even slab depth
        if do % t == 0:
            best = t
    # TODO(synk): if no even divisor fits the budget, fall back to the full depth.
    return best if best is not None else do


# ----------------------------------------------------------------------------
# kernels
# ----------------------------------------------------------------------------
def _down_kernel(cols_ref, w_ref, out_ref, stats_ref):
    """cols: (TD, 8*C1, HWp) bf16 padded-flat im2col columns, w: (C2, 8*C1) bf16.
    Emits raw conv planes (bf16) + per-channel (sum, sumsq) f32 (pad columns are 0)."""
    c2 = w_ref.shape[0]
    w = w_ref[...]

    def body(t, carry):
        s1, s2 = carry
        y = jnp.dot(w, cols_ref[t], preferred_element_type=jnp.float32)
        out_ref[t] = y.astype(out_ref.dtype)
        return (s1 + jnp.sum(y, axis=1, keepdims=True),
                s2 + jnp.sum(y * y, axis=1, keepdims=True))

    z = jnp.zeros((c2, 1), jnp.float32)
    s1, s2 = jax.lax.fori_loop(0, cols_ref.shape[0], body, (z, z))
    stats_ref[...] = jnp.concatenate([s1, s2], axis=1)


def _conv5_block_kernel(x_ref, lo_ref, hi_ref, w_ref, sc_ref, sh_ref, al_ref,
                        mask_ref, out_ref, stats_ref, xpad_ref, gbuf_ref, acc_ref,
                        *, Wp, Lc, j0):
    """One basic block on a D-slab: fused [BN-apply + PReLU + pad mask] of the raw
    input, then 5^3 'same' conv via the padded-row stride trick, emitting the raw conv
    output (bf16) and per-channel (sum, sumsq) over valid voxels."""
    TD, C, HWp = x_ref.shape
    s = pl.program_id(1)
    ns = pl.num_programs(1)

    scale = sc_ref[...]                       # (C, 1) f32
    shift = sh_ref[...]
    alpha = al_ref[...]
    mask = mask_ref[...]                      # (1, HWp) f32, 1 at valid voxels
    mask_c = mask_ref[:, pl.ds(j0, Lc)]       # (1, Lc)

    def act(raw_plane):                       # previous stage's BN + PReLU + masking
        y = raw_plane.astype(jnp.float32) * scale + shift
        y = jnp.where(y > 0, y, alpha * y)
        y = jnp.where(mask > 0, y, 0.0)
        return y.astype(jnp.bfloat16)

    out_ref[...] = jnp.zeros_like(out_ref)

    # ---- activated, zero-padded slab: [2 lo-halo | TD center | 2 hi-halo] ----
    zplane = jnp.zeros((C, HWp), jnp.bfloat16)

    @pl.when(s > 0)
    def _():
        xpad_ref[0] = act(lo_ref[0])
        xpad_ref[1] = act(lo_ref[1])

    @pl.when(s == 0)
    def _():
        xpad_ref[0] = zplane
        xpad_ref[1] = zplane

    @pl.when(s < ns - 1)
    def _():
        xpad_ref[2 + TD] = act(hi_ref[0])
        xpad_ref[3 + TD] = act(hi_ref[1])

    @pl.when(s == ns - 1)
    def _():
        xpad_ref[2 + TD] = zplane
        xpad_ref[3 + TD] = zplane

    def fill(t, carry):
        xpad_ref[2 + t] = act(x_ref[t])
        return carry

    jax.lax.fori_loop(0, TD, fill, 0)

    # ---- conv: per output plane, 5 matmuls of contraction depth 25*C ----
    def plane(d, carry):
        s1, s2 = carry
        acc_ref[...] = jnp.zeros_like(acc_ref)
        for kz in range(K5):
            for t in range(K5 * K5):
                ky, kx = t // K5, t % K5
                gbuf_ref[pl.ds(t * C, C), :] = (
                    xpad_ref[d + kz, :, pl.ds(ky * Wp + kx, Lc)])
            acc_ref[...] += jnp.dot(w_ref[kz], gbuf_ref[...],
                                    preferred_element_type=jnp.float32)
        y = jnp.where(mask_c > 0, acc_ref[...], 0.0)
        out_ref[d, :, pl.ds(j0, Lc)] = y.astype(out_ref.dtype)
        return (s1 + jnp.sum(y, axis=1, keepdims=True),
                s2 + jnp.sum(y * y, axis=1, keepdims=True))

    z = jnp.zeros((C, 1), jnp.float32)
    s1, s2 = jax.lax.fori_loop(0, TD, plane, (z, z))
    stats_ref[...] = jnp.concatenate([s1, s2], axis=1)


def _residual_out_kernel(y_ref, d_ref, scb_ref, shb_ref, alb_ref,
                         scd_ref, shd_ref, ald_ref, a2_ref, o_ref):
    """out = PReLU_a2( PReLU_blk(BN_blk(y)) + PReLU_down(BN_down(down_raw)) )."""
    yb = y_ref[...].astype(jnp.float32) * scb_ref[...] + shb_ref[...]
    yb = jnp.where(yb > 0, yb, alb_ref[...] * yb)
    yd = d_ref[...].astype(jnp.float32) * scd_ref[...] + shd_ref[...]
    yd = jnp.where(yd > 0, yd, ald_ref[...] * yd)
    z = yb + yd
    o_ref[...] = jnp.where(z > 0, z, a2_ref[...] * z)


# ----------------------------------------------------------------------------
# pallas_call wrappers
# ----------------------------------------------------------------------------
def _down_conv_call(cols, wd, N, Do, C1, C2, HWp, budget):
    TDd = _down_depth_tile(Do, C1, C2, HWp, budget)
    NSd = Do // TDd
    out, stats = pl.pallas_call(
        _down_kernel,
        grid=(N, NSd),
        in_specs=[
            pl.BlockSpec((None, TDd, 8 * C1, HWp), lambda n, s: (n, s, 0, 0)),
            pl.BlockSpec((C2, 8 * C1), lambda n, s: (0, 0)),
        ],
        out_specs=[
            pl.BlockSpec((None, TDd, C2, HWp), lambda n, s: (n, s, 0, 0)),
            pl.BlockSpec((None, None, C2, 2), lambda n, s: (n, s, 0, 0)),
        ],
        out_shape=[
            jax.ShapeDtypeStruct((N, Do, C2, HWp), jnp.bfloat16),
            jax.ShapeDtypeStruct((N, NSd, C2, 2), jnp.float32),
        ],
        compiler_params=_compiler_params(),
    )(cols, wd)
    return out, stats.sum(axis=(0, 1))


def _conv5_block(x_work, w5, scale, shift, alpha, mask, N, Do, C, HWp, Wp, Lc, j0,
                 budget):
    TD = _conv5_depth_tile(Do, C, HWp, Lc, budget)
    NS = Do // TD
    half = TD // 2
    nhalf = (Do + 1) // 2
    kern = functools.partial(_conv5_block_kernel, Wp=Wp, Lc=Lc, j0=j0)
    out, stats = pl.pallas_call(
        kern,
        grid=(N, NS),
        in_specs=[
            pl.BlockSpec((None, TD, C, HWp), lambda n, s: (n, s, 0, 0)),
            pl.BlockSpec((None, 2, C, HWp),
                         lambda n, s: (n, jnp.maximum(s * half - 1, 0), 0, 0)),
            pl.BlockSpec((None, 2, C, HWp),
                         lambda n, s: (n, jnp.minimum((s + 1) * half, nhalf - 1), 0, 0)),
            pl.BlockSpec((K5, C, K5 * K5 * C), lambda n, s: (0, 0, 0)),
            pl.BlockSpec((C, 1), lambda n, s: (0, 0)),
            pl.BlockSpec((C, 1), lambda n, s: (0, 0)),
            pl.BlockSpec((C, 1), lambda n, s: (0, 0)),
            pl.BlockSpec((1, HWp), lambda n, s: (0, 0)),
        ],
        out_specs=[
            pl.BlockSpec((None, TD, C, HWp), lambda n, s: (n, s, 0, 0)),
            pl.BlockSpec((None, None, C, 2), lambda n, s: (n, s, 0, 0)),
        ],
        out_shape=[
            jax.ShapeDtypeStruct((N, Do, C, HWp), jnp.bfloat16),
            jax.ShapeDtypeStruct((N, NS, C, 2), jnp.float32),
        ],
        scratch_shapes=[
            pltpu.VMEM((TD + 4, C, HWp), jnp.bfloat16),     # activated padded slab
            pltpu.VMEM((K5 * K5 * C, Lc), jnp.bfloat16),    # grouped tap operand
            pltpu.VMEM((C, Lc), jnp.float32),               # f32 accumulator
        ],
        compiler_params=_compiler_params(),
    )(x_work, x_work, x_work, w5, scale, shift, alpha, mask)
    return out, stats.sum(axis=(0, 1))


def _residual_out(y_last, down_raw, pb, pd, a2, N, Do, C, HWp, budget):
    TDf = _final_depth_tile(Do, C, HWp, budget)
    NSf = Do // TDf
    par_spec = pl.BlockSpec((C, 1), lambda n, s: (0, 0))
    out = pl.pallas_call(
        _residual_out_kernel,
        grid=(N, NSf),
        in_specs=[
            pl.BlockSpec((None, TDf, C, HWp), lambda n, s: (n, s, 0, 0)),
            pl.BlockSpec((None, TDf, C, HWp), lambda n, s: (n, s, 0, 0)),
            par_spec, par_spec, par_spec, par_spec, par_spec, par_spec, par_spec,
        ],
        out_specs=pl.BlockSpec((None, TDf, C, HWp), lambda n, s: (n, s, 0, 0)),
        out_shape=jax.ShapeDtypeStruct((N, Do, C, HWp), jnp.float32),
        compiler_params=_compiler_params(),
    )(y_last, down_raw, pb[0], pb[1], pb[2], pd[0], pd[1], pd[2], a2)
    return out


# ----------------------------------------------------------------------------
# BN finalize / small helpers
# ----------------------------------------------------------------------------
def _finalize_bn(stats, count, gamma, beta):
    mean = stats[:, 0] / count
    var = jnp.maximum(stats[:, 1] / count - mean * mean, 0.0)
    inv = jax.lax.rsqrt(var + EPS)
    scale = gamma * inv
    shift = beta - mean * scale
    return scale.reshape(-1, 1).astype(jnp.float32), \
        shift.reshape(-1, 1).astype(jnp.float32)


def _col(v, C):
    v = jnp.asarray(v, jnp.float32).reshape(-1)
    if v.size == 1:
        v = jnp.broadcast_to(v, (C,))
    return v.reshape(C, 1)


# ----------------------------------------------------------------------------
# full module forward
# ----------------------------------------------------------------------------
def vnet_downward_transition(x, params):
    """x: (N, C1, D, H, W) f32.  Returns (N, C2, D//2, H//2, W//2) f32.
    params: {'down_w': (C2,C1,2,2,2), 'down_gamma','down_beta': (C2,),
             'down_alpha': scalar or (C2,),
             'blocks': [{'w': (C2,C2,5,5,5), 'gamma','beta': (C2,),
                         'alpha': scalar or (C2,)}, ...],
             'alpha2': scalar or (C2,)}"""
    N, C1, D, H, W = x.shape
    assert D % 2 == 0 and H % 2 == 0 and W % 2 == 0
    C2 = params["down_w"].shape[0]
    Do, Ho, Wo = D // 2, H // 2, W // 2
    assert Do >= 2
    Hp, Wp = Ho + 2 * P5, Wo + 2 * P5
    HWp = Hp * Wp
    Lc = (Ho - 1) * Wp + Wo                 # span of valid output lanes per plane
    j0 = P5 * Wp + P5                       # first valid lane inside a padded plane
    count = jnp.float32(N * Do * Ho * Wo)
    budget = BLOCK_BUDGET

    # valid-voxel mask inside the padded-flat plane
    mask = jnp.pad(jnp.ones((Ho, Wo), jnp.float32),
                   ((P5, P5), (P5, P5))).reshape(1, HWp)

    # ---- down conv (k=2, s=2): wrapper-side im2col into padded-flat columns ----
    xs = x.reshape(N, C1, Do, 2, Ho, 2, Wo, 2)
    cols = xs.transpose(0, 2, 1, 3, 5, 7, 4, 6).reshape(N, Do, 8 * C1, Ho, Wo)
    cols = jnp.pad(cols, ((0, 0), (0, 0), (0, 0), (P5, P5), (P5, P5)))
    cols = cols.reshape(N, Do, 8 * C1, HWp).astype(jnp.bfloat16)
    wd = params["down_w"].reshape(C2, 8 * C1).astype(jnp.bfloat16)

    down_raw, down_stats = _down_conv_call(cols, wd, N, Do, C1, C2, HWp, budget)
    sc_d, sh_d = _finalize_bn(down_stats, count,
                              params["down_gamma"], params["down_beta"])
    al_d = _col(params["down_alpha"], C2)

    # ---- nConvs basic blocks, BN/PReLU fused into each consumer ----
    blocks = params["blocks"]
    assert len(blocks) >= 1, "this implementation expects nConvs >= 1"
    cur = down_raw
    cur_sc, cur_sh, cur_al = sc_d, sh_d, al_d
    for blk in blocks:
        w5 = blk["w"].transpose(2, 0, 3, 4, 1).reshape(
            K5, C2, K5 * K5 * C2).astype(jnp.bfloat16)
        conv_raw, stats = _conv5_block(cur, w5, cur_sc, cur_sh, cur_al, mask,
                                       N, Do, C2, HWp, Wp, Lc, j0, budget)
        sc_b, sh_b = _finalize_bn(stats, count, blk["gamma"], blk["beta"])
        cur, cur_sc, cur_sh = conv_raw, sc_b, sh_b
        cur_al = _col(blk["alpha"], C2)

    # ---- residual add + final PReLU (recomputes `down`'s activation) ----
    a2 = _col(params["alpha2"], C2)
    out_pf = _residual_out(cur, down_raw, (cur_sc, cur_sh, cur_al),
                           (sc_d, sh_d, al_d), a2, N, Do, C2, HWp, budget)

    out = out_pf.reshape(N, Do, C2, Hp, Wp)[:, :, :, P5:P5 + Ho, P5:P5 + Wo]
    return out.transpose(0, 2, 1, 3, 4)


# ----------------------------------------------------------------------------
# pure-JAX reference (f32, training-mode BN) for a loose numerical check
# ----------------------------------------------------------------------------
def _ref_forward(x, params):
    def conv(v, w, stride, pad):
        return jax.lax.conv_general_dilated(
            v, w, window_strides=(stride,) * 3, padding=[(pad, pad)] * 3,
            dimension_numbers=("NCDHW", "OIDHW", "NCDHW"),
            precision=jax.lax.Precision.HIGHEST)

    def bcast(a, c):
        return jnp.broadcast_to(jnp.asarray(a, jnp.float32).reshape(-1),
                                (c,)).reshape(1, -1, 1, 1, 1)

    def bn_prelu(y, gamma, beta, alpha):
        mean = jnp.mean(y, axis=(0, 2, 3, 4), keepdims=True)
        var = jnp.mean((y - mean) ** 2, axis=(0, 2, 3, 4), keepdims=True)
        yh = (y - mean) * jax.lax.rsqrt(var + EPS)
        yh = yh * gamma.reshape(1, -1, 1, 1, 1) + beta.reshape(1, -1, 1, 1, 1)
        a = bcast(alpha, y.shape[1])
        return jnp.where(yh > 0, yh, a * yh)

    down = bn_prelu(conv(x, params["down_w"], 2, 0),
                    params["down_gamma"], params["down_beta"], params["down_alpha"])
    h = down
    for blk in params["blocks"]:
        h = bn_prelu(conv(h, blk["w"], 1, 2), blk["gamma"], blk["beta"], blk["alpha"])
    z = h + down
    a2 = bcast(params["alpha2"], z.shape[1])
    return jnp.where(z > 0, z, a2 * z)


if __name__ == "__main__":
    key = jax.random.PRNGKey(0)
    keys = jax.random.split(key, 8)

    N = 2
    C1, C2 = 8, 16
    D = H = W = 16
    n_convs = 2

    x = jax.random.normal(keys[0], (N, C1, D, H, W), dtype=jnp.float32)

    bd = 1.0 / math.sqrt(C1 * 8)
    down_w = jax.random.uniform(keys[1], (C2, C1, 2, 2, 2),
                                minval=-bd, maxval=bd, dtype=jnp.float32)

    fan_out = C2 * K5 * K5 * K5
    bound = math.sqrt(2.0) * math.sqrt(3.0 / fan_out) / math.sqrt(n_convs)
    blocks = []
    for i in range(n_convs):
        w = jax.random.uniform(keys[2 + i], (C2, C2, K5, K5, K5),
                               minval=-bound, maxval=bound, dtype=jnp.float32)
        blocks.append(dict(w=w,
                           gamma=jnp.ones((C2,), jnp.float32),
                           beta=jnp.zeros((C2,), jnp.float32),
                           alpha=0.1 + 0.02 * jnp.arange(C2, dtype=jnp.float32)))

    params = dict(down_w=down_w,
                  down_gamma=jnp.ones((C2,), jnp.float32),
                  down_beta=jnp.zeros((C2,), jnp.float32),
                  down_alpha=jnp.float32(0.25),
                  blocks=blocks,
                  alpha2=jnp.float32(0.25))

    fwd = jax.jit(vnet_downward_transition)
    out = fwd(x, params)
    jax.block_until_ready(out)
    assert out.shape == (N, C2, D // 2, H // 2, W // 2)
    assert bool(jnp.all(jnp.isfinite(out)))

    ref = jax.jit(_ref_forward)(x, params)
    max_err = float(jnp.max(jnp.abs(out - ref)))
    mean_err = float(jnp.mean(jnp.abs(out - ref)))
    assert max_err < 0.3 and mean_err < 0.05, (max_err, mean_err)

    print("KERNEL_OK")
</pallas_src>

<mosaic_0001>
module attributes {stable_mosaic.version = 11 : i64} {
  func.func @_down_kernel(%arg0: i32, %arg1: i32, %arg2: memref<1x8x64x144xbf16, #tpu.memory_space<vmem>>, %arg3: memref<16x64xbf16, #tpu.memory_space<vmem>>, %arg4: memref<1x8x16x144xbf16, #tpu.memory_space<vmem>>, %arg5: memref<1x1x16x2xf32, #tpu.memory_space<vmem>>) attributes {dimension_semantics = [#tpu.dimension_semantics<parallel>, #tpu.dimension_semantics<parallel>], iteration_bounds = array<i64: 2, 1>, scalar_prefetch = 0 : i64, scratch_operands = 0 : i64, tpu.core_type = #tpu.core_type<tc>, window_params = [{transform_indices = @transform_0, window_bounds = array<i64: 1, 8, 64, 144>}, {pipeline_mode = #tpu.pipeline_mode<synchronous>, transform_indices = @transform_1, window_bounds = array<i64: 16, 64>}, {transform_indices = @transform_2, window_bounds = array<i64: 1, 8, 16, 144>}, {transform_indices = @transform_3, window_bounds = array<i64: 1, 1, 16, 2>}]} {
    %c0 = arith.constant 0 : index
    %c0_0 = arith.constant 0 : index
    %0 = vector.load %arg3[%c0, %c0_0] : memref<16x64xbf16, #tpu.memory_space<vmem>>, vector<16x64xbf16>
    %cst = arith.constant 0.000000e+00 : f32
    %1 = vector.broadcast %cst : f32 to vector<16x1xf32>
    %c0_i32 = arith.constant 0 : i32
    %c8_i32 = arith.constant 8 : i32
    %2 = arith.addi %c0_i32, %c8_i32 : i32
    %c1_i32 = arith.constant 1 : i32
    %3:2 = scf.for %arg6 = %c0_i32 to %2 step %c1_i32 iter_args(%arg7 = %1, %arg8 = %1) -> (vector<16x1xf32>, vector<16x1xf32>)  : i32 {
      %c0_6 = arith.constant 0 : index
      %8 = arith.index_cast %arg6 : i32 to index
      %c0_7 = arith.constant 0 : index
      %c0_8 = arith.constant 0 : index
      %9 = vector.load %arg2[%c0_6, %8, %c0_7, %c0_8] : memref<1x8x64x144xbf16, #tpu.memory_space<vmem>>, vector<1x1x64x144xbf16>
      %10 = vector.shape_cast %9 : vector<1x1x64x144xbf16> to vector<64x144xbf16>
      %cst_9 = arith.constant dense<0.000000e+00> : vector<16x144xf32>
      %11 = tpu.matmul %0, %10, %cst_9 {dimension_numbers = #tpu.dot_dimension_numbers<[1], [0], [0], [1], [0, 0, 1, 1], [], []>} : vector<16x64xbf16>, vector<64x144xbf16>, vector<16x144xf32> -> vector<16x144xf32>
      %12 = arith.truncf %11 : vector<16x144xf32> to vector<16x144xbf16>
      %c0_10 = arith.constant 0 : index
      %13 = arith.index_cast %arg6 : i32 to index
      %c0_11 = arith.constant 0 : index
      %c0_12 = arith.constant 0 : index
      %14 = vector.load %arg4[%c0_10, %13, %c0_11, %c0_12] : memref<1x8x16x144xbf16, #tpu.memory_space<vmem>>, vector<1x1x16x144xbf16>
      %15 = vector.shape_cast %14 : vector<1x1x16x144xbf16> to vector<16x144xbf16>
      %16 = vector.shape_cast %12 : vector<16x144xbf16> to vector<1x1x16x144xbf16>
      tpu.vector_store %arg4[%c0_10, %13, %c0_11, %c0_12], %16 {strides = array<i32>} : memref<1x8x16x144xbf16, #tpu.memory_space<vmem>>, vector<1x1x16x144xbf16>,
      %cst_13 = arith.constant dense<0.000000e+00> : vector<16xf32>
      %17 = vector.multi_reduction <add>, %11, %cst_13 [1] : vector<16x144xf32> to vector<16xf32>
      %18 = vector.shape_cast %17 : vector<16xf32> to vector<16x1xf32>
      %19 = arith.addf %arg7, %18 : vector<16x1xf32>
      %20 = arith.mulf %11, %11 : vector<16x144xf32>
      %cst_14 = arith.constant dense<0.000000e+00> : vector<16xf32>
      %21 = vector.multi_reduction <add>, %20, %cst_14 [1] : vector<16x144xf32> to vector<16xf32>
      %22 = vector.shape_cast %21 : vector<16xf32> to vector<16x1xf32>
      %23 = arith.addf %arg8, %22 : vector<16x1xf32>
      scf.yield %19, %23 : vector<16x1xf32>, vector<16x1xf32>
    }
    %c8_i32_1 = arith.constant 8 : i32
    %4 = tpu.concatenate %3#0, %3#1 in 1 : vector<16x1xf32>, vector<16x1xf32> -> vector<16x2xf32>
    %c0_2 = arith.constant 0 : index
    %c0_3 = arith.constant 0 : index
    %c0_4 = arith.constant 0 : index
    %c0_5 = arith.constant 0 : index
    %5 = vector.load %arg5[%c0_2, %c0_3, %c0_4, %c0_5] : memref<1x1x16x2xf32, #tpu.memory_space<vmem>>, vector<1x1x16x2xf32>
    %6 = vector.shape_cast %5 : vector<1x1x16x2xf32> to vector<16x2xf32>
    %7 = vector.shape_cast %4 : vector<16x2xf32> to vector<1x1x16x2xf32>
    tpu.vector_store %arg5[%c0_2, %c0_3, %c0_4, %c0_5], %7 {strides = array<i32>} : memref<1x1x16x2xf32, #tpu.memory_space<vmem>>, vector<1x1x16x2xf32>,
    return
  }
  func.func @transform_0(%arg0: i32, %arg1: i32) -> (i32, i32, i32, i32) {
    %c0_i32 = arith.constant 0 : i32
    %c0_i32_0 = arith.constant 0 : i32
    %c0_i32_1 = arith.constant 0 : i32
    return %arg0, %arg1, %c0_i32, %c0_i32_0 : i32, i32, i32, i32
  }
  func.func @transform_1(%arg0: i32, %arg1: i32) -> (i32, i32) {
    %c0_i32 = arith.constant 0 : i32
    %c0_i32_0 = arith.constant 0 : i32
    %c0_i32_1 = arith.constant 0 : i32
    return %c0_i32, %c0_i32_0 : i32, i32
  }
  func.func @transform_2(%arg0: i32, %arg1: i32) -> (i32, i32, i32, i32) {
    %c0_i32 = arith.constant 0 : i32
    %c0_i32_0 = arith.constant 0 : i32
    %c0_i32_1 = arith.constant 0 : i32
    return %arg0, %arg1, %c0_i32, %c0_i32_0 : i32, i32, i32, i32
  }
  func.func @transform_3(%arg0: i32, %arg1: i32) -> (i32, i32, i32, i32) {
    %c0_i32 = arith.constant 0 : i32
    %c0_i32_0 = arith.constant 0 : i32
    %c0_i32_1 = arith.constant 0 : i32
    return %arg0, %arg1, %c0_i32, %c0_i32_0 : i32, i32, i32, i32
  }
}

module attributes {stable_mosaic.version = 11 : i64} {
  func.func @_conv5_block_kernel(%arg0: i32, %arg1: i32, %arg2: memref<1x8x16x144xbf16, #tpu.memory_space<vmem>>, %arg3: memref<1x2x16x144xbf16, #tpu.memory_space<vmem>>, %arg4: memref<1x2x16x144xbf16, #tpu.memory_space<vmem>>, %arg5: memref<5x16x400xbf16, #tpu.memory_space<vmem>>, %arg6: memref<16x1xf32, #tpu.memory_space<vmem>>, %arg7: memref<16x1xf32, #tpu.memory_space<vmem>>, %arg8: memref<16x1xf32, #tpu.memory_space<vmem>>, %arg9: memref<1x144xf32, #tpu.memory_space<vmem>>, %arg10: memref<1x8x16x144xbf16, #tpu.memory_space<vmem>>, %arg11: memref<1x1x16x2xf32, #tpu.memory_space<vmem>>, %arg12: memref<12x16x144xbf16, #tpu.memory_space<vmem>>, %arg13: memref<400x92xbf16, #tpu.memory_space<vmem>>, %arg14: memref<16x92xf32, #tpu.memory_space<vmem>>) attributes {dimension_semantics = [#tpu.dimension_semantics<parallel>, #tpu.dimension_semantics<parallel>], iteration_bounds = array<i64: 2, 1>, scalar_prefetch = 0 : i64, scratch_operands = 3 : i64, tpu.core_type = #tpu.core_type<tc>, window_params = [{transform_indices = @transform_0, window_bounds = array<i64: 1, 8, 16, 144>}, {transform_indices = @transform_1, window_bounds = array<i64: 1, 2, 16, 144>}, {transform_indices = @transform_2, window_bounds = array<i64: 1, 2, 16, 144>}, {pipeline_mode = #tpu.pipeline_mode<synchronous>, transform_indices = @transform_3, window_bounds = array<i64: 5, 16, 400>}, {pipeline_mode = #tpu.pipeline_mode<synchronous>, transform_indices = @transform_4, window_bounds = array<i64: 16, 1>}, {pipeline_mode = #tpu.pipeline_mode<synchronous>, transform_indices = @transform_5, window_bounds = array<i64: 16, 1>}, {pipeline_mode = #tpu.pipeline_mode<synchronous>, transform_indices = @transform_6, window_bounds = array<i64: 16, 1>}, {pipeline_mode = #tpu.pipeline_mode<synchronous>, transform_indices = @transform_7, window_bounds = array<i64: 1, 144>}, {transform_indices = @transform_8, window_bounds = array<i64: 1, 8, 16, 144>}, {transform_indices = @transform_9, window_bounds = array<i64: 1, 1, 16, 2>}]} {
    %c0 = arith.constant 0 : index
    %c0_0 = arith.constant 0 : index
    %0 = vector.load %arg6[%c0, %c0_0] : memref<16x1xf32, #tpu.memory_space<vmem>>, vector<16x1xf32>
    %c0_1 = arith.constant 0 : index
    %c0_2 = arith.constant 0 : index
    %1 = vector.load %arg7[%c0_1, %c0_2] : memref<16x1xf32, #tpu.memory_space<vmem>>, vector<16x1xf32>
    %c0_3 = arith.constant 0 : index
    %c0_4 = arith.constant 0 : index
    %2 = vector.load %arg8[%c0_3, %c0_4] : memref<16x1xf32, #tpu.memory_space<vmem>>, vector<16x1xf32>
    %c0_5 = arith.constant 0 : index
    %c0_6 = arith.constant 0 : index
    %3 = vector.load %arg9[%c0_5, %c0_6] : memref<1x144xf32, #tpu.memory_space<vmem>>, vector<1x144xf32>
    %c0_7 = arith.constant 0 : index
    %c26 = arith.constant 26 : index
    %4 = vector.load %arg9[%c0_7, %c26] : memref<1x144xf32, #tpu.memory_space<vmem>>, vector<1x92xf32>
    %cst = arith.constant 0.000000e+00 : bf16
    %5 = vector.broadcast %cst : bf16 to vector<8x16x144xbf16>
    %c0_8 = arith.constant 0 : index
    %c0_9 = arith.constant 0 : index
    %c0_10 = arith.constant 0 : index
    %c0_11 = arith.constant 0 : index
    %6 = vector.load %arg10[%c0_8, %c0_9, %c0_10, %c0_11] : memref<1x8x16x144xbf16, #tpu.memory_space<vmem>>, vector<1x8x16x144xbf16>
    %7 = vector.shape_cast %6 : vector<1x8x16x144xbf16> to vector<8x16x144xbf16>
    %8 = vector.shape_cast %5 : vector<8x16x144xbf16> to vector<1x8x16x144xbf16>
    tpu.vector_store %arg10[%c0_8, %c0_9, %c0_10, %c0_11], %8 {strides = array<i32>} : memref<1x8x16x144xbf16, #tpu.memory_space<vmem>>, vector<1x8x16x144xbf16>,
    %cst_12 = arith.constant 0.000000e+00 : bf16
    %9 = vector.broadcast %cst_12 : bf16 to vector<16x144xbf16>
    %c0_i32 = arith.constant 0 : i32
    %10 = arith.cmpi sgt, %arg1, %c0_i32 : i32
    %11 = arith.extui %10 : i1 to i32
    %c0_i32_13 = arith.constant 0 : i32
    %12 = arith.cmpi ne, %11, %c0_i32_13 : i32
    scf.if %12 {
      %c0_31 = arith.constant 0 : index
      %c0_32 = arith.constant 0 : index
      %c0_33 = arith.constant 0 : index
      %c0_34 = arith.constant 0 : index
      %30 = vector.load %arg3[%c0_31, %c0_32, %c0_33, %c0_34] : memref<1x2x16x144xbf16, #tpu.memory_space<vmem>>, vector<1x1x16x144xbf16>
      %31 = vector.shape_cast %30 : vector<1x1x16x144xbf16> to vector<16x144xbf16>
      %32 = arith.extf %31 : vector<16x144xbf16> to vector<16x144xf32>
      %33 = vector.broadcast %0 : vector<16x1xf32> to vector<16x144xf32>
      %34 = arith.mulf %32, %33 : vector<16x144xf32>
      %35 = vector.broadcast %1 : vector<16x1xf32> to vector<16x144xf32>
      %36 = arith.addf %34, %35 : vector<16x144xf32>
      %cst_35 = arith.constant 0.000000e+00 : f32
      %37 = vector.broadcast %cst_35 : f32 to vector<16x144xf32>
      %38 = arith.cmpf ogt, %36, %37 : vector<16x144xf32>
      %39 = vector.broadcast %2 : vector<16x1xf32> to vector<16x144xf32>
      %40 = arith.mulf %39, %36 : vector<16x144xf32>
      %41 = arith.select %38, %36, %40 : vector<16x144xi1>, vector<16x144xf32>
      %cst_36 = arith.constant 0.000000e+00 : f32
      %42 = vector.broadcast %cst_36 : f32 to vector<1x144xf32>
      %43 = arith.cmpf ogt, %3, %42 : vector<1x144xf32>
      %cst_37 = arith.constant 0.000000e+00 : f32
      %44 = vector.shape_cast %43 : vector<1x144xi1> to vector<1x144xi1>
      %45 = vector.broadcast %44 : vector<1x144xi1> to vector<16x144xi1>
      %46 = vector.broadcast %cst_37 : f32 to vector<16x144xf32>
      %47 = arith.select %45, %41, %46 : vector<16x144xi1>, vector<16x144xf32>
      %48 = arith.truncf %47 : vector<16x144xf32> to vector<16x144xbf16>
      %c0_38 = arith.constant 0 : index
      %c0_39 = arith.constant 0 : index
      %c0_40 = arith.constant 0 : index
      %49 = vector.load %arg12[%c0_38, %c0_39, %c0_40] : memref<12x16x144xbf16, #tpu.memory_space<vmem>>, vector<1x16x144xbf16>
      %50 = vector.shape_cast %49 : vector<1x16x144xbf16> to vector<16x144xbf16>
      %51 = vector.shape_cast %48 : vector<16x144xbf16> to vector<1x16x144xbf16>
      tpu.vector_store %arg12[%c0_38, %c0_39, %c0_40], %51 {strides = array<i32>} : memref<12x16x144xbf16, #tpu.memory_space<vmem>>, vector<1x16x144xbf16>,
      %c0_41 = arith.constant 0 : index
      %c1 = arith.constant 1 : index
      %c0_42 = arith.constant 0 : index
      %c0_43 = arith.constant 0 : index
      %52 = vector.load %arg3[%c0_41, %c1, %c0_42, %c0_43] : memref<1x2x16x144xbf16, #tpu.memory_space<vmem>>, vector<1x1x16x144xbf16>
      %53 = vector.shape_cast %52 : vector<1x1x16x144xbf16> to vector<16x144xbf16>
      %54 = arith.extf %53 : vector<16x144xbf16> to vector<16x144xf32>
      %55 = vector.broadcast %0 : vector<16x1xf32> to vector<16x144xf32>
      %56 = arith.mulf %54, %55 : vector<16x144xf32>
      %57 = vector.broadcast %1 : vector<16x1xf32> to vector<16x144xf32>
      %58 = arith.addf %56, %57 : vector<16x144xf32>
      %cst_44 = arith.constant 0.000000e+00 : f32
      %59 = vector.broadcast %cst_44 : f32 to vector<16x144xf32>
      %60 = arith.cmpf ogt, %58, %59 : vector<16x144xf32>
      %61 = vector.broadcast %2 : vector<16x1xf32> to vector<16x144xf32>
      %62 = arith.mulf %61, %58 : vector<16x144xf32>
      %63 = arith.select %60, %58, %62 : vector<16x144xi1>, vector<16x144xf32>
      %cst_45 = arith.constant 0.000000e+00 : f32
      %64 = vector.broadcast %cst_45 : f32 to vector<1x144xf32>
      %65 = arith.cmpf ogt, %3, %64 : vector<1x144xf32>
      %cst_46 = arith.constant 0.000000e+00 : f32
      %66 = vector.shape_cast %65 : vector<1x144xi1> to vector<1x144xi1>
      %67 = vector.broadcast %66 : vector<1x144xi1> to vector<16x144xi1>
      %68 = vector.broadcast %cst_46 : f32 to vector<16x144xf32>
      %69 = arith.select %67, %63, %68 : vector<16x144xi1>, vector<16x144xf32>
      %70 = arith.truncf %69 : vector<16x144xf32> to vector<16x144xbf16>
      %c1_47 = arith.constant 1 : index
      %c0_48 = arith.constant 0 : index
      %c0_49 = arith.constant 0 : index
      %71 = vector.load %arg12[%c1_47, %c0_48, %c0_49] : memref<12x16x144xbf16, #tpu.memory_space<vmem>>, vector<1x16x144xbf16>
      %72 = vector.shape_cast %71 : vector<1x16x144xbf16> to vector<16x144xbf16>
      %73 = vector.shape_cast %70 : vector<16x144xbf16> to vector<1x16x144xbf16>
      tpu.vector_store %arg12[%c1_47, %c0_48, %c0_49], %73 {strides = array<i32>} : memref<12x16x144xbf16, #tpu.memory_space<vmem>>, vector<1x16x144xbf16>,
    } else {
    }
    %c0_i32_14 = arith.constant 0 : i32
    %13 = arith.cmpi eq, %arg1, %c0_i32_14 : i32
    %14 = arith.extui %13 : i1 to i32
    %c0_i32_15 = arith.constant 0 : i32
    %15 = arith.cmpi ne, %14, %c0_i32_15 : i32
    scf.if %15 {
      %c0_31 = arith.constant 0 : index
      %c0_32 = arith.constant 0 : index
      %c0_33 = arith.constant 0 : index
      %30 = vector.load %arg12[%c0_31, %c0_32, %c0_33] : memref<12x16x144xbf16, #tpu.memory_space<vmem>>, vector<1x16x144xbf16>
      %31 = vector.shape_cast %30 : vector<1x16x144xbf16> to vector<16x144xbf16>
      %32 = vector.shape_cast %9 : vector<16x144xbf16> to vector<1x16x144xbf16>
      tpu.vector_store %arg12[%c0_31, %c0_32, %c0_33], %32 {strides = array<i32>} : memref<12x16x144xbf16, #tpu.memory_space<vmem>>, vector<1x16x144xbf16>,
      %c1 = arith.constant 1 : index
      %c0_34 = arith.constant 0 : index
      %c0_35 = arith.constant 0 : index
      %33 = vector.load %arg12[%c1, %c0_34, %c0_35] : memref<12x16x144xbf16, #tpu.memory_space<vmem>>, vector<1x16x144xbf16>
      %34 = vector.shape_cast %33 : vector<1x16x144xbf16> to vector<16x144xbf16>
      %35 = vector.shape_cast %9 : vector<16x144xbf16> to vector<1x16x144xbf16>
      tpu.vector_store %arg12[%c1, %c0_34, %c0_35], %35 {strides = array<i32>} : memref<12x16x144xbf16, #tpu.memory_space<vmem>>, vector<1x16x144xbf16>,
    } else {
    }
    %c0_i32_16 = arith.constant 0 : i32
    %16 = arith.cmpi slt, %arg1, %c0_i32_16 : i32
    %17 = arith.extui %16 : i1 to i32
    %c0_i32_17 = arith.constant 0 : i32
    %18 = arith.cmpi ne, %17, %c0_i32_17 : i32
    scf.if %18 {
      %c0_31 = arith.constant 0 : index
      %c0_32 = arith.constant 0 : index
      %c0_33 = arith.constant 0 : index
      %c0_34 = arith.constant 0 : index
      %30 = vector.load %arg4[%c0_31, %c0_32, %c0_33, %c0_34] : memref<1x2x16x144xbf16, #tpu.memory_space<vmem>>, vector<1x1x16x144xbf16>
      %31 = vector.shape_cast %30 : vector<1x1x16x144xbf16> to vector<16x144xbf16>
      %32 = arith.extf %31 : vector<16x144xbf16> to vector<16x144xf32>
      %33 = vector.broadcast %0 : vector<16x1xf32> to vector<16x144xf32>
      %34 = arith.mulf %32, %33 : vector<16x144xf32>
      %35 = vector.broadcast %1 : vector<16x1xf32> to vector<16x144xf32>
      %36 = arith.addf %34, %35 : vector<16x144xf32>
      %cst_35 = arith.constant 0.000000e+00 : f32
      %37 = vector.broadcast %cst_35 : f32 to vector<16x144xf32>
      %38 = arith.cmpf ogt, %36, %37 : vector<16x144xf32>
      %39 = vector.broadcast %2 : vector<16x1xf32> to vector<16x144xf32>
      %40 = arith.mulf %39, %36 : vector<16x144xf32>
      %41 = arith.select %38, %36, %40 : vector<16x144xi1>, vector<16x144xf32>
      %cst_36 = arith.constant 0.000000e+00 : f32
      %42 = vector.broadcast %cst_36 : f32 to vector<1x144xf32>
      %43 = arith.cmpf ogt, %3, %42 : vector<1x144xf32>
      %cst_37 = arith.constant 0.000000e+00 : f32
      %44 = vector.shape_cast %43 : vector<1x144xi1> to vector<1x144xi1>
      %45 = vector.broadcast %44 : vector<1x144xi1> to vector<16x144xi1>
      %46 = vector.broadcast %cst_37 : f32 to vector<16x144xf32>
      %47 = arith.select %45, %41, %46 : vector<16x144xi1>, vector<16x144xf32>
      %48 = arith.truncf %47 : vector<16x144xf32> to vector<16x144xbf16>
      %c10 = arith.constant 10 : index
      %c0_38 = arith.constant 0 : index
      %c0_39 = arith.constant 0 : index
      %49 = vector.load %arg12[%c10, %c0_38, %c0_39] : memref<12x16x144xbf16, #tpu.memory_space<vmem>>, vector<1x16x144xbf16>
      %50 = vector.shape_cast %49 : vector<1x16x144xbf16> to vector<16x144xbf16>
      %51 = vector.shape_cast %48 : vector<16x144xbf16> to vector<1x16x144xbf16>
      tpu.vector_store %arg12[%c10, %c0_38, %c0_39], %51 {strides = array<i32>} : memref<12x16x144xbf16, #tpu.memory_space<vmem>>, vector<1x16x144xbf16>,
      %c0_40 = arith.constant 0 : index
      %c1 = arith.constant 1 : index
      %c0_41 = arith.constant 0 : index
      %c0_42 = arith.constant 0 : index
      %52 = vector.load %arg4[%c0_40, %c1, %c0_41, %c0_42] : memref<1x2x16x144xbf16, #tpu.memory_space<vmem>>, vector<1x1x16x144xbf16>
      %53 = vector.shape_cast %52 : vector<1x1x16x144xbf16> to vector<16x144xbf16>
      %54 = arith.extf %53 : vector<16x144xbf16> to vector<16x144xf32>
      %55 = vector.broadcast %0 : vector<16x1xf32> to vector<16x144xf32>
      %56 = arith.mulf %54, %55 : vector<16x144xf32>
      %57 = vector.broadcast %1 : vector<16x1xf32> to vector<16x144xf32>
      %58 = arith.addf %56, %57 : vector<16x144xf32>
      %cst_43 = arith.constant 0.000000e+00 : f32
      %59 = vector.broadcast %cst_43 : f32 to vector<16x144xf32>
      %60 = arith.cmpf ogt, %58, %59 : vector<16x144xf32>
      %61 = vector.broadcast %2 : vector<16x1xf32> to vector<16x144xf32>
      %62 = arith.mulf %61, %58 : vector<16x144xf32>
      %63 = arith.select %60, %58, %62 : vector<16x144xi1>, vector<16x144xf32>
      %cst_44 = arith.constant 0.000000e+00 : f32
      %64 = vector.broadcast %cst_44 : f32 to vector<1x144xf32>
      %65 = arith.cmpf ogt, %3, %64 : vector<1x144xf32>
      %cst_45 = arith.constant 0.000000e+00 : f32
      %66 = vector.shape_cast %65 : vector<1x144xi1> to vector<1x144xi1>
      %67 = vector.broadcast %66 : vector<1x144xi1> to vector<16x144xi1>
      %68 = vector.broadcast %cst_45 : f32 to vector<16x144xf32>
      %69 = arith.select %67, %63, %68 : vector<16x144xi1>, vector<16x144xf32>
      %70 = arith.truncf %69 : vector<16x144xf32> to vector<16x144xbf16>
      %c11 = arith.constant 11 : index
      %c0_46 = arith.constant 0 : index
      %c0_47 = arith.constant 0 : index
      %71 = vector.load %arg12[%c11, %c0_46, %c0_47] : memref<12x16x144xbf16, #tpu.memory_space<vmem>>, vector<1x16x144xbf16>
      %72 = vector.shape_cast %71 : vector<1x16x144xbf16> to vector<16x144xbf16>
      %73 = vector.shape_cast %70 : vector<16x144xbf16> to vector<1x16x144xbf16>
      tpu.vector_store %arg12[%c11, %c0_46, %c0_47], %73 {strides = array<i32>} : memref<12x16x144xbf16, #tpu.memory_space<vmem>>, vector<1x16x144xbf16>,
    } else {
    }
    %c0_i32_18 = arith.constant 0 : i32
    %19 = arith.cmpi eq, %arg1, %c0_i32_18 : i32
    %20 = arith.extui %19 : i1 to i32
    %c0_i32_19 = arith.constant 0 : i32
    %21 = arith.cmpi ne, %20, %c0_i32_19 : i32
    scf.if %21 {
      %c10 = arith.constant 10 : index
      %c0_31 = arith.constant 0 : index
      %c0_32 = arith.constant 0 : index
      %30 = vector.load %arg12[%c10, %c0_31, %c0_32] : memref<12x16x144xbf16, #tpu.memory_space<vmem>>, vector<1x16x144xbf16>
      %31 = vector.shape_cast %30 : vector<1x16x144xbf16> to vector<16x144xbf16>
      %32 = vector.shape_cast %9 : vector<16x144xbf16> to vector<1x16x144xbf16>
      tpu.vector_store %arg12[%c10, %c0_31, %c0_32], %32 {strides = array<i32>} : memref<12x16x144xbf16, #tpu.memory_space<vmem>>, vector<1x16x144xbf16>,
      %c11 = arith.constant 11 : index
      %c0_33 = arith.constant 0 : index
      %c0_34 = arith.constant 0 : index
      %33 = vector.load %arg12[%c11, %c0_33, %c0_34] : memref<12x16x144xbf16, #tpu.memory_space<vmem>>, vector<1x16x144xbf16>
      %34 = vector.shape_cast %33 : vector<1x16x144xbf16> to vector<16x144xbf16>
      %35 = vector.shape_cast %9 : vector<16x144xbf16> to vector<1x16x144xbf16>
      tpu.vector_store %arg12[%c11, %c0_33, %c0_34], %35 {strides = array<i32>} : memref<12x16x144xbf16, #tpu.memory_space<vmem>>, vector<1x16x144xbf16>,
    } else {
    }
    %c0_i32_20 = arith.constant 0 : i32
    %c8_i32 = arith.constant 8 : i32
    %22 = arith.addi %c0_i32_20, %c8_i32 : i32
    %c1_i32 = arith.constant 1 : i32
    scf.for %arg15 = %c0_i32_20 to %22 step %c1_i32  : i32 {
      %c0_31 = arith.constant 0 : index
      %30 = arith.index_cast %arg15 : i32 to index
      %c0_32 = arith.constant 0 : index
      %c0_33 = arith.constant 0 : index
      %31 = vector.load %arg2[%c0_31, %30, %c0_32, %c0_33] : memref<1x8x16x144xbf16, #tpu.memory_space<vmem>>, vector<1x1x16x144xbf16>
      %32 = vector.shape_cast %31 : vector<1x1x16x144xbf16> to vector<16x144xbf16>
      %33 = arith.extf %32 : vector<16x144xbf16> to vector<16x144xf32>
      %34 = vector.broadcast %0 : vector<16x1xf32> to vector<16x144xf32>
      %35 = arith.mulf %33, %34 : vector<16x144xf32>
      %36 = vector.broadcast %1 : vector<16x1xf32> to vector<16x144xf32>
      %37 = arith.addf %35, %36 : vector<16x144xf32>
      %cst_34 = arith.constant 0.000000e+00 : f32
      %38 = vector.broadcast %cst_34 : f32 to vector<16x144xf32>
      %39 = arith.cmpf ogt, %37, %38 : vector<16x144xf32>
      %40 = vector.broadcast %2 : vector<16x1xf32> to vector<16x144xf32>
      %41 = arith.mulf %40, %37 : vector<16x144xf32>
      %42 = arith.select %39, %37, %41 : vector<16x144xi1>, vector<16x144xf32>
      %cst_35 = arith.constant 0.000000e+00 : f32
      %43 = vector.broadcast %cst_35 : f32 to vector<1x144xf32>
      %44 = arith.cmpf ogt, %3, %43 : vector<1x144xf32>
      %cst_36 = arith.constant 0.000000e+00 : f32
      %45 = vector.shape_cast %44 : vector<1x144xi1> to vector<1x144xi1>
      %46 = vector.broadcast %45 : vector<1x144xi1> to vector<16x144xi1>
      %47 = vector.broadcast %cst_36 : f32 to vector<16x144xf32>
      %48 = arith.select %46, %42, %47 : vector<16x144xi1>, vector<16x144xf32>
      %49 = arith.truncf %48 : vector<16x144xf32> to vector<16x144xbf16>
      %c2_i32 = arith.constant 2 : i32
      %50 = arith.addi %c2_i32, %arg15 : i32
      %51 = arith.index_cast %50 : i32 to index
      %c0_37 = arith.constant 0 : index
      %c0_38 = arith.constant 0 : index
      %52 = vector.load %arg12[%51, %c0_37, %c0_38] : memref<12x16x144xbf16, #tpu.memory_space<vmem>>, vector<1x16x144xbf16>
      %53 = vector.shape_cast %52 : vector<1x16x144xbf16> to vector<16x144xbf16>
      %54 = vector.shape_cast %49 : vector<16x144xbf16> to vector<1x16x144xbf16>
      tpu.vector_store %arg12[%51, %c0_37, %c0_38], %54 {strides = array<i32>} : memref<12x16x144xbf16, #tpu.memory_space<vmem>>, vector<1x16x144xbf16>,
    }
    %c8_i32_21 = arith.constant 8 : i32
    %cst_22 = arith.constant 0.000000e+00 : f32
    %23 = vector.broadcast %cst_22 : f32 to vector<16x1xf32>
    %c0_i32_23 = arith.constant 0 : i32
    %c8_i32_24 = arith.constant 8 : i32
    %24 = arith.addi %c0_i32_23, %c8_i32_24 : i32
    %c1_i32_25 = arith.constant 1 : i32
    %25:2 = scf.for %arg15 = %c0_i32_23 to %24 step %c1_i32_25 iter_args(%arg16 = %23, %arg17 = %23) -> (vector<16x1xf32>, vector<16x1xf32>)  : i32 {
      %cst_31 = arith.constant 0.000000e+00 : f32
      %30 = vector.broadcast %cst_31 : f32 to vector<16x92xf32>
      %c0_32 = arith.constant 0 : index
      %c0_33 = arith.constant 0 : index
      %31 = vector.load %arg14[%c0_32, %c0_33] : memref<16x92xf32, #tpu.memory_space<vmem>>, vector<16x92xf32>
      tpu.vector_store %arg14[%c0_32, %c0_33], %30 {strides = array<i32>} : memref<16x92xf32, #tpu.memory_space<vmem>>, vector<16x92xf32>,
      %c0_i32_34 = arith.constant 0 : i32
      %32 = arith.addi %arg15, %c0_i32_34 : i32
      %33 = arith.index_cast %32 : i32 to index
      %c0_35 = arith.constant 0 : index
      %c0_36 = arith.constant 0 : index
      %34 = vector.load %arg12[%33, %c0_35, %c0_36] : memref<12x16x144xbf16, #tpu.memory_space<vmem>>, vector<1x16x92xbf16>
      %35 = vector.shape_cast %34 : vector<1x16x92xbf16> to vector<16x92xbf16>
      %c0_37 = arith.constant 0 : index
      %c0_38 = arith.constant 0 : index
      %36 = vector.load %arg13[%c0_37, %c0_38] : memref<400x92xbf16, #tpu.memory_space<vmem>>, vector<16x92xbf16>
      tpu.vector_store %arg13[%c0_37, %c0_38], %35 {strides = array<i32>} : memref<400x92xbf16, #tpu.memory_space<vmem>>, vector<16x92xbf16>,
      %c0_i32_39 = arith.constant 0 : i32
      %37 = arith.addi %arg15, %c0_i32_39 : i32
      %38 = arith.index_cast %37 : i32 to index
      %c0_40 = arith.constant 0 : index
      %c1 = arith.constant 1 : index
      %39 = vector.load %arg12[%38, %c0_40, %c1] : memref<12x16x144xbf16, #tpu.memory_space<vmem>>, vector<1x16x92xbf16>
      %40 = vector.shape_cast %39 : vector<1x16x92xbf16> to vector<16x92xbf16>
      %c16 = arith.constant 16 : index
      %c0_41 = arith.constant 0 : index
      %41 = vector.load %arg13[%c16, %c0_41] : memref<400x92xbf16, #tpu.memory_space<vmem>>, vector<16x92xbf16>
      tpu.vector_store %arg13[%c16, %c0_41], %40 {strides = array<i32>} : memref<400x92xbf16, #tpu.memory_space<vmem>>, vector<16x92xbf16>,
      %c0_i32_42 = arith.constant 0 : i32
      %42 = arith.addi %arg15, %c0_i32_42 : i32
      %43 = arith.index_cast %42 : i32 to index
      %c0_43 = arith.constant 0 : index
      %c2 = arith.constant 2 : index
      %44 = vector.load %arg12[%43, %c0_43, %c2] : memref<12x16x144xbf16, #tpu.memory_space<vmem>>, vector<1x16x92xbf16>
      %45 = vector.shape_cast %44 : vector<1x16x92xbf16> to vector<16x92xbf16>
      %c32 = arith.constant 32 : index
      %c0_44 = arith.constant 0 : index
      %46 = vector.load %arg13[%c32, %c0_44] : memref<400x92xbf16, #tpu.memory_space<vmem>>, vector<16x92xbf16>
      tpu.vector_store %arg13[%c32, %c0_44], %45 {strides = array<i32>} : memref<400x92xbf16, #tpu.memory_space<vmem>>, vector<16x92xbf16>,
      %c0_i32_45 = arith.constant 0 : i32
      %47 = arith.addi %arg15, %c0_i32_45 : i32
      %48 = arith.index_cast %47 : i32 to index
      %c0_46 = arith.constant 0 : index
      %c3 = arith.constant 3 : index
      %49 = vector.load %arg12[%48, %c0_46, %c3] : memref<12x16x144xbf16, #tpu.memory_space<vmem>>, vector<1x16x92xbf16>
      %50 = vector.shape_cast %49 : vector<1x16x92xbf16> to vector<16x92xbf16>
      %c48 = arith.constant 48 : index
      %c0_47 = arith.constant 0 : index
      %51 = vector.load %arg13[%c48, %c0_47] : memref<400x92xbf16, #tpu.memory_space<vmem>>, vector<16x92xbf16>
      tpu.vector_store %arg13[%c48, %c0_47], %50 {strides = array<i32>} : memref<400x92xbf16, #tpu.memory_space<vmem>>, vector<16x92xbf16>,
      %c0_i32_48 = arith.constant 0 : i32
      %52 = arith.addi %arg15, %c0_i32_48 : i32
      %53 = arith.index_cast %52 : i32 to index
      %c0_49 = arith.constant 0 : index
      %c4 = arith.constant 4 : index
      %54 = vector.load %arg12[%53, %c0_49, %c4] : memref<12x16x144xbf16, #tpu.memory_space<vmem>>, vector<1x16x92xbf16>
      %55 = vector.shape_cast %54 : vector<1x16x92xbf16> to vector<16x92xbf16>
      %c64 = arith.constant 64 : index
      %c0_50 = arith.constant 0 : index
      %56 = vector.load %arg13[%c64, %c0_50] : memref<400x92xbf16, #tpu.memory_space<vmem>>, vector<16x92xbf16>
      tpu.vector_store %arg13[%c64, %c0_50], %55 {strides = array<i32>} : memref<400x92xbf16, #tpu.memory_space<vmem>>, vector<16x92xbf16>,
      %c0_i32_51 = arith.constant 0 : i32
      %57 = arith.addi %arg15, %c0_i32_51 : i32
      %58 = arith.index_cast %57 : i32 to index
      %c0_52 = arith.constant 0 : index
      %c12 = arith.constant 12 : index
      %59 = vector.load %arg12[%58, %c0_52, %c12] : memref<12x16x144xbf16, #tpu.memory_space<vmem>>, vector<1x16x92xbf16>
      %60 = vector.shape_cast %59 : vector<1x16x92xbf16> to vector<16x92xbf16>
      %c80 = arith.constant 80 : index
      %c0_53 = arith.constant 0 : index
      %61 = vector.load %arg13[%c80, %c0_53] : memref<400x92xbf16, #tpu.memory_space<vmem>>, vector<16x92xbf16>
      tpu.vector_store %arg13[%c80, %c0_53], %60 {strides = array<i32>} : memref<400x92xbf16, #tpu.memory_space<vmem>>, vector<16x92xbf16>,
      %c0_i32_54 = arith.constant 0 : i32
      %62 = arith.addi %arg15, %c0_i32_54 : i32
      %63 = arith.index_cast %62 : i32 to index
      %c0_55 = arith.constant 0 : index
      %c13 = arith.constant 13 : index
      %64 = vector.load %arg12[%63, %c0_55, %c13] : memref<12x16x144xbf16, #tpu.memory_space<vmem>>, vector<1x16x92xbf16>
      %65 = vector.shape_cast %64 : vector<1x16x92xbf16> to vector<16x92xbf16>
      %c96 = arith.constant 96 : index
      %c0_56 = arith.constant 0 : index
      %66 = vector.load %arg13[%c96, %c0_56] : memref<400x92xbf16, #tpu.memory_space<vmem>>, vector<16x92xbf16>
      tpu.vector_store %arg13[%c96, %c0_56], %65 {strides = array<i32>} : memref<400x92xbf16, #tpu.memory_space<vmem>>, vector<16x92xbf16>,
      %c0_i32_57 = arith.constant 0 : i32
      %67 = arith.addi %arg15, %c0_i32_57 : i32
      %68 = arith.index_cast %67 : i32 to index
      %c0_58 = arith.constant 0 : index
      %c14 = arith.constant 14 : index
      %69 = vector.load %arg12[%68, %c0_58, %c14] : memref<12x16x144xbf16, #tpu.memory_space<vmem>>, vector<1x16x92xbf16>
      %70 = vector.shape_cast %69 : vector<1x16x92xbf16> to vector<16x92xbf16>
      %c112 = arith.constant 112 : index
      %c0_59 = arith.constant 0 : index
      %71 = vector.load %arg13[%c112, %c0_59] : memref<400x92xbf16, #tpu.memory_space<vmem>>, vector<16x92xbf16>
      tpu.vector_store %arg13[%c112, %c0_59], %70 {strides = array<i32>} : memref<400x92xbf16, #tpu.memory_space<vmem>>, vector<16x92xbf16>,
      %c0_i32_60 = arith.constant 0 : i32
      %72 = arith.addi %arg15, %c0_i32_60 : i32
      %73 = arith.index_cast %72 : i32 to index
      %c0_61 = arith.constant 0 : index
      %c15 = arith.constant 15 : index
      %74 = vector.load %arg12[%73, %c0_61, %c15] : memref<12x16x144xbf16, #tpu.memory_space<vmem>>, vector<1x16x92xbf16>
      %75 = vector.shape_cast %74 : vector<1x16x92xbf16> to vector<16x92xbf16>
      %c128 = arith.constant 128 : index
      %c0_62 = arith.constant 0 : index
      %76 = vector.load %arg13[%c128, %c0_62] : memref<400x92xbf16, #tpu.memory_space<vmem>>, vector<16x92xbf16>
      tpu.vector_store %arg13[%c128, %c0_62], %75 {strides = array<i32>} : memref<400x92xbf16, #tpu.memory_space<vmem>>, vector<16x92xbf16>,
      %c0_i32_63 = arith.constant 0 : i32
      %77 = arith.addi %arg15, %c0_i32_63 : i32
      %78 = arith.index_cast %77 : i32 to index
      %c0_64 = arith.constant 0 : index
      %c16_65 = arith.constant 16 : index
      %79 = vector.load %arg12[%78, %c0_64, %c16_65] : memref<12x16x144xbf16, #tpu.memory_space<vmem>>, vector<1x16x92xbf16>
      %80 = vector.shape_cast %79 : vector<1x16x92xbf16> to vector<16x92xbf16>
      %c144 = arith.constant 144 : index
      %c0_66 = arith.constant 0 : index
      %81 = vector.load %arg13[%c144, %c0_66] : memref<400x92xbf16, #tpu.memory_space<vmem>>, vector<16x92xbf16>
      tpu.vector_store %arg13[%c144, %c0_66], %80 {strides = array<i32>} : memref<400x92xbf16, #tpu.memory_space<vmem>>, vector<16x92xbf16>,
      %c0_i32_67 = arith.constant 0 : i32
      %82 = arith.addi %arg15, %c0_i32_67 : i32
      %83 = arith.index_cast %82 : i32 to index
      %c0_68 = arith.constant 0 : index
      %c24 = arith.constant 24 : index
      %84 = vector.load %arg12[%83, %c0_68, %c24] : memref<12x16x144xbf16, #tpu.memory_space<vmem>>, vector<1x16x92xbf16>
      %85 = vector.shape_cast %84 : vector<1x16x92xbf16> to vector<16x92xbf16>
      %c160 = arith.constant 160 : index
      %c0_69 = arith.constant 0 : index
      %86 = vector.load %arg13[%c160, %c0_69] : memref<400x92xbf16, #tpu.memory_space<vmem>>, vector<16x92xbf16>
      tpu.vector_store %arg13[%c160, %c0_69], %85 {strides = array<i32>} : memref<400x92xbf16, #tpu.memory_space<vmem>>, vector<16x92xbf16>,
      %c0_i32_70 = arith.constant 0 : i32
      %87 = arith.addi %arg15, %c0_i32_70 : i32
      %88 = arith.index_cast %87 : i32 to index
      %c0_71 = arith.constant 0 : index
      %c25 = arith.constant 25 : index
      %89 = vector.load %arg12[%88, %c0_71, %c25] : memref<12x16x144xbf16, #tpu.memory_space<vmem>>, vector<1x16x92xbf16>
      %90 = vector.shape_cast %89 : vector<1x16x92xbf16> to vector<16x92xbf16>
      %c176 = arith.constant 176 : index
      %c0_72 = arith.constant 0 : index
      %91 = vector.load %arg13[%c176, %c0_72] : memref<400x92xbf16, #tpu.memory_space<vmem>>, vector<16x92xbf16>
      tpu.vector_store %arg13[%c176, %c0_72], %90 {strides = array<i32>} : memref<400x92xbf16, #tpu.memory_space<vmem>>, vector<16x92xbf16>,
      %c0_i32_73 = arith.constant 0 : i32
      %92 = arith.addi %arg15, %c0_i32_73 : i32
      %93 = arith.index_cast %92 : i32 to index
      %c0_74 = arith.constant 0 : index
      %c26_75 = arith.constant 26 : index
      %94 = vector.load %arg12[%93, %c0_74, %c26_75] : memref<12x16x144xbf16, #tpu.memory_space<vmem>>, vector<1x16x92xbf16>
      %95 = vector.shape_cast %94 : vector<1x16x92xbf16> to vector<16x92xbf16>
      %c192 = arith.constant 192 : index
      %c0_76 = arith.constant 0 : index
      %96 = vector.load %arg13[%c192, %c0_76] : memref<400x92xbf16, #tpu.memory_space<vmem>>, vector<16x92xbf16>
      tpu.vector_store %arg13[%c192, %c0_76], %95 {strides = array<i32>} : memref<400x92xbf16, #tpu.memory_space<vmem>>, vector<16x92xbf16>,
      %c0_i32_77 = arith.constant 0 : i32
      %97 = arith.addi %arg15, %c0_i32_77 : i32
      %98 = arith.index_cast %97 : i32 to index
      %c0_78 = arith.constant 0 : index
      %c27 = arith.constant 27 : index
      %99 = vector.load %arg12[%98, %c0_78, %c27] : memref<12x16x144xbf16, #tpu.memory_space<vmem>>, vector<1x16x92xbf16>
      %100 = vector.shape_cast %99 : vector<1x16x92xbf16> to vector<16x92xbf16>
      %c208 = arith.constant 208 : index
      %c0_79 = arith.constant 0 : index
      %101 = vector.load %arg13[%c208, %c0_79] : memref<400x92xbf16, #tpu.memory_space<vmem>>, vector<16x92xbf16>
      tpu.vector_store %arg13[%c208, %c0_79], %100 {strides = array<i32>} : memref<400x92xbf16, #tpu.memory_space<vmem>>, vector<16x92xbf16>,
      %c0_i32_80 = arith.constant 0 : i32
      %102 = arith.addi %arg15, %c0_i32_80 : i32
      %103 = arith.index_cast %102 : i32 to index
      %c0_81 = arith.constant 0 : index
      %c28 = arith.constant 28 : index
      %104 = vector.load %arg12[%103, %c0_81, %c28] : memref<12x16x144xbf16, #tpu.memory_space<vmem>>, vector<1x16x92xbf16>
      %105 = vector.shape_cast %104 : vector<1x16x92xbf16> to vector<16x92xbf16>
      %c224 = arith.constant 224 : index
      %c0_82 = arith.constant 0 : index
      %106 = vector.load %arg13[%c224, %c0_82] : memref<400x92xbf16, #tpu.memory_space<vmem>>, vector<16x92xbf16>
      tpu.vector_store %arg13[%c224, %c0_82], %105 {strides = array<i32>} : memref<400x92xbf16, #tpu.memory_space<vmem>>, vector<16x92xbf16>,
      %c0_i32_83 = arith.constant 0 : i32
      %107 = arith.addi %arg15, %c0_i32_83 : i32
      %108 = arith.index_cast %107 : i32 to index
      %c0_84 = arith.constant 0 : index
      %c36 = arith.constant 36 : index
      %109 = vector.load %arg12[%108, %c0_84, %c36] : memref<12x16x144xbf16, #tpu.memory_space<vmem>>, vector<1x16x92xbf16>
      %110 = vector.shape_cast %109 : vector<1x16x92xbf16> to vector<16x92xbf16>
      %c240 = arith.constant 240 : index
      %c0_85 = arith.constant 0 : index
      %111 = vector.load %arg13[%c240, %c0_85] : memref<400x92xbf16, #tpu.memory_space<vmem>>, vector<16x92xbf16>
      tpu.vector_store %arg13[%c240, %c0_85], %110 {strides = array<i32>} : memref<400x92xbf16, #tpu.memory_space<vmem>>, vector<16x92xbf16>,
      %c0_i32_86 = arith.constant 0 : i32
      %112 = arith.addi %arg15, %c0_i32_86 : i32
      %113 = arith.index_cast %112 : i32 to index
      %c0_87 = arith.constant 0 : index
      %c37 = arith.constant 37 : index
      %114 = vector.load %arg12[%113, %c0_87, %c37] : memref<12x16x144xbf16, #tpu.memory_space<vmem>>, vector<1x16x92xbf16>
      %115 = vector.shape_cast %114 : vector<1x16x92xbf16> to vector<16x92xbf16>
      %c256 = arith.constant 256 : index
      %c0_88 = arith.constant 0 : index
      %116 = vector.load %arg13[%c256, %c0_88] : memref<400x92xbf16, #tpu.memory_space<vmem>>, vector<16x92xbf16>
      tpu.vector_store %arg13[%c256, %c0_88], %115 {strides = array<i32>} : memref<400x92xbf16, #tpu.memory_space<vmem>>, vector<16x92xbf16>,
      %c0_i32_89 = arith.constant 0 : i32
      %117 = arith.addi %arg15, %c0_i32_89 : i32
      %118 = arith.index_cast %117 : i32 to index
      %c0_90 = arith.constant 0 : index
      %c38 = arith.constant 38 : index
      %119 = vector.load %arg12[%118, %c0_90, %c38] : memref<12x16x144xbf16, #tpu.memory_space<vmem>>, vector<1x16x92xbf16>
      %120 = vector.shape_cast %119 : vector<1x16x92xbf16> to vector<16x92xbf16>
      %c272 = arith.constant 272 : index
      %c0_91 = arith.constant 0 : index
      %121 = vector.load %arg13[%c272, %c0_91] : memref<400x92xbf16, #tpu.memory_space<vmem>>, vector<16x92xbf16>
      tpu.vector_store %arg13[%c272, %c0_91], %120 {strides = array<i32>} : memref<400x92xbf16, #tpu.memory_space<vmem>>, vector<16x92xbf16>,
      %c0_i32_92 = arith.constant 0 : i32
      %122 = arith.addi %arg15, %c0_i32_92 : i32
      %123 = arith.index_cast %122 : i32 to index
      %c0_93 = arith.constant 0 : index
      %c39 = arith.constant 39 : index
      %124 = vector.load %arg12[%123, %c0_93, %c39] : memref<12x16x144xbf16, #tpu.memory_space<vmem>>, vector<1x16x92xbf16>
      %125 = vector.shape_cast %124 : vector<1x16x92xbf16> to vector<16x92xbf16>
      %c288 = arith.constant 288 : index
      %c0_94 = arith.constant 0 : index
      %126 = vector.load %arg13[%c288, %c0_94] : memref<400x92xbf16, #tpu.memory_space<vmem>>, vector<16x92xbf16>
      tpu.vector_store %arg13[%c288, %c0_94], %125 {strides = array<i32>} : memref<400x92xbf16, #tpu.memory_space<vmem>>, vector<16x92xbf16>,
      %c0_i32_95 = arith.constant 0 : i32
      %127 = arith.addi %arg15, %c0_i32_95 : i32
      %128 = arith.index_cast %127 : i32 to index
      %c0_96 = arith.constant 0 : index
      %c40 = arith.constant 40 : index
      %129 = vector.load %arg12[%128, %c0_96, %c40] : memref<12x16x144xbf16, #tpu.memory_space<vmem>>, vector<1x16x92xbf16>
      %130 = vector.shape_cast %129 : vector<1x16x92xbf16> to vector<16x92xbf16>
      %c304 = arith.constant 304 : index
      %c0_97 = arith.constant 0 : index
      %131 = vector.load %arg13[%c304, %c0_97] : memref<400x92xbf16, #tpu.memory_space<vmem>>, vector<16x92xbf16>
      tpu.vector_store %arg13[%c304, %c0_97], %130 {strides = array<i32>} : memref<400x92xbf16, #tpu.memory_space<vmem>>, vector<16x92xbf16>,
      %c0_i32_98 = arith.constant 0 : i32
      %132 = arith.addi %arg15, %c0_i32_98 : i32
      %133 = arith.index_cast %132 : i32 to index
      %c0_99 = arith.constant 0 : index
      %c48_100 = arith.constant 48 : index
      %134 = vector.load %arg12[%133, %c0_99, %c48_100] : memref<12x16x144xbf16, #tpu.memory_space<vmem>>, vector<1x16x92xbf16>
      %135 = vector.shape_cast %134 : vector<1x16x92xbf16> to vector<16x92xbf16>
      %c320 = arith.constant 320 : index
      %c0_101 = arith.constant 0 : index
      %136 = vector.load %arg13[%c320, %c0_101] : memref<400x92xbf16, #tpu.memory_space<vmem>>, vector<16x92xbf16>
      tpu.vector_store %arg13[%c320, %c0_101], %135 {strides = array<i32>} : memref<400x92xbf16, #tpu.memory_space<vmem>>, vector<16x92xbf16>,
      %c0_i32_102 = arith.constant 0 : i32
      %137 = arith.addi %arg15, %c0_i32_102 : i32
      %138 = arith.index_cast %137 : i32 to index
      %c0_103 = arith.constant 0 : index
      %c49 = arith.constant 49 : index
      %139 = vector.load %arg12[%138, %c0_103, %c49] : memref<12x16x144xbf16, #tpu.memory_space<vmem>>, vector<1x16x92xbf16>
      %140 = vector.shape_cast %139 : vector<1x16x92xbf16> to vector<16x92xbf16>
      %c336 = arith.constant 336 : index
      %c0_104 = arith.constant 0 : index
      %141 = vector.load %arg13[%c336, %c0_104] : memref<400x92xbf16, #tpu.memory_space<vmem>>, vector<16x92xbf16>
      tpu.vector_store %arg13[%c336, %c0_104], %140 {strides = array<i32>} : memref<400x92xbf16, #tpu.memory_space<vmem>>, vector<16x92xbf16>,
      %c0_i32_105 = arith.constant 0 : i32
      %142 = arith.addi %arg15, %c0_i32_105 : i32
      %143 = arith.index_cast %142 : i32 to index
      %c0_106 = arith.constant 0 : index
      %c50 = arith.constant 50 : index
      %144 = vector.load %arg12[%143, %c0_106, %c50] : memref<12x16x144xbf16, #tpu.memory_space<vmem>>, vector<1x16x92xbf16>
      %145 = vector.shape_cast %144 : vector<1x16x92xbf16> to vector<16x92xbf16>
      %c352 = arith.constant 352 : index
      %c0_107 = arith.constant 0 : index
      %146 = vector.load %arg13[%c352, %c0_107] : memref<400x92xbf16, #tpu.memory_space<vmem>>, vector<16x92xbf16>
      tpu.vector_store %arg13[%c352, %c0_107], %145 {strides = array<i32>} : memref<400x92xbf16, #tpu.memory_space<vmem>>, vector<16x92xbf16>,
      %c0_i32_108 = arith.constant 0 : i32
      %147 = arith.addi %arg15, %c0_i32_108 : i32
      %148 = arith.index_cast %147 : i32 to index
      %c0_109 = arith.constant 0 : index
      %c51 = arith.constant 51 : index
      %149 = vector.load %arg12[%148, %c0_109, %c51] : memref<12x16x144xbf16, #tpu.memory_space<vmem>>, vector<1x16x92xbf16>
      %150 = vector.shape_cast %149 : vector<1x16x92xbf16> to vector<16x92xbf16>
      %c368 = arith.constant 368 : index
      %c0_110 = arith.constant 0 : index
      %151 = vector.load %arg13[%c368, %c0_110] : memref<400x92xbf16, #tpu.memory_space<vmem>>, vector<16x92xbf16>
      tpu.vector_store %arg13[%c368, %c0_110], %150 {strides = array<i32>} : memref<400x92xbf16, #tpu.memory_space<vmem>>, vector<16x92xbf16>,
      %c0_i32_111 = arith.constant 0 : i32
      %152 = arith.addi %arg15, %c0_i32_111 : i32
      %153 = arith.index_cast %152 : i32 to index
      %c0_112 = arith.constant 0 : index
      %c52 = arith.constant 52 : index
      %154 = vector.load %arg12[%153, %c0_112, %c52] : memref<12x16x144xbf16, #tpu.memory_space<vmem>>, vector<1x16x92xbf16>
      %155 = vector.shape_cast %154 : vector<1x16x92xbf16> to vector<16x92xbf16>
      %c384 = arith.constant 384 : index
      %c0_113 = arith.constant 0 : index
      %156 = vector.load %arg13[%c384, %c0_113] : memref<400x92xbf16, #tpu.memory_space<vmem>>, vector<16x92xbf16>
      tpu.vector_store %arg13[%c384, %c0_113], %155 {strides = array<i32>} : memref<400x92xbf16, #tpu.memory_space<vmem>>, vector<16x92xbf16>,
      %c0_114 = arith.constant 0 : index
      %c0_115 = arith.constant 0 : index
      %157 = vector.load %arg14[%c0_114, %c0_115] : memref<16x92xf32, #tpu.memory_space<vmem>>, vector<16x92xf32>
      %c0_116 = arith.constant 0 : index
      %c0_117 = arith.constant 0 : index
      %c0_118 = arith.constant 0 : index
      %158 = vector.load %arg5[%c0_116, %c0_117, %c0_118] : memref<5x16x400xbf16, #tpu.memory_space<vmem>>, vector<1x16x400xbf16>
      %159 = vector.shape_cast %158 : vector<1x16x400xbf16> to vector<16x400xbf16>
      %c0_119 = arith.constant 0 : index
      %c0_120 = arith.constant 0 : index
      %160 = vector.load %arg13[%c0_119, %c0_120] : memref<400x92xbf16, #tpu.memory_space<vmem>>, vector<400x92xbf16>
      %cst_121 = arith.constant dense<0.000000e+00> : vector<16x92xf32>
      %161 = tpu.matmul %159, %160, %cst_121 {dimension_numbers = #tpu.dot_dimension_numbers<[1], [0], [0], [1], [0, 0, 1, 1], [], []>} : vector<16x400xbf16>, vector<400x92xbf16>, vector<16x92xf32> -> vector<16x92xf32>
      %162 = arith.addf %157, %161 : vector<16x92xf32>
      %c0_122 = arith.constant 0 : index
      %c0_123 = arith.constant 0 : index
      %163 = vector.load %arg14[%c0_122, %c0_123] : memref<16x92xf32, #tpu.memory_space<vmem>>, vector<16x92xf32>
      tpu.vector_store %arg14[%c0_122, %c0_123], %162 {strides = array<i32>} : memref<16x92xf32, #tpu.memory_space<vmem>>, vector<16x92xf32>,
      %c1_i32_124 = arith.constant 1 : i32
      %164 = arith.addi %arg15, %c1_i32_124 : i32
      %165 = arith.index_cast %164 : i32 to index
      %c0_125 = arith.constant 0 : index
      %c0_126 = arith.constant 0 : index
      %166 = vector.load %arg12[%165, %c0_125, %c0_126] : memref<12x16x144xbf16, #tpu.memory_space<vmem>>, vector<1x16x92xbf16>
      %167 = vector.shape_cast %166 : vector<1x16x92xbf16> to vector<16x92xbf16>
      %c0_127 = arith.constant 0 : index
      %c0_128 = arith.constant 0 : index
      %168 = vector.load %arg13[%c0_127, %c0_128] : memref<400x92xbf16, #tpu.memory_space<vmem>>, vector<16x92xbf16>
      tpu.vector_store %arg13[%c0_127, %c0_128], %167 {strides = array<i32>} : memref<400x92xbf16, #tpu.memory_space<vmem>>, vector<16x92xbf16>,
      %c1_i32_129 = arith.constant 1 : i32
      %169 = arith.addi %arg15, %c1_i32_129 : i32
      %170 = arith.index_cast %169 : i32 to index
      %c0_130 = arith.constant 0 : index
      %c1_131 = arith.constant 1 : index
      %171 = vector.load %arg12[%170, %c0_130, %c1_131] : memref<12x16x144xbf16, #tpu.memory_space<vmem>>, vector<1x16x92xbf16>
      %172 = vector.shape_cast %171 : vector<1x16x92xbf16> to vector<16x92xbf16>
      %c16_132 = arith.constant 16 : index
      %c0_133 = arith.constant 0 : index
      %173 = vector.load %arg13[%c16_132, %c0_133] : memref<400x92xbf16, #tpu.memory_space<vmem>>, vector<16x92xbf16>
      tpu.vector_store %arg13[%c16_132, %c0_133], %172 {strides = array<i32>} : memref<400x92xbf16, #tpu.memory_space<vmem>>, vector<16x92xbf16>,
      %c1_i32_134 = arith.constant 1 : i32
      %174 = arith.addi %arg15, %c1_i32_134 : i32
      %175 = arith.index_cast %174 : i32 to index
      %c0_135 = arith.constant 0 : index
      %c2_136 = arith.constant 2 : index
      %176 = vector.load %arg12[%175, %c0_135, %c2_136] : memref<12x16x144xbf16, #tpu.memory_space<vmem>>, vector<1x16x92xbf16>
      %177 = vector.shape_cast %176 : vector<1x16x92xbf16> to vector<16x92xbf16>
      %c32_137 = arith.constant 32 : index
      %c0_138 = arith.constant 0 : index
      %178 = vector.load %arg13[%c32_137, %c0_138] : memref<400x92xbf16, #tpu.memory_space<vmem>>, vector<16x92xbf16>
      tpu.vector_store %arg13[%c32_137, %c0_138], %177 {strides = array<i32>} : memref<400x92xbf16, #tpu.memory_space<vmem>>, vector<16x92xbf16>,
      %c1_i32_139 = arith.constant 1 : i32
      %179 = arith.addi %arg15, %c1_i32_139 : i32
      %180 = arith.index_cast %179 : i32 to index
      %c0_140 = arith.constant 0 : index
      %c3_141 = arith.constant 3 : index
      %181 = vector.load %arg12[%180, %c0_140, %c3_141] : memref<12x16x144xbf16, #tpu.memory_space<vmem>>, vector<1x16x92xbf16>
      %182 = vector.shape_cast %181 : vector<1x16x92xbf16> to vector<16x92xbf16>
      %c48_142 = arith.constant 48 : index
      %c0_143 = arith.constant 0 : index
      %183 = vector.load %arg13[%c48_142, %c0_143] : memref<400x92xbf16, #tpu.memory_space<vmem>>, vector<16x92xbf16>
      tpu.vector_store %arg13[%c48_142, %c0_143], %182 {strides = array<i32>} : memref<400x92xbf16, #tpu.memory_space<vmem>>, vector<16x92xbf16>,
      %c1_i32_144 = arith.constant 1 : i32
      %184 = arith.addi %arg15, %c1_i32_144 : i32
      %185 = arith.index_cast %184 : i32 to index
      %c0_145 = arith.constant 0 : index
      %c4_146 = arith.constant 4 : index
      %186 = vector.load %arg12[%185, %c0_145, %c4_146] : memref<12x16x144xbf16, #tpu.memory_space<vmem>>, vector<1x16x92xbf16>
      %187 = vector.shape_cast %186 : vector<1x16x92xbf16> to vector<16x92xbf16>
      %c64_147 = arith.constant 64 : index
      %c0_148 = arith.constant 0 : index
      %188 = vector.load %arg13[%c64_147, %c0_148] : memref<400x92xbf16, #tpu.memory_space<vmem>>, vector<16x92xbf16>
      tpu.vector_store %arg13[%c64_147, %c0_148], %187 {strides = array<i32>} : memref<400x92xbf16, #tpu.memory_space<vmem>>, vector<16x92xbf16>,
      %c1_i32_149 = arith.constant 1 : i32
      %189 = arith.addi %arg15, %c1_i32_149 : i32
      %190 = arith.index_cast %189 : i32 to index
      %c0_150 = arith.constant 0 : index
      %c12_151 = arith.constant 12 : index
      %191 = vector.load %arg12[%190, %c0_150, %c12_151] : memref<12x16x144xbf16, #tpu.memory_space<vmem>>, vector<1x16x92xbf16>
      %192 = vector.shape_cast %191 : vector<1x16x92xbf16> to vector<16x92xbf16>
      %c80_152 = arith.constant 80 : index
      %c0_153 = arith.constant 0 : index
      %193 = vector.load %arg13[%c80_152, %c0_153] : memref<400x92xbf16, #tpu.memory_space<vmem>>, vector<16x92xbf16>
      tpu.vector_store %arg13[%c80_152, %c0_153], %192 {strides = array<i32>} : memref<400x92xbf16, #tpu.memory_space<vmem>>, vector<16x92xbf16>,
      %c1_i32_154 = arith.constant 1 : i32
      %194 = arith.addi %arg15, %c1_i32_154 : i32
      %195 = arith.index_cast %194 : i32 to index
      %c0_155 = arith.constant 0 : index
      %c13_156 = arith.constant 13 : index
      %196 = vector.load %arg12[%195, %c0_155, %c13_156] : memref<12x16x144xbf16, #tpu.memory_space<vmem>>, vector<1x16x92xbf16>
      %197 = vector.shape_cast %196 : vector<1x16x92xbf16> to vector<16x92xbf16>
      %c96_157 = arith.constant 96 : index
      %c0_158 = arith.constant 0 : index
      %198 = vector.load %arg13[%c96_157, %c0_158] : memref<400x92xbf16, #tpu.memory_space<vmem>>, vector<16x92xbf16>
      tpu.vector_store %arg13[%c96_157, %c0_158], %197 {strides = array<i32>} : memref<400x92xbf16, #tpu.memory_space<vmem>>, vector<16x92xbf16>,
      %c1_i32_159 = arith.constant 1 : i32
      %199 = arith.addi %arg15, %c1_i32_159 : i32
      %200 = arith.index_cast %199 : i32 to index
      %c0_160 = arith.constant 0 : index
      %c14_161 = arith.constant 14 : index
      %201 = vector.load %arg12[%200, %c0_160, %c14_161] : memref<12x16x144xbf16, #tpu.memory_space<vmem>>, vector<1x16x92xbf16>
      %202 = vector.shape_cast %201 : vector<1x16x92xbf16> to vector<16x92xbf16>
      %c112_162 = arith.constant 112 : index
      %c0_163 = arith.constant 0 : index
      %203 = vector.load %arg13[%c112_162, %c0_163] : memref<400x92xbf16, #tpu.memory_space<vmem>>, vector<16x92xbf16>
      tpu.vector_store %arg13[%c112_162, %c0_163], %202 {strides = array<i32>} : memref<400x92xbf16, #tpu.memory_space<vmem>>, vector<16x92xbf16>,
      %c1_i32_164 = arith.constant 1 : i32
      %204 = arith.addi %arg15, %c1_i32_164 : i32
      %205 = arith.index_cast %204 : i32 to index
      %c0_165 = arith.constant 0 : index
      %c15_166 = arith.constant 15 : index
      %206 = vector.load %arg12[%205, %c0_165, %c15_166] : memref<12x16x144xbf16, #tpu.memory_space<vmem>>, vector<1x16x92xbf16>
      %207 = vector.shape_cast %206 : vector<1x16x92xbf16> to vector<16x92xbf16>
      %c128_167 = arith.constant 128 : index
      %c0_168 = arith.constant 0 : index
      %208 = vector.load %arg13[%c128_167, %c0_168] : memref<400x92xbf16, #tpu.memory_space<vmem>>, vector<16x92xbf16>
      tpu.vector_store %arg13[%c128_167, %c0_168], %207 {strides = array<i32>} : memref<400x92xbf16, #tpu.memory_space<vmem>>, vector<16x92xbf16>,
      %c1_i32_169 = arith.constant 1 : i32
      %209 = arith.addi %arg15, %c1_i32_169 : i32
      %210 = arith.index_cast %209 : i32 to index
      %c0_170 = arith.constant 0 : index
      %c16_171 = arith.constant 16 : index
      %211 = vector.load %arg12[%210, %c0_170, %c16_171] : memref<12x16x144xbf16, #tpu.memory_space<vmem>>, vector<1x16x92xbf16>
      %212 = vector.shape_cast %211 : vector<1x16x92xbf16> to vector<16x92xbf16>
      %c144_172 = arith.constant 144 : index
      %c0_173 = arith.constant 0 : index
      %213 = vector.load %arg13[%c144_172, %c0_173] : memref<400x92xbf16, #tpu.memory_space<vmem>>, vector<16x92xbf16>
      tpu.vector_store %arg13[%c144_172, %c0_173], %212 {strides = array<i32>} : memref<400x92xbf16, #tpu.memory_space<vmem>>, vector<16x92xbf16>,
      %c1_i32_174 = arith.constant 1 : i32
      %214 = arith.addi %arg15, %c1_i32_174 : i32
      %215 = arith.index_cast %214 : i32 to index
      %c0_175 = arith.constant 0 : index
      %c24_176 = arith.constant 24 : index
      %216 = vector.load %arg12[%215, %c0_175, %c24_176] : memref<12x16x144xbf16, #tpu.memory_space<vmem>>, vector<1x16x92xbf16>
      %217 = vector.shape_cast %216 : vector<1x16x92xbf16> to vector<16x92xbf16>
      %c160_177 = arith.constant 160 : index
      %c0_178 = arith.constant 0 : index
      %218 = vector.load %arg13[%c160_177, %c0_178] : memref<400x92xbf16, #tpu.memory_space<vmem>>, vector<16x92xbf16>
      tpu.vector_store %arg13[%c160_177, %c0_178], %217 {strides = array<i32>} : memref<400x92xbf16, #tpu.memory_space<vmem>>, vector<16x92xbf16>,
      %c1_i32_179 = arith.constant 1 : i32
      %219 = arith.addi %arg15, %c1_i32_179 : i32
      %220 = arith.index_cast %219 : i32 to index
      %c0_180 = arith.constant 0 : index
      %c25_181 = arith.constant 25 : index
      %221 = vector.load %arg12[%220, %c0_180, %c25_181] : memref<12x16x144xbf16, #tpu.memory_space<vmem>>, vector<1x16x92xbf16>
      %222 = vector.shape_cast %221 : vector<1x16x92xbf16> to vector<16x92xbf16>
      %c176_182 = arith.constant 176 : index
      %c0_183 = arith.constant 0 : index
      %223 = vector.load %arg13[%c176_182, %c0_183] : memref<400x92xbf16, #tpu.memory_space<vmem>>, vector<16x92xbf16>
      tpu.vector_store %arg13[%c176_182, %c0_183], %222 {strides = array<i32>} : memref<400x92xbf16, #tpu.memory_space<vmem>>, vector<16x92xbf16>,
      %c1_i32_184 = arith.constant 1 : i32
      %224 = arith.addi %arg15, %c1_i32_184 : i32
      %225 = arith.index_cast %224 : i32 to index
      %c0_185 = arith.constant 0 : index
      %c26_186 = arith.constant 26 : index
      %226 = vector.load %arg12[%225, %c0_185, %c26_186] : memref<12x16x144xbf16, #tpu.memory_space<vmem>>, vector<1x16x92xbf16>
      %227 = vector.shape_cast %226 : vector<1x16x92xbf16> to vector<16x92xbf16>
      %c192_187 = arith.constant 192 : index
      %c0_188 = arith.constant 0 : index
      %228 = vector.load %arg13[%c192_187, %c0_188] : memref<400x92xbf16, #tpu.memory_space<vmem>>, vector<16x92xbf16>
      tpu.vector_store %arg13[%c192_187, %c0_188], %227 {strides = array<i32>} : memref<400x92xbf16, #tpu.memory_space<vmem>>, vector<16x92xbf16>,
      %c1_i32_189 = arith.constant 1 : i32
      %229 = arith.addi %arg15, %c1_i32_189 : i32
      %230 = arith.index_cast %229 : i32 to index
      %c0_190 = arith.constant 0 : index
      %c27_191 = arith.constant 27 : index
      %231 = vector.load %arg12[%230, %c0_190, %c27_191] : memref<12x16x144xbf16, #tpu.memory_space<vmem>>, vector<1x16x92xbf16>
      %232 = vector.shape_cast %231 : vector<1x16x92xbf16> to vector<16x92xbf16>
      %c208_192 = arith.constant 208 : index
      %c0_193 = arith.constant 0 : index
      %233 = vector.load %arg13[%c208_192, %c0_193] : memref<400x92xbf16, #tpu.memory_space<vmem>>, vector<16x92xbf16>
      tpu.vector_store %arg13[%c208_192, %c0_193], %232 {strides = array<i32>} : memref<400x92xbf16, #tpu.memory_space<vmem>>, vector<16x92xbf16>,
      %c1_i32_194 = arith.constant 1 : i32
      %234 = arith.addi %arg15, %c1_i32_194 : i32
      %235 = arith.index_cast %234 : i32 to index
      %c0_195 = arith.constant 0 : index
      %c28_196 = arith.constant 28 : index
      %236 = vector.load %arg12[%235, %c0_195, %c28_196] : memref<12x16x144xbf16, #tpu.memory_space<vmem>>, vector<1x16x92xbf16>
      %237 = vector.shape_cast %236 : vector<1x16x92xbf16> to vector<16x92xbf16>
      %c224_197 = arith.constant 224 : index
      %c0_198 = arith.constant 0 : index
      %238 = vector.load %arg13[%c224_197, %c0_198] : memref<400x92xbf16, #tpu.memory_space<vmem>>, vector<16x92xbf16>
      tpu.vector_store %arg13[%c224_197, %c0_198], %237 {strides = array<i32>} : memref<400x92xbf16, #tpu.memory_space<vmem>>, vector<16x92xbf16>,
      %c1_i32_199 = arith.constant 1 : i32
      %239 = arith.addi %arg15, %c1_i32_199 : i32
      %240 = arith.index_cast %239 : i32 to index
      %c0_200 = arith.constant 0 : index
      %c36_201 = arith.constant 36 : index
      %241 = vector.load %arg12[%240, %c0_200, %c36_201] : memref<12x16x144xbf16, #tpu.memory_space<vmem>>, vector<1x16x92xbf16>
      %242 = vector.shape_cast %241 : vector<1x16x92xbf16> to vector<16x92xbf16>
      %c240_202 = arith.constant 240 : index
      %c0_203 = arith.constant 0 : index
      %243 = vector.load %arg13[%c240_202, %c0_203] : memref<400x92xbf16, #tpu.memory_space<vmem>>, vector<16x92xbf16>
      tpu.vector_store %arg13[%c240_202, %c0_203], %242 {strides = array<i32>} : memref<400x92xbf16, #tpu.memory_space<vmem>>, vector<16x92xbf16>,
      %c1_i32_204 = arith.constant 1 : i32
      %244 = arith.addi %arg15, %c1_i32_204 : i32
      %245 = arith.index_cast %244 : i32 to index
      %c0_205 = arith.constant 0 : index
      %c37_206 = arith.constant 37 : index
      %246 = vector.load %arg12[%245, %c0_205, %c37_206] : memref<12x16x144xbf16, #tpu.memory_space<vmem>>, vector<1x16x92xbf16>
      %247 = vector.shape_cast %246 : vector<1x16x92xbf16> to vector<16x92xbf16>
      %c256_207 = arith.constant 256 : index
      %c0_208 = arith.constant 0 : index
      %248 = vector.load %arg13[%c256_207, %c0_208] : memref<400x92xbf16, #tpu.memory_space<vmem>>, vector<16x92xbf16>
      tpu.vector_store %arg13[%c256_207, %c0_208], %247 {strides = array<i32>} : memref<400x92xbf16, #tpu.memory_space<vmem>>, vector<16x92xbf16>,
      %c1_i32_209 = arith.constant 1 : i32
      %249 = arith.addi %arg15, %c1_i32_209 : i32
      %250 = arith.index_cast %249 : i32 to index
      %c0_210 = arith.constant 0 : index
      %c38_211 = arith.constant 38 : index
      %251 = vector.load %arg12[%250, %c0_210, %c38_211] : memref<12x16x144xbf16, #tpu.memory_space<vmem>>, vector<1x16x92xbf16>
      %252 = vector.shape_cast %251 : vector<1x16x92xbf16> to vector<16x92xbf16>
      %c272_212 = arith.constant 272 : index
      %c0_213 = arith.constant 0 : index
      %253 = vector.load %arg13[%c272_212, %c0_213] : memref<400x92xbf16, #tpu.memory_space<vmem>>, vector<16x92xbf16>
      tpu.vector_store %arg13[%c272_212, %c0_213], %252 {strides = array<i32>} : memref<400x92xbf16, #tpu.memory_space<vmem>>, vector<16x92xbf16>,
      %c1_i32_214 = arith.constant 1 : i32
      %254 = arith.addi %arg15, %c1_i32_214 : i32
      %255 = arith.index_cast %254 : i32 to index
      %c0_215 = arith.constant 0 : index
      %c39_216 = arith.constant 39 : index
      %256 = vector.load %arg12[%255, %c0_215, %c39_216] : memref<12x16x144xbf16, #tpu.memory_space<vmem>>, vector<1x16x92xbf16>
      %257 = vector.shape_cast %256 : vector<1x16x92xbf16> to vector<16x92xbf16>
      %c288_217 = arith.constant 288 : index
      %c0_218 = arith.constant 0 : index
      %258 = vector.load %arg13[%c288_217, %c0_218] : memref<400x92xbf16, #tpu.memory_space<vmem>>, vector<16x92xbf16>
      tpu.vector_store %arg13[%c288_217, %c0_218], %257 {strides = array<i32>} : memref<400x92xbf16, #tpu.memory_space<vmem>>, vector<16x92xbf16>,
      %c1_i32_219 = arith.constant 1 : i32
      %259 = arith.addi %arg15, %c1_i32_219 : i32
      %260 = arith.index_cast %259 : i32 to index
      %c0_220 = arith.constant 0 : index
      %c40_221 = arith.constant 40 : index
      %261 = vector.load %arg12[%260, %c0_220, %c40_221] : memref<12x16x144xbf16, #tpu.memory_space<vmem>>, vector<1x16x92xbf16>
      %262 = vector.shape_cast %261 : vector<1x16x92xbf16> to vector<16x92xbf16>
      %c304_222 = arith.constant 304 : index
      %c0_223 = arith.constant 0 : index
      %263 = vector.load %arg13[%c304_222, %c0_223] : memref<400x92xbf16, #tpu.memory_space<vmem>>, vector<16x92xbf16>
      tpu.vector_store %arg13[%c304_222, %c0_223], %262 {strides = array<i32>} : memref<400x92xbf16, #tpu.memory_space<vmem>>, vector<16x92xbf16>,
      %c1_i32_224 = arith.constant 1 : i32
      %264 = arith.addi %arg15, %c1_i32_224 : i32
      %265 = arith.index_cast %264 : i32 to index
      %c0_225 = arith.constant 0 : index
      %c48_226 = arith.constant 48 : index
      %266 = vector.load %arg12[%265, %c0_225, %c48_226] : memref<12x16x144xbf16, #tpu.memory_space<vmem>>, vector<1x16x92xbf16>
      %267 = vector.shape_cast %266 : vector<1x16x92xbf16> to vector<16x92xbf16>
      %c320_227 = arith.constant 320 : index
      %c0_228 = arith.constant 0 : index
      %268 = vector.load %arg13[%c320_227, %c0_228] : memref<400x92xbf16, #tpu.memory_space<vmem>>, vector<16x92xbf16>
      tpu.vector_store %arg13[%c320_227, %c0_228], %267 {strides = array<i32>} : memref<400x92xbf16, #tpu.memory_space<vmem>>, vector<16x92xbf16>,
      %c1_i32_229 = arith.constant 1 : i32
      %269 = arith.addi %arg15, %c1_i32_229 : i32
      %270 = arith.index_cast %269 : i32 to index
      %c0_230 = arith.constant 0 : index
      %c49_231 = arith.constant 49 : index
      %271 = vector.load %arg12[%270, %c0_230, %c49_231] : memref<12x16x144xbf16, #tpu.memory_space<vmem>>, vector<1x16x92xbf16>
      %272 = vector.shape_cast %271 : vector<1x16x92xbf16> to vector<16x92xbf16>
      %c336_232 = arith.constant 336 : index
      %c0_233 = arith.constant 0 : index
      %273 = vector.load %arg13[%c336_232, %c0_233] : memref<400x92xbf16, #tpu.memory_space<vmem>>, vector<16x92xbf16>
      tpu.vector_store %arg13[%c336_232, %c0_233], %272 {strides = array<i32>} : memref<400x92xbf16, #tpu.memory_space<vmem>>, vector<16x92xbf16>,
      %c1_i32_234 = arith.constant 1 : i32
      %274 = arith.addi %arg15, %c1_i32_234 : i32
      %275 = arith.index_cast %274 : i32 to index
      %c0_235 = arith.constant 0 : index
      %c50_236 = arith.constant 50 : index
      %276 = vector.load %arg12[%275, %c0_235, %c50_236] : memref<12x16x144xbf16, #tpu.memory_space<vmem>>, vector<1x16x92xbf16>
      %277 = vector.shape_cast %276 : vector<1x16x92xbf16> to vector<16x92xbf16>
      %c352_237 = arith.constant 352 : index
      %c0_238 = arith.constant 0 : index
      %278 = vector.load %arg13[%c352_237, %c0_238] : memref<400x92xbf16, #tpu.memory_space<vmem>>, vector<16x92xbf16>
      tpu.vector_store %arg13[%c352_237, %c0_238], %277 {strides = array<i32>} : memref<400x92xbf16, #tpu.memory_space<vmem>>, vector<16x92xbf16>,
      %c1_i32_239 = arith.constant 1 : i32
      %279 = arith.addi %arg15, %c1_i32_239 : i32
      %280 = arith.index_cast %279 : i32 to index
      %c0_240 = arith.constant 0 : index
      %c51_241 = arith.constant 51 : index
      %281 = vector.load %arg12[%280, %c0_240, %c51_241] : memref<12x16x144xbf16, #tpu.memory_space<vmem>>, vector<1x16x92xbf16>
      %282 = vector.shape_cast %281 : vector<1x16x92xbf16> to vector<16x92xbf16>
      %c368_242 = arith.constant 368 : index
      %c0_243 = arith.constant 0 : index
      %283 = vector.load %arg13[%c368_242, %c0_243] : memref<400x92xbf16, #tpu.memory_space<vmem>>, vector<16x92xbf16>
      tpu.vector_store %arg13[%c368_242, %c0_243], %282 {strides = array<i32>} : memref<400x92xbf16, #tpu.memory_space<vmem>>, vector<16x92xbf16>,
      %c1_i32_244 = arith.constant 1 : i32
      %284 = arith.addi %arg15, %c1_i32_244 : i32
      %285 = arith.index_cast %284 : i32 to index
      %c0_245 = arith.constant 0 : index
      %c52_246 = arith.constant 52 : index
      %286 = vector.load %arg12[%285, %c0_245, %c52_246] : memref<12x16x144xbf16, #tpu.memory_space<vmem>>, vector<1x16x92xbf16>
      %287 = vector.shape_cast %286 : vector<1x16x92xbf16> to vector<16x92xbf16>
      %c384_247 = arith.constant 384 : index
      %c0_248 = arith.constant 0 : index
      %288 = vector.load %arg13[%c384_247, %c0_248] : memref<400x92xbf16, #tpu.memory_space<vmem>>, vector<16x92xbf16>
      tpu.vector_store %arg13[%c384_247, %c0_248], %287 {strides = array<i32>} : memref<400x92xbf16, #tpu.memory_space<vmem>>, vector<16x92xbf16>,
      %c0_249 = arith.constant 0 : index
      %c0_250 = arith.constant 0 : index
      %289 = vector.load %arg14[%c0_249, %c0_250] : memref<16x92xf32, #tpu.memory_space<vmem>>, vector<16x92xf32>
      %c1_251 = arith.constant 1 : index
      %c0_252 = arith.constant 0 : index
      %c0_253 = arith.constant 0 : index
      %290 = vector.load %arg5[%c1_251, %c0_252, %c0_253] : memref<5x16x400xbf16, #tpu.memory_space<vmem>>, vector<1x16x400xbf16>
      %291 = vector.shape_cast %290 : vector<1x16x400xbf16> to vector<16x400xbf16>
      %c0_254 = arith.constant 0 : index
      %c0_255 = arith.constant 0 : index
      %292 = vector.load %arg13[%c0_254, %c0_255] : memref<400x92xbf16, #tpu.memory_space<vmem>>, vector<400x92xbf16>
      %cst_256 = arith.constant dense<0.000000e+00> : vector<16x92xf32>
      %293 = tpu.matmul %291, %292, %cst_256 {dimension_numbers = #tpu.dot_dimension_numbers<[1], [0], [0], [1], [0, 0, 1, 1], [], []>} : vector<16x400xbf16>, vector<400x92xbf16>, vector<16x92xf32> -> vector<16x92xf32>
      %294 = arith.addf %289, %293 : vector<16x92xf32>
      %c0_257 = arith.constant 0 : index
      %c0_258 = arith.constant 0 : index
      %295 = vector.load %arg14[%c0_257, %c0_258] : memref<16x92xf32, #tpu.memory_space<vmem>>, vector<16x92xf32>
      tpu.vector_store %arg14[%c0_257, %c0_258], %294 {strides = array<i32>} : memref<16x92xf32, #tpu.memory_space<vmem>>, vector<16x92xf32>,
      %c2_i32 = arith.constant 2 : i32
      %296 = arith.addi %arg15, %c2_i32 : i32
      %297 = arith.index_cast %296 : i32 to index
      %c0_259 = arith.constant 0 : index
      %c0_260 = arith.constant 0 : index
      %298 = vector.load %arg12[%297, %c0_259, %c0_260] : memref<12x16x144xbf16, #tpu.memory_space<vmem>>, vector<1x16x92xbf16>
      %299 = vector.shape_cast %298 : vector<1x16x92xbf16> to vector<16x92xbf16>
      %c0_261 = arith.constant 0 : index
      %c0_262 = arith.constant 0 : index
      %300 = vector.load %arg13[%c0_261, %c0_262] : memref<400x92xbf16, #tpu.memory_space<vmem>>, vector<16x92xbf16>
      tpu.vector_store %arg13[%c0_261, %c0_262], %299 {strides = array<i32>} : memref<400x92xbf16, #tpu.memory_space<vmem>>, vector<16x92xbf16>,
      %c2_i32_263 = arith.constant 2 : i32
      %301 = arith.addi %arg15, %c2_i32_263 : i32
      %302 = arith.index_cast %301 : i32 to index
      %c0_264 = arith.constant 0 : index
      %c1_265 = arith.constant 1 : index
      %303 = vector.load %arg12[%302, %c0_264, %c1_265] : memref<12x16x144xbf16, #tpu.memory_space<vmem>>, vector<1x16x92xbf16>
      %304 = vector.shape_cast %303 : vector<1x16x92xbf16> to vector<16x92xbf16>
      %c16_266 = arith.constant 16 : index
      %c0_267 = arith.constant 0 : index
      %305 = vector.load %arg13[%c16_266, %c0_267] : memref<400x92xbf16, #tpu.memory_space<vmem>>, vector<16x92xbf16>
      tpu.vector_store %arg13[%c16_266, %c0_267], %304 {strides = array<i32>} : memref<400x92xbf16, #tpu.memory_space<vmem>>, vector<16x92xbf16>,
      %c2_i32_268 = arith.constant 2 : i32
      %306 = arith.addi %arg15, %c2_i32_268 : i32
      %307 = arith.index_cast %306 : i32 to index
      %c0_269 = arith.constant 0 : index
      %c2_270 = arith.constant 2 : index
      %308 = vector.load %arg12[%307, %c0_269, %c2_270] : memref<12x16x144xbf16, #tpu.memory_space<vmem>>, vector<1x16x92xbf16>
      %309 = vector.shape_cast %308 : vector<1x16x92xbf16> to vector<16x92xbf16>
      %c32_271 = arith.constant 32 : index
      %c0_272 = arith.constant 0 : index
      %310 = vector.load %arg13[%c32_271, %c0_272] : memref<400x92xbf16, #tpu.memory_space<vmem>>, vector<16x92xbf16>
      tpu.vector_store %arg13[%c32_271, %c0_272], %309 {strides = array<i32>} : memref<400x92xbf16, #tpu.memory_space<vmem>>, vector<16x92xbf16>,
      %c2_i32_273 = arith.constant 2 : i32
      %311 = arith.addi %arg15, %c2_i32_273 : i32
      %312 = arith.index_cast %311 : i32 to index
      %c0_274 = arith.constant 0 : index
      %c3_275 = arith.constant 3 : index
      %313 = vector.load %arg12[%312, %c0_274, %c3_275] : memref<12x16x144xbf16, #tpu.memory_space<vmem>>, vector<1x16x92xbf16>
      %314 = vector.shape_cast %313 : vector<1x16x92xbf16> to vector<16x92xbf16>
      %c48_276 = arith.constant 48 : index
      %c0_277 = arith.constant 0 : index
      %315 = vector.load %arg13[%c48_276, %c0_277] : memref<400x92xbf16, #tpu.memory_space<vmem>>, vector<16x92xbf16>
      tpu.vector_store %arg13[%c48_276, %c0_277], %314 {strides = array<i32>} : memref<400x92xbf16, #tpu.memory_space<vmem>>, vector<16x92xbf16>,
      %c2_i32_278 = arith.constant 2 : i32
      %316 = arith.addi %arg15, %c2_i32_278 : i32
      %317 = arith.index_cast %316 : i32 to index
      %c0_279 = arith.constant 0 : index
      %c4_280 = arith.constant 4 : index
      %318 = vector.load %arg12[%317, %c0_279, %c4_280] : memref<12x16x144xbf16, #tpu.memory_space<vmem>>, vector<1x16x92xbf16>
      %319 = vector.shape_cast %318 : vector<1x16x92xbf16> to vector<16x92xbf16>
      %c64_281 = arith.constant 64 : index
      %c0_282 = arith.constant 0 : index
      %320 = vector.load %arg13[%c64_281, %c0_282] : memref<400x92xbf16, #tpu.memory_space<vmem>>, vector<16x92xbf16>
      tpu.vector_store %arg13[%c64_281, %c0_282], %319 {strides = array<i32>} : memref<400x92xbf16, #tpu.memory_space<vmem>>, vector<16x92xbf16>,
      %c2_i32_283 = arith.constant 2 : i32
      %321 = arith.addi %arg15, %c2_i32_283 : i32
      %322 = arith.index_cast %321 : i32 to index
      %c0_284 = arith.constant 0 : index
      %c12_285 = arith.constant 12 : index
      %323 = vector.load %arg12[%322, %c0_284, %c12_285] : memref<12x16x144xbf16, #tpu.memory_space<vmem>>, vector<1x16x92xbf16>
      %324 = vector.shape_cast %323 : vector<1x16x92xbf16> to vector<16x92xbf16>
      %c80_286 = arith.constant 80 : index
      %c0_287 = arith.constant 0 : index
      %325 = vector.load %arg13[%c80_286, %c0_287] : memref<400x92xbf16, #tpu.memory_space<vmem>>, vector<16x92xbf16>
      tpu.vector_store %arg13[%c80_286, %c0_287], %324 {strides = array<i32>} : memref<400x92xbf16, #tpu.memory_space<vmem>>, vector<16x92xbf16>,
      %c2_i32_288 = arith.constant 2 : i32
      %326 = arith.addi %arg15, %c2_i32_288 : i32
      %327 = arith.index_cast %326 : i32 to index
      %c0_289 = arith.constant 0 : index
      %c13_290 = arith.constant 13 : index
      %328 = vector.load %arg12[%327, %c0_289, %c13_290] : memref<12x16x144xbf16, #tpu.memory_space<vmem>>, vector<1x16x92xbf16>
      %329 = vector.shape_cast %328 : vector<1x16x92xbf16> to vector<16x92xbf16>
      %c96_291 = arith.constant 96 : index
      %c0_292 = arith.constant 0 : index
      %330 = vector.load %arg13[%c96_291, %c0_292] : memref<400x92xbf16, #tpu.memory_space<vmem>>, vector<16x92xbf16>
      tpu.vector_store %arg13[%c96_291, %c0_292], %329 {strides = array<i32>} : memref<400x92xbf16, #tpu.memory_space<vmem>>, vector<16x92xbf16>,
      %c2_i32_293 = arith.constant 2 : i32
      %331 = arith.addi %arg15, %c2_i32_293 : i32
      %332 = arith.index_cast %331 : i32 to index
      %c0_294 = arith.constant 0 : index
      %c14_295 = arith.constant 14 : index
      %333 = vector.load %arg12[%332, %c0_294, %c14_295] : memref<12x16x144xbf16, #tpu.memory_space<vmem>>, vector<1x16x92xbf16>
      %334 = vector.shape_cast %333 : vector<1x16x92xbf16> to vector<16x92xbf16>
      %c112_296 = arith.constant 112 : index
      %c0_297 = arith.constant 0 : index
      %335 = vector.load %arg13[%c112_296, %c0_297] : memref<400x92xbf16, #tpu.memory_space<vmem>>, vector<16x92xbf16>
      tpu.vector_store %arg13[%c112_296, %c0_297], %334 {strides = array<i32>} : memref<400x92xbf16, #tpu.memory_space<vmem>>, vector<16x92xbf16>,
      %c2_i32_298 = arith.constant 2 : i32
      %336 = arith.addi %arg15, %c2_i32_298 : i32
      %337 = arith.index_cast %336 : i32 to index
      %c0_299 = arith.constant 0 : index
      %c15_300 = arith.constant 15 : index
      %338 = vector.load %arg12[%337, %c0_299, %c15_300] : memref<12x16x144xbf16, #tpu.memory_space<vmem>>, vector<1x16x92xbf16>
      %339 = vector.shape_cast %338 : vector<1x16x92xbf16> to vector<16x92xbf16>
      %c128_301 = arith.constant 128 : index
      %c0_302 = arith.constant 0 : index
      %340 = vector.load %arg13[%c128_301, %c0_302] : memref<400x92xbf16, #tpu.memory_space<vmem>>, vector<16x92xbf16>
      tpu.vector_store %arg13[%c128_301, %c0_302], %339 {strides = array<i32>} : memref<400x92xbf16, #tpu.memory_space<vmem>>, vector<16x92xbf16>,
      %c2_i32_303 = arith.constant 2 : i32
      %341 = arith.addi %arg15, %c2_i32_303 : i32
      %342 = arith.index_cast %341 : i32 to index
      %c0_304 = arith.constant 0 : index
      %c16_305 = arith.constant 16 : index
      %343 = vector.load %arg12[%342, %c0_304, %c16_305] : memref<12x16x144xbf16, #tpu.memory_space<vmem>>, vector<1x16x92xbf16>
      %344 = vector.shape_cast %343 : vector<1x16x92xbf16> to vector<16x92xbf16>
      %c144_306 = arith.constant 144 : index
      %c0_307 = arith.constant 0 : index
      %345 = vector.load %arg13[%c144_306, %c0_307] : memref<400x92xbf16, #tpu.memory_space<vmem>>, vector<16x92xbf16>
      tpu.vector_store %arg13[%c144_306, %c0_307], %344 {strides = array<i32>} : memref<400x92xbf16, #tpu.memory_space<vmem>>, vector<16x92xbf16>,
      %c2_i32_308 = arith.constant 2 : i32
      %346 = arith.addi %arg15, %c2_i32_308 : i32
      %347 = arith.index_cast %346 : i32 to index
      %c0_309 = arith.constant 0 : index
      %c24_310 = arith.constant 24 : index
      %348 = vector.load %arg12[%347, %c0_309, %c24_310] : memref<12x16x144xbf16, #tpu.memory_space<vmem>>, vector<1x16x92xbf16>
      %349 = vector.shape_cast %348 : vector<1x16x92xbf16> to vector<16x92xbf16>
      %c160_311 = arith.constant 160 : index
      %c0_312 = arith.constant 0 : index
      %350 = vector.load %arg13[%c160_311, %c0_312] : memref<400x92xbf16, #tpu.memory_space<vmem>>, vector<16x92xbf16>
      tpu.vector_store %arg13[%c160_311, %c0_312], %349 {strides = array<i32>} : memref<400x92xbf16, #tpu.memory_space<vmem>>, vector<16x92xbf16>,
      %c2_i32_313 = arith.constant 2 : i32
      %351 = arith.addi %arg15, %c2_i32_313 : i32
      %352 = arith.index_cast %351 : i32 to index
      %c0_314 = arith.constant 0 : index
      %c25_315 = arith.constant 25 : index
      %353 = vector.load %arg12[%352, %c0_314, %c25_315] : memref<12x16x144xbf16, #tpu.memory_space<vmem>>, vector<1x16x92xbf16>
      %354 = vector.shape_cast %353 : vector<1x16x92xbf16> to vector<16x92xbf16>
      %c176_316 = arith.constant 176 : index
      %c0_317 = arith.constant 0 : index
      %355 = vector.load %arg13[%c176_316, %c0_317] : memref<400x92xbf16, #tpu.memory_space<vmem>>, vector<16x92xbf16>
      tpu.vector_store %arg13[%c176_316, %c0_317], %354 {strides = array<i32>} : memref<400x92xbf16, #tpu.memory_space<vmem>>, vector<16x92xbf16>,
      %c2_i32_318 = arith.constant 2 : i32
      %356 = arith.addi %arg15, %c2_i32_318 : i32
      %357 = arith.index_cast %356 : i32 to index
      %c0_319 = arith.constant 0 : index
      %c26_320 = arith.constant 26 : index
      %358 = vector.load %arg12[%357, %c0_319, %c26_320] : memref<12x16x144xbf16, #tpu.memory_space<vmem>>, vector<1x16x92xbf16>
      %359 = vector.shape_cast %358 : vector<1x16x92xbf16> to vector<16x92xbf16>
      %c192_321 = arith.constant 192 : index
      %c0_322 = arith.constant 0 : index
      %360 = vector.load %arg13[%c192_321, %c0_322] : memref<400x92xbf16, #tpu.memory_space<vmem>>, vector<16x92xbf16>
      tpu.vector_store %arg13[%c192_321, %c0_322], %359 {strides = array<i32>} : memref<400x92xbf16, #tpu.memory_space<vmem>>, vector<16x92xbf16>,
      %c2_i32_323 = arith.constant 2 : i32
      %361 = arith.addi %arg15, %c2_i32_323 : i32
      %362 = arith.index_cast %361 : i32 to index
      %c0_324 = arith.constant 0 : index
      %c27_325 = arith.constant 27 : index
      %363 = vector.load %arg12[%362, %c0_324, %c27_325] : memref<12x16x144xbf16, #tpu.memory_space<vmem>>, vector<1x16x92xbf16>
      %364 = vector.shape_cast %363 : vector<1x16x92xbf16> to vector<16x92xbf16>
      %c208_326 = arith.constant 208 : index
      %c0_327 = arith.constant 0 : index
      %365 = vector.load %arg13[%c208_326, %c0_327] : memref<400x92xbf16, #tpu.memory_space<vmem>>, vector<16x92xbf16>
      tpu.vector_store %arg13[%c208_326, %c0_327], %364 {strides = array<i32>} : memref<400x92xbf16, #tpu.memory_space<vmem>>, vector<16x92xbf16>,
      %c2_i32_328 = arith.constant 2 : i32
      %366 = arith.addi %arg15, %c2_i32_328 : i32
      %367 = arith.index_cast %366 : i32 to index
      %c0_329 = arith.constant 0 : index
      %c28_330 = arith.constant 28 : index
      %368 = vector.load %arg12[%367, %c0_329, %c28_330] : memref<12x16x144xbf16, #tpu.memory_space<vmem>>, vector<1x16x92xbf16>
      %369 = vector.shape_cast %368 : vector<1x16x92xbf16> to vector<16x92xbf16>
      %c224_331 = arith.constant 224 : index
      %c0_332 = arith.constant 0 : index
      %370 = vector.load %arg13[%c224_331, %c0_332] : memref<400x92xbf16, #tpu.memory_space<vmem>>, vector<16x92xbf16>
      tpu.vector_store %arg13[%c224_331, %c0_332], %369 {strides = array<i32>} : memref<400x92xbf16, #tpu.memory_space<vmem>>, vector<16x92xbf16>,
      %c2_i32_333 = arith.constant 2 : i32
      %371 = arith.addi %arg15, %c2_i32_333 : i32
      %372 = arith.index_cast %371 : i32 to index
      %c0_334 = arith.constant 0 : index
      %c36_335 = arith.constant 36 : index
      %373 = vector.load %arg12[%372, %c0_334, %c36_335] : memref<12x16x144xbf16, #tpu.memory_space<vmem>>, vector<1x16x92xbf16>
      %374 = vector.shape_cast %373 : vector<1x16x92xbf16> to vector<16x92xbf16>
      %c240_336 = arith.constant 240 : index
      %c0_337 = arith.constant 0 : index
      %375 = vector.load %arg13[%c240_336, %c0_337] : memref<400x92xbf16, #tpu.memory_space<vmem>>, vector<16x92xbf16>
      tpu.vector_store %arg13[%c240_336, %c0_337], %374 {strides = array<i32>} : memref<400x92xbf16, #tpu.memory_space<vmem>>, vector<16x92xbf16>,
      %c2_i32_338 = arith.constant 2 : i32
      %376 = arith.addi %arg15, %c2_i32_338 : i32
      %377 = arith.index_cast %376 : i32 to index
      %c0_339 = arith.constant 0 : index
      %c37_340 = arith.constant 37 : index
      %378 = vector.load %arg12[%377, %c0_339, %c37_340] : memref<12x16x144xbf16, #tpu.memory_space<vmem>>, vector<1x16x92xbf16>
      %379 = vector.shape_cast %378 : vector<1x16x92xbf16> to vector<16x92xbf16>
      %c256_341 = arith.constant 256 : index
      %c0_342 = arith.constant 0 : index
      %380 = vector.load %arg13[%c256_341, %c0_342] : memref<400x92xbf16, #tpu.memory_space<vmem>>, vector<16x92xbf16>
      tpu.vector_store %arg13[%c256_341, %c0_342], %379 {strides = array<i32>} : memref<400x92xbf16, #tpu.memory_space<vmem>>, vector<16x92xbf16>,
      %c2_i32_343 = arith.constant 2 : i32
      %381 = arith.addi %arg15, %c2_i32_343 : i32
      %382 = arith.index_cast %381 : i32 to index
      %c0_344 = arith.constant 0 : index
      %c38_345 = arith.constant 38 : index
      %383 = vector.load %arg12[%382, %c0_344, %c38_345] : memref<12x16x144xbf16, #tpu.memory_space<vmem>>, vector<1x16x92xbf16>
      %384 = vector.shape_cast %383 : vector<1x16x92xbf16> to vector<16x92xbf16>
      %c272_346 = arith.constant 272 : index
      %c0_347 = arith.constant 0 : index
      %385 = vector.load %arg13[%c272_346, %c0_347] : memref<400x92xbf16, #tpu.memory_space<vmem>>, vector<16x92xbf16>
      tpu.vector_store %arg13[%c272_346, %c0_347], %384 {strides = array<i32>} : memref<400x92xbf16, #tpu.memory_space<vmem>>, vector<16x92xbf16>,
      %c2_i32_348 = arith.constant 2 : i32
      %386 = arith.addi %arg15, %c2_i32_348 : i32
      %387 = arith.index_cast %386 : i32 to index
      %c0_349 = arith.constant 0 : index
      %c39_350 = arith.constant 39 : index
      %388 = vector.load %arg12[%387, %c0_349, %c39_350] : memref<12x16x144xbf16, #tpu.memory_space<vmem>>, vector<1x16x92xbf16>
      %389 = vector.shape_cast %388 : vector<1x16x92xbf16> to vector<16x92xbf16>
      %c288_351 = arith.constant 288 : index
      %c0_352 = arith.constant 0 : index
      %390 = vector.load %arg13[%c288_351, %c0_352] : memref<400x92xbf16, #tpu.memory_space<vmem>>, vector<16x92xbf16>
      tpu.vector_store %arg13[%c288_351, %c0_352], %389 {strides = array<i32>} : memref<400x92xbf16, #tpu.memory_space<vmem>>, vector<16x92xbf16>,
      %c2_i32_353 = arith.constant 2 : i32
      %391 = arith.addi %arg15, %c2_i32_353 : i32
      %392 = arith.index_cast %391 : i32 to index
      %c0_354 = arith.constant 0 : index
      %c40_355 = arith.constant 40 : index
      %393 = vector.load %arg12[%392, %c0_354, %c40_355] : memref<12x16x144xbf16, #tpu.memory_space<vmem>>, vector<1x16x92xbf16>
      %394 = vector.shape_cast %393 : vector<1x16x92xbf16> to vector<16x92xbf16>
      %c304_356 = arith.constant 304 : index
      %c0_357 = arith.constant 0 : index
      %395 = vector.load %arg13[%c304_356, %c0_357] : memref<400x92xbf16, #tpu.memory_space<vmem>>, vector<16x92xbf16>
      tpu.vector_store %arg13[%c304_356, %c0_357], %394 {strides = array<i32>} : memref<400x92xbf16, #tpu.memory_space<vmem>>, vector<16x92xbf16>,
      %c2_i32_358 = arith.constant 2 : i32
      %396 = arith.addi %arg15, %c2_i32_358 : i32
      %397 = arith.index_cast %396 : i32 to index
      %c0_359 = arith.constant 0 : index
      %c48_360 = arith.constant 48 : index
      %398 = vector.load %arg12[%397, %c0_359, %c48_360] : memref<12x16x144xbf16, #tpu.memory_space<vmem>>, vector<1x16x92xbf16>
      %399 = vector.shape_cast %398 : vector<1x16x92xbf16> to vector<16x92xbf16>
      %c320_361 = arith.constant 320 : index
      %c0_362 = arith.constant 0 : index
      %400 = vector.load %arg13[%c320_361, %c0_362] : memref<400x92xbf16, #tpu.memory_space<vmem>>, vector<16x92xbf16>
      tpu.vector_store %arg13[%c320_361, %c0_362], %399 {strides = array<i32>} : memref<400x92xbf16, #tpu.memory_space<vmem>>, vector<16x92xbf16>,
      %c2_i32_363 = arith.constant 2 : i32
      %401 = arith.addi %arg15, %c2_i32_363 : i32
      %402 = arith.index_cast %401 : i32 to index
      %c0_364 = arith.constant 0 : index
      %c49_365 = arith.constant 49 : index
      %403 = vector.load %arg12[%402, %c0_364, %c49_365] : memref<12x16x144xbf16, #tpu.memory_space<vmem>>, vector<1x16x92xbf16>
      %404 = vector.shape_cast %403 : vector<1x16x92xbf16> to vector<16x92xbf16>
      %c336_366 = arith.constant 336 : index
      %c0_367 = arith.constant 0 : index
      %405 = vector.load %arg13[%c336_366, %c0_367] : memref<400x92xbf16, #tpu.memory_space<vmem>>, vector<16x92xbf16>
      tpu.vector_store %arg13[%c336_366, %c0_367], %404 {strides = array<i32>} : memref<400x92xbf16, #tpu.memory_space<vmem>>, vector<16x92xbf16>,
      %c2_i32_368 = arith.constant 2 : i32
      %406 = arith.addi %arg15, %c2_i32_368 : i32
      %407 = arith.index_cast %406 : i32 to index
      %c0_369 = arith.constant 0 : index
      %c50_370 = arith.constant 50 : index
      %408 = vector.load %arg12[%407, %c0_369, %c50_370] : memref<12x16x144xbf16, #tpu.memory_space<vmem>>, vector<1x16x92xbf16>
      %409 = vector.shape_cast %408 : vector<1x16x92xbf16> to vector<16x92xbf16>
      %c352_371 = arith.constant 352 : index
      %c0_372 = arith.constant 0 : index
      %410 = vector.load %arg13[%c352_371, %c0_372] : memref<400x92xbf16, #tpu.memory_space<vmem>>, vector<16x92xbf16>
      tpu.vector_store %arg13[%c352_371, %c0_372], %409 {strides = array<i32>} : memref<400x92xbf16, #tpu.memory_space<vmem>>, vector<16x92xbf16>,
      %c2_i32_373 = arith.constant 2 : i32
      %411 = arith.addi %arg15, %c2_i32_373 : i32
      %412 = arith.index_cast %411 : i32 to index
      %c0_374 = arith.constant 0 : index
      %c51_375 = arith.constant 51 : index
      %413 = vector.load %arg12[%412, %c0_374, %c51_375] : memref<12x16x144xbf16, #tpu.memory_space<vmem>>, vector<1x16x92xbf16>
      %414 = vector.shape_cast %413 : vector<1x16x92xbf16> to vector<16x92xbf16>
      %c368_376 = arith.constant 368 : index
      %c0_377 = arith.constant 0 : index
      %415 = vector.load %arg13[%c368_376, %c0_377] : memref<400x92xbf16, #tpu.memory_space<vmem>>, vector<16x92xbf16>
      tpu.vector_store %arg13[%c368_376, %c0_377], %414 {strides = array<i32>} : memref<400x92xbf16, #tpu.memory_space<vmem>>, vector<16x92xbf16>,
      %c2_i32_378 = arith.constant 2 : i32
      %416 = arith.addi %arg15, %c2_i32_378 : i32
      %417 = arith.index_cast %416 : i32 to index
      %c0_379 = arith.constant 0 : index
      %c52_380 = arith.constant 52 : index
      %418 = vector.load %arg12[%417, %c0_379, %c52_380] : memref<12x16x144xbf16, #tpu.memory_space<vmem>>, vector<1x16x92xbf16>
      %419 = vector.shape_cast %418 : vector<1x16x92xbf16> to vector<16x92xbf16>
      %c384_381 = arith.constant 384 : index
      %c0_382 = arith.constant 0 : index
      %420 = vector.load %arg13[%c384_381, %c0_382] : memref<400x92xbf16, #tpu.memory_space<vmem>>, vector<16x92xbf16>
      tpu.vector_store %arg13[%c384_381, %c0_382], %419 {strides = array<i32>} : memref<400x92xbf16, #tpu.memory_space<vmem>>, vector<16x92xbf16>,
      %c0_383 = arith.constant 0 : index
      %c0_384 = arith.constant 0 : index
      %421 = vector.load %arg14[%c0_383, %c0_384] : memref<16x92xf32, #tpu.memory_space<vmem>>, vector<16x92xf32>
      %c2_385 = arith.constant 2 : index
      %c0_386 = arith.constant 0 : index
      %c0_387 = arith.constant 0 : index
      %422 = vector.load %arg5[%c2_385, %c0_386, %c0_387] : memref<5x16x400xbf16, #tpu.memory_space<vmem>>, vector<1x16x400xbf16>
      %423 = vector.shape_cast %422 : vector<1x16x400xbf16> to vector<16x400xbf16>
      %c0_388 = arith.constant 0 : index
      %c0_389 = arith.constant 0 : index
      %424 = vector.load %arg13[%c0_388, %c0_389] : memref<400x92xbf16, #tpu.memory_space<vmem>>, vector<400x92xbf16>
      %cst_390 = arith.constant dense<0.000000e+00> : vector<16x92xf32>
      %425 = tpu.matmul %423, %424, %cst_390 {dimension_numbers = #tpu.dot_dimension_numbers<[1], [0], [0], [1], [0, 0, 1, 1], [], []>} : vector<16x400xbf16>, vector<400x92xbf16>, vector<16x92xf32> -> vector<16x92xf32>
      %426 = arith.addf %421, %425 : vector<16x92xf32>
      %c0_391 = arith.constant 0 : index
      %c0_392 = arith.constant 0 : index
      %427 = vector.load %arg14[%c0_391, %c0_392] : memref<16x92xf32, #tpu.memory_space<vmem>>, vector<16x92xf32>
      tpu.vector_store %arg14[%c0_391, %c0_392], %426 {strides = array<i32>} : memref<16x92xf32, #tpu.memory_space<vmem>>, vector<16x92xf32>,
      %c3_i32 = arith.constant 3 : i32
      %428 = arith.addi %arg15, %c3_i32 : i32
      %429 = arith.index_cast %428 : i32 to index
      %c0_393 = arith.constant 0 : index
      %c0_394 = arith.constant 0 : index
      %430 = vector.load %arg12[%429, %c0_393, %c0_394] : memref<12x16x144xbf16, #tpu.memory_space<vmem>>, vector<1x16x92xbf16>
      %431 = vector.shape_cast %430 : vector<1x16x92xbf16> to vector<16x92xbf16>
      %c0_395 = arith.constant 0 : index
      %c0_396 = arith.constant 0 : index
      %432 = vector.load %arg13[%c0_395, %c0_396] : memref<400x92xbf16, #tpu.memory_space<vmem>>, vector<16x92xbf16>
      tpu.vector_store %arg13[%c0_395, %c0_396], %431 {strides = array<i32>} : memref<400x92xbf16, #tpu.memory_space<vmem>>, vector<16x92xbf16>,
      %c3_i32_397 = arith.constant 3 : i32
      %433 = arith.addi %arg15, %c3_i32_397 : i32
      %434 = arith.index_cast %433 : i32 to index
      %c0_398 = arith.constant 0 : index
      %c1_399 = arith.constant 1 : index
      %435 = vector.load %arg12[%434, %c0_398, %c1_399] : memref<12x16x144xbf16, #tpu.memory_space<vmem>>, vector<1x16x92xbf16>
      %436 = vector.shape_cast %435 : vector<1x16x92xbf16> to vector<16x92xbf16>
      %c16_400 = arith.constant 16 : index
      %c0_401 = arith.constant 0 : index
      %437 = vector.load %arg13[%c16_400, %c0_401] : memref<400x92xbf16, #tpu.memory_space<vmem>>, vector<16x92xbf16>
      tpu.vector_store %arg13[%c16_400, %c0_401], %436 {strides = array<i32>} : memref<400x92xbf16, #tpu.memory_space<vmem>>, vector<16x92xbf16>,
      %c3_i32_402 = arith.constant 3 : i32
      %438 = arith.addi %arg15, %c3_i32_402 : i32
      %439 = arith.index_cast %438 : i32 to index
      %c0_403 = arith.constant 0 : index
      %c2_404 = arith.constant 2 : index
      %440 = vector.load %arg12[%439, %c0_403, %c2_404] : memref<12x16x144xbf16, #tpu.memory_space<vmem>>, vector<1x16x92xbf16>
      %441 = vector.shape_cast %440 : vector<1x16x92xbf16> to vector<16x92xbf16>
      %c32_405 = arith.constant 32 : index
      %c0_406 = arith.constant 0 : index
      %442 = vector.load %arg13[%c32_405, %c0_406] : memref<400x92xbf16, #tpu.memory_space<vmem>>, vector<16x92xbf16>
      tpu.vector_store %arg13[%c32_405, %c0_406], %441 {strides = array<i32>} : memref<400x92xbf16, #tpu.memory_space<vmem>>, vector<16x92xbf16>,
      %c3_i32_407 = arith.constant 3 : i32
      %443 = arith.addi %arg15, %c3_i32_407 : i32
      %444 = arith.index_cast %443 : i32 to index
      %c0_408 = arith.constant 0 : index
      %c3_409 = arith.constant 3 : index
      %445 = vector.load %arg12[%444, %c0_408, %c3_409] : memref<12x16x144xbf16, #tpu.memory_space<vmem>>, vector<1x16x92xbf16>
      %446 = vector.shape_cast %445 : vector<1x16x92xbf16> to vector<16x92xbf16>
      %c48_410 = arith.constant 48 : index
      %c0_411 = arith.constant 0 : index
      %447 = vector.load %arg13[%c48_410, %c0_411] : memref<400x92xbf16, #tpu.memory_space<vmem>>, vector<16x92xbf16>
      tpu.vector_store %arg13[%c48_410, %c0_411], %446 {strides = array<i32>} : memref<400x92xbf16, #tpu.memory_space<vmem>>, vector<16x92xbf16>,
      %c3_i32_412 = arith.constant 3 : i32
      %448 = arith.addi %arg15, %c3_i32_412 : i32
      %449 = arith.index_cast %448 : i32 to index
      %c0_413 = arith.constant 0 : index
      %c4_414 = arith.constant 4 : index
      %450 = vector.load %arg12[%449, %c0_413, %c4_414] : memref<12x16x144xbf16, #tpu.memory_space<vmem>>, vector<1x16x92xbf16>
      %451 = vector.shape_cast %450 : vector<1x16x92xbf16> to vector<16x92xbf16>
      %c64_415 = arith.constant 64 : index
      %c0_416 = arith.constant 0 : index
      %452 = vector.load %arg13[%c64_415, %c0_416] : memref<400x92xbf16, #tpu.memory_space<vmem>>, vector<16x92xbf16>
      tpu.vector_store %arg13[%c64_415, %c0_416], %451 {strides = array<i32>} : memref<400x92xbf16, #tpu.memory_space<vmem>>, vector<16x92xbf16>,
      %c3_i32_417 = arith.constant 3 : i32
      %453 = arith.addi %arg15, %c3_i32_417 : i32
      %454 = arith.index_cast %453 : i32 to index
      %c0_418 = arith.constant 0 : index
      %c12_419 = arith.constant 12 : index
      %455 = vector.load %arg12[%454, %c0_418, %c12_419] : memref<12x16x144xbf16, #tpu.memory_space<vmem>>, vector<1x16x92xbf16>
      %456 = vector.shape_cast %455 : vector<1x16x92xbf16> to vector<16x92xbf16>
      %c80_420 = arith.constant 80 : index
      %c0_421 = arith.constant 0 : index
      %457 = vector.load %arg13[%c80_420, %c0_421] : memref<400x92xbf16, #tpu.memory_space<vmem>>, vector<16x92xbf16>
      tpu.vector_store %arg13[%c80_420, %c0_421], %456 {strides = array<i32>} : memref<400x92xbf16, #tpu.memory_space<vmem>>, vector<16x92xbf16>,
      %c3_i32_422 = arith.constant 3 : i32
      %458 = arith.addi %arg15, %c3_i32_422 : i32
      %459 = arith.index_cast %458 : i32 to index
      %c0_423 = arith.constant 0 : index
      %c13_424 = arith.constant 13 : index
      %460 = vector.load %arg12[%459, %c0_423, %c13_424] : memref<12x16x144xbf16, #tpu.memory_space<vmem>>, vector<1x16x92xbf16>
      %461 = vector.shape_cast %460 : vector<1x16x92xbf16> to vector<16x92xbf16>
      %c96_425 = arith.constant 96 : index
      %c0_426 = arith.constant 0 : index
      %462 = vector.load %arg13[%c96_425, %c0_426] : memref<400x92xbf16, #tpu.memory_space<vmem>>, vector<16x92xbf16>
      tpu.vector_store %arg13[%c96_425, %c0_426], %461 {strides = array<i32>} : memref<400x92xbf16, #tpu.memory_space<vmem>>, vector<16x92xbf16>,
      %c3_i32_427 = arith.constant 3 : i32
      %463 = arith.addi %arg15, %c3_i32_427 : i32
      %464 = arith.index_cast %463 : i32 to index
      %c0_428 = arith.constant 0 : index
      %c14_429 = arith.constant 14 : index
      %465 = vector.load %arg12[%464, %c0_428, %c14_429] : memref<12x16x144xbf16, #tpu.memory_space<vmem>>, vector<1x16x92xbf16>
      %466 = vector.shape_cast %465 : vector<1x16x92xbf16> to vector<16x92xbf16>
      %c112_430 = arith.constant 112 : index
      %c0_431 = arith.constant 0 : index
      %467 = vector.load %arg13[%c112_430, %c0_431] : memref<400x92xbf16, #tpu.memory_space<vmem>>, vector<16x92xbf16>
      tpu.vector_store %arg13[%c112_430, %c0_431], %466 {strides = array<i32>} : memref<400x92xbf16, #tpu.memory_space<vmem>>, vector<16x92xbf16>,
      %c3_i32_432 = arith.constant 3 : i32
      %468 = arith.addi %arg15, %c3_i32_432 : i32
      %469 = arith.index_cast %468 : i32 to index
      %c0_433 = arith.constant 0 : index
      %c15_434 = arith.constant 15 : index
      %470 = vector.load %arg12[%469, %c0_433, %c15_434] : memref<12x16x144xbf16, #tpu.memory_space<vmem>>, vector<1x16x92xbf16>
      %471 = vector.shape_cast %470 : vector<1x16x92xbf16> to vector<16x92xbf16>
      %c128_435 = arith.constant 128 : index
      %c0_436 = arith.constant 0 : index
      %472 = vector.load %arg13[%c128_435, %c0_436] : memref<400x92xbf16, #tpu.memory_space<vmem>>, vector<16x92xbf16>
      tpu.vector_store %arg13[%c128_435, %c0_436], %471 {strides = array<i32>} : memref<400x92xbf16, #tpu.memory_space<vmem>>, vector<16x92xbf16>,
      %c3_i32_437 = arith.constant 3 : i32
      %473 = arith.addi %arg15, %c3_i32_437 : i32
      %474 = arith.index_cast %473 : i32 to index
      %c0_438 = arith.constant 0 : index
      %c16_439 = arith.constant 16 : index
      %475 = vector.load %arg12[%474, %c0_438, %c16_439] : memref<12x16x144xbf16, #tpu.memory_space<vmem>>, vector<1x16x92xbf16>
      %476 = vector.shape_cast %475 : vector<1x16x92xbf16> to vector<16x92xbf16>
      %c144_440 = arith.constant 144 : index
      %c0_441 = arith.constant 0 : index
      %477 = vector.load %arg13[%c144_440, %c0_441] : memref<400x92xbf16, #tpu.memory_space<vmem>>, vector<16x92xbf16>
      tpu.vector_store %arg13[%c144_440, %c0_441], %476 {strides = array<i32>} : memref<400x92xbf16, #tpu.memory_space<vmem>>, vector<16x92xbf16>,
      %c3_i32_442 = arith.constant 3 : i32
      %478 = arith.addi %arg15, %c3_i32_442 : i32
      %479 = arith.index_cast %478 : i32 to index
      %c0_443 = arith.constant 0 : index
      %c24_444 = arith.constant 24 : index
      %480 = vector.load %arg12[%479, %c0_443, %c24_444] : memref<12x16x144xbf16, #tpu.memory_space<vmem>>, vector<1x16x92xbf16>
      %481 = vector.shape_cast %480 : vector<1x16x92xbf16> to vector<16x92xbf16>
      %c160_445 = arith.constant 160 : index
      %c0_446 = arith.constant 0 : index
      %482 = vector.load %arg13[%c160_445, %c0_446] : memref<400x92xbf16, #tpu.memory_space<vmem>>, vector<16x92xbf16>
      tpu.vector_store %arg13[%c160_445, %c0_446], %481 {strides = array<i32>} : memref<400x92xbf16, #tpu.memory_space<vmem>>, vector<16x92xbf16>,
      %c3_i32_447 = arith.constant 3 : i32
      %483 = arith.addi %arg15, %c3_i32_447 : i32
      %484 = arith.index_cast %483 : i32 to index
      %c0_448 = arith.constant 0 : index
      %c25_449 = arith.constant 25 : index
      %485 = vector.load %arg12[%484, %c0_448, %c25_449] : memref<12x16x144xbf16, #tpu.memory_space<vmem>>, vector<1x16x92xbf16>
      %486 = vector.shape_cast %485 : vector<1x16x92xbf16> to vector<16x92xbf16>
      %c176_450 = arith.constant 176 : index
      %c0_451 = arith.constant 0 : index
      %487 = vector.load %arg13[%c176_450, %c0_451] : memref<400x92xbf16, #tpu.memory_space<vmem>>, vector<16x92xbf16>
      tpu.vector_store %arg13[%c176_450, %c0_451], %486 {strides = array<i32>} : memref<400x92xbf16, #tpu.memory_space<vmem>>, vector<16x92xbf16>,
      %c3_i32_452 = arith.constant 3 : i32
      %488 = arith.addi %arg15, %c3_i32_452 : i32
      %489 = arith.index_cast %488 : i32 to index
      %c0_453 = arith.constant 0 : index
      %c26_454 = arith.constant 26 : index
      %490 = vector.load %arg12[%489, %c0_453, %c26_454] : memref<12x16x144xbf16, #tpu.memory_space<vmem>>, vector<1x16x92xbf16>
      %491 = vector.shape_cast %490 : vector<1x16x92xbf16> to vector<16x92xbf16>
      %c192_455 = arith.constant 192 : index
      %c0_456 = arith.constant 0 : index
      %492 = vector.load %arg13[%c192_455, %c0_456] : memref<400x92xbf16, #tpu.memory_space<vmem>>, vector<16x92xbf16>
      tpu.vector_store %arg13[%c192_455, %c0_456], %491 {strides = array<i32>} : memref<400x92xbf16, #tpu.memory_space<vmem>>, vector<16x92xbf16>,
      %c3_i32_457 = arith.constant 3 : i32
      %493 = arith.addi %arg15, %c3_i32_457 : i32
      %494 = arith.index_cast %493 : i32 to index
      %c0_458 = arith.constant 0 : index
      %c27_459 = arith.constant 27 : index
      %495 = vector.load %arg12[%494, %c0_458, %c27_459] : memref<12x16x144xbf16, #tpu.memory_space<vmem>>, vector<1x16x92xbf16>
      %496 = vector.shape_cast %495 : vector<1x16x92xbf16> to vector<16x92xbf16>
      %c208_460 = arith.constant 208 : index
      %c0_461 = arith.constant 0 : index
      %497 = vector.load %arg13[%c208_460, %c0_461] : memref<400x92xbf16, #tpu.memory_space<vmem>>, vector<16x92xbf16>
      tpu.vector_store %arg13[%c208_460, %c0_461], %496 {strides = array<i32>} : memref<400x92xbf16, #tpu.memory_space<vmem>>, vector<16x92xbf16>,
      %c3_i32_462 = arith.constant 3 : i32
      %498 = arith.addi %arg15, %c3_i32_462 : i32
      %499 = arith.index_cast %498 : i32 to index
      %c0_463 = arith.constant 0 : index
      %c28_464 = arith.constant 28 : index
      %500 = vector.load %arg12[%499, %c0_463, %c28_464] : memref<12x16x144xbf16, #tpu.memory_space<vmem>>, vector<1x16x92xbf16>
      %501 = vector.shape_cast %500 : vector<1x16x92xbf16> to vector<16x92xbf16>
      %c224_465 = arith.constant 224 : index
      %c0_466 = arith.constant 0 : index
      %502 = vector.load %arg13[%c224_465, %c0_466] : memref<400x92xbf16, #tpu.memory_space<vmem>>, vector<16x92xbf16>
      tpu.vector_store %arg13[%c224_465, %c0_466], %501 {strides = array<i32>} : memref<400x92xbf16, #tpu.memory_space<vmem>>, vector<16x92xbf16>,
      %c3_i32_467 = arith.constant 3 : i32
      %503 = arith.addi %arg15, %c3_i32_467 : i32
      %504 = arith.index_cast %503 : i32 to index
      %c0_468 = arith.constant 0 : index
      %c36_469 = arith.constant 36 : index
      %505 = vector.load %arg12[%504, %c0_468, %c36_469] : memref<12x16x144xbf16, #tpu.memory_space<vmem>>, vector<1x16x92xbf16>
      %506 = vector.shape_cast %505 : vector<1x16x92xbf16> to vector<16x92xbf16>
      %c240_470 = arith.constant 240 : index
      %c0_471 = arith.constant 0 : index
      %507 = vector.load %arg13[%c240_470, %c0_471] : memref<400x92xbf16, #tpu.memory_space<vmem>>, vector<16x92xbf16>
      tpu.vector_store %arg13[%c240_470, %c0_471], %506 {strides = array<i32>} : memref<400x92xbf16, #tpu.memory_space<vmem>>, vector<16x92xbf16>,
      %c3_i32_472 = arith.constant 3 : i32
      %508 = arith.addi %arg15, %c3_i32_472 : i32
      %509 = arith.index_cast %508 : i32 to index
      %c0_473 = arith.constant 0 : index
      %c37_474 = arith.constant 37 : index
      %510 = vector.load %arg12[%509, %c0_473, %c37_474] : memref<12x16x144xbf16, #tpu.memory_space<vmem>>, vector<1x16x92xbf16>
      %511 = vector.shape_cast %510 : vector<1x16x92xbf16> to vector<16x92xbf16>
      %c256_475 = arith.constant 256 : index
      %c0_476 = arith.constant 0 : index
      %512 = vector.load %arg13[%c256_475, %c0_476] : memref<400x92xbf16, #tpu.memory_space<vmem>>, vector<16x92xbf16>
      tpu.vector_store %arg13[%c256_475, %c0_476], %511 {strides = array<i32>} : memref<400x92xbf16, #tpu.memory_space<vmem>>, vector<16x92xbf16>,
      %c3_i32_477 = arith.constant 3 : i32
      %513 = arith.addi %arg15, %c3_i32_477 : i32
      %514 = arith.index_cast %513 : i32 to index
      %c0_478 = arith.constant 0 : index
      %c38_479 = arith.constant 38 : index
      %515 = vector.load %arg12[%514, %c0_478, %c38_479] : memref<12x16x144xbf16, #tpu.memory_space<vmem>>, vector<1x16x92xbf16>
      %516 = vector.shape_cast %515 : vector<1x16x92xbf16> to vector<16x92xbf16>
      %c272_480 = arith.constant 272 : index
      %c0_481 = arith.constant 0 : index
      %517 = vector.load %arg13[%c272_480, %c0_481] : memref<400x92xbf16, #tpu.memory_space<vmem>>, vector<16x92xbf16>
      tpu.vector_store %arg13[%c272_480, %c0_481], %516 {strides = array<i32>} : memref<400x92xbf16, #tpu.memory_space<vmem>>, vector<16x92xbf16>,
      %c3_i32_482 = arith.constant 3 : i32
      %518 = arith.addi %arg15, %c3_i32_482 : i32
      %519 = arith.index_cast %518 : i32 to index
      %c0_483 = arith.constant 0 : index
      %c39_484 = arith.constant 39 : index
      %520 = vector.load %arg12[%519, %c0_483, %c39_484] : memref<12x16x144xbf16, #tpu.memory_space<vmem>>, vector<1x16x92xbf16>
      %521 = vector.shape_cast %520 : vector<1x16x92xbf16> to vector<16x92xbf16>
      %c288_485 = arith.constant 288 : index
      %c0_486 = arith.constant 0 : index
      %522 = vector.load %arg13[%c288_485, %c0_486] : memref<400x92xbf16, #tpu.memory_space<vmem>>, vector<16x92xbf16>
      tpu.vector_store %arg13[%c288_485, %c0_486], %521 {strides = array<i32>} : memref<400x92xbf16, #tpu.memory_space<vmem>>, vector<16x92xbf16>,
      %c3_i32_487 = arith.constant 3 : i32
      %523 = arith.addi %arg15, %c3_i32_487 : i32
      %524 = arith.index_cast %523 : i32 to index
      %c0_488 = arith.constant 0 : index
      %c40_489 = arith.constant 40 : index
      %525 = vector.load %arg12[%524, %c0_488, %c40_489] : memref<12x16x144xbf16, #tpu.memory_space<vmem>>, vector<1x16x92xbf16>
      %526 = vector.shape_cast %525 : vector<1x16x92xbf16> to vector<16x92xbf16>
      %c304_490 = arith.constant 304 : index
      %c0_491 = arith.constant 0 : index
      %527 = vector.load %arg13[%c304_490, %c0_491] : memref<400x92xbf16, #tpu.memory_space<vmem>>, vector<16x92xbf16>
      tpu.vector_store %arg13[%c304_490, %c0_491], %526 {strides = array<i32>} : memref<400x92xbf16, #tpu.memory_space<vmem>>, vector<16x92xbf16>,
      %c3_i32_492 = arith.constant 3 : i32
      %528 = arith.addi %arg15, %c3_i32_492 : i32
      %529 = arith.index_cast %528 : i32 to index
      %c0_493 = arith.constant 0 : index
      %c48_494 = arith.constant 48 : index
      %530 = vector.load %arg12[%529, %c0_493, %c48_494] : memref<12x16x144xbf16, #tpu.memory_space<vmem>>, vector<1x16x92xbf16>
      %531 = vector.shape_cast %530 : vector<1x16x92xbf16> to vector<16x92xbf16>
      %c320_495 = arith.constant 320 : index
      %c0_496 = arith.constant 0 : index
      %532 = vector.load %arg13[%c320_495, %c0_496] : memref<400x92xbf16, #tpu.memory_space<vmem>>, vector<16x92xbf16>
      tpu.vector_store %arg13[%c320_495, %c0_496], %531 {strides = array<i32>} : memref<400x92xbf16, #tpu.memory_space<vmem>>, vector<16x92xbf16>,
      %c3_i32_497 = arith.constant 3 : i32
      %533 = arith.addi %arg15, %c3_i32_497 : i32
      %534 = arith.index_cast %533 : i32 to index
      %c0_498 = arith.constant 0 : index
      %c49_499 = arith.constant 49 : index
      %535 = vector.load %arg12[%534, %c0_498, %c49_499] : memref<12x16x144xbf16, #tpu.memory_space<vmem>>, vector<1x16x92xbf16>
      %536 = vector.shape_cast %535 : vector<1x16x92xbf16> to vector<16x92xbf16>
      %c336_500 = arith.constant 336 : index
      %c0_501 = arith.constant 0 : index
      %537 = vector.load %arg13[%c336_500, %c0_501] : memref<400x92xbf16, #tpu.memory_space<vmem>>, vector<16x92xbf16>
      tpu.vector_store %arg13[%c336_500, %c0_501], %536 {strides = array<i32>} : memref<400x92xbf16, #tpu.memory_space<vmem>>, vector<16x92xbf16>,
      %c3_i32_502 = arith.constant 3 : i32
      %538 = arith.addi %arg15, %c3_i32_502 : i32
      %539 = arith.index_cast %538 : i32 to index
      %c0_503 = arith.constant 0 : index
      %c50_504 = arith.constant 50 : index
      %540 = vector.load %arg12[%539, %c0_503, %c50_504] : memref<12x16x144xbf16, #tpu.memory_space<vmem>>, vector<1x16x92xbf16>
      %541 = vector.shape_cast %540 : vector<1x16x92xbf16> to vector<16x92xbf16>
      %c352_505 = arith.constant 352 : index
      %c0_506 = arith.constant 0 : index
      %542 = vector.load %arg13[%c352_505, %c0_506] : memref<400x92xbf16, #tpu.memory_space<vmem>>, vector<16x92xbf16>
      tpu.vector_store %arg13[%c352_505, %c0_506], %541 {strides = array<i32>} : memref<400x92xbf16, #tpu.memory_space<vmem>>, vector<16x92xbf16>,
      %c3_i32_507 = arith.constant 3 : i32
      %543 = arith.addi %arg15, %c3_i32_507 : i32
      %544 = arith.index_cast %543 : i32 to index
      %c0_508 = arith.constant 0 : index
      %c51_509 = arith.constant 51 : index
      %545 = vector.load %arg12[%544, %c0_508, %c51_509] : memref<12x16x144xbf16, #tpu.memory_space<vmem>>, vector<1x16x92xbf16>
      %546 = vector.shape_cast %545 : vector<1x16x92xbf16> to vector<16x92xbf16>
      %c368_510 = arith.constant 368 : index
      %c0_511 = arith.constant 0 : index
      %547 = vector.load %arg13[%c368_510, %c0_511] : memref<400x92xbf16, #tpu.memory_space<vmem>>, vector<16x92xbf16>
      tpu.vector_store %arg13[%c368_510, %c0_511], %546 {strides = array<i32>} : memref<400x92xbf16, #tpu.memory_space<vmem>>, vector<16x92xbf16>,
      %c3_i32_512 = arith.constant 3 : i32
      %548 = arith.addi %arg15, %c3_i32_512 : i32
      %549 = arith.index_cast %548 : i32 to index
      %c0_513 = arith.constant 0 : index
      %c52_514 = arith.constant 52 : index
      %550 = vector.load %arg12[%549, %c0_513, %c52_514] : memref<12x16x144xbf16, #tpu.memory_space<vmem>>, vector<1x16x92xbf16>
      %551 = vector.shape_cast %550 : vector<1x16x92xbf16> to vector<16x92xbf16>
      %c384_515 = arith.constant 384 : index
      %c0_516 = arith.constant 0 : index
      %552 = vector.load %arg13[%c384_515, %c0_516] : memref<400x92xbf16, #tpu.memory_space<vmem>>, vector<16x92xbf16>
      tpu.vector_store %arg13[%c384_515, %c0_516], %551 {strides = array<i32>} : memref<400x92xbf16, #tpu.memory_space<vmem>>, vector<16x92xbf16>,
      %c0_517 = arith.constant 0 : index
      %c0_518 = arith.constant 0 : index
      %553 = vector.load %arg14[%c0_517, %c0_518] : memref<16x92xf32, #tpu.memory_space<vmem>>, vector<16x92xf32>
      %c3_519 = arith.constant 3 : index
      %c0_520 = arith.constant 0 : index
      %c0_521 = arith.constant 0 : index
      %554 = vector.load %arg5[%c3_519, %c0_520, %c0_521] : memref<5x16x400xbf16, #tpu.memory_space<vmem>>, vector<1x16x400xbf16>
      %555 = vector.shape_cast %554 : vector<1x16x400xbf16> to vector<16x400xbf16>
      %c0_522 = arith.constant 0 : index
      %c0_523 = arith.constant 0 : index
      %556 = vector.load %arg13[%c0_522, %c0_523] : memref<400x92xbf16, #tpu.memory_space<vmem>>, vector<400x92xbf16>
      %cst_524 = arith.constant dense<0.000000e+00> : vector<16x92xf32>
      %557 = tpu.matmul %555, %556, %cst_524 {dimension_numbers = #tpu.dot_dimension_numbers<[1], [0], [0], [1], [0, 0, 1, 1], [], []>} : vector<16x400xbf16>, vector<400x92xbf16>, vector<16x92xf32> -> vector<16x92xf32>
      %558 = arith.addf %553, %557 : vector<16x92xf32>
      %c0_525 = arith.constant 0 : index
      %c0_526 = arith.constant 0 : index
      %559 = vector.load %arg14[%c0_525, %c0_526] : memref<16x92xf32, #tpu.memory_space<vmem>>, vector<16x92xf32>
      tpu.vector_store %arg14[%c0_525, %c0_526], %558 {strides = array<i32>} : memref<16x92xf32, #tpu.memory_space<vmem>>, vector<16x92xf32>,
      %c4_i32 = arith.constant 4 : i32
      %560 = arith.addi %arg15, %c4_i32 : i32
      %561 = arith.index_cast %560 : i32 to index
      %c0_527 = arith.constant 0 : index
      %c0_528 = arith.constant 0 : index
      %562 = vector.load %arg12[%561, %c0_527, %c0_528] : memref<12x16x144xbf16, #tpu.memory_space<vmem>>, vector<1x16x92xbf16>
      %563 = vector.shape_cast %562 : vector<1x16x92xbf16> to vector<16x92xbf16>
      %c0_529 = arith.constant 0 : index
      %c0_530 = arith.constant 0 : index
      %564 = vector.load %arg13[%c0_529, %c0_530] : memref<400x92xbf16, #tpu.memory_space<vmem>>, vector<16x92xbf16>
      tpu.vector_store %arg13[%c0_529, %c0_530], %563 {strides = array<i32>} : memref<400x92xbf16, #tpu.memory_space<vmem>>, vector<16x92xbf16>,
      %c4_i32_531 = arith.constant 4 : i32
      %565 = arith.addi %arg15, %c4_i32_531 : i32
      %566 = arith.index_cast %565 : i32 to index
      %c0_532 = arith.constant 0 : index
      %c1_533 = arith.constant 1 : index
      %567 = vector.load %arg12[%566, %c0_532, %c1_533] : memref<12x16x144xbf16, #tpu.memory_space<vmem>>, vector<1x16x92xbf16>
      %568 = vector.shape_cast %567 : vector<1x16x92xbf16> to vector<16x92xbf16>
      %c16_534 = arith.constant 16 : index
      %c0_535 = arith.constant 0 : index
      %569 = vector.load %arg13[%c16_534, %c0_535] : memref<400x92xbf16, #tpu.memory_space<vmem>>, vector<16x92xbf16>
      tpu.vector_store %arg13[%c16_534, %c0_535], %568 {strides = array<i32>} : memref<400x92xbf16, #tpu.memory_space<vmem>>, vector<16x92xbf16>,
      %c4_i32_536 = arith.constant 4 : i32
      %570 = arith.addi %arg15, %c4_i32_536 : i32
      %571 = arith.index_cast %570 : i32 to index
      %c0_537 = arith.constant 0 : index
      %c2_538 = arith.constant 2 : index
      %572 = vector.load %arg12[%571, %c0_537, %c2_538] : memref<12x16x144xbf16, #tpu.memory_space<vmem>>, vector<1x16x92xbf16>
      %573 = vector.shape_cast %572 : vector<1x16x92xbf16> to vector<16x92xbf16>
      %c32_539 = arith.constant 32 : index
      %c0_540 = arith.constant 0 : index
      %574 = vector.load %arg13[%c32_539, %c0_540] : memref<400x92xbf16, #tpu.memory_space<vmem>>, vector<16x92xbf16>
      tpu.vector_store %arg13[%c32_539, %c0_540], %573 {strides = array<i32>} : memref<400x92xbf16, #tpu.memory_space<vmem>>, vector<16x92xbf16>,
      %c4_i32_541 = arith.constant 4 : i32
      %575 = arith.addi %arg15, %c4_i32_541 : i32
      %576 = arith.index_cast %575 : i32 to index
      %c0_542 = arith.constant 0 : index
      %c3_543 = arith.constant 3 : index
      %577 = vector.load %arg12[%576, %c0_542, %c3_543] : memref<12x16x144xbf16, #tpu.memory_space<vmem>>, vector<1x16x92xbf16>
      %578 = vector.shape_cast %577 : vector<1x16x92xbf16> to vector<16x92xbf16>
      %c48_544 = arith.constant 48 : index
      %c0_545 = arith.constant 0 : index
      %579 = vector.load %arg13[%c48_544, %c0_545] : memref<400x92xbf16, #tpu.memory_space<vmem>>, vector<16x92xbf16>
      tpu.vector_store %arg13[%c48_544, %c0_545], %578 {strides = array<i32>} : memref<400x92xbf16, #tpu.memory_space<vmem>>, vector<16x92xbf16>,
      %c4_i32_546 = arith.constant 4 : i32
      %580 = arith.addi %arg15, %c4_i32_546 : i32
      %581 = arith.index_cast %580 : i32 to index
      %c0_547 = arith.constant 0 : index
      %c4_548 = arith.constant 4 : index
      %582 = vector.load %arg12[%581, %c0_547, %c4_548] : memref<12x16x144xbf16, #tpu.memory_space<vmem>>, vector<1x16x92xbf16>
      %583 = vector.shape_cast %582 : vector<1x16x92xbf16> to vector<16x92xbf16>
      %c64_549 = arith.constant 64 : index
      %c0_550 = arith.constant 0 : index
      %584 = vector.load %arg13[%c64_549, %c0_550] : memref<400x92xbf16, #tpu.memory_space<vmem>>, vector<16x92xbf16>
      tpu.vector_store %arg13[%c64_549, %c0_550], %583 {strides = array<i32>} : memref<400x92xbf16, #tpu.memory_space<vmem>>, vector<16x92xbf16>,
      %c4_i32_551 = arith.constant 4 : i32
      %585 = arith.addi %arg15, %c4_i32_551 : i32
      %586 = arith.index_cast %585 : i32 to index
      %c0_552 = arith.constant 0 : index
      %c12_553 = arith.constant 12 : index
      %587 = vector.load %arg12[%586, %c0_552, %c12_553] : memref<12x16x144xbf16, #tpu.memory_space<vmem>>, vector<1x16x92xbf16>
      %588 = vector.shape_cast %587 : vector<1x16x92xbf16> to vector<16x92xbf16>
      %c80_554 = arith.constant 80 : index
      %c0_555 = arith.constant 0 : index
      %589 = vector.load %arg13[%c80_554, %c0_555] : memref<400x92xbf16, #tpu.memory_space<vmem>>, vector<16x92xbf16>
      tpu.vector_store %arg13[%c80_554, %c0_555], %588 {strides = array<i32>} : memref<400x92xbf16, #tpu.memory_space<vmem>>, vector<16x92xbf16>,
      %c4_i32_556 = arith.constant 4 : i32
      %590 = arith.addi %arg15, %c4_i32_556 : i32
      %591 = arith.index_cast %590 : i32 to index
      %c0_557 = arith.constant 0 : index
      %c13_558 = arith.constant 13 : index
      %592 = vector.load %arg12[%591, %c0_557, %c13_558] : memref<12x16x144xbf16, #tpu.memory_space<vmem>>, vector<1x16x92xbf16>
      %593 = vector.shape_cast %592 : vector<1x16x92xbf16> to vector<16x92xbf16>
      %c96_559 = arith.constant 96 : index
      %c0_560 = arith.constant 0 : index
      %594 = vector.load %arg13[%c96_559, %c0_560] : memref<400x92xbf16, #tpu.memory_space<vmem>>, vector<16x92xbf16>
      tpu.vector_store %arg13[%c96_559, %c0_560], %593 {strides = array<i32>} : memref<400x92xbf16, #tpu.memory_space<vmem>>, vector<16x92xbf16>,
      %c4_i32_561 = arith.constant 4 : i32
      %595 = arith.addi %arg15, %c4_i32_561 : i32
      %596 = arith.index_cast %595 : i32 to index
      %c0_562 = arith.constant 0 : index
      %c14_563 = arith.constant 14 : index
      %597 = vector.load %arg12[%596, %c0_562, %c14_563] : memref<12x16x144xbf16, #tpu.memory_space<vmem>>, vector<1x16x92xbf16>
      %598 = vector.shape_cast %597 : vector<1x16x92xbf16> to vector<16x92xbf16>
      %c112_564 = arith.constant 112 : index
      %c0_565 = arith.constant 0 : index
      %599 = vector.load %arg13[%c112_564, %c0_565] : memref<400x92xbf16, #tpu.memory_space<vmem>>, vector<16x92xbf16>
      tpu.vector_store %arg13[%c112_564, %c0_565], %598 {strides = array<i32>} : memref<400x92xbf16, #tpu.memory_space<vmem>>, vector<16x92xbf16>,
      %c4_i32_566 = arith.constant 4 : i32
      %600 = arith.addi %arg15, %c4_i32_566 : i32
      %601 = arith.index_cast %600 : i32 to index
      %c0_567 = arith.constant 0 : index
      %c15_568 = arith.constant 15 : index
      %602 = vector.load %arg12[%601, %c0_567, %c15_568] : memref<12x16x144xbf16, #tpu.memory_space<vmem>>, vector<1x16x92xbf16>
      %603 = vector.shape_cast %602 : vector<1x16x92xbf16> to vector<16x92xbf16>
      %c128_569 = arith.constant 128 : index
      %c0_570 = arith.constant 0 : index
      %604 = vector.load %arg13[%c128_569, %c0_570] : memref<400x92xbf16, #tpu.memory_space<vmem>>, vector<16x92xbf16>
      tpu.vector_store %arg13[%c128_569, %c0_570], %603 {strides = array<i32>} : memref<400x92xbf16, #tpu.memory_space<vmem>>, vector<16x92xbf16>,
      %c4_i32_571 = arith.constant 4 : i32
      %605 = arith.addi %arg15, %c4_i32_571 : i32
      %606 = arith.index_cast %605 : i32 to index
      %c0_572 = arith.constant 0 : index
      %c16_573 = arith.constant 16 : index
      %607 = vector.load %arg12[%606, %c0_572, %c16_573] : memref<12x16x144xbf16, #tpu.memory_space<vmem>>, vector<1x16x92xbf16>
      %608 = vector.shape_cast %607 : vector<1x16x92xbf16> to vector<16x92xbf16>
      %c144_574 = arith.constant 144 : index
      %c0_575 = arith.constant 0 : index
      %609 = vector.load %arg13[%c144_574, %c0_575] : memref<400x92xbf16, #tpu.memory_space<vmem>>, vector<16x92xbf16>
      tpu.vector_store %arg13[%c144_574, %c0_575], %608 {strides = array<i32>} : memref<400x92xbf16, #tpu.memory_space<vmem>>, vector<16x92xbf16>,
      %c4_i32_576 = arith.constant 4 : i32
      %610 = arith.addi %arg15, %c4_i32_576 : i32
      %611 = arith.index_cast %610 : i32 to index
      %c0_577 = arith.constant 0 : index
      %c24_578 = arith.constant 24 : index
      %612 = vector.load %arg12[%611, %c0_577, %c24_578] : memref<12x16x144xbf16, #tpu.memory_space<vmem>>, vector<1x16x92xbf16>
      %613 = vector.shape_cast %612 : vector<1x16x92xbf16> to vector<16x92xbf16>
      %c160_579 = arith.constant 160 : index
      %c0_580 = arith.constant 0 : index
      %614 = vector.load %arg13[%c160_579, %c0_580] : memref<400x92xbf16, #tpu.memory_space<vmem>>, vector<16x92xbf16>
      tpu.vector_store %arg13[%c160_579, %c0_580], %613 {strides = array<i32>} : memref<400x92xbf16, #tpu.memory_space<vmem>>, vector<16x92xbf16>,
      %c4_i32_581 = arith.constant 4 : i32
      %615 = arith.addi %arg15, %c4_i32_581 : i32
      %616 = arith.index_cast %615 : i32 to index
      %c0_582 = arith.constant 0 : index
      %c25_583 = arith.constant 25 : index
      %617 = vector.load %arg12[%616, %c0_582, %c25_583] : memref<12x16x144xbf16, #tpu.memory_space<vmem>>, vector<1x16x92xbf16>
      %618 = vector.shape_cast %617 : vector<1x16x92xbf16> to vector<16x92xbf16>
      %c176_584 = arith.constant 176 : index
      %c0_585 = arith.constant 0 : index
      %619 = vector.load %arg13[%c176_584, %c0_585] : memref<400x92xbf16, #tpu.memory_space<vmem>>, vector<16x92xbf16>
      tpu.vector_store %arg13[%c176_584, %c0_585], %618 {strides = array<i32>} : memref<400x92xbf16, #tpu.memory_space<vmem>>, vector<16x92xbf16>,
      %c4_i32_586 = arith.constant 4 : i32
      %620 = arith.addi %arg15, %c4_i32_586 : i32
      %621 = arith.index_cast %620 : i32 to index
      %c0_587 = arith.constant 0 : index
      %c26_588 = arith.constant 26 : index
      %622 = vector.load %arg12[%621, %c0_587, %c26_588] : memref<12x16x144xbf16, #tpu.memory_space<vmem>>, vector<1x16x92xbf16>
      %623 = vector.shape_cast %622 : vector<1x16x92xbf16> to vector<16x92xbf16>
      %c192_589 = arith.constant 192 : index
      %c0_590 = arith.constant 0 : index
      %624 = vector.load %arg13[%c192_589, %c0_590] : memref<400x92xbf16, #tpu.memory_space<vmem>>, vector<16x92xbf16>
      tpu.vector_store %arg13[%c192_589, %c0_590], %623 {strides = array<i32>} : memref<400x92xbf16, #tpu.memory_space<vmem>>, vector<16x92xbf16>,
      %c4_i32_591 = arith.constant 4 : i32
      %625 = arith.addi %arg15, %c4_i32_591 : i32
      %626 = arith.index_cast %625 : i32 to index
      %c0_592 = arith.constant 0 : index
      %c27_593 = arith.constant 27 : index
      %627 = vector.load %arg12[%626, %c0_592, %c27_593] : memref<12x16x144xbf16, #tpu.memory_space<vmem>>, vector<1x16x92xbf16>
      %628 = vector.shape_cast %627 : vector<1x16x92xbf16> to vector<16x92xbf16>
      %c208_594 = arith.constant 208 : index
      %c0_595 = arith.constant 0 : index
      %629 = vector.load %arg13[%c208_594, %c0_595] : memref<400x92xbf16, #tpu.memory_space<vmem>>, vector<16x92xbf16>
      tpu.vector_store %arg13[%c208_594, %c0_595], %628 {strides = array<i32>} : memref<400x92xbf16, #tpu.memory_space<vmem>>, vector<16x92xbf16>,
      %c4_i32_596 = arith.constant 4 : i32
      %630 = arith.addi %arg15, %c4_i32_596 : i32
      %631 = arith.index_cast %630 : i32 to index
      %c0_597 = arith.constant 0 : index
      %c28_598 = arith.constant 28 : index
      %632 = vector.load %arg12[%631, %c0_597, %c28_598] : memref<12x16x144xbf16, #tpu.memory_space<vmem>>, vector<1x16x92xbf16>
      %633 = vector.shape_cast %632 : vector<1x16x92xbf16> to vector<16x92xbf16>
      %c224_599 = arith.constant 224 : index
      %c0_600 = arith.constant 0 : index
      %634 = vector.load %arg13[%c224_599, %c0_600] : memref<400x92xbf16, #tpu.memory_space<vmem>>, vector<16x92xbf16>
      tpu.vector_store %arg13[%c224_599, %c0_600], %633 {strides = array<i32>} : memref<400x92xbf16, #tpu.memory_space<vmem>>, vector<16x92xbf16>,
      %c4_i32_601 = arith.constant 4 : i32
      %635 = arith.addi %arg15, %c4_i32_601 : i32
      %636 = arith.index_cast %635 : i32 to index
      %c0_602 = arith.constant 0 : index
      %c36_603 = arith.constant 36 : index
      %637 = vector.load %arg12[%636, %c0_602, %c36_603] : memref<12x16x144xbf16, #tpu.memory_space<vmem>>, vector<1x16x92xbf16>
      %638 = vector.shape_cast %637 : vector<1x16x92xbf16> to vector<16x92xbf16>
      %c240_604 = arith.constant 240 : index
      %c0_605 = arith.constant 0 : index
      %639 = vector.load %arg13[%c240_604, %c0_605] : memref<400x92xbf16, #tpu.memory_space<vmem>>, vector<16x92xbf16>
      tpu.vector_store %arg13[%c240_604, %c0_605], %638 {strides = array<i32>} : memref<400x92xbf16, #tpu.memory_space<vmem>>, vector<16x92xbf16>,
      %c4_i32_606 = arith.constant 4 : i32
      %640 = arith.addi %arg15, %c4_i32_606 : i32
      %641 = arith.index_cast %640 : i32 to index
      %c0_607 = arith.constant 0 : index
      %c37_608 = arith.constant 37 : index
      %642 = vector.load %arg12[%641, %c0_607, %c37_608] : memref<12x16x144xbf16, #tpu.memory_space<vmem>>, vector<1x16x92xbf16>
      %643 = vector.shape_cast %642 : vector<1x16x92xbf16> to vector<16x92xbf16>
      %c256_609 = arith.constant 256 : index
      %c0_610 = arith.constant 0 : index
      %644 = vector.load %arg13[%c256_609, %c0_610] : memref<400x92xbf16, #tpu.memory_space<vmem>>, vector<16x92xbf16>
      tpu.vector_store %arg13[%c256_609, %c0_610], %643 {strides = array<i32>} : memref<400x92xbf16, #tpu.memory_space<vmem>>, vector<16x92xbf16>,
      %c4_i32_611 = arith.constant 4 : i32
      %645 = arith.addi %arg15, %c4_i32_611 : i32
      %646 = arith.index_cast %645 : i32 to index
      %c0_612 = arith.constant 0 : index
      %c38_613 = arith.constant 38 : index
      %647 = vector.load %arg12[%646, %c0_612, %c38_613] : memref<12x16x144xbf16, #tpu.memory_space<vmem>>, vector<1x16x92xbf16>
      %648 = vector.shape_cast %647 : vector<1x16x92xbf16> to vector<16x92xbf16>
      %c272_614 = arith.constant 272 : index
      %c0_615 = arith.constant 0 : index
      %649 = vector.load %arg13[%c272_614, %c0_615] : memref<400x92xbf16, #tpu.memory_space<vmem>>, vector<16x92xbf16>
      tpu.vector_store %arg13[%c272_614, %c0_615], %648 {strides = array<i32>} : memref<400x92xbf16, #tpu.memory_space<vmem>>, vector<16x92xbf16>,
      %c4_i32_616 = arith.constant 4 : i32
      %650 = arith.addi %arg15, %c4_i32_616 : i32
      %651 = arith.index_cast %650 : i32 to index
      %c0_617 = arith.constant 0 : index
      %c39_618 = arith.constant 39 : index
      %652 = vector.load %arg12[%651, %c0_617, %c39_618] : memref<12x16x144xbf16, #tpu.memory_space<vmem>>, vector<1x16x92xbf16>
      %653 = vector.shape_cast %652 : vector<1x16x92xbf16> to vector<16x92xbf16>
      %c288_619 = arith.constant 288 : index
      %c0_620 = arith.constant 0 : index
      %654 = vector.load %arg13[%c288_619, %c0_620] : memref<400x92xbf16, #tpu.memory_space<vmem>>, vector<16x92xbf16>
      tpu.vector_store %arg13[%c288_619, %c0_620], %653 {strides = array<i32>} : memref<400x92xbf16, #tpu.memory_space<vmem>>, vector<16x92xbf16>,
      %c4_i32_621 = arith.constant 4 : i32
      %655 = arith.addi %arg15, %c4_i32_621 : i32
      %656 = arith.index_cast %655 : i32 to index
      %c0_622 = arith.constant 0 : index
      %c40_623 = arith.constant 40 : index
      %657 = vector.load %arg12[%656, %c0_622, %c40_623] : memref<12x16x144xbf16, #tpu.memory_space<vmem>>, vector<1x16x92xbf16>
      %658 = vector.shape_cast %657 : vector<1x16x92xbf16> to vector<16x92xbf16>
      %c304_624 = arith.constant 304 : index
      %c0_625 = arith.constant 0 : index
      %659 = vector.load %arg13[%c304_624, %c0_625] : memref<400x92xbf16, #tpu.memory_space<vmem>>, vector<16x92xbf16>
      tpu.vector_store %arg13[%c304_624, %c0_625], %658 {strides = array<i32>} : memref<400x92xbf16, #tpu.memory_space<vmem>>, vector<16x92xbf16>,
      %c4_i32_626 = arith.constant 4 : i32
      %660 = arith.addi %arg15, %c4_i32_626 : i32
      %661 = arith.index_cast %660 : i32 to index
      %c0_627 = arith.constant 0 : index
      %c48_628 = arith.constant 48 : index
      %662 = vector.load %arg12[%661, %c0_627, %c48_628] : memref<12x16x144xbf16, #tpu.memory_space<vmem>>, vector<1x16x92xbf16>
      %663 = vector.shape_cast %662 : vector<1x16x92xbf16> to vector<16x92xbf16>
      %c320_629 = arith.constant 320 : index
      %c0_630 = arith.constant 0 : index
      %664 = vector.load %arg13[%c320_629, %c0_630] : memref<400x92xbf16, #tpu.memory_space<vmem>>, vector<16x92xbf16>
      tpu.vector_store %arg13[%c320_629, %c0_630], %663 {strides = array<i32>} : memref<400x92xbf16, #tpu.memory_space<vmem>>, vector<16x92xbf16>,
      %c4_i32_631 = arith.constant 4 : i32
      %665 = arith.addi %arg15, %c4_i32_631 : i32
      %666 = arith.index_cast %665 : i32 to index
      %c0_632 = arith.constant 0 : index
      %c49_633 = arith.constant 49 : index
      %667 = vector.load %arg12[%666, %c0_632, %c49_633] : memref<12x16x144xbf16, #tpu.memory_space<vmem>>, vector<1x16x92xbf16>
      %668 = vector.shape_cast %667 : vector<1x16x92xbf16> to vector<16x92xbf16>
      %c336_634 = arith.constant 336 : index
      %c0_635 = arith.constant 0 : index
      %669 = vector.load %arg13[%c336_634, %c0_635] : memref<400x92xbf16, #tpu.memory_space<vmem>>, vector<16x92xbf16>
      tpu.vector_store %arg13[%c336_634, %c0_635], %668 {strides = array<i32>} : memref<400x92xbf16, #tpu.memory_space<vmem>>, vector<16x92xbf16>,
      %c4_i32_636 = arith.constant 4 : i32
      %670 = arith.addi %arg15, %c4_i32_636 : i32
      %671 = arith.index_cast %670 : i32 to index
      %c0_637 = arith.constant 0 : index
      %c50_638 = arith.constant 50 : index
      %672 = vector.load %arg12[%671, %c0_637, %c50_638] : memref<12x16x144xbf16, #tpu.memory_space<vmem>>, vector<1x16x92xbf16>
      %673 = vector.shape_cast %672 : vector<1x16x92xbf16> to vector<16x92xbf16>
      %c352_639 = arith.constant 352 : index
      %c0_640 = arith.constant 0 : index
      %674 = vector.load %arg13[%c352_639, %c0_640] : memref<400x92xbf16, #tpu.memory_space<vmem>>, vector<16x92xbf16>
      tpu.vector_store %arg13[%c352_639, %c0_640], %673 {strides = array<i32>} : memref<400x92xbf16, #tpu.memory_space<vmem>>, vector<16x92xbf16>,
      %c4_i32_641 = arith.constant 4 : i32
      %675 = arith.addi %arg15, %c4_i32_641 : i32
      %676 = arith.index_cast %675 : i32 to index
      %c0_642 = arith.constant 0 : index
      %c51_643 = arith.constant 51 : index
      %677 = vector.load %arg12[%676, %c0_642, %c51_643] : memref<12x16x144xbf16, #tpu.memory_space<vmem>>, vector<1x16x92xbf16>
      %678 = vector.shape_cast %677 : vector<1x16x92xbf16> to vector<16x92xbf16>
      %c368_644 = arith.constant 368 : index
      %c0_645 = arith.constant 0 : index
      %679 = vector.load %arg13[%c368_644, %c0_645] : memref<400x92xbf16, #tpu.memory_space<vmem>>, vector<16x92xbf16>
      tpu.vector_store %arg13[%c368_644, %c0_645], %678 {strides = array<i32>} : memref<400x92xbf16, #tpu.memory_space<vmem>>, vector<16x92xbf16>,
      %c4_i32_646 = arith.constant 4 : i32
      %680 = arith.addi %arg15, %c4_i32_646 : i32
      %681 = arith.index_cast %680 : i32 to index
      %c0_647 = arith.constant 0 : index
      %c52_648 = arith.constant 52 : index
      %682 = vector.load %arg12[%681, %c0_647, %c52_648] : memref<12x16x144xbf16, #tpu.memory_space<vmem>>, vector<1x16x92xbf16>
      %683 = vector.shape_cast %682 : vector<1x16x92xbf16> to vector<16x92xbf16>
      %c384_649 = arith.constant 384 : index
      %c0_650 = arith.constant 0 : index
      %684 = vector.load %arg13[%c384_649, %c0_650] : memref<400x92xbf16, #tpu.memory_space<vmem>>, vector<16x92xbf16>
      tpu.vector_store %arg13[%c384_649, %c0_650], %683 {strides = array<i32>} : memref<400x92xbf16, #tpu.memory_space<vmem>>, vector<16x92xbf16>,
      %c0_651 = arith.constant 0 : index
      %c0_652 = arith.constant 0 : index
      %685 = vector.load %arg14[%c0_651, %c0_652] : memref<16x92xf32, #tpu.memory_space<vmem>>, vector<16x92xf32>
      %c4_653 = arith.constant 4 : index
      %c0_654 = arith.constant 0 : index
      %c0_655 = arith.constant 0 : index
      %686 = vector.load %arg5[%c4_653, %c0_654, %c0_655] : memref<5x16x400xbf16, #tpu.memory_space<vmem>>, vector<1x16x400xbf16>
      %687 = vector.shape_cast %686 : vector<1x16x400xbf16> to vector<16x400xbf16>
      %c0_656 = arith.constant 0 : index
      %c0_657 = arith.constant 0 : index
      %688 = vector.load %arg13[%c0_656, %c0_657] : memref<400x92xbf16, #tpu.memory_space<vmem>>, vector<400x92xbf16>
      %cst_658 = arith.constant dense<0.000000e+00> : vector<16x92xf32>
      %689 = tpu.matmul %687, %688, %cst_658 {dimension_numbers = #tpu.dot_dimension_numbers<[1], [0], [0], [1], [0, 0, 1, 1], [], []>} : vector<16x400xbf16>, vector<400x92xbf16>, vector<16x92xf32> -> vector<16x92xf32>
      %690 = arith.addf %685, %689 : vector<16x92xf32>
      %c0_659 = arith.constant 0 : index
      %c0_660 = arith.constant 0 : index
      %691 = vector.load %arg14[%c0_659, %c0_660] : memref<16x92xf32, #tpu.memory_space<vmem>>, vector<16x92xf32>
      tpu.vector_store %arg14[%c0_659, %c0_660], %690 {strides = array<i32>} : memref<16x92xf32, #tpu.memory_space<vmem>>, vector<16x92xf32>,
      %cst_661 = arith.constant 0.000000e+00 : f32
      %692 = vector.broadcast %cst_661 : f32 to vector<1x92xf32>
      %693 = arith.cmpf ogt, %4, %692 : vector<1x92xf32>
      %c0_662 = arith.constant 0 : index
      %c0_663 = arith.constant 0 : index
      %694 = vector.load %arg14[%c0_662, %c0_663] : memref<16x92xf32, #tpu.memory_space<vmem>>, vector<16x92xf32>
      %cst_664 = arith.constant 0.000000e+00 : f32
      %695 = vector.shape_cast %693 : vector<1x92xi1> to vector<1x92xi1>
      %696 = vector.broadcast %695 : vector<1x92xi1> to vector<16x92xi1>
      %697 = vector.broadcast %cst_664 : f32 to vector<16x92xf32>
      %698 = arith.select %696, %694, %697 : vector<16x92xi1>, vector<16x92xf32>
      %699 = arith.truncf %698 : vector<16x92xf32> to vector<16x92xbf16>
      %c0_665 = arith.constant 0 : index
      %700 = arith.index_cast %arg15 : i32 to index
      %c0_666 = arith.constant 0 : index
      %c26_667 = arith.constant 26 : index
      %701 = vector.load %arg10[%c0_665, %700, %c0_666, %c26_667] : memref<1x8x16x144xbf16, #tpu.memory_space<vmem>>, vector<1x1x16x92xbf16>
      %702 = vector.shape_cast %701 : vector<1x1x16x92xbf16> to vector<16x92xbf16>
      %703 = vector.shape_cast %699 : vector<16x92xbf16> to vector<1x1x16x92xbf16>
      tpu.vector_store %arg10[%c0_665, %700, %c0_666, %c26_667], %703 {strides = array<i32>} : memref<1x8x16x144xbf16, #tpu.memory_space<vmem>>, vector<1x1x16x92xbf16>,
      %cst_668 = arith.constant dense<0.000000e+00> : vector<16xf32>
      %704 = vector.multi_reduction <add>, %698, %cst_668 [1] : vector<16x92xf32> to vector<16xf32>
      %705 = vector.shape_cast %704 : vector<16xf32> to vector<16x1xf32>
      %706 = arith.addf %arg16, %705 : vector<16x1xf32>
      %707 = arith.mulf %698, %698 : vector<16x92xf32>
      %cst_669 = arith.constant dense<0.000000e+00> : vector<16xf32>
      %708 = vector.multi_reduction <add>, %707, %cst_669 [1] : vector<16x92xf32> to vector<16xf32>
      %709 = vector.shape_cast %708 : vector<16xf32> to vector<16x1xf32>
      %710 = arith.addf %arg17, %709 : vector<16x1xf32>
      scf.yield %706, %710 : vector<16x1xf32>, vector<16x1xf32>
    }
    %c8_i32_26 = arith.constant 8 : i32
    %26 = tpu.concatenate %25#0, %25#1 in 1 : vector<16x1xf32>, vector<16x1xf32> -> vector<16x2xf32>
    %c0_27 = arith.constant 0 : index
    %c0_28 = arith.constant 0 : index
    %c0_29 = arith.constant 0 : index
    %c0_30 = arith.constant 0 : index
    %27 = vector.load %arg11[%c0_27, %c0_28, %c0_29, %c0_30] : memref<1x1x16x2xf32, #tpu.memory_space<vmem>>, vector<1x1x16x2xf32>
    %28 = vector.shape_cast %27 : vector<1x1x16x2xf32> to vector<16x2xf32>
    %29 = vector.shape_cast %26 : vector<16x2xf32> to vector<1x1x16x2xf32>
    tpu.vector_store %arg11[%c0_27, %c0_28, %c0_29, %c0_30], %29 {strides = array<i32>} : memref<1x1x16x2xf32, #tpu.memory_space<vmem>>, vector<1x1x16x2xf32>,
    return
  }
  func.func @transform_0(%arg0: i32, %arg1: i32) -> (i32, i32, i32, i32) {
    %c0_i32 = arith.constant 0 : i32
    %c0_i32_0 = arith.constant 0 : i32
    %c0_i32_1 = arith.constant 0 : i32
    return %arg0, %arg1, %c0_i32, %c0_i32_0 : i32, i32, i32, i32
  }
  func.func @transform_1(%arg0: i32, %arg1: i32) -> (i32, i32, i32, i32) {
    %c4_i32 = arith.constant 4 : i32
    %0 = arith.muli %arg1, %c4_i32 : i32
    %c1_i32 = arith.constant 1 : i32
    %1 = arith.subi %0, %c1_i32 : i32
    %c0_i32 = arith.constant 0 : i32
    %2 = arith.maxsi %1, %c0_i32 : i32
    %c0_i32_0 = arith.constant 0 : i32
    %c0_i32_1 = arith.constant 0 : i32
    %c0_i32_2 = arith.constant 0 : i32
    return %arg0, %2, %c0_i32_0, %c0_i32_1 : i32, i32, i32, i32
  }
  func.func @transform_2(%arg0: i32, %arg1: i32) -> (i32, i32, i32, i32) {
    %c1_i32 = arith.constant 1 : i32
    %0 = arith.addi %arg1, %c1_i32 : i32
    %c4_i32 = arith.constant 4 : i32
    %1 = arith.muli %0, %c4_i32 : i32
    %c3_i32 = arith.constant 3 : i32
    %2 = arith.minsi %1, %c3_i32 : i32
    %c0_i32 = arith.constant 0 : i32
    %c0_i32_0 = arith.constant 0 : i32
    %c0_i32_1 = arith.constant 0 : i32
    return %arg0, %2, %c0_i32, %c0_i32_0 : i32, i32, i32, i32
  }
  func.func @transform_3(%arg0: i32, %arg1: i32) -> (i32, i32, i32) {
    %c0_i32 = arith.constant 0 : i32
    %c0_i32_0 = arith.constant 0 : i32
    %c0_i32_1 = arith.constant 0 : i32
    %c0_i32_2 = arith.constant 0 : i32
    return %c0_i32, %c0_i32_0, %c0_i32_1 : i32, i32, i32
  }
  func.func @transform_4(%arg0: i32, %arg1: i32) -> (i32, i32) {
    %c0_i32 = arith.constant 0 : i32
    %c0_i32_0 = arith.constant 0 : i32
    %c0_i32_1 = arith.constant 0 : i32
    return %c0_i32, %c0_i32_0 : i32, i32
  }
  func.func @transform_5(%arg0: i32, %arg1: i32) -> (i32, i32) {
    %c0_i32 = arith.constant 0 : i32
    %c0_i32_0 = arith.constant 0 : i32
    %c0_i32_1 = arith.constant 0 : i32
    return %c0_i32, %c0_i32_0 : i32, i32
  }
  func.func @transform_6(%arg0: i32, %arg1: i32) -> (i32, i32) {
    %c0_i32 = arith.constant 0 : i32
    %c0_i32_0 = arith.constant 0 : i32
    %c0_i32_1 = arith.constant 0 : i32
    return %c0_i32, %c0_i32_0 : i32, i32
  }
  func.func @transform_7(%arg0: i32, %arg1: i32) -> (i32, i32) {
    %c0_i32 = arith.constant 0 : i32
    %c0_i32_0 = arith.constant 0 : i32
    %c0_i32_1 = arith.constant 0 : i32
    return %c0_i32, %c0_i32_0 : i32, i32
  }
  func.func @transform_8(%arg0: i32, %arg1: i32) -> (i32, i32, i32, i32) {
    %c0_i32 = arith.constant 0 : i32
    %c0_i32_0 = arith.constant 0 : i32
    %c0_i32_1 = arith.constant 0 : i32
    return %arg0, %arg1, %c0_i32, %c0_i32_0 : i32, i32, i32, i32
  }
  func.func @transform_9(%arg0: i32, %arg1: i32) -> (i32, i32, i32, i32) {
    %c0_i32 = arith.constant 0 : i32
    %c0_i32_0 = arith.constant 0 : i32
    %c0_i32_1 = arith.constant 0 : i32
    return %arg0, %arg1, %c0_i32, %c0_i32_0 : i32, i32, i32, i32
  }
}

module attributes {stable_mosaic.version = 11 : i64} {
  func.func @_residual_out_kernel(%arg0: i32, %arg1: i32, %arg2: memref<1x8x16x144xbf16, #tpu.memory_space<vmem>>, %arg3: memref<1x8x16x144xbf16, #tpu.memory_space<vmem>>, %arg4: memref<16x1xf32, #tpu.memory_space<vmem>>, %arg5: memref<16x1xf32, #tpu.memory_space<vmem>>, %arg6: memref<16x1xf32, #tpu.memory_space<vmem>>, %arg7: memref<16x1xf32, #tpu.memory_space<vmem>>, %arg8: memref<16x1xf32, #tpu.memory_space<vmem>>, %arg9: memref<16x1xf32, #tpu.memory_space<vmem>>, %arg10: memref<16x1xf32, #tpu.memory_space<vmem>>, %arg11: memref<1x8x16x144xf32, #tpu.memory_space<vmem>>) attributes {dimension_semantics = [#tpu.dimension_semantics<parallel>, #tpu.dimension_semantics<parallel>], iteration_bounds = array<i64: 2, 1>, scalar_prefetch = 0 : i64, scratch_operands = 0 : i64, tpu.core_type = #tpu.core_type<tc>, window_params = [{transform_indices = @transform_0, window_bounds = array<i64: 1, 8, 16, 144>}, {transform_indices = @transform_1, window_bounds = array<i64: 1, 8, 16, 144>}, {pipeline_mode = #tpu.pipeline_mode<synchronous>, transform_indices = @transform_2, window_bounds = array<i64: 16, 1>}, {pipeline_mode = #tpu.pipeline_mode<synchronous>, transform_indices = @transform_3, window_bounds = array<i64: 16, 1>}, {pipeline_mode = #tpu.pipeline_mode<synchronous>, transform_indices = @transform_4, window_bounds = array<i64: 16, 1>}, {pipeline_mode = #tpu.pipeline_mode<synchronous>, transform_indices = @transform_5, window_bounds = array<i64: 16, 1>}, {pipeline_mode = #tpu.pipeline_mode<synchronous>, transform_indices = @transform_6, window_bounds = array<i64: 16, 1>}, {pipeline_mode = #tpu.pipeline_mode<synchronous>, transform_indices = @transform_7, window_bounds = array<i64: 16, 1>}, {pipeline_mode = #tpu.pipeline_mode<synchronous>, transform_indices = @transform_8, window_bounds = array<i64: 16, 1>}, {transform_indices = @transform_9, window_bounds = array<i64: 1, 8, 16, 144>}]} {
    %c0 = arith.constant 0 : index
    %c0_0 = arith.constant 0 : index
    %c0_1 = arith.constant 0 : index
    %c0_2 = arith.constant 0 : index
    %0 = vector.load %arg2[%c0, %c0_0, %c0_1, %c0_2] : memref<1x8x16x144xbf16, #tpu.memory_space<vmem>>, vector<1x8x16x144xbf16>
    %1 = vector.shape_cast %0 : vector<1x8x16x144xbf16> to vector<8x16x144xbf16>
    %2 = arith.extf %1 : vector<8x16x144xbf16> to vector<8x16x144xf32>
    %c0_3 = arith.constant 0 : index
    %c0_4 = arith.constant 0 : index
    %3 = vector.load %arg4[%c0_3, %c0_4] : memref<16x1xf32, #tpu.memory_space<vmem>>, vector<16x1xf32>
    %4 = vector.shape_cast %3 : vector<16x1xf32> to vector<1x16x1xf32>
    %5 = vector.broadcast %4 : vector<1x16x1xf32> to vector<8x16x144xf32>
    %6 = arith.mulf %2, %5 : vector<8x16x144xf32>
    %c0_5 = arith.constant 0 : index
    %c0_6 = arith.constant 0 : index
    %7 = vector.load %arg5[%c0_5, %c0_6] : memref<16x1xf32, #tpu.memory_space<vmem>>, vector<16x1xf32>
    %8 = vector.shape_cast %7 : vector<16x1xf32> to vector<1x16x1xf32>
    %9 = vector.broadcast %8 : vector<1x16x1xf32> to vector<8x16x144xf32>
    %10 = arith.addf %6, %9 : vector<8x16x144xf32>
    %cst = arith.constant 0.000000e+00 : f32
    %11 = vector.broadcast %cst : f32 to vector<8x16x144xf32>
    %12 = arith.cmpf ogt, %10, %11 : vector<8x16x144xf32>
    %c0_7 = arith.constant 0 : index
    %c0_8 = arith.constant 0 : index
    %13 = vector.load %arg6[%c0_7, %c0_8] : memref<16x1xf32, #tpu.memory_space<vmem>>, vector<16x1xf32>
    %14 = vector.shape_cast %13 : vector<16x1xf32> to vector<1x16x1xf32>
    %15 = vector.broadcast %14 : vector<1x16x1xf32> to vector<8x16x144xf32>
    %16 = arith.mulf %15, %10 : vector<8x16x144xf32>
    %17 = arith.select %12, %10, %16 : vector<8x16x144xi1>, vector<8x16x144xf32>
    %c0_9 = arith.constant 0 : index
    %c0_10 = arith.constant 0 : index
    %c0_11 = arith.constant 0 : index
    %c0_12 = arith.constant 0 : index
    %18 = vector.load %arg3[%c0_9, %c0_10, %c0_11, %c0_12] : memref<1x8x16x144xbf16, #tpu.memory_space<vmem>>, vector<1x8x16x144xbf16>
    %19 = vector.shape_cast %18 : vector<1x8x16x144xbf16> to vector<8x16x144xbf16>
    %20 = arith.extf %19 : vector<8x16x144xbf16> to vector<8x16x144xf32>
    %c0_13 = arith.constant 0 : index
    %c0_14 = arith.constant 0 : index
    %21 = vector.load %arg7[%c0_13, %c0_14] : memref<16x1xf32, #tpu.memory_space<vmem>>, vector<16x1xf32>
    %22 = vector.shape_cast %21 : vector<16x1xf32> to vector<1x16x1xf32>
    %23 = vector.broadcast %22 : vector<1x16x1xf32> to vector<8x16x144xf32>
    %24 = arith.mulf %20, %23 : vector<8x16x144xf32>
    %c0_15 = arith.constant 0 : index
    %c0_16 = arith.constant 0 : index
    %25 = vector.load %arg8[%c0_15, %c0_16] : memref<16x1xf32, #tpu.memory_space<vmem>>, vector<16x1xf32>
    %26 = vector.shape_cast %25 : vector<16x1xf32> to vector<1x16x1xf32>
    %27 = vector.broadcast %26 : vector<1x16x1xf32> to vector<8x16x144xf32>
    %28 = arith.addf %24, %27 : vector<8x16x144xf32>
    %cst_17 = arith.constant 0.000000e+00 : f32
    %29 = vector.broadcast %cst_17 : f32 to vector<8x16x144xf32>
    %30 = arith.cmpf ogt, %28, %29 : vector<8x16x144xf32>
    %c0_18 = arith.constant 0 : index
    %c0_19 = arith.constant 0 : index
    %31 = vector.load %arg9[%c0_18, %c0_19] : memref<16x1xf32, #tpu.memory_space<vmem>>, vector<16x1xf32>
    %32 = vector.shape_cast %31 : vector<16x1xf32> to vector<1x16x1xf32>
    %33 = vector.broadcast %32 : vector<1x16x1xf32> to vector<8x16x144xf32>
    %34 = arith.mulf %33, %28 : vector<8x16x144xf32>
    %35 = arith.select %30, %28, %34 : vector<8x16x144xi1>, vector<8x16x144xf32>
    %36 = arith.addf %17, %35 : vector<8x16x144xf32>
    %cst_20 = arith.constant 0.000000e+00 : f32
    %37 = vector.broadcast %cst_20 : f32 to vector<8x16x144xf32>
    %38 = arith.cmpf ogt, %36, %37 : vector<8x16x144xf32>
    %c0_21 = arith.constant 0 : index
    %c0_22 = arith.constant 0 : index
    %39 = vector.load %arg10[%c0_21, %c0_22] : memref<16x1xf32, #tpu.memory_space<vmem>>, vector<16x1xf32>
    %40 = vector.shape_cast %39 : vector<16x1xf32> to vector<1x16x1xf32>
    %41 = vector.broadcast %40 : vector<1x16x1xf32> to vector<8x16x144xf32>
    %42 = arith.mulf %41, %36 : vector<8x16x144xf32>
    %43 = arith.select %38, %36, %42 : vector<8x16x144xi1>, vector<8x16x144xf32>
    %c0_23 = arith.constant 0 : index
    %c0_24 = arith.constant 0 : index
    %c0_25 = arith.constant 0 : index
    %c0_26 = arith.constant 0 : index
    %44 = vector.load %arg11[%c0_23, %c0_24, %c0_25, %c0_26] : memref<1x8x16x144xf32, #tpu.memory_space<vmem>>, vector<1x8x16x144xf32>
    %45 = vector.shape_cast %44 : vector<1x8x16x144xf32> to vector<8x16x144xf32>
    %46 = vector.shape_cast %43 : vector<8x16x144xf32> to vector<1x8x16x144xf32>
    tpu.vector_store %arg11[%c0_23, %c0_24, %c0_25, %c0_26], %46 {strides = array<i32>} : memref<1x8x16x144xf32, #tpu.memory_space<vmem>>, vector<1x8x16x144xf32>,
    return
  }
  func.func @transform_0(%arg0: i32, %arg1: i32) -> (i32, i32, i32, i32) {
    %c0_i32 = arith.constant 0 : i32
    %c0_i32_0 = arith.constant 0 : i32
    %c0_i32_1 = arith.constant 0 : i32
    return %arg0, %arg1, %c0_i32, %c0_i32_0 : i32, i32, i32, i32
  }
  func.func @transform_1(%arg0: i32, %arg1: i32) -> (i32, i32, i32, i32) {
    %c0_i32 = arith.constant 0 : i32
    %c0_i32_0 = arith.constant 0 : i32
    %c0_i32_1 = arith.constant 0 : i32
    return %arg0, %arg1, %c0_i32, %c0_i32_0 : i32, i32, i32, i32
  }
  func.func @transform_2(%arg0: i32, %arg1: i32) -> (i32, i32) {
    %c0_i32 = arith.constant 0 : i32
    %c0_i32_0 = arith.constant 0 : i32
    %c0_i32_1 = arith.constant 0 : i32
    return %c0_i32, %c0_i32_0 : i32, i32
  }
  func.func @transform_3(%arg0: i32, %arg1: i32) -> (i32, i32) {
    %c0_i32 = arith.constant 0 : i32
    %c0_i32_0 = arith.constant 0 : i32
    %c0_i32_1 = arith.constant 0 : i32
    return %c0_i32, %c0_i32_0 : i32, i32
  }
  func.func @transform_4(%arg0: i32, %arg1: i32) -> (i32, i32) {
    %c0_i32 = arith.constant 0 : i32
    %c0_i32_0 = arith.constant 0 : i32
    %c0_i32_1 = arith.constant 0 : i32
    return %c0_i32, %c0_i32_0 : i32, i32
  }
  func.func @transform_5(%arg0: i32, %arg1: i32) -> (i32, i32) {
    %c0_i32 = arith.constant 0 : i32
    %c0_i32_0 = arith.constant 0 : i32
    %c0_i32_1 = arith.constant 0 : i32
    return %c0_i32, %c0_i32_0 : i32, i32
  }
  func.func @transform_6(%arg0: i32, %arg1: i32) -> (i32, i32) {
    %c0_i32 = arith.constant 0 : i32
    %c0_i32_0 = arith.constant 0 : i32
    %c0_i32_1 = arith.constant 0 : i32
    return %c0_i32, %c0_i32_0 : i32, i32
  }
  func.func @transform_7(%arg0: i32, %arg1: i32) -> (i32, i32) {
    %c0_i32 = arith.constant 0 : i32
    %c0_i32_0 = arith.constant 0 : i32
    %c0_i32_1 = arith.constant 0 : i32
    return %c0_i32, %c0_i32_0 : i32, i32
  }
  func.func @transform_8(%arg0: i32, %arg1: i32) -> (i32, i32) {
    %c0_i32 = arith.constant 0 : i32
    %c0_i32_0 = arith.constant 0 : i32
    %c0_i32_1 = arith.constant 0 : i32
    return %c0_i32, %c0_i32_0 : i32, i32
  }
  func.func @transform_9(%arg0: i32, %arg1: i32) -> (i32, i32, i32, i32) {
    %c0_i32 = arith.constant 0 : i32
    %c0_i32_0 = arith.constant 0 : i32
    %c0_i32_1 = arith.constant 0 : i32
    return %arg0, %arg1, %c0_i32, %c0_i32_0 : i32, i32, i32, i32
  }
}

</mosaic_0001>

<bundles_post_ra>
// kernel: vnet_downward_transition.4
= control target key start
LH: loop header
LB: loop body
LE: loop exit
PB: predicated region body
PF: predicated region fallthrough
CT: control target
= control target key end

     0   :  { %9 = vsyncpa [#allocation3], 0  ;;  %s1350_s0 = inlined_call_operand.hbm [shape: bf16[2,8,64,144], index: 0, kind: input, shape index: {}]   ;;  %s1351_s1 = inlined_call_operand.hbm [shape: bf16[16,64], index: 1, kind: input, shape index: {}]   ;;  %s1352_s2 = inlined_call_operand.hbm [shape: bf16[2,8,16,144], index: 2, kind: output, shape index: {0}]   ;;  %s1353_s3 = inlined_call_operand.hbm [shape: f32[2,1,16,2], index: 3, kind: output, shape index: {1}]  }
   0x1   :  { %11 = vsyncpa [#allocation3 + $0x1], 0 }
   0x2   :  { %12 = vsyncpa [#allocation6], 0 }
   0x3   :  { %13 = vsyncpa [#allocation4], 0 }
   0x4   :  { %15 = vsyncpa [#allocation4 + $0x1], 0 }
   0x5   :  { %16 = vsyncpa [#allocation9], 0 }
   0x6   :  { %18 = vsyncpa [#allocation9 + $0x1], 0  ;;  %s1028_s12 = smov 0   ;;  %s1030_s13 = smov 0  }
   0x7   :  { %s1032_s14 = smov 0   ;;  %s1034_s15 = smov 0  }
   0x8   :  { %s1036_s16 = smov 0   ;;  %s1038_s17 = smov 0  }
   0x9 LB: > { %s598_s18 = sadd.s32 4294967295, %s975_s17   ;;  %s599_s19 = sadd.s32 4294967294, %s975_s17   ;;  %s975_s17 = sphi %s1038_s17, %s24_s17   ;;  %s971_s16 = sphi %s1036_s16, %s1383_s16   ;;  %s967_s15 = sphi %s1034_s15, %s1382_s15   ;;  %s963_s14 = sphi %s1032_s14, %s1381_s14   ;;  %s959_s13 = sphi %s1030_s13, %s1380_s13   ;;  %s955_s12 = sphi %s1028_s12, %s1379_s12  }
   0xa   : > { %p58_p0 = scmp.ne.s32.totalorder %s959_s13, %s955_s12  ;;  %p1062_p1 = scmp.eq.s32.totalorder %s598_s18, 0 }
   0xb   : > { %p1066_p2 = scmp.eq.s32.totalorder %s598_s18, 1  ;;  %p111_p3 = scmp.eq.s32.totalorder %s599_s19, 1 }
   0xc   : > { %s1358_s20 = scalar_select %p1062_p1, 1, 0 }
   0xd   : > { %s1359_s21 = scalar_select %p1066_p2, 1, 0 }
   0xe   : > { %p1072_p4 = por %p1062_p1, %p58_p0  ;;  %p600_p5 = scmp.ge.s32.totalorder %s975_s17, 1 }
   0xf   : > { %p1077_p6 = por %p111_p3, %p58_p0  ;;  %p146_p7 = scmp.lt.s32.totalorder %s975_s17, 3 }
  0x10   : > { %s1360_s22 = scalar_select %p1072_p4, 1, 0 }
  0x11   : > { %s1361_s23 = scalar_select %p1077_p6, 1, 0 }
  0x12   : > { %p1082_p8 = pnand %p600_p5, %p146_p7  ;;  %s997_s25 = smov [#allocation5]  }
  0x13   : > { %s158_s26 = sshll.u32 %s997_s25, 4  ;;  %s36_s28 = sadd.s32 1, %s971_s16  ;;  %s159_s26 = int_to_ptr.vmem [resolvable:$true] %s158_s26 }
  0x14   : > { %s1362_s24 = scalar_select %p1082_p8, 1, 0 }
  0x15   : > { %p652_p9 = pneg %p1082_p8  ;;  %s779_s4 = scalar_lea.hbm %s1351_s1, 128 }
  0x16   : > { %p780_p12 = scmp.ne.s32.totalorder %s1351_s1, %s779_s4  ;;  %p786_p5 = scmp.lt.u32.totalorder %s779_s4, %s1351_s1 }
  0x17   : > { %p1091_p11 = pnand %p652_p9, %p1062_p1 }
  0x19   : > { %p781_p13 = pneg %p1091_p11 }
  0x1b   : > { %p782_p0 = pnand %p781_p13, %p780_p12 }
  0x1d   : > { %p783_p3 = pneg %p782_p0 }
  0x1f   : > { %p788_p7 = pnand %p786_p5, %p783_p3 }
  0x21   : > { %791 = shalt.err (!%p788_p7)
}
  0x22   : > { %s792_s9 = scalar_lea.vmem %s159_s26, 128  ;;  %p800_p1 = scmp.lt.s32.totalorder %s159_s26, %s159_s26 }
  0x23   : > { %p793_p9 = scmp.ne.s32.totalorder %s159_s26, %s792_s9  ;;  %p801_p4 = scmp.lt.s32.totalorder %s792_s9, %s792_s9 }
  0x25   : > { %p795_p10 = pnand %p793_p9, %p781_p13  ;;  %p802_p8 = por %p801_p4, %p800_p1 }
  0x27   : > { %p796_p6 = pneg %p795_p10 }
  0x29   : > { %p803_p2 = pnand %p802_p8, %p796_p6 }
  0x2b   : > { %806 = shalt.err (!%p803_p2)
}
  0x2c   : > { %s998_s10 = smov 64   ;;  %s999_s11 = smov 4  }
  0x2d   : > { %655 = dma.hbm_to_vmem [thread:$0]  (!%p1091_p11), %s1351_s1, 128, %s159_s26, [#allocation6], %s998_s10, %s998_s10, %s999_s11  }
  0x2e   : > { %p38_p1 = scmp.ge.s32.totalorder %s36_s28, 2  ;;  %s45_s25 = sadd.s32 1, %s963_s14 }
  0x2f   : > { %p52_p2 = scmp.ne.s32.totalorder %s963_s14, %s959_s13  ;;  %p53_p4 = scmp.eq.s32.totalorder %s975_s17, 0 }
  0x30   : > { %s1385_s28 = smov (%p38_p1, %s36_s28), 0  ;;  %p1365_p8 = scmp.ne.s32.totalorder %s1359_s21, 0 }
  0x31   : > { %p1118_p6 = por %p53_p4, %p52_p2  ;;  %s40_s27 = ssub.s32 %s971_s16, %s1385_s28 }
  0x32   : > { %p1124_p10 = por %p1365_p8, %p52_p2  ;;  %p668_p12 = scmp.lt.s32.totalorder %s975_s17, 2 }
  0x33   : > { %p43_p11 = scmp.eq.s32.totalorder %s40_s27, 0  ;;  %s172_s26 = sand.u32 1, %s963_s14  }
  0x34   : > { %s603_s4 = sshll.u32 %s172_s26, 9  ;;  %s635_s6 = sshll.u32 %s971_s16, 13 }
  0x35   : > { %s1133_s5 = scalar_select %p43_p11, %s963_s14, %s45_s25  }
  0x36   : > { %s1139_s9 = scalar_lea.hbm %s1350_s0, %s635_s6  ;;  %s176_s21 = scalar_lea.vmem [#allocation2], %s603_s4 }
  0x37   : > { %s186_s10 = sshll.u32 %s176_s21, 4  ;;  %p1145_p13 = pnand %p668_p12, %p1118_p6  ;;  %s1141_s10 = int_to_ptr.vmem [resolvable:$true] %s186_s10 }
  0x38   : > { %s1149_s18 = scalar_lea.sflag [#allocation3], %s172_s26  ;;  %s807_s19 = scalar_lea.hbm %s1139_s9, 8192 }
  0x39   : > { %p808_p0 = scmp.ne.s32.totalorder %s1139_s9, %s807_s19  ;;  %p809_p3 = pneg %p1145_p13 }
  0x3a   : > { %s812_s29 = scalar_lea.hbm %s1350_s0, 16384  ;;  %p813_p9 = scmp.lt.u32.totalorder %s1139_s9, %s1350_s0 }
  0x3b   : > { %p810_p5 = pnand %p809_p3, %p808_p0  ;;  %p814_p1 = scmp.lt.u32.totalorder %s812_s29, %s807_s19 }
  0x3c   : > { %p816_p4 = scmp.lt.u32.totalorder %s807_s19, %s1139_s9 }
  0x3d   : > { %p811_p7 = pneg %p810_p5  ;;  %p815_p2 = por %p814_p1, %p813_p9 }
  0x3f   : > { %p817_p6 = por %p816_p4, %p815_p2 }
  0x41   : > { %p818_p8 = pnand %p817_p6, %p811_p7 }
  0x43   : > { %821 = shalt.err (!%p818_p8)
}
  0x44   : > { %s822_s26 = scalar_lea.vmem %s1141_s10, 8192  ;;  %s1000_s7 = smov [#allocation2]  }
  0x45   : > { %p823_p12 = scmp.ne.s32.totalorder %s1141_s10, %s822_s26  ;;  %s827_s8 = sshll.u32 %s1000_s7, 4  ;;  %s828_s8 = int_to_ptr.vmem [resolvable:$false] %s827_s8 }
  0x46   : > { %s829_s21 = scalar_lea.vmem %s828_s8, 16384  ;;  %p830_p5 = scmp.lt.s32.totalorder %s1141_s10, %s828_s8 }
  0x47   : > { %p825_p11 = pnand %p823_p12, %p809_p3  ;;  %p831_p9 = scmp.lt.s32.totalorder %s829_s21, %s822_s26 }
  0x49   : > { %p826_p0 = pneg %p825_p11  ;;  %p832_p1 = por %p831_p9, %p830_p5 }
  0x4b   : > { %p833_p2 = pnand %p832_p1, %p826_p0 }
  0x4d   : > { %836 = shalt.err (!%p833_p2)
}
  0x4e   : > { %s1001_s19 = smov 128   ;;  %s1002_s25 = smov 8  }
  0x4f   : > { %659 = dma.hbm_to_vmem [thread:$0]  (!%p1145_p13), %s1139_s9, 8192, %s1141_s10, %s1149_s18, %s1001_s19, %s1001_s19, %s1002_s25  }
  0x50   : > { %p1368_p3 = scmp.ne.s32.totalorder %s1362_s24, 0 }
  0x51   : > { %s1180_s27 = sand.u32 (!%p1368_p3), 1, %s959_s13   ;;  %p1369_p7 = scmp.ne.s32.totalorder (!%p1368_p3), %s1360_s22, 0 }
  0x52   : > { %198 = sbr.rel (%p1368_p3) target bundleno = 521 (0x209), region = 28  ;;  %s607_s29 = sshll.u32 (!%p1368_p3), %s1180_s27, 9 }
  0x53   : > { %s201_s4 = scalar_lea.sflag (!%p1368_p3), [#allocation3], %s1180_s27  ;;  %s1184_s6 = scalar_lea.vmem (!%p1368_p3), [#allocation2], %s607_s29 }
  0x59   : > { %938 = dma.done.wait (%p1369_p7), %s201_s4, 8192  }
  0x5a   : > { %940 = vsyncadd (%p1369_p7), %s201_s4, 4294959104  ;;  %p1370_p13 = scmp.ne.s32.totalorder %s1358_s20, 0 }
  0x5c   : > { %942 = dma.done.wait (%p1370_p13), [#allocation6], 128  }
  0x5d   : > { %944 = vsyncadd (%p1370_p13), [#allocation6], 4294967168  ;;  %s609_s24 = sshll.u32 %s1180_s27, 7  ;;  %s610_s9 = sshll.u32 %s1180_s27, 4  ;;  %v1196_v0 = vld [vmem:[#allocation5] sm:$0xf] }
  0x5e   : > { %v1198_v1 = vld [vmem:[#allocation5 + $0x4] sm:$0xf]  ;;  %s1200_s10 = scalar_lea.vmem [#allocation7], %s609_s24  ;;  %s1202_s11 = scalar_lea.vmem [#allocation8], %s610_s9  ;;  %v1204_v2 = vmov 0.0   ;;  %v1206_v3 = vmov 0.0  }
  0x5f   : > { %v1208_v4 = vmov 0.0   ;;  %v1210_v5 = vmov 0.0   ;;  %s1212_s20 = smov 0  }
  0x60 LB: >> { %v1003_v6 = vmov 0   ;;  %s636_s22 = sshll.u32 %s995_s20, 6  ;;  %v613_v15 = vcombine.low %v1196_v0, %v1198_v1  ;;  %vm307_vm0 = vcmask 523264   ;;  %s639_s26 = sshll.u32 %s995_s20, 4  ;;  %vm369_vm1 = vcmask 1043456   ;;  %s995_s20 = sphi %s1212_s20, %s246_s20   ;;  %v991_v5 = vphi %v1210_v5, %v1376_v5   ;;  %v987_v4 = vphi %v1208_v4, %v1375_v4   ;;  %v983_v3 = vphi %v1206_v3, %v1374_v3   ;;  %v979_v2 = vphi %v1204_v2, %v1373_v2  }
  0x61   : >> { %343 = vmatprep.mubr.bf16.mxu0 %v1003_v6  ;;  %s253_s18 = scalar_lea.vmem %s1184_s6, %s636_s22 [#allocation2]  ;;  %vm370_vm2 = vcmask 130052   ;;  %vm374_vm3 = vcmask 130048   ;;  %s368_s7 = scalar_lea.vmem %s1200_s10, %s639_s26 [#allocation7] }
  0x62   : >> { %v767_v7 = vld [vmem:[%s253_s18 + $0x4] ss:$8 sps:$4 sm:$0xff]   ;;  %v769_v8 = vld [vmem:[%s253_s18] ss:$8 sps:$4 sm:$0xff]   ;;  %v770_v9 = vld [vmem:[%s253_s18 + $0x14] ss:$8 sps:$4 sm:$0xff]  }
  0x63   : >> { %311 = vmatprep.subr.bf16.mxu0 %v767_v7  ;;  %v772_v10 = vld [vmem:[%s253_s18 + $0x10] ss:$8 sps:$4 sm:$0xff]   ;;  %v773_v11 = vld [vmem:[%s253_s18 + $0x24] ss:$8 sps:$4 sm:$0xff]   ;;  %v775_v12 = vld [vmem:[%s253_s18 + $0x20] ss:$8 sps:$4 sm:$0xff]  }
  0x64   : >> { %312 = vmatpush1.bf16.msra.mxu0 %v769_v8  ;;  %v776_v13 = vld [vmem:[%s253_s18 + $0x34] ss:$8 sps:$4 sm:$0xff]   ;;  %v778_v14 = vld [vmem:[%s253_s18 + $0x30] ss:$8 sps:$4 sm:$0xff]   ;;  %vm1229_vm4 = vmor %vm370_vm2, %vm369_vm1  ;;  %s246_s20 = sadd.s32 1, %s995_s20  }
  0x65   : >> { %313 = vmatprep.subr.bf16.mxu0 %v770_v9  ;;  %p243_p4 = scmp.ge.s32.totalorder %s246_s20, 8  }
  0x66   : > { %vm399_vm5 = vcmask (%p243_p4), 7168   ;;  %vm402_vm6 = vcmask (%p243_p4), 15360   ;;  %s640_s8 = sshll.u32 (%p243_p4), %s967_s15, 11  ;;  %s427_s29 = sshll.u32 (%p243_p4), %s1200_s10, 4  ;;  %s1262_s29 = int_to_ptr.vmem [resolvable:$true] %s427_s29 }
  0x67   : > { %s1257_s25 = scalar_lea.hbm (%p243_p4), %s1352_s2, %s640_s8  ;;  %s406_s4 = scalar_lea.sflag (%p243_p4), [#allocation4], %s1180_s27 }
  0x68   : >> { %314 = vmatpush1.bf16.msra.mxu0 %v772_v10  ;;  %s837_s6 = scalar_lea.vmem (%p243_p4), %s1262_s29, 2048  ;;  %s1004_s24 = smov (%p243_p4), [#allocation7]  }
  0x69   : >> { %315 = vmatprep.subr.bf16.mxu0 %v773_v11  ;;  %p838_p6 = scmp.ne.s32.totalorder (%p243_p4), %s1262_s29, %s837_s6  ;;  %s841_s9 = sshll.u32 (%p243_p4), %s1004_s24, 4  ;;  %s842_s9 = int_to_ptr.vmem [resolvable:$false] %s841_s9 }
  0x6a   : > { %s843_s20 = scalar_lea.vmem (%p243_p4), %s842_s9, 4096  ;;  %p844_p11 = scmp.lt.s32.totalorder (%p243_p4), %s1262_s29, %s842_s9 }
  0x6b   : > { %p839_p8 = pnand (%p243_p4), %p838_p6, %p1124_p10  ;;  %p845_p0 = scmp.lt.s32.totalorder (%p243_p4), %s843_s20, %s837_s6 }
  0x6c   : >> { %316 = vmatpush1.bf16.msra.mxu0 %v775_v12 }
  0x6d   : >> { %317 = vmatprep.subr.bf16.mxu0 %v776_v13  ;;  %p840_p12 = pneg (%p243_p4), %p839_p8  ;;  %p846_p5 = por (%p243_p4), %p845_p0, %p844_p11 }
  0x6f   : > { %p847_p9 = pnand (%p243_p4), %p846_p5, %p840_p12 }
  0x70   : >> { %318 = vmatpush1.bf16.msra.mxu0 %v778_v14 }
  0x73   : >> { %622 = vmatmul.mubr.msk.bf16.vlgmr.msra.gmra.mrb[0].mxu0 %vm307_vm0, %v613_v15 }
 0x146   : >> { %v345_v16 = vpop.f32.mrb[0].mxu0 }
 0x147   : >> { %v347_v17 = vpop.f32.mrb[1].mxu0  ;;  %v385_v25 = vmul.f32 %v345_v16, %v345_v16 }
 0x148   : >> { %v637_v19 = vpack.c.bf16 %v347_v17, %v345_v16  ;;  %v349_v20 = vpop.f32.mrb[2].mxu0  ;;  %v375_v21 = vsel %vm374_vm3, %v347_v17, 0.0  ;;  %v386_v22 = vmul.f32 %v347_v17, %v347_v17 }
 0x149   : >> { %v351_v23 = vpop.f32.mrb[3].mxu0  ;;  %v376_v24 = vadd.f32 %v375_v21, %v345_v16  ;;  %v387_v32 = vmul.f32 %v349_v20, %v349_v20 }
 0x14a   : >> { %372 = vst.msk [vmem:[%s368_s7] sm:$0xff] %vm1229_vm4, %v637_v19  ;;  %v638_v26 = vpack.c.bf16 %v351_v23, %v349_v20  ;;  %v379_v27 = vsel %vm374_vm3, %v351_v23, 0.0  ;;  %v388_v28 = vmul.f32 %v351_v23, %v351_v23  ;;  %v389_v29 = vsel %vm374_vm3, %v386_v22, 0.0 }
 0x14b   : >> { %377 = vadd.xlane.f32.xlu0 %v376_v24  ;;  %v390_v30 = vadd.f32 %v389_v29, %v385_v25  ;;  %v380_v31 = vadd.f32 %v379_v27, %v349_v20 }
 0x14c   : >> { %373 = vst.msk [vmem:[%s368_s7 + $0x8] sm:$0xff] %vm1229_vm4, %v638_v26  ;;  %v393_v33 = vsel %vm374_vm3, %v388_v28, 0.0 }
 0x14d   : >> { %391 = vadd.xlane.f32.xlu1 %v390_v30  ;;  %v394_v34 = vadd.f32 %v393_v33, %v387_v32 }
 0x14f   : >> { %381 = vadd.xlane.f32.xlu0 %v380_v31 }
 0x151   : >> { %395 = vadd.xlane.f32.xlu1 %v394_v34 }
 0x1d8   : >> { %v378_v35 = vpop.xlane.xlu0 %377 }
 0x1d9   : >> { %v383_v36 = vadd.f32 %v991_v5, %v378_v35  }
 0x1da   : >> { %v392_v37 = vpop.xlane.xlu1 %391 }
 0x1db   : >> { %v397_v38 = vadd.f32 %v983_v3, %v392_v37   ;;  %v1376_v5 = vmov %v383_v36  ;;  %245 = sbr.rel (!%p243_p4) target bundleno = 96 (0x60), region = 103 }
 0x1dc   : >> { %v382_v39 = vpop.xlane.xlu0 %381 }
 0x1dd   : >> { %v384_v40 = vadd.f32 %v987_v4, %v382_v39   ;;  %v1374_v3 = vmov %v397_v38  ;;  %v400_v43 = vsel (%p243_p4), %vm399_vm5, %v383_v36, %v397_v38 }
 0x1de   : >> { %v396_v41 = vpop.xlane.xlu1 %395  ;;  %403 = vst.msk [vmem:[%s1202_s11] sm:$0xff] (%p243_p4), %vm402_vm6, %v400_v43 }
 0x1df   : >> { %v398_v42 = vadd.f32 %v979_v2, %v396_v41   ;;  %v1375_v4 = vmov %v384_v40 }
 0x1e1   : >> { %v1373_v2 = vmov %v398_v42  ;;  %v401_v44 = vsel (%p243_p4), %vm399_vm5, %v384_v40, %v398_v42 }
 0x1e2   : > { %404 = vst.msk [vmem:[%s1202_s11 + $0x8] sm:$0xff] %vm402_vm6, %v401_v44 }
 0x1e3   : > { %850 = shalt.err (!%p847_p9)
}
 0x1e4   : > { %s851_s10 = scalar_lea.hbm %s1257_s25, 2048  ;;  %s855_s26 = scalar_lea.hbm %s1352_s2, 4096 }
 0x1e5   : > { %p852_p1 = scmp.ne.s32.totalorder %s1257_s25, %s851_s10  ;;  %p856_p7 = scmp.lt.u32.totalorder %s1257_s25, %s1352_s2 }
 0x1e6   : > { %p857_p13 = scmp.lt.u32.totalorder %s855_s26, %s851_s10  ;;  %p859_p6 = scmp.lt.u32.totalorder %s851_s10, %s1257_s25 }
 0x1e7   : > { %p853_p2 = pnand %p852_p1, %p1124_p10 }
 0x1e8   : > { %p858_p4 = por %p857_p13, %p856_p7 }
 0x1e9   : > { %p854_p3 = pneg %p853_p2 }
 0x1ea   : > { %p860_p8 = por %p859_p6, %p858_p4 }
 0x1ec   : > { %p861_p12 = pnand %p860_p8, %p854_p3 }
 0x1ee   : > { %864 = shalt.err (!%p861_p12)
}
 0x1ef   : > { %s1005_s21 = smov 128   ;;  %s1006_s19 = smov 8  }
 0x1f0   : > { %648 = dma.vmem_to_hbm [thread:$0]  (%p1124_p10), %s1262_s29, 2048, %s1257_s25, %s406_s4, %s1005_s21, %s1005_s21, %s1006_s19  }
 0x1f1   : > { %s641_s6 = sshll.u32 %s967_s15, 8  ;;  %s445_s24 = sshll.u32 %s1202_s11, 4  ;;  %s1298_s24 = int_to_ptr.vmem [resolvable:$true] %s445_s24 }
 0x1f2   : > { %s1296_s10 = scalar_lea.hbm %s1353_s3, %s641_s6  ;;  %s411_s22 = scalar_lea.sflag [#allocation9], %s1180_s27 }
 0x1f3   : > { %s865_s18 = scalar_lea.vmem %s1298_s24, 256  ;;  %s1007_s26 = smov [#allocation8]  }
 0x1f4   : > { %p866_p11 = scmp.ne.s32.totalorder %s1298_s24, %s865_s18  ;;  %s869_s25 = sshll.u32 %s1007_s26, 4  ;;  %s870_s25 = int_to_ptr.vmem [resolvable:$false] %s869_s25 }
 0x1f5   : > { %s871_s15 = scalar_lea.vmem %s870_s25, 512  ;;  %p872_p9 = scmp.lt.s32.totalorder %s1298_s24, %s870_s25 }
 0x1f6   : > { %p867_p0 = pnand %p866_p11, %p1124_p10  ;;  %p873_p1 = scmp.lt.s32.totalorder %s871_s15, %s865_s18 }
 0x1f8   : > { %p868_p5 = pneg %p867_p0  ;;  %p874_p2 = por %p873_p1, %p872_p9 }
 0x1fa   : > { %p875_p3 = pnand %p874_p2, %p868_p5 }
 0x1fc   : > { %878 = shalt.err (!%p875_p3)
}
 0x1fd   : > { %s879_s11 = scalar_lea.hbm %s1296_s10, 256  ;;  %s883_s7 = scalar_lea.hbm %s1353_s3, 512 }
 0x1fe   : > { %p880_p7 = scmp.ne.s32.totalorder %s1296_s10, %s879_s11  ;;  %p884_p6 = scmp.lt.u32.totalorder %s1296_s10, %s1353_s3 }
 0x1ff   : > { %p885_p8 = scmp.lt.u32.totalorder %s883_s7, %s879_s11  ;;  %p887_p11 = scmp.lt.u32.totalorder %s879_s11, %s1296_s10 }
 0x200   : > { %p881_p13 = pnand %p880_p7, %p1124_p10 }
 0x201   : > { %p886_p12 = por %p885_p8, %p884_p6 }
 0x202   : > { %p882_p4 = pneg %p881_p13 }
 0x203   : > { %p888_p0 = por %p887_p11, %p886_p12 }
 0x205   : > { %p889_p5 = pnand %p888_p0, %p882_p4 }
 0x207   : > { %892 = shalt.err (!%p889_p5)
}
 0x208   : > { %649 = dma.vmem_to_hbm [thread:$0]  (%p1124_p10), %s1298_s24, 256, %s1296_s10, %s411_s22, %s1005_s21, %s1005_s21, %s1006_s19  }
 0x209 PF: > { %s460_s9 = sand.u32 1, %s955_s12   ;;  %p1377_p9 = scmp.ne.s32.totalorder %s1361_s23, 0 }
 0x20a   : > { %p1378_p1 = scmp.ge.s32.totalorder %s975_s17, 2  ;;  %s461_s20 = scalar_lea.sflag [#allocation4], %s460_s9 }
 0x20c   : > { %p661_p2 = pnand %p1378_p1, %p1377_p9 }
 0x20e   : > { %946 = dma.done.wait (!%p661_p2), %s461_s20, 2048  }
 0x20f   : > { %948 = vsyncadd (!%p661_p2), %s461_s20, 4294965248  ;;  %s470_s30 = scalar_lea.sflag [#allocation9], %s460_s9 }
 0x210   : > { %950 = dma.done.wait (!%p661_p2), %s470_s30, 256  }
 0x211   : > { %952 = vsyncadd (!%p661_p2), %s470_s30, 4294967040  ;;  %s24_s17 = sadd.s32 1, %s975_s17   ;;  %s1379_s12 = smov %s959_s13 }
 0x212   : > { %p21_p3 = scmp.ge.s32.totalorder %s24_s17, 4   ;;  %s1380_s13 = smov %s963_s14 }
 0x213   : > { %s1381_s14 = smov %s1133_s5  ;;  %s1382_s15 = smov %s971_s16 }
 0x214   : > { %s1383_s16 = smov %s1385_s28  ;;  %23 = sbr.rel (!%p21_p3) target bundleno = 9 (0x9), region = 114 }
 0x21b   :  { %475 = vsyncpa [#allocation3], 1 }
 0x21c   :  { %477 = vsyncpa [#allocation3 + $0x1], 1 }
 0x21d   :  { %478 = vsyncpa [#allocation6], 1 }
 0x21e   :  { %479 = vsyncpa [#allocation4], 1 }
 0x21f   :  { %481 = vsyncpa [#allocation4 + $0x1], 1 }
 0x220   :  { %482 = vsyncpa [#allocation9], 1 }
 0x221   :  { %484 = vsyncpa [#allocation9 + $0x1], 1 }

// kernel: vnet_downward_transition.7
= control target key start
LH: loop header
LB: loop body
LE: loop exit
PB: predicated region body
PF: predicated region fallthrough
CT: control target
= control target key end

     0   :  { %s3521_s0 = inlined_call_operand.hbm [shape: bf16[2,8,16,144], index: 0, kind: input, shape index: {}]   ;;  %s3522_s1 = inlined_call_operand.hbm [shape: bf16[2,8,16,144], index: 1, kind: input, shape index: {}]   ;;  %s3523_s2 = inlined_call_operand.hbm [shape: f32[16,1], index: 2, kind: input, shape index: {}]   ;;  %s3524_s3 = inlined_call_operand.hbm [shape: f32[16,1], index: 3, kind: input, shape index: {}]   ;;  %s3525_s4 = inlined_call_operand.hbm [shape: f32[16,1], index: 4, kind: input, shape index: {}]   ;;  %s3526_s5 = inlined_call_operand.hbm [shape: f32[16,1], index: 5, kind: input, shape index: {}]   ;;  %s3527_s6 = inlined_call_operand.hbm [shape: f32[16,1], index: 6, kind: input, shape index: {}]   ;;  %s3528_s7 = inlined_call_operand.hbm [shape: f32[16,1], index: 7, kind: input, shape index: {}]   ;;  %s3529_s8 = inlined_call_operand.hbm [shape: f32[16,1], index: 8, kind: input, shape index: {}]   ;;  %s3530_s9 = inlined_call_operand.hbm [shape: f32[2,8,16,144], index: 9, kind: output, shape index: {}]  }
   0x1   :  { %3593 = sst [smem:[#allocation99_spill]] %s3521_s0 }
   0x2   :  { %3594 = sst [smem:[#allocation100_spill]] %s3523_s2 }
   0x3   :  { %3595 = sst [smem:[#allocation101_spill]] %s3524_s3 }
   0x4   :  { %3596 = sst [smem:[#allocation102_spill]] %s3525_s4 }
   0x5   :  { %3597 = sst [smem:[#allocation103_spill]] %s3526_s5 }
   0x6   :  { %3598 = sst [smem:[#allocation104_spill]] %s3530_s9 }
   0x7   :  { %14 = vsyncpa [#allocation3], 0 }
   0x8   :  { %16 = vsyncpa [#allocation3 + $0x1], 0 }
   0x9   :  { %17 = vsyncpa [#allocation6], 0 }
   0xa   :  { %19 = vsyncpa [#allocation6 + $0x1], 0 }
   0xb   :  { %20 = vsyncpa [#allocation9], 0 }
   0xc   :  { %21 = vsyncpa [#allocation12], 0 }
   0xd   :  { %22 = vsyncpa [#allocation15], 0 }
   0xe   :  { %23 = vsyncpa [#allocation4], 0 }
   0xf   :  { %25 = vsyncpa [#allocation4 + $0x1], 0  ;;  %s1982_s30 = smov 0   ;;  %s1984_s10 = smov 0  }
  0x10   :  { %s1986_s11 = smov 0   ;;  %s1988_s12 = smov 0  }
  0x11   :  { %s1990_s13 = smov 0   ;;  %s1992_s14 = smov 0  }
  0x12 LB: > { %3599 = sst [smem:[#allocation25_spill]] %s1907_s12  ;;  %s2013_s15 = sadd.s32 4294967295, %s1915_s14   ;;  %s1915_s14 = sphi %s1992_s14, %s31_s14   ;;  %s1911_s13 = sphi %s1990_s13, %s3883_s13   ;;  %s1907_s12 = sphi %s1988_s12, %s3882_s12   ;;  %s1903_s11 = sphi %s1986_s11, %s3881_s11   ;;  %s1899_s10 = sphi %s1984_s10, %s3880_s10   ;;  %s1895_s30 = sphi %s1982_s30, %s3879_s30  }
  0x13   : > { %p1378_p0 = scmp.ge.s32.totalorder %s1915_s14, 1  ;;  %p3533_p1 = scmp.eq.s32.totalorder %s2013_s15, 0 }
  0x14   : > { %p279_p2 = scmp.lt.s32.totalorder %s1915_s14, 3  ;;  %s1917_s17 = smov [#allocation7]  }
  0x15   : > { %s291_s18 = sshll.u32 %s1917_s17, 4  ;;  %s1918_s20 = smov [#allocation8]   ;;  %s2022_s18 = int_to_ptr.vmem [resolvable:$true] %s291_s18 }
  0x16   : > { %p2018_p3 = pnand %p1378_p0, %p279_p2  ;;  %s304_s21 = sshll.u32 %s1918_s20, 4  ;;  %s2033_s21 = int_to_ptr.vmem [resolvable:$true] %s304_s21 }
  0x17   : > { %s1919_s22 = smov [#allocation11]   ;;  %s3603_s2 = sld [smem:[#allocation100_spill]] }
  0x18   : > { %s3600_s16 = scalar_select %p2018_p3, 1, 0 }
  0x19   : > { %p1446_p4 = pneg %p2018_p3  ;;  %s2035_s23 = sshll.u32 %s1919_s22, 4  ;;  %s331_s23 = int_to_ptr.vmem [resolvable:$true] %s2035_s23 }
  0x1a   : > { %3601 = sst [smem:[#allocation26_spill]] %s3600_s16 }
  0x1b   : > { %p2029_p6 = pnand %p1446_p4, %p3533_p1 }
  0x1d   : > { %s1557_s26 = scalar_lea.hbm %s3603_s2, 256  ;;  %p2045_p8 = pneg %p2029_p6 }
  0x1e   : > { %p1558_p7 = scmp.ne.s32.totalorder %s3603_s2, %s1557_s26  ;;  %p1564_p11 = scmp.lt.u32.totalorder %s1557_s26, %s3603_s2 }
  0x20   : > { %p1560_p9 = pnand %p2045_p8, %p1558_p7 }
  0x22   : > { %p1561_p10 = pneg %p1560_p9 }
  0x24   : > { %p1566_p12 = pnand %p1564_p11, %p1561_p10 }
  0x26   : > { %1569 = shalt.err (!%p1566_p12)
}
  0x27   : > { %s1570_s22 = scalar_lea.vmem %s2022_s18, 256  ;;  %p1578_p4 = scmp.lt.s32.totalorder %s2022_s18, %s2022_s18 }
  0x28   : > { %p1571_p13 = scmp.ne.s32.totalorder %s2022_s18, %s1570_s22  ;;  %p1579_p5 = scmp.lt.s32.totalorder %s1570_s22, %s1570_s22 }
  0x2a   : > { %p1573_p0 = pnand %p1571_p13, %p2045_p8  ;;  %p1580_p7 = por %p1579_p5, %p1578_p4 }
  0x2c   : > { %p1574_p2 = pneg %p1573_p0 }
  0x2e   : > { %p1581_p9 = pnand %p1580_p7, %p1574_p2 }
  0x30   : > { %1584 = shalt.err (!%p1581_p9)
}
  0x31   : > { %s3535_s24 = smov 128   ;;  %s3537_s25 = smov 8  }
  0x32   : > { %1449 = dma.hbm_to_vmem [thread:$0]  (!%p2029_p6), %s3603_s2, 256, %s2022_s18, [#allocation6], %s3535_s24, %s3535_s24, %s3537_s25  }
  0x33   : > { %s3605_s3 = sld [smem:[#allocation101_spill]] }
  0x39   : > { %s1585_s20 = scalar_lea.hbm %s3605_s3, 256 }
  0x3a   : > { %p1586_p5 = scmp.ne.s32.totalorder %s3605_s3, %s1585_s20  ;;  %p1592_p12 = scmp.lt.u32.totalorder %s1585_s20, %s3605_s3 }
  0x3c   : > { %p1588_p10 = pnand %p1586_p5, %p2045_p8 }
  0x3e   : > { %p1589_p11 = pneg %p1588_p10 }
  0x40   : > { %p1594_p13 = pnand %p1592_p12, %p1589_p11 }
  0x42   : > { %1597 = shalt.err (!%p1594_p13)
}
  0x43   : > { %s1598_s18 = scalar_lea.vmem %s2033_s21, 256  ;;  %p1606_p7 = scmp.lt.s32.totalorder %s2033_s21, %s2033_s21 }
  0x44   : > { %p1599_p0 = scmp.ne.s32.totalorder %s2033_s21, %s1598_s18  ;;  %p1607_p9 = scmp.lt.s32.totalorder %s1598_s18, %s1598_s18 }
  0x46   : > { %p1601_p2 = pnand %p1599_p0, %p2045_p8  ;;  %p1608_p5 = por %p1607_p9, %p1606_p7 }
  0x48   : > { %p1602_p4 = pneg %p1601_p2 }
  0x4a   : > { %p1609_p10 = pnand %p1608_p5, %p1602_p4 }
  0x4c   : > { %1612 = shalt.err (!%p1609_p10)
}
  0x4d   : > { %1452 = dma.hbm_to_vmem [thread:$0]  (!%p2029_p6), %s3605_s3, 256, %s2033_s21, [#allocation9], %s3535_s24, %s3535_s24, %s3537_s25  }
  0x4e   : > { %s3606_s5 = sld [smem:[#allocation103_spill]] }
  0x54   : > { %s1613_s27 = scalar_lea.hbm %s3606_s5, 256 }
  0x55   : > { %p1614_p11 = scmp.ne.s32.totalorder %s3606_s5, %s1613_s27  ;;  %p1620_p0 = scmp.lt.u32.totalorder %s1613_s27, %s3606_s5 }
  0x57   : > { %p1616_p12 = pnand %p1614_p11, %p2045_p8 }
  0x59   : > { %p1617_p13 = pneg %p1616_p12 }
  0x5b   : > { %p1622_p2 = pnand %p1620_p0, %p1617_p13 }
  0x5d   : > { %1625 = shalt.err (!%p1622_p2)
}
  0x5e   : > { %s1626_s18 = scalar_lea.vmem %s331_s23, 256  ;;  %p1634_p5 = scmp.lt.s32.totalorder %s331_s23, %s331_s23 }
  0x5f   : > { %p1627_p4 = scmp.ne.s32.totalorder %s331_s23, %s1626_s18  ;;  %p1635_p10 = scmp.lt.s32.totalorder %s1626_s18, %s1626_s18 }
  0x61   : > { %p1629_p7 = pnand %p1627_p4, %p2045_p8  ;;  %p1636_p1 = por %p1635_p10, %p1634_p5 }
  0x63   : > { %p1630_p9 = pneg %p1629_p7 }
  0x65   : > { %p1637_p3 = pnand %p1636_p1, %p1630_p9 }
  0x67   : > { %1640 = shalt.err (!%p1637_p3)
}
  0x68   : > { %1458 = dma.hbm_to_vmem [thread:$0]  (!%p2029_p6), %s3606_s5, 256, %s331_s23, [#allocation12], %s3535_s24, %s3535_s24, %s3537_s25  }
  0x69   : > { %s1922_s12 = smov [#allocation14]   ;;  %s1923_s26 = smov [#allocation10]  }
  0x6a   : > { %s356_s16 = sshll.u32 %s1922_s12, 4  ;;  %s317_s27 = sshll.u32 %s1923_s26, 4  ;;  %s357_s16 = int_to_ptr.vmem [resolvable:$true] %s356_s16  ;;  %s318_s27 = int_to_ptr.vmem [resolvable:$true] %s317_s27 }
  0x6b   : > { %s1641_s20 = scalar_lea.hbm %s3528_s7, 256 }
  0x6c   : > { %p1642_p1 = scmp.ne.s32.totalorder %s3528_s7, %s1641_s20  ;;  %p1648_p12 = scmp.lt.u32.totalorder %s1641_s20, %s3528_s7 }
  0x6e   : > { %p1644_p3 = pnand %p1642_p1, %p2045_p8 }
  0x70   : > { %p1645_p11 = pneg %p1644_p3 }
  0x72   : > { %p1650_p13 = pnand %p1648_p12, %p1645_p11 }
  0x74   : > { %1653 = shalt.err (!%p1650_p13)
}
  0x75   : > { %s1654_s23 = scalar_lea.vmem %s357_s16, 256  ;;  %p1662_p7 = scmp.lt.s32.totalorder %s357_s16, %s357_s16 }
  0x76   : > { %p1655_p0 = scmp.ne.s32.totalorder %s357_s16, %s1654_s23  ;;  %p1663_p9 = scmp.lt.s32.totalorder %s1654_s23, %s1654_s23 }
  0x78   : > { %p1657_p2 = pnand %p1655_p0, %p2045_p8  ;;  %p1664_p5 = por %p1663_p9, %p1662_p7 }
  0x7a   : > { %p1658_p4 = pneg %p1657_p2 }
  0x7c   : > { %p1665_p10 = pnand %p1664_p5, %p1658_p4 }
  0x7e   : > { %1668 = shalt.err (!%p1665_p10)
}
  0x7f   : > { %1464 = dma.hbm_to_vmem [thread:$0]  (!%p2029_p6), %s3528_s7, 256, %s357_s16, [#allocation15], %s3535_s24, %s3535_s24, %s3537_s25  }
  0x80   : > { %s3607_s4 = sld [smem:[#allocation102_spill]] }
  0x86   : > { %s1669_s28 = scalar_lea.hbm %s3607_s4, 256 }
  0x87   : > { %p1670_p1 = scmp.ne.s32.totalorder %s3607_s4, %s1669_s28  ;;  %p1676_p12 = scmp.lt.u32.totalorder %s1669_s28, %s3607_s4 }
  0x89   : > { %p1672_p3 = pnand %p1670_p1, %p2045_p8 }
  0x8b   : > { %p1673_p11 = pneg %p1672_p3 }
  0x8d   : > { %p1678_p13 = pnand %p1676_p12, %p1673_p11 }
  0x8f   : > { %1681 = shalt.err (!%p1678_p13)
}
  0x90   : > { %s1682_s21 = scalar_lea.vmem %s318_s27, 256  ;;  %p1690_p7 = scmp.lt.s32.totalorder %s318_s27, %s318_s27 }
  0x91   : > { %p1683_p0 = scmp.ne.s32.totalorder %s318_s27, %s1682_s21  ;;  %p1691_p9 = scmp.lt.s32.totalorder %s1682_s21, %s1682_s21 }
  0x93   : > { %p1685_p2 = pnand %p1683_p0, %p2045_p8  ;;  %p1692_p5 = por %p1691_p9, %p1690_p7 }
  0x95   : > { %p1686_p4 = pneg %p1685_p2 }
  0x97   : > { %p1693_p10 = pnand %p1692_p5, %p1686_p4 }
  0x99   : > { %1696 = shalt.err (!%p1693_p10)
}
  0x9a   : > { %1455 = dma.hbm_to_vmem [thread:$0]  (!%p2029_p6), %s3607_s4, 256, %s318_s27, [#allocation9], %s3535_s24, %s3535_s24, %s3537_s25  }
  0x9b   : > { %s1924_s2 = smov [#allocation13]   ;;  %s1925_s12 = smov [#allocation16]  }
  0x9c   : > { %s343_s9 = sshll.u32 %s1924_s2, 4  ;;  %s369_s26 = sshll.u32 %s1925_s12, 4  ;;  %s344_s9 = int_to_ptr.vmem [resolvable:$true] %s343_s9  ;;  %s370_s26 = int_to_ptr.vmem [resolvable:$true] %s369_s26 }
  0x9d   : > { %s1697_s20 = scalar_lea.hbm %s3527_s6, 256 }
  0x9e   : > { %p1698_p1 = scmp.ne.s32.totalorder %s3527_s6, %s1697_s20  ;;  %p1704_p12 = scmp.lt.u32.totalorder %s1697_s20, %s3527_s6 }
  0xa0   : > { %p1700_p3 = pnand %p1698_p1, %p2045_p8 }
  0xa2   : > { %p1701_p11 = pneg %p1700_p3 }
  0xa4   : > { %p1706_p13 = pnand %p1704_p12, %p1701_p11 }
  0xa6   : > { %1709 = shalt.err (!%p1706_p13)
}
  0xa7   : > { %s1710_s27 = scalar_lea.vmem %s344_s9, 256  ;;  %p1718_p7 = scmp.lt.s32.totalorder %s344_s9, %s344_s9 }
  0xa8   : > { %p1711_p0 = scmp.ne.s32.totalorder %s344_s9, %s1710_s27  ;;  %p1719_p9 = scmp.lt.s32.totalorder %s1710_s27, %s1710_s27 }
  0xaa   : > { %p1713_p2 = pnand %p1711_p0, %p2045_p8  ;;  %p1720_p5 = por %p1719_p9, %p1718_p7 }
  0xac   : > { %p1714_p4 = pneg %p1713_p2 }
  0xae   : > { %p1721_p10 = pnand %p1720_p5, %p1714_p4 }
  0xb0   : > { %1724 = shalt.err (!%p1721_p10)
}
  0xb1   : > { %1461 = dma.hbm_to_vmem [thread:$0]  (!%p2029_p6), %s3527_s6, 256, %s344_s9, [#allocation12], %s3535_s24, %s3535_s24, %s3537_s25  }
  0xb2   : > { %s1725_s17 = scalar_lea.hbm %s3529_s8, 256 }
  0xb3   : > { %p1726_p1 = scmp.ne.s32.totalorder %s3529_s8, %s1725_s17  ;;  %p1732_p12 = scmp.lt.u32.totalorder %s1725_s17, %s3529_s8 }
  0xb5   : > { %p1728_p3 = pnand %p1726_p1, %p2045_p8 }
  0xb7   : > { %p1729_p11 = pneg %p1728_p3 }
  0xb9   : > { %p1734_p13 = pnand %p1732_p12, %p1729_p11 }
  0xbb   : > { %1737 = shalt.err (!%p1734_p13)
}
  0xbc   : > { %s1738_s16 = scalar_lea.vmem %s370_s26, 256  ;;  %p1746_p7 = scmp.lt.s32.totalorder %s370_s26, %s370_s26 }
  0xbd   : > { %p1739_p0 = scmp.ne.s32.totalorder %s370_s26, %s1738_s16  ;;  %p1747_p9 = scmp.lt.s32.totalorder %s1738_s16, %s1738_s16 }
  0xbf   : > { %p1741_p2 = pnand %p1739_p0, %p2045_p8  ;;  %p1748_p5 = por %p1747_p9, %p1746_p7 }
  0xc1   : > { %p1742_p4 = pneg %p1741_p2 }
  0xc3   : > { %p1749_p10 = pnand %p1748_p5, %p1742_p4 }
  0xc5   : > { %1752 = shalt.err (!%p1749_p10)
}
  0xc6   : > { %1467 = dma.hbm_to_vmem [thread:$0]  (!%p2029_p6), %s3529_s8, 256, %s370_s26, [#allocation15], %s3535_s24, %s3535_s24, %s3537_s25  }
  0xc7   : > { %s1377_s19 = sadd.s32 4294967294, %s1915_s14   ;;  %s43_s29 = sadd.s32 1, %s1911_s13 }
  0xc8   : > { %s52_s23 = sadd.s32 1, %s1903_s11  ;;  %p45_p8 = scmp.ge.s32.totalorder %s43_s29, 2 }
  0xc9   : > { %p59_p1 = scmp.ne.s32.totalorder %s1903_s11, %s1899_s10  ;;  %p60_p3 = scmp.eq.s32.totalorder %s1915_s14, 0 }
  0xca   : > { %p65_p11 = scmp.ne.s32.totalorder %s1899_s10, %s1895_s30  ;;  %s3885_s29 = smov (%p45_p8, %s43_s29), 0 }
  0xcb   : > { %p2211_p12 = por %p60_p3, %p59_p1  ;;  %p3609_p13 = scmp.eq.s32.totalorder %s2013_s15, 0 }
  0xcc   : > { %s47_s12 = ssub.s32 %s1911_s13, %s3885_s29  ;;  %p266_p0 = scmp.eq.s32.totalorder %s2013_s15, 1 }
  0xcd   : > { %p2217_p6 = por %p3609_p13, %p65_p11  ;;  %p50_p2 = scmp.eq.s32.totalorder %s47_s12, 0 }
  0xce   : > { %p272_p4 = scmp.eq.s32.totalorder %s1377_s19, 1  ;;  %p2224_p7 = por %p266_p0, %p59_p1 }
  0xcf   : > { %p1486_p9 = scmp.lt.s32.totalorder %s1915_s14, 2  ;;  %s383_s22 = sand.u32 1, %s1903_s11  }
  0xd0   : > { %s3611_s28 = scalar_select %p2224_p7, 1, 0 }
  0xd1   : > { %s2230_s17 = scalar_select %p50_p2, %s1903_s11, %s52_s23  }
  0xd2   : > { %p2232_p5 = por %p272_p4, %p65_p11  ;;  %s1387_s18 = sshll.u32 %s383_s22, 7 }
  0xd3   : > { %s1409_s21 = sshll.u32 %s1911_s13, 11  ;;  %s3613_s0 = sld [smem:[#allocation99_spill]] }
  0xd4   : > { %s3612_s20 = scalar_select %p2232_p5, 1, 0 }
  0xd5   : > { %s387_s19 = scalar_lea.vmem [#allocation2], %s1387_s18  ;;  %p2247_p10 = pnand %p1486_p9, %p2211_p12 }
  0xd6   : > { %s397_s12 = sshll.u32 %s387_s19, 4  ;;  %s2254_s16 = scalar_lea.hbm %s3522_s1, %s1409_s21  ;;  %s2243_s12 = int_to_ptr.vmem [resolvable:$true] %s397_s12 }
  0xd7   : > { %s411_s9 = scalar_lea.vmem [#allocation5], %s1387_s18  ;;  %s2258_s4 = scalar_lea.sflag [#allocation3], %s383_s22 }
  0xd8   : > { %s2256_s3 = sshll.u32 %s411_s9, 4  ;;  %p1755_p1 = pneg %p2247_p10  ;;  %s2290_s3 = int_to_ptr.vmem [resolvable:$true] %s2256_s3 }
  0xd9   : > { %s2241_s27 = scalar_lea.hbm %s3613_s0, %s1409_s21  ;;  %s1758_s24 = scalar_lea.hbm %s3613_s0, 4096 }
  0xda   : > { %s1753_s19 = scalar_lea.hbm %s2241_s27, 2048  ;;  %p1759_p12 = scmp.lt.u32.totalorder %s2241_s27, %s3613_s0 }
  0xdb   : > { %p1754_p8 = scmp.ne.s32.totalorder %s2241_s27, %s1753_s19  ;;  %p1760_p13 = scmp.lt.u32.totalorder %s1758_s24, %s1753_s19 }
  0xdc   : > { %p1762_p2 = scmp.lt.u32.totalorder %s1753_s19, %s2241_s27 }
  0xdd   : > { %p1756_p3 = pnand %p1755_p1, %p1754_p8  ;;  %p1761_p0 = por %p1760_p13, %p1759_p12 }
  0xdf   : > { %p1757_p11 = pneg %p1756_p3  ;;  %p1763_p4 = por %p1762_p2, %p1761_p0 }
  0xe1   : > { %p1764_p9 = pnand %p1763_p4, %p1757_p11 }
  0xe3   : > { %1767 = shalt.err (!%p1764_p9)
}
  0xe4   : > { %s1768_s22 = scalar_lea.vmem %s2243_s12, 2048  ;;  %s1926_s5 = smov [#allocation2]  }
  0xe5   : > { %p1769_p8 = scmp.ne.s32.totalorder %s2243_s12, %s1768_s22  ;;  %s1773_s18 = sshll.u32 %s1926_s5, 4  ;;  %s1774_s18 = int_to_ptr.vmem [resolvable:$false] %s1773_s18 }
  0xe6   : > { %s1775_s9 = scalar_lea.vmem %s1774_s18, 4096  ;;  %p1776_p7 = scmp.lt.s32.totalorder %s2243_s12, %s1774_s18 }
  0xe7   : > { %p1771_p3 = pnand %p1769_p8, %p1755_p1  ;;  %p1777_p12 = scmp.lt.s32.totalorder %s1775_s9, %s1768_s22 }
  0xe9   : > { %p1772_p5 = pneg %p1771_p3  ;;  %p1778_p13 = por %p1777_p12, %p1776_p7 }
  0xeb   : > { %p1779_p0 = pnand %p1778_p13, %p1772_p5 }
  0xed   : > { %1782 = shalt.err (!%p1779_p0)
}
  0xee   : > { %s3615_s19 = smov 8   ;;  %s3616_s2 = smov 128  }
  0xef   : > { %1471 = dma.hbm_to_vmem [thread:$0]  (!%p2247_p10), %s2241_s27, 2048, %s2243_s12, %s2258_s4, %s3616_s2, %s3616_s2, %s3615_s19  }
  0xf0   : > { %s407_s24 = sand.u32 1, %s1915_s14   ;;  %s1783_s21 = scalar_lea.hbm %s2254_s16, 2048 }
  0xf1   : > { %s2293_s25 = scalar_lea.sflag [#allocation6], %s407_s24  ;;  %p1784_p7 = scmp.ne.s32.totalorder %s2254_s16, %s1783_s21 }
  0xf2   : > { %s1788_s18 = scalar_lea.hbm %s3522_s1, 4096  ;;  %p1789_p2 = scmp.lt.u32.totalorder %s2254_s16, %s3522_s1 }
  0xf3   : > { %p1786_p5 = pnand %p1784_p7, %p1755_p1  ;;  %p1790_p4 = scmp.lt.u32.totalorder %s1788_s18, %s1783_s21 }
  0xf4   : > { %p1792_p8 = scmp.lt.u32.totalorder %s1783_s21, %s2254_s16 }
  0xf5   : > { %p1787_p11 = pneg %p1786_p5  ;;  %p1791_p9 = por %p1790_p4, %p1789_p2 }
  0xf7   : > { %p1793_p3 = por %p1792_p8, %p1791_p9 }
  0xf9   : > { %p1794_p12 = pnand %p1793_p3, %p1787_p11 }
  0xfb   : > { %1797 = shalt.err (!%p1794_p12)
}
  0xfc   : > { %s1798_s4 = scalar_lea.vmem %s2290_s3, 2048  ;;  %s1927_s27 = smov [#allocation5]  }
  0xfd   : > { %p1799_p13 = scmp.ne.s32.totalorder %s2290_s3, %s1798_s4  ;;  %s1803_s12 = sshll.u32 %s1927_s27, 4  ;;  %s1804_s12 = int_to_ptr.vmem [resolvable:$false] %s1803_s12 }
  0xfe   : > { %s1805_s0 = scalar_lea.vmem %s1804_s12, 4096  ;;  %p1806_p5 = scmp.lt.s32.totalorder %s2290_s3, %s1804_s12 }
  0xff   : > { %p1801_p0 = pnand %p1799_p13, %p1755_p1  ;;  %p1807_p2 = scmp.lt.s32.totalorder %s1805_s0, %s1798_s4 }
 0x101   : > { %p1802_p7 = pneg %p1801_p0  ;;  %p1808_p4 = por %p1807_p2, %p1806_p5 }
 0x103   : > { %p1809_p9 = pnand %p1808_p4, %p1802_p7 }
 0x105   : > { %1812 = shalt.err (!%p1809_p9)
}
 0x106   : > { %1474 = dma.hbm_to_vmem [thread:$0]  (!%p2247_p10), %s2254_s16, 2048, %s2290_s3, %s2293_s25, %s3616_s2, %s3616_s2, %s3615_s19  }
 0x107   : > { %s3617_s24 = sld [smem:[#allocation26_spill]] }
 0x10d   : > { %p3618_p1 = scmp.ne.s32.totalorder %s3617_s24, 0 }
 0x10f   : > { %433 = sbr.rel (%p3618_p1) target bundleno = 582 (0x246), region = 56 }
 0x116   : > { %s2325_s21 = sand.u32 1, %s1899_s10  }
 0x117   : > { %s1394_s22 = sshll.u32 %s2325_s21, 7  ;;  %s436_s5 = scalar_lea.sflag [#allocation3], %s2325_s21 }
 0x118   : > { %s2329_s18 = scalar_lea.vmem [#allocation2], %s1394_s22 }
 0x119   : > { %1866 = dma.done.wait (%p2217_p6), %s436_s5, 2048  }
 0x11a   : > { %1868 = vsyncadd (%p2217_p6), %s436_s5, 4294965248  ;;  %s444_s3 = sand.u32 1, %s2013_s15   ;;  %s2336_s16 = scalar_lea.vmem [#allocation5], %s1394_s22 }
 0x11b   : > { %s445_s23 = scalar_lea.sflag [#allocation6], %s444_s3 }
 0x11c   : > { %1870 = dma.done.wait (%p2217_p6), %s445_s23, 2048  }
 0x11d   : > { %1872 = vsyncadd (%p2217_p6), %s445_s23, 4294965248  ;;  %p3619_p10 = scmp.eq.s32.totalorder %s2013_s15, 0 }
 0x11f   : > { %1874 = dma.done.wait (%p3619_p10), [#allocation6], 256   ;;  %p3620_p11 = pmov %p3619_p10 }
 0x120   : > { %p3621_p8 = pmov %p3619_p10 }
 0x121   : > { %1876 = vsyncadd (%p3620_p11), [#allocation6], 4294967040 }
 0x122   : > { %1878 = dma.done.wait (%p3621_p8), [#allocation9], 512   ;;  %p3622_p3 = pmov %p3621_p8 }
 0x124   : > { %1880 = vsyncadd (%p3622_p3), [#allocation9], 4294966784  ;;  %p3623_p12 = pmov %p3622_p3 }
 0x125   : > { %p3624_p13 = pmov %p3622_p3 }
 0x126   : > { %1882 = dma.done.wait (%p3623_p12), [#allocation12], 512  }
 0x127   : > { %1884 = vsyncadd (%p3624_p13), [#allocation12], 4294966784  ;;  %p3625_p6 = pmov %p3622_p3 }
 0x128   : > { %p3626_p0 = pmov %p3622_p3 }
 0x129   : > { %1886 = dma.done.wait (%p3625_p6), [#allocation15], 512  }
 0x12a   : > { %1888 = vsyncadd (%p3626_p0), [#allocation15], 4294966784  ;;  %v1928_v0 = vmov 0   ;;  %v811_v1 = vld [vmem:[#allocation11] sm:$0xff]  ;;  %v567_v2 = vld [vmem:[#allocation7] sm:$0xff]  ;;  %s1403_s15 = sshll.u32 %s2325_s21, 8 }
 0x12b   : > { %1556 = vset.pattern.permute.xlu1 %v1928_v0  ;;  %1555 = vset.pattern.permute.xlu0 %v1928_v0  ;;  %v812_v3 = vld [vmem:[#allocation11 + $0x8] sm:$0xff]  ;;  %v568_v4 = vld [vmem:[#allocation7 + $0x8] sm:$0xff]  ;;  %v611_v6 = vld [vmem:[#allocation8] sm:$0xff]  ;;  %s3231_s26 = scalar_lea.vmem [#allocation17], %s1403_s15  ;;  %s3866_s19 = sld [smem:[#allocation25_spill]] }
 0x12c   : > { %815 = vperm.xlu1 %1556, %v811_v1   ;;  %571 = vperm.xlu0 %1555, %v567_v2   ;;  %v612_v5 = vld [vmem:[#allocation8 + $0x8] sm:$0xff]  ;;  %v856_v7 = vld [vmem:[#allocation13 + $0x8] sm:$0xff]  ;;  %v855_v8 = vld [vmem:[#allocation13] sm:$0xff]  ;;  %s1197_s25 = sshll.u32 %s3231_s26, 4  ;;  %s3869_s27 = sld [smem:[#allocation104_spill]]  ;;  %s3446_s25 = int_to_ptr.vmem [resolvable:$true] %s1197_s25 }
 0x12d   : > { %v688_v9 = vld [vmem:[#allocation10 + $0x8] sm:$0xff]  ;;  %v687_v10 = vld [vmem:[#allocation10] sm:$0xff]  ;;  %v932_v11 = vld [vmem:[#allocation14 + $0x8] sm:$0xff]  ;;  %s1181_s0 = scalar_lea.sflag [#allocation4], %s2325_s21  ;;  %s1813_s24 = scalar_lea.vmem %s3446_s25, 4096 }
 0x12e   : > { %v931_v12 = vld [vmem:[#allocation14] sm:$0xff]  ;;  %v1072_v13 = vld [vmem:[#allocation16 + $0x8] sm:$0xff]  ;;  %v1071_v14 = vld [vmem:[#allocation16] sm:$0xff]  ;;  %p1814_p7 = scmp.ne.s32.totalorder %s3446_s25, %s1813_s24  ;;  %p3876_p5 = scmp.ne.s32.totalorder %s3611_s28, 0 }
 0x12f   : > { %v2359_v15 = vld [vmem:[%s2336_s16] sm:$0xff]  ;;  %v2362_v16 = vld [vmem:[%s2336_s16 + $0x10] sm:$0xff]  ;;  %v2431_v55 = vld [vmem:[%s2336_s16 + $0x8] sm:$0xff]  ;;  %s1929_s22 = smov [#allocation17]  }
 0x130   : > { %820 = vperm.xlu1 %1556, %v812_v3   ;;  %576 = vperm.xlu0 %1555, %v568_v4   ;;  %v2365_v17 = vld [vmem:[%s2336_s16 + $0x20] sm:$0xff]  ;;  %v2368_v18 = vld [vmem:[%s2336_s16 + $0x30] sm:$0xff]  ;;  %v779_v23 = vunpack.c.l.bf16 %v2359_v15  ;;  %v780_v24 = vunpack.c.h.bf16 %v2359_v15  ;;  %v783_v25 = vunpack.c.l.bf16 %v2362_v16  ;;  %v784_v26 = vunpack.c.h.bf16 %v2362_v16  ;;  %v2434_v56 = vld [vmem:[%s2336_s16 + $0x18] sm:$0xff]  ;;  %p1815_p2 = pnand %p1814_p7, %p3876_p5  ;;  %s1817_s5 = sshll.u32 %s1929_s22, 4  ;;  %s1818_s5 = int_to_ptr.vmem [resolvable:$false] %s1817_s5 }
 0x131   : > { %v2371_v19 = vld [vmem:[%s2336_s16 + $0x40] sm:$0xff]  ;;  %v2374_v20 = vld [vmem:[%s2336_s16 + $0x50] sm:$0xff]  ;;  %v787_v27 = vunpack.c.l.bf16 %v2365_v17  ;;  %v788_v28 = vunpack.c.h.bf16 %v2365_v17  ;;  %v791_v29 = vunpack.c.l.bf16 %v2368_v18  ;;  %v792_v30 = vunpack.c.h.bf16 %v2368_v18  ;;  %v2441_v61 = vld [vmem:[%s2336_s16 + $0x28] sm:$0xff]  ;;  %s1411_s2 = sshll.u32 %s3866_s19, 12  ;;  %p1820_p9 = scmp.lt.s32.totalorder %s3446_s25, %s1818_s5 }
 0x132   : > { %v2377_v21 = vld [vmem:[%s2336_s16 + $0x60] sm:$0xff]  ;;  %v2380_v22 = vld [vmem:[%s2336_s16 + $0x70] sm:$0xff]  ;;  %v795_v33 = vunpack.c.l.bf16 %v2371_v19  ;;  %v796_v34 = vunpack.c.h.bf16 %v2371_v19  ;;  %v799_v35 = vunpack.c.l.bf16 %v2374_v20  ;;  %v800_v36 = vunpack.c.h.bf16 %v2374_v20  ;;  %v2444_v62 = vld [vmem:[%s2336_s16 + $0x38] sm:$0xff]  ;;  %s3444_s12 = scalar_lea.hbm %s3869_s27, %s1411_s2  ;;  %p1816_p4 = pneg %p1815_p2 }
 0x133   : > { %v2391_v31 = vld [vmem:[%s2329_s18] sm:$0xff]  ;;  %v2394_v32 = vld [vmem:[%s2329_s18 + $0x10] sm:$0xff]  ;;  %v803_v39 = vunpack.c.l.bf16 %v2377_v21  ;;  %v804_v40 = vunpack.c.h.bf16 %v2377_v21  ;;  %v807_v41 = vunpack.c.l.bf16 %v2380_v22  ;;  %v808_v42 = vunpack.c.h.bf16 %v2380_v22  ;;  %v2451_v3 = vld [vmem:[%s2336_s16 + $0x48] sm:$0xff] }
 0x134   : > { %620 = vperm.xlu1 %1556, %v612_v5   ;;  %615 = vperm.xlu0 %1555, %v611_v6   ;;  %v2401_v37 = vld [vmem:[%s2329_s18 + $0x20] sm:$0xff]  ;;  %v2404_v38 = vld [vmem:[%s2329_s18 + $0x30] sm:$0xff]  ;;  %v535_v47 = vunpack.c.l.bf16 %v2391_v31  ;;  %v536_v48 = vunpack.c.h.bf16 %v2391_v31  ;;  %v539_v49 = vunpack.c.l.bf16 %v2394_v32  ;;  %v540_v50 = vunpack.c.h.bf16 %v2394_v32  ;;  %v2454_v4 = vld [vmem:[%s2336_s16 + $0x58] sm:$0xff] }
 0x135   : > { %v2411_v43 = vld [vmem:[%s2329_s18 + $0x40] sm:$0xff]  ;;  %v2414_v44 = vld [vmem:[%s2329_s18 + $0x50] sm:$0xff]  ;;  %v543_v51 = vunpack.c.l.bf16 %v2401_v37  ;;  %v2457_v5 = vld [vmem:[%s2336_s16 + $0x68] sm:$0xff]  ;;  %v3642_v31 = vunpack.c.l.bf16 %v2404_v38  ;;  %v3655_v63 = vunpack.c.h.bf16 %v2434_v56 }
 0x136   : > { %v2417_v45 = vld [vmem:[%s2329_s18 + $0x60] sm:$0xff]  ;;  %v2420_v46 = vld [vmem:[%s2329_s18 + $0x70] sm:$0xff]  ;;  %v2460_v6 = vld [vmem:[%s2336_s16 + $0x78] sm:$0xff]  ;;  %v3644_v32 = vunpack.c.l.bf16 %v2411_v43 }
 0x137   : > { %v2471_v2 = vld [vmem:[%s2329_s18 + $0x8] sm:$0xff]  ;;  %v2484_v1 = vld [vmem:[%s2329_s18 + $0x38] sm:$0xff] }
 0x138   : > { %864 = vperm.xlu1 %1556, %v856_v7   ;;  %859 = vperm.xlu0 %1555, %v855_v8   ;;  %v2474_v7 = vld [vmem:[%s2329_s18 + $0x18] sm:$0xff]  ;;  %v2491_v60 = vld [vmem:[%s2329_s18 + $0x48] sm:$0xff] }
 0x13c   : > { %696 = vperm.xlu1 %1556, %v688_v9   ;;  %691 = vperm.xlu0 %1555, %v687_v10   ;;  %v2494_v9 = vld [vmem:[%s2329_s18 + $0x58] sm:$0xff]  ;;  %v2497_v10 = vld [vmem:[%s2329_s18 + $0x68] sm:$0xff] }
 0x140   : > { %940 = vperm.xlu1 %1556, %v932_v11   ;;  %935 = vperm.xlu0 %1555, %v931_v12   ;;  %v2481_v12 = vld [vmem:[%s2329_s18 + $0x28] sm:$0xff]  ;;  %v2500_v11 = vld [vmem:[%s2329_s18 + $0x78] sm:$0xff]  ;;  %s1819_s18 = scalar_lea.vmem %s1818_s5, 8192 }
 0x141   : > { %p1821_p1 = scmp.lt.s32.totalorder %s1819_s18, %s1813_s24 }
 0x143   : > { %p1822_p10 = por %p1821_p1, %p1820_p9 }
 0x144   : > { %1080 = vperm.xlu1 %1556, %v1072_v13   ;;  %1075 = vperm.xlu0 %1555, %v1071_v14   ;;  %v3659_v14 = vunpack.c.h.bf16 %v2444_v62 }
 0x145   : > { %p1823_p11 = pnand %p1822_p10, %p1816_p4 }
 0x1ab   : > { %v816_v52 = vpop.permute.xlu1 %815 }
 0x1ac   : > { %v2520_v57 = vmul.f32 %v816_v52, %v779_v23  ;;  %v2524_v53 = vmul.f32 %v816_v52, %v780_v24  ;;  %v2528_v59 = vmul.f32 %v816_v52, %v783_v25  ;;  %v2532_v13 = vmul.f32 %v816_v52, %v784_v26  ;;  %v572_v25 = vpop.permute.xlu0 %571 }
 0x1ad   : > { %v2536_v0 = vmul.f32 %v816_v52, %v787_v27  ;;  %v2540_v23 = vmul.f32 %v816_v52, %v788_v28  ;;  %v2544_v15 = vmul.f32 %v816_v52, %v791_v29  ;;  %v2548_v24 = vmul.f32 %v816_v52, %v792_v30 }
 0x1ae   : > { %3627 = vst [vmem:[#allocation27_spill] sm:$0xff] %v2528_v59  ;;  %3628 = vst [vmem:[#allocation28_spill] sm:$0xff] %v2532_v13  ;;  %v2552_v16 = vmul.f32 %v816_v52, %v795_v33  ;;  %v2556_v26 = vmul.f32 %v816_v52, %v796_v34  ;;  %v2560_v17 = vmul.f32 %v816_v52, %v799_v35  ;;  %v3641_v34 = vunpack.c.h.bf16 %v2401_v37 }
 0x1af   : > { %3629 = vst [vmem:[#allocation29_spill] sm:$0xff] %v2536_v0  ;;  %3630 = vst [vmem:[#allocation30_spill] sm:$0xff] %v2540_v23  ;;  %v2564_v27 = vmul.f32 %v816_v52, %v800_v36  ;;  %v2568_v18 = vmul.f32 %v816_v52, %v803_v39  ;;  %v2572_v28 = vmul.f32 %v816_v52, %v804_v40  ;;  %v3643_v39 = vunpack.c.h.bf16 %v2404_v38 }
 0x1b0   : > { %3631 = vst [vmem:[#allocation31_spill] sm:$0xff] %v2544_v15  ;;  %3632 = vst [vmem:[#allocation32_spill] sm:$0xff] %v2548_v24  ;;  %v2576_v19 = vmul.f32 %v816_v52, %v807_v41  ;;  %v2580_v29 = vmul.f32 %v816_v52, %v808_v42  ;;  %v2584_v20 = vmul.f32 %v572_v25, %v535_v47  ;;  %v821_v41 = vpop.permute.xlu1 %820  ;;  %v3645_v47 = vunpack.c.h.bf16 %v2411_v43  ;;  %v577_v8 = vpop.permute.xlu0 %576 }
 0x1b1   : > { %3633 = vst [vmem:[#allocation33_spill] sm:$0xff] %v2552_v16  ;;  %3634 = vst [vmem:[#allocation34_spill] sm:$0xff] %v2556_v26  ;;  %v2588_v30 = vmul.f32 %v572_v25, %v536_v48  ;;  %v2592_v21 = vmul.f32 %v572_v25, %v539_v49  ;;  %v2596_v33 = vmul.f32 %v572_v25, %v540_v50  ;;  %v3646_v37 = vunpack.c.l.bf16 %v2414_v44 }
 0x1b2   : > { %3635 = vst [vmem:[#allocation35_spill] sm:$0xff] %v2560_v17  ;;  %3636 = vst [vmem:[#allocation36_spill] sm:$0xff] %v2564_v27  ;;  %v2600_v22 = vmul.f32 %v572_v25, %v543_v51  ;;  %v2604_v35 = vmul.f32 %v572_v25, %v3641_v34  ;;  %v2608_v36 = vmul.f32 %v572_v25, %v3642_v31  ;;  %v3647_v50 = vunpack.c.h.bf16 %v2414_v44 }
 0x1b3   : > { %3637 = vst [vmem:[#allocation37_spill] sm:$0xff] %v2568_v18  ;;  %3638 = vst [vmem:[#allocation38_spill] sm:$0xff] %v2572_v28  ;;  %v2612_v40 = vmul.f32 %v572_v25, %v3643_v39  ;;  %v2616_v42 = vmul.f32 %v572_v25, %v3644_v32  ;;  %v2620_v48 = vmul.f32 %v572_v25, %v3645_v47  ;;  %v3648_v38 = vunpack.c.l.bf16 %v2417_v45 }
 0x1b4   : > { %3639 = vst [vmem:[#allocation39_spill] sm:$0xff] %v2576_v19  ;;  %3640 = vst [vmem:[#allocation40_spill] sm:$0xff] %v2580_v29  ;;  %v2624_v49 = vmul.f32 %v572_v25, %v3646_v37  ;;  %v2628_v51 = vmul.f32 %v572_v25, %v3647_v50  ;;  %v3649_v34 = vunpack.c.h.bf16 %v2417_v45  ;;  %v3650_v43 = vunpack.c.l.bf16 %v2420_v46 }
 0x1b5   : > { %v2632_v52 = vmul.f32 %v572_v25, %v3648_v38  ;;  %v3651_v32 = vunpack.c.h.bf16 %v2420_v46  ;;  %v3652_v44 = vunpack.c.l.bf16 %v2431_v55  ;;  %v3653_v50 = vunpack.c.h.bf16 %v2431_v55 }
 0x1b6   : > { %v2636_v31 = vmul.f32 %v572_v25, %v3649_v34  ;;  %v2640_v39 = vmul.f32 %v572_v25, %v3650_v43  ;;  %v3654_v45 = vunpack.c.l.bf16 %v2434_v56  ;;  %v2660_v43 = vmul.f32 %v821_v41, %v3655_v63 }
 0x1b7   : > { %v2644_v47 = vmul.f32 %v572_v25, %v3651_v32  ;;  %v2648_v37 = vmul.f32 %v821_v41, %v3652_v44  ;;  %v2652_v38 = vmul.f32 %v821_v41, %v3653_v50  ;;  %v3656_v46 = vunpack.c.l.bf16 %v2441_v61 }
 0x1b8   : > { %v2656_v34 = vmul.f32 %v821_v41, %v3654_v45  ;;  %v3657_v32 = vunpack.c.h.bf16 %v2441_v61  ;;  %v3658_v55 = vunpack.c.l.bf16 %v2444_v62  ;;  %v2676_v45 = vmul.f32 %v821_v41, %v3659_v14 }
 0x1b9   : > { %v2664_v25 = vmul.f32 %v821_v41, %v3656_v46  ;;  %v3660_v56 = vunpack.c.l.bf16 %v2451_v3  ;;  %v3661_v46 = vunpack.c.h.bf16 %v2451_v3  ;;  %v3662_v61 = vunpack.c.l.bf16 %v2454_v4 }
 0x1ba   : > { %v2668_v44 = vmul.f32 %v821_v41, %v3657_v32  ;;  %v2672_v50 = vmul.f32 %v821_v41, %v3658_v55  ;;  %v3663_v55 = vunpack.c.h.bf16 %v2454_v4  ;;  %v3664_v62 = vunpack.c.l.bf16 %v2457_v5 }
 0x1bb   : > { %v2680_v63 = vmul.f32 %v821_v41, %v3660_v56  ;;  %v2684_v54 = vmul.f32 %v821_v41, %v3661_v46  ;;  %v2688_v32 = vmul.f32 %v821_v41, %v3662_v61  ;;  %v3665_v29 = vunpack.c.h.bf16 %v2457_v5 }
 0x1bc   : > { %v2692_v58 = vmul.f32 %v821_v41, %v3663_v55  ;;  %v2696_v14 = vmul.f32 %v821_v41, %v3664_v62  ;;  %v3666_v3 = vunpack.c.l.bf16 %v2460_v6  ;;  %v3667_v19 = vunpack.c.h.bf16 %v2460_v6 }
 0x1bd   : > { %v2700_v56 = vmul.f32 %v821_v41, %v3665_v29  ;;  %v3668_v4 = vunpack.c.l.bf16 %v2471_v2  ;;  %v3669_v28 = vunpack.c.h.bf16 %v2471_v2  ;;  %v3670_v62 = vunpack.c.l.bf16 %v2474_v7  ;;  %v621_v2 = vpop.permute.xlu1 %620 }
 0x1be   : > { %v2704_v46 = vmul.f32 %v821_v41, %v3666_v3  ;;  %v2708_v61 = vmul.f32 %v821_v41, %v3667_v19  ;;  %v3671_v5 = vunpack.c.h.bf16 %v2474_v7  ;;  %v3672_v17 = vunpack.c.l.bf16 %v2481_v12 }
 0x1bf   : > { %v581_v55 = vmul.f32 %v577_v8, %v3668_v4  ;;  %v582_v18 = vmul.f32 %v577_v8, %v3669_v28  ;;  %v585_v27 = vmul.f32 %v577_v8, %v3670_v62  ;;  %v3673_v26 = vunpack.c.h.bf16 %v2481_v12 }
 0x1c0   : > { %v586_v29 = vmul.f32 %v577_v8, %v3671_v5  ;;  %v589_v3 = vmul.f32 %v577_v8, %v3672_v17  ;;  %v3674_v19 = vunpack.c.l.bf16 %v2484_v1  ;;  %v3675_v4 = vunpack.c.h.bf16 %v2484_v1 }
 0x1c1   : > { %v590_v6 = vmul.f32 %v577_v8, %v3673_v26  ;;  %v3676_v28 = vunpack.c.l.bf16 %v2491_v60  ;;  %v3677_v62 = vunpack.c.h.bf16 %v2491_v60  ;;  %v3678_v5 = vunpack.c.l.bf16 %v2494_v9 }
 0x1c2   : > { %v593_v41 = vmul.f32 %v577_v8, %v3674_v19  ;;  %v594_v16 = vmul.f32 %v577_v8, %v3675_v4  ;;  %v3679_v17 = vunpack.c.h.bf16 %v2494_v9  ;;  %v3680_v26 = vunpack.c.l.bf16 %v2497_v10 }
 0x1c3   : > { %v597_v24 = vmul.f32 %v577_v8, %v3676_v28  ;;  %v598_v7 = vmul.f32 %v577_v8, %v3677_v62  ;;  %v601_v15 = vmul.f32 %v577_v8, %v3678_v5  ;;  %v3681_v19 = vunpack.c.h.bf16 %v2497_v10 }
 0x1c4   : > { %v602_v12 = vmul.f32 %v577_v8, %v3679_v17  ;;  %v605_v23 = vmul.f32 %v577_v8, %v3680_v26  ;;  %v3682_v4 = vunpack.c.l.bf16 %v2500_v11  ;;  %v3683_v28 = vunpack.c.h.bf16 %v2500_v11 }
 0x1c5   : > { %v606_v1 = vmul.f32 %v577_v8, %v3681_v19  ;;  %v2742_v60 = vadd.f32 %v621_v2, %v581_v55  ;;  %v2744_v62 = vadd.f32 %v621_v2, %v582_v18  ;;  %v2746_v5 = vadd.f32 %v621_v2, %v585_v27 }
 0x1c6   : > { %v609_v0 = vmul.f32 %v577_v8, %v3682_v4  ;;  %v610_v13 = vmul.f32 %v577_v8, %v3683_v28  ;;  %v2748_v9 = vadd.f32 %v621_v2, %v586_v29  ;;  %v2750_v17 = vadd.f32 %v621_v2, %v589_v3  ;;  %v616_v4 = vpop.permute.xlu0 %615 }
 0x1c7   : > { %v2752_v26 = vadd.f32 %v621_v2, %v590_v6  ;;  %v2754_v10 = vadd.f32 %v621_v2, %v593_v41  ;;  %v2756_v19 = vadd.f32 %v621_v2, %v594_v16  ;;  %v2758_v59 = vadd.f32 %v621_v2, %v597_v24 }
 0x1c8   : > { %v2760_v8 = vadd.f32 %v621_v2, %v598_v7  ;;  %v2762_v11 = vadd.f32 %v621_v2, %v601_v15  ;;  %v2764_v18 = vadd.f32 %v621_v2, %v602_v12  ;;  %v2766_v27 = vadd.f32 %v621_v2, %v605_v23 }
 0x1c9   : > { %v2768_v55 = vadd.f32 %v621_v2, %v606_v1  ;;  %v2770_v29 = vadd.f32 %v621_v2, %v609_v0  ;;  %v2772_v3 = vadd.f32 %v621_v2, %v610_v13  ;;  %v2775_v16 = vadd.f32 %v616_v4, %v2584_v20 }
 0x1ca   : > { %3684 = vst [vmem:[#allocation41_spill] sm:$0xff] %v2762_v11  ;;  %3685 = vst [vmem:[#allocation42_spill] sm:$0xff] %v2764_v18  ;;  %v2778_v24 = vadd.f32 %v616_v4, %v2588_v30  ;;  %v2781_v6 = vadd.f32 %v616_v4, %v2592_v21  ;;  %v2784_v15 = vadd.f32 %v616_v4, %v2596_v33  ;;  %v865_v30 = vpop.permute.xlu1 %864 }
 0x1cb   : > { %3686 = vst [vmem:[#allocation43_spill] sm:$0xff] %v2766_v27  ;;  %3687 = vst [vmem:[#allocation44_spill] sm:$0xff] %v2768_v55  ;;  %v2787_v23 = vadd.f32 %v616_v4, %v2600_v22  ;;  %v2790_v0 = vadd.f32 %v616_v4, %v2604_v35  ;;  %v2793_v13 = vadd.f32 %v616_v4, %v2608_v36 }
 0x1cc   : > { %3688 = vst [vmem:[#allocation45_spill] sm:$0xff] %v2770_v29  ;;  %3689 = vst [vmem:[#allocation46_spill] sm:$0xff] %v2772_v3  ;;  %v2796_v20 = vadd.f32 %v616_v4, %v2612_v40  ;;  %v2799_v41 = vadd.f32 %v616_v4, %v2616_v42  ;;  %v2802_v21 = vadd.f32 %v616_v4, %v2620_v48 }
 0x1cd   : > { %3690 = vst [vmem:[#allocation47_spill] sm:$0xff] %v2775_v16  ;;  %3691 = vst [vmem:[#allocation48_spill] sm:$0xff] %v2778_v24  ;;  %v2805_v33 = vadd.f32 %v616_v4, %v2624_v49  ;;  %v2808_v22 = vadd.f32 %v616_v4, %v2628_v51  ;;  %v2811_v35 = vadd.f32 %v616_v4, %v2632_v52 }
 0x1ce   : > { %3692 = vst [vmem:[#allocation49_spill] sm:$0xff] %v2781_v6  ;;  %3693 = vst [vmem:[#allocation50_spill] sm:$0xff] %v2784_v15  ;;  %v2814_v36 = vadd.f32 %v616_v4, %v2636_v31  ;;  %v2817_v40 = vadd.f32 %v616_v4, %v2640_v39  ;;  %v2820_v42 = vadd.f32 %v616_v4, %v2644_v47 }
 0x1cf   : > { %3694 = vst [vmem:[#allocation51_spill] sm:$0xff] %v2787_v23  ;;  %3695 = vst [vmem:[#allocation52_spill] sm:$0xff] %v2790_v0  ;;  %v2823_v48 = vadd.f32 %v865_v30, %v2648_v37  ;;  %v2826_v49 = vadd.f32 %v865_v30, %v2652_v38  ;;  %v2829_v51 = vadd.f32 %v865_v30, %v2656_v34  ;;  %v860_v38 = vpop.permute.xlu0 %859 }
 0x1d0   : > { %3696 = vst [vmem:[#allocation53_spill] sm:$0xff] %v2793_v13  ;;  %3697 = vst [vmem:[#allocation54_spill] sm:$0xff] %v2796_v20  ;;  %v2832_v52 = vadd.f32 %v865_v30, %v2660_v43  ;;  %v2835_v31 = vadd.f32 %v865_v30, %v2664_v25  ;;  %v2838_v39 = vadd.f32 %v865_v30, %v2668_v44 }
 0x1d1   : > { %3698 = vst [vmem:[#allocation55_spill] sm:$0xff] %v2799_v41  ;;  %3699 = vst [vmem:[#allocation56_spill] sm:$0xff] %v2802_v21  ;;  %v2841_v47 = vadd.f32 %v865_v30, %v2672_v50  ;;  %v2844_v37 = vadd.f32 %v865_v30, %v2676_v45  ;;  %v2847_v2 = vadd.f32 %v865_v30, %v2680_v63  ;;  %vm901_vm0 = vcmp.gt.f32.partialorder %v2823_v48, 0.0 }
 0x1d2   : > { %3700 = vst [vmem:[#allocation57_spill] sm:$0xff] %v2805_v33  ;;  %3701 = vst [vmem:[#allocation58_spill] sm:$0xff] %v2808_v22  ;;  %v2850_v34 = vadd.f32 %v865_v30, %v2684_v54  ;;  %v2853_v43 = vadd.f32 %v865_v30, %v2688_v32  ;;  %v2856_v25 = vadd.f32 %v865_v30, %v2692_v58  ;;  %v3708_v58 = vld [vmem:[#allocation27_spill] sm:$0xff]  ;;  %vm902_vm1 = vcmp.gt.f32.partialorder %v2826_v49, 0.0 }
 0x1d3   : > { %3702 = vst [vmem:[#allocation59_spill] sm:$0xff] %v2811_v35  ;;  %3703 = vst [vmem:[#allocation60_spill] sm:$0xff] %v2814_v36  ;;  %v2859_v44 = vadd.f32 %v865_v30, %v2696_v14  ;;  %v2862_v50 = vadd.f32 %v865_v30, %v2700_v56  ;;  %v2865_v45 = vadd.f32 %v865_v30, %v2704_v46  ;;  %v3710_v14 = vld [vmem:[#allocation28_spill] sm:$0xff]  ;;  %v3712_v56 = vld [vmem:[#allocation29_spill] sm:$0xff]  ;;  %vm905_vm2 = vcmp.gt.f32.partialorder %v2829_v51, 0.0 }
 0x1d4   : > { %3704 = vst [vmem:[#allocation61_spill] sm:$0xff] %v2817_v40  ;;  %3705 = vst [vmem:[#allocation62_spill] sm:$0xff] %v2820_v42  ;;  %v2868_v63 = vadd.f32 %v865_v30, %v2708_v61  ;;  %v2871_v54 = vadd.f32 %v860_v38, %v2520_v57  ;;  %v2874_v32 = vadd.f32 %v860_v38, %v2524_v53  ;;  %v3714_v46 = vld [vmem:[#allocation30_spill] sm:$0xff]  ;;  %v3716_v61 = vld [vmem:[#allocation31_spill] sm:$0xff]  ;;  %v697_v53 = vpop.permute.xlu1 %696  ;;  %vm906_vm3 = vcmp.gt.f32.partialorder %v2832_v52, 0.0 }
 0x1d5   : > { %v2877_v7 = vadd.f32 %v860_v38, %v3708_v58  ;;  %v2880_v12 = vadd.f32 %v860_v38, %v3710_v14  ;;  %v2883_v1 = vadd.f32 %v860_v38, %v3712_v56  ;;  %v2886_v28 = vadd.f32 %v860_v38, %v3714_v46  ;;  %v3718_v57 = vld [vmem:[#allocation32_spill] sm:$0xff]  ;;  %v3722_v58 = vld [vmem:[#allocation34_spill] sm:$0xff]  ;;  %v3723_v14 = vld [vmem:[#allocation35_spill] sm:$0xff] }
 0x1d6   : > { %3706 = vst [vmem:[#allocation63_spill] sm:$0xff] %v2871_v54  ;;  %3707 = vst [vmem:[#allocation64_spill] sm:$0xff] %v2874_v32  ;;  %v2889_v4 = vadd.f32 %v860_v38, %v3716_v61  ;;  %v2892_v30 = vadd.f32 %v860_v38, %v3718_v57  ;;  %v3720_v32 = vld [vmem:[#allocation33_spill] sm:$0xff]  ;;  %v3724_v56 = vld [vmem:[#allocation36_spill] sm:$0xff]  ;;  %vm909_vm4 = vcmp.gt.f32.partialorder %v2835_v31, 0.0  ;;  %vm910_vm5 = vcmp.gt.f32.partialorder %v2838_v39, 0.0 }
 0x1d7   : > { %3709 = vst [vmem:[#allocation27_spill] sm:$0xff] %v2877_v7  ;;  %3711 = vst [vmem:[#allocation28_spill] sm:$0xff] %v2880_v12  ;;  %v2895_v54 = vadd.f32 %v860_v38, %v3720_v32  ;;  %v2898_v7 = vadd.f32 %v860_v38, %v3722_v58  ;;  %v2901_v12 = vadd.f32 %v860_v38, %v3723_v14  ;;  %v3725_v46 = vld [vmem:[#allocation37_spill] sm:$0xff]  ;;  %v3726_v61 = vld [vmem:[#allocation38_spill] sm:$0xff]  ;;  %vm913_vm6 = vcmp.gt.f32.partialorder %v2841_v47, 0.0 }
 0x1d8   : > { %3713 = vst [vmem:[#allocation29_spill] sm:$0xff] %v2883_v1  ;;  %3715 = vst [vmem:[#allocation30_spill] sm:$0xff] %v2886_v28  ;;  %v2904_v1 = vadd.f32 %v860_v38, %v3724_v56  ;;  %v2907_v28 = vadd.f32 %v860_v38, %v3725_v46  ;;  %v3727_v57 = vld [vmem:[#allocation39_spill] sm:$0xff]  ;;  %v3728_v32 = vld [vmem:[#allocation40_spill] sm:$0xff]  ;;  %v2919_v58 = vmul.f32 %v697_v53, %v2742_v60  ;;  %vm914_vm7 = vcmp.gt.f32.partialorder %v2844_v37, 0.0 }
 0x1d9   : > { %3717 = vst [vmem:[#allocation31_spill] sm:$0xff] %v2889_v4  ;;  %3719 = vst [vmem:[#allocation32_spill] sm:$0xff] %v2892_v30  ;;  %v2910_v4 = vadd.f32 %v860_v38, %v3726_v61  ;;  %v2913_v30 = vadd.f32 %v860_v38, %v3727_v57  ;;  %v2922_v14 = vmul.f32 %v697_v53, %v2744_v62  ;;  %vm917_vm8 = vcmp.gt.f32.partialorder %v2847_v2, 0.0 }
 0x1da   : > { %3721 = vst [vmem:[#allocation33_spill] sm:$0xff] %v2895_v54  ;;  %v2916_v54 = vadd.f32 %v860_v38, %v3728_v32  ;;  %3729 = vst [vmem:[#allocation34_spill] sm:$0xff] %v2919_v58  ;;  %v2925_v56 = vmul.f32 %v697_v53, %v2746_v5  ;;  %v2928_v46 = vmul.f32 %v697_v53, %v2748_v9  ;;  %v692_v58 = vpop.permute.xlu0 %691  ;;  %vm918_vm9 = vcmp.gt.f32.partialorder %v2850_v34, 0.0 }
 0x1db   : > { %3730 = vst [vmem:[#allocation35_spill] sm:$0xff] %v2922_v14  ;;  %v2931_v61 = vmul.f32 %v697_v53, %v2750_v17  ;;  %v2934_v57 = vmul.f32 %v697_v53, %v2752_v26  ;;  %v2937_v38 = vmul.f32 %v697_v53, %v2754_v10  ;;  %v2940_v32 = vmul.f32 %v697_v53, %v2756_v19 }
 0x1dc   : > { %3731 = vst [vmem:[#allocation36_spill] sm:$0xff] %v2925_v56  ;;  %3732 = vst [vmem:[#allocation37_spill] sm:$0xff] %v2928_v46  ;;  %v2943_v14 = vmul.f32 %v697_v53, %v2758_v59  ;;  %v2946_v56 = vmul.f32 %v697_v53, %v2760_v8  ;;  %v2949_v46 = vmul.f32 %v697_v53, %v2762_v11  ;;  %vm921_vm10 = vcmp.gt.f32.partialorder %v2853_v43, 0.0 }
 0x1dd   : > { %3733 = vst [vmem:[#allocation38_spill] sm:$0xff] %v2931_v61  ;;  %3734 = vst [vmem:[#allocation39_spill] sm:$0xff] %v2934_v57  ;;  %v2952_v61 = vmul.f32 %v697_v53, %v2764_v18  ;;  %v2955_v57 = vmul.f32 %v697_v53, %v2766_v27  ;;  %vm922_vm11 = vcmp.gt.f32.partialorder %v2856_v25, 0.0  ;;  %vm925_vm12 = vcmp.gt.f32.partialorder %v2859_v44, 0.0 }
 0x1de   : > { %3735 = vst [vmem:[#allocation40_spill] sm:$0xff] %v2937_v38  ;;  %3736 = vst [vmem:[#allocation65_spill] sm:$0xff] %v2940_v32  ;;  %v2958_v38 = vmul.f32 %v697_v53, %v2768_v55  ;;  %v2961_v32 = vmul.f32 %v697_v53, %v2770_v29  ;;  %vm926_vm13 = vcmp.gt.f32.partialorder %v2862_v50, 0.0  ;;  %vm929_vm14 = vcmp.gt.f32.partialorder %v2865_v45, 0.0 }
 0x1df   : > { %3737 = vst [vmem:[#allocation66_spill] sm:$0xff] %v2943_v14  ;;  %3738 = vst [vmem:[#allocation67_spill] sm:$0xff] %v2946_v56  ;;  %v2964_v14 = vmul.f32 %v697_v53, %v2772_v3  ;;  %v2967_v56 = vmul.f32 %v692_v58, %v2775_v16  ;;  %v2985_v53 = vmul.f32 %v692_v58, %v2793_v13  ;;  %v3761_v13 = vld [vmem:[#allocation63_spill] sm:$0xff]  ;;  %v3769_v29 = vld [vmem:[#allocation29_spill] sm:$0xff]  ;;  %vm930_vm15 = vcmp.gt.f32.partialorder %v2868_v63, 0.0 }
 0x1e0   : > { %3739 = vst [vmem:[#allocation68_spill] sm:$0xff] %v2949_v46  ;;  %3740 = vst [vmem:[#allocation69_spill] sm:$0xff] %v2952_v61  ;;  %v2970_v46 = vmul.f32 %v692_v58, %v2778_v24  ;;  %v2973_v61 = vmul.f32 %v692_v58, %v2781_v6  ;;  %v941_v24 = vpop.permute.xlu1 %940  ;;  %v3765_v6 = vld [vmem:[#allocation27_spill] sm:$0xff]  ;;  %v3771_v27 = vld [vmem:[#allocation30_spill] sm:$0xff] }
 0x1e1   : > { %3741 = vst [vmem:[#allocation70_spill] sm:$0xff] %v2955_v57  ;;  %3742 = vst [vmem:[#allocation71_spill] sm:$0xff] %v2958_v38  ;;  %v2976_v57 = vmul.f32 %v692_v58, %v2784_v15  ;;  %v2979_v38 = vmul.f32 %v692_v58, %v2787_v23  ;;  %v3763_v23 = vld [vmem:[#allocation64_spill] sm:$0xff]  ;;  %v3773_v11 = vld [vmem:[#allocation31_spill] sm:$0xff] }
 0x1e2   : > { %3743 = vst [vmem:[#allocation72_spill] sm:$0xff] %v2961_v32  ;;  %3744 = vst [vmem:[#allocation73_spill] sm:$0xff] %v2964_v14  ;;  %v2982_v32 = vmul.f32 %v692_v58, %v2790_v0  ;;  %v3767_v14 = vld [vmem:[#allocation28_spill] sm:$0xff] }
 0x1e3   : > { %3745 = vst [vmem:[#allocation74_spill] sm:$0xff] %v2967_v56  ;;  %3746 = vst [vmem:[#allocation75_spill] sm:$0xff] %v2970_v46  ;;  %v2988_v56 = vmul.f32 %v692_v58, %v2796_v20  ;;  %v2991_v46 = vmul.f32 %v692_v58, %v2799_v41  ;;  %v973_v41 = vmul.f32 %v941_v24, %v2865_v45 }
 0x1e4   : > { %3747 = vst [vmem:[#allocation76_spill] sm:$0xff] %v2973_v61  ;;  %3748 = vst [vmem:[#allocation77_spill] sm:$0xff] %v2976_v57  ;;  %v2994_v61 = vmul.f32 %v692_v58, %v2802_v21  ;;  %v2997_v57 = vmul.f32 %v692_v58, %v2805_v33  ;;  %v946_v33 = vmul.f32 %v941_v24, %v2826_v49 }
 0x1e5   : > { %3749 = vst [vmem:[#allocation78_spill] sm:$0xff] %v2979_v38  ;;  %3750 = vst [vmem:[#allocation79_spill] sm:$0xff] %v2982_v32  ;;  %v3000_v38 = vmul.f32 %v692_v58, %v2808_v22  ;;  %v3003_v32 = vmul.f32 %v692_v58, %v2811_v35  ;;  %v953_v35 = vmul.f32 %v941_v24, %v2835_v31 }
 0x1e6   : > { %3751 = vst [vmem:[#allocation80_spill] sm:$0xff] %v2985_v53  ;;  %3752 = vst [vmem:[#allocation81_spill] sm:$0xff] %v2988_v56  ;;  %v3006_v53 = vmul.f32 %v692_v58, %v2814_v36  ;;  %v3009_v56 = vmul.f32 %v692_v58, %v2817_v40  ;;  %v958_v40 = vmul.f32 %v941_v24, %v2844_v37 }
 0x1e7   : > { %3753 = vst [vmem:[#allocation82_spill] sm:$0xff] %v2991_v46  ;;  %3754 = vst [vmem:[#allocation83_spill] sm:$0xff] %v2994_v61  ;;  %v3012_v46 = vmul.f32 %v692_v58, %v2820_v42  ;;  %v945_v61 = vmul.f32 %v941_v24, %v2823_v48  ;;  %v961_v58 = vmul.f32 %v941_v24, %v2847_v2 }
 0x1e8   : > { %3755 = vst [vmem:[#allocation84_spill] sm:$0xff] %v2997_v57  ;;  %3756 = vst [vmem:[#allocation85_spill] sm:$0xff] %v3000_v38  ;;  %v949_v57 = vmul.f32 %v941_v24, %v2829_v51  ;;  %v950_v38 = vmul.f32 %v941_v24, %v2832_v52  ;;  %v965_v42 = vmul.f32 %v941_v24, %v2853_v43 }
 0x1e9   : > { %3757 = vst [vmem:[#allocation86_spill] sm:$0xff] %v3003_v32  ;;  %3758 = vst [vmem:[#allocation87_spill] sm:$0xff] %v3006_v53  ;;  %v954_v32 = vmul.f32 %v941_v24, %v2838_v39  ;;  %v957_v53 = vmul.f32 %v941_v24, %v2841_v47  ;;  %v966_v36 = vmul.f32 %v941_v24, %v2856_v25 }
 0x1ea   : > { %3759 = vst [vmem:[#allocation88_spill] sm:$0xff] %v3009_v56  ;;  %3760 = vst [vmem:[#allocation89_spill] sm:$0xff] %v3012_v46  ;;  %v936_v56 = vpop.permute.xlu0 %935  ;;  %v962_v46 = vmul.f32 %v941_v24, %v2850_v34  ;;  %v969_v22 = vmul.f32 %v941_v24, %v2859_v44  ;;  %v970_v21 = vmul.f32 %v941_v24, %v2862_v50 }
 0x1eb   : > { %v974_v20 = vmul.f32 %v941_v24, %v2868_v63  ;;  %v3031_v0 = vmul.f32 %v936_v56, %v3761_v13  ;;  %v3034_v15 = vmul.f32 %v936_v56, %v3763_v23  ;;  %v3037_v16 = vmul.f32 %v936_v56, %v3765_v6  ;;  %v3775_v13 = vld [vmem:[#allocation32_spill] sm:$0xff]  ;;  %v3777_v23 = vld [vmem:[#allocation33_spill] sm:$0xff] }
 0x1ec   : > { %v3040_v3 = vmul.f32 %v936_v56, %v3767_v14  ;;  %v3043_v55 = vmul.f32 %v936_v56, %v3769_v29  ;;  %v3046_v18 = vmul.f32 %v936_v56, %v3771_v27  ;;  %v3049_v24 = vmul.f32 %v936_v56, %v3773_v11 }
 0x1ed   : > { %3762 = vst [vmem:[#allocation90_spill] sm:$0xff] %v3031_v0  ;;  %3764 = vst [vmem:[#allocation91_spill] sm:$0xff] %v3034_v15  ;;  %v3052_v0 = vmul.f32 %v936_v56, %v3775_v13  ;;  %v3055_v15 = vmul.f32 %v936_v56, %v3777_v23 }
 0x1ee   : > { %3766 = vst [vmem:[#allocation27_spill] sm:$0xff] %v3037_v16  ;;  %3768 = vst [vmem:[#allocation28_spill] sm:$0xff] %v3040_v3  ;;  %v3058_v16 = vmul.f32 %v936_v56, %v2898_v7  ;;  %v3061_v3 = vmul.f32 %v936_v56, %v2901_v12 }
 0x1ef   : > { %3770 = vst [vmem:[#allocation29_spill] sm:$0xff] %v3043_v55  ;;  %3772 = vst [vmem:[#allocation30_spill] sm:$0xff] %v3046_v18  ;;  %v3064_v55 = vmul.f32 %v936_v56, %v2904_v1  ;;  %v3067_v18 = vmul.f32 %v936_v56, %v2907_v28 }
 0x1f0   : > { %3774 = vst [vmem:[#allocation31_spill] sm:$0xff] %v3049_v24  ;;  %3776 = vst [vmem:[#allocation32_spill] sm:$0xff] %v3052_v0  ;;  %v3070_v24 = vmul.f32 %v936_v56, %v2910_v4  ;;  %v3073_v0 = vmul.f32 %v936_v56, %v2913_v30 }
 0x1f1   : > { %3778 = vst [vmem:[#allocation33_spill] sm:$0xff] %v3055_v15  ;;  %3779 = vst [vmem:[#allocation92_spill] sm:$0xff] %v3058_v16  ;;  %v3076_v15 = vmul.f32 %v936_v56, %v2916_v54  ;;  %v977_v56 = vsel %vm901_vm0, %v2823_v48, %v945_v61  ;;  %v986_v48 = vsel %vm910_vm5, %v2838_v39, %v954_v32  ;;  %vm657_vm0 = vcmp.gt.f32.partialorder %v2742_v60, 0.0  ;;  %v3797_v61 = vld [vmem:[#allocation39_spill] sm:$0xff]  ;;  %v3800_v32 = vld [vmem:[#allocation66_spill] sm:$0xff] }
 0x1f2   : > { %3780 = vst [vmem:[#allocation93_spill] sm:$0xff] %v3061_v3  ;;  %3781 = vst [vmem:[#allocation94_spill] sm:$0xff] %v3064_v55  ;;  %v1002_v39 = vsel %vm926_vm13, %v2862_v50, %v970_v21  ;;  %vm666_vm5 = vcmp.gt.f32.partialorder %v2752_v26, 0.0  ;;  %v3788_v21 = vld [vmem:[#allocation43_spill] sm:$0xff] }
 0x1f3   : > { %3782 = vst [vmem:[#allocation95_spill] sm:$0xff] %v3067_v18  ;;  %3783 = vst [vmem:[#allocation96_spill] sm:$0xff] %v3070_v24  ;;  %v982_v24 = vsel %vm906_vm3, %v2832_v52, %v950_v38  ;;  %v985_v18 = vsel %vm909_vm4, %v2835_v31, %v953_v35  ;;  %v994_v35 = vsel %vm918_vm9, %v2850_v34, %v962_v46  ;;  %vm662_vm3 = vcmp.gt.f32.partialorder %v2748_v9, 0.0  ;;  %v3796_v46 = vld [vmem:[#allocation38_spill] sm:$0xff]  ;;  %v3799_v38 = vld [vmem:[#allocation65_spill] sm:$0xff] }
 0x1f4   : > { %3784 = vst [vmem:[#allocation97_spill] sm:$0xff] %v3073_v0  ;;  %3785 = vst [vmem:[#allocation98_spill] sm:$0xff] %v3076_v15  ;;  %v978_v15 = vsel %vm902_vm1, %v2826_v49, %v946_v33  ;;  %v981_v0 = vsel %vm905_vm2, %v2829_v51, %v949_v57  ;;  %v989_v33 = vsel %vm913_vm6, %v2841_v47, %v957_v53  ;;  %vm658_vm1 = vcmp.gt.f32.partialorder %v2744_v62, 0.0  ;;  %v3798_v57 = vld [vmem:[#allocation40_spill] sm:$0xff]  ;;  %v3801_v53 = vld [vmem:[#allocation67_spill] sm:$0xff] }
 0x1f5   : > { %v990_v49 = vsel %vm914_vm7, %v2844_v37, %v958_v40  ;;  %v993_v51 = vsel %vm917_vm8, %v2847_v2, %v961_v58  ;;  %v997_v52 = vsel %vm921_vm10, %v2853_v43, %v965_v42  ;;  %v998_v31 = vsel %vm922_vm11, %v2856_v25, %v966_v36  ;;  %v3790_v36 = vld [vmem:[#allocation45_spill] sm:$0xff]  ;;  %v3791_v37 = vld [vmem:[#allocation46_spill] sm:$0xff]  ;;  %v3793_v43 = vld [vmem:[#allocation35_spill] sm:$0xff] }
 0x1f6   : > { %v1001_v40 = vsel %vm925_vm12, %v2859_v44, %v969_v22  ;;  %v1005_v47 = vsel %vm929_vm14, %v2865_v45, %v973_v41  ;;  %v1006_v42 = vsel %vm930_vm15, %v2868_v63, %v974_v20  ;;  %vm661_vm2 = vcmp.gt.f32.partialorder %v2746_v5, 0.0  ;;  %v3786_v20 = vld [vmem:[#allocation41_spill] sm:$0xff]  ;;  %v3787_v41 = vld [vmem:[#allocation42_spill] sm:$0xff]  ;;  %v3789_v22 = vld [vmem:[#allocation44_spill] sm:$0xff] }
 0x1f7   : > { %vm665_vm4 = vcmp.gt.f32.partialorder %v2750_v17, 0.0  ;;  %vm669_vm6 = vcmp.gt.f32.partialorder %v2754_v10, 0.0  ;;  %vm670_vm7 = vcmp.gt.f32.partialorder %v2756_v19, 0.0  ;;  %vm673_vm8 = vcmp.gt.f32.partialorder %v2758_v59, 0.0  ;;  %v3792_v2 = vld [vmem:[#allocation34_spill] sm:$0xff]  ;;  %v3794_v44 = vld [vmem:[#allocation36_spill] sm:$0xff] }
 0x1f8   : > { %vm674_vm9 = vcmp.gt.f32.partialorder %v2760_v8, 0.0  ;;  %vm677_vm10 = vcmp.gt.f32.partialorder %v3786_v20, 0.0  ;;  %vm678_vm11 = vcmp.gt.f32.partialorder %v3787_v41, 0.0  ;;  %vm681_vm12 = vcmp.gt.f32.partialorder %v3788_v21, 0.0  ;;  %v3795_v45 = vld [vmem:[#allocation37_spill] sm:$0xff]  ;;  %v3802_v58 = vld [vmem:[#allocation68_spill] sm:$0xff] }
 0x1f9   : > { %vm682_vm13 = vcmp.gt.f32.partialorder %v3789_v22, 0.0  ;;  %vm685_vm14 = vcmp.gt.f32.partialorder %v3790_v36, 0.0  ;;  %vm686_vm15 = vcmp.gt.f32.partialorder %v3791_v37, 0.0  ;;  %v733_v34 = vsel %vm657_vm0, %v2742_v60, %v3792_v2  ;;  %v3803_v2 = vld [vmem:[#allocation69_spill] sm:$0xff] }
 0x1fa   : > { %v734_v25 = vsel %vm658_vm1, %v2744_v62, %v3793_v43  ;;  %v737_v50 = vsel %vm661_vm2, %v2746_v5, %v3794_v44  ;;  %v738_v63 = vsel %vm662_vm3, %v2748_v9, %v3795_v45  ;;  %v741_v60 = vsel %vm665_vm4, %v2750_v17, %v3796_v46  ;;  %v3804_v43 = vld [vmem:[#allocation70_spill] sm:$0xff]  ;;  %v3805_v44 = vld [vmem:[#allocation71_spill] sm:$0xff]  ;;  %v3806_v45 = vld [vmem:[#allocation72_spill] sm:$0xff] }
 0x1fb   : > { %v742_v62 = vsel %vm666_vm5, %v2752_v26, %v3797_v61  ;;  %v745_v5 = vsel %vm669_vm6, %v2754_v10, %v3798_v57  ;;  %v746_v9 = vsel %vm670_vm7, %v2756_v19, %v3799_v38  ;;  %v749_v17 = vsel %vm673_vm8, %v2758_v59, %v3800_v32  ;;  %v3807_v46 = vld [vmem:[#allocation73_spill] sm:$0xff] }
 0x1fc   : > { %v750_v26 = vsel %vm674_vm9, %v2760_v8, %v3801_v53  ;;  %v753_v10 = vsel %vm677_vm10, %v3786_v20, %v3802_v58  ;;  %v754_v19 = vsel %vm678_vm11, %v3787_v41, %v3803_v2  ;;  %v757_v59 = vsel %vm681_vm12, %v3788_v21, %v3804_v43 }
 0x1fd   : > { %v758_v8 = vsel %vm682_vm13, %v3789_v22, %v3805_v44  ;;  %v761_v20 = vsel %vm685_vm14, %v3790_v36, %v3806_v45  ;;  %v762_v41 = vsel %vm686_vm15, %v3791_v37, %v3807_v46  ;;  %v1009_v61 = vadd.f32 %v977_v56, %v733_v34 }
 0x1fe   : > { %v1010_v57 = vadd.f32 %v978_v15, %v734_v25  ;;  %v1013_v38 = vadd.f32 %v981_v0, %v737_v50  ;;  %v1014_v32 = vadd.f32 %v982_v24, %v738_v63  ;;  %v1017_v21 = vadd.f32 %v985_v18, %v741_v60  ;;  %v1081_v15 = vpop.permute.xlu1 %1080 }
 0x1ff   : > { %v1018_v53 = vadd.f32 %v986_v48, %v742_v62  ;;  %v1021_v58 = vadd.f32 %v989_v33, %v745_v5  ;;  %v1022_v2 = vadd.f32 %v990_v49, %v746_v9  ;;  %v1025_v22 = vadd.f32 %v993_v51, %v749_v17 }
 0x200   : > { %v1026_v43 = vadd.f32 %v994_v35, %v750_v26  ;;  %v1029_v44 = vadd.f32 %v997_v52, %v753_v10  ;;  %v1030_v55 = vadd.f32 %v998_v31, %v754_v19  ;;  %v1033_v3 = vadd.f32 %v1001_v40, %v757_v59 }
 0x201   : > { %v1034_v36 = vadd.f32 %v1002_v39, %v758_v8  ;;  %v1037_v45 = vadd.f32 %v1005_v47, %v761_v20  ;;  %v1038_v16 = vadd.f32 %v1006_v42, %v762_v41  ;;  %vm1041_vm1 = vcmp.gt.f32.partialorder %v1009_v61, 0.0 }
 0x202   : > { %vm1042_vm2 = vcmp.gt.f32.partialorder %v1010_v57, 0.0  ;;  %vm1045_vm3 = vcmp.gt.f32.partialorder %v1013_v38, 0.0  ;;  %vm1046_vm4 = vcmp.gt.f32.partialorder %v1014_v32, 0.0  ;;  %vm1049_vm5 = vcmp.gt.f32.partialorder %v1017_v21, 0.0 }
 0x203   : > { %vm1050_vm6 = vcmp.gt.f32.partialorder %v1018_v53, 0.0  ;;  %vm1053_vm7 = vcmp.gt.f32.partialorder %v1021_v58, 0.0  ;;  %vm1054_vm8 = vcmp.gt.f32.partialorder %v1022_v2, 0.0  ;;  %vm1057_vm9 = vcmp.gt.f32.partialorder %v1025_v22, 0.0 }
 0x204   : > { %vm1058_vm10 = vcmp.gt.f32.partialorder %v1026_v43, 0.0  ;;  %vm1061_vm11 = vcmp.gt.f32.partialorder %v1029_v44, 0.0  ;;  %vm1062_vm12 = vcmp.gt.f32.partialorder %v1030_v55, 0.0  ;;  %vm1065_vm13 = vcmp.gt.f32.partialorder %v1033_v3, 0.0 }
 0x205   : > { %vm1066_vm14 = vcmp.gt.f32.partialorder %v1034_v36, 0.0  ;;  %vm1069_vm15 = vcmp.gt.f32.partialorder %v1037_v45, 0.0  ;;  %vm1070_vm0 = vcmp.gt.f32.partialorder %v1038_v16, 0.0  ;;  %v1085_v18 = vmul.f32 %v1081_v15, %v1009_v61 }
 0x206   : > { %v1086_v0 = vmul.f32 %v1081_v15, %v1010_v57  ;;  %v1089_v24 = vmul.f32 %v1081_v15, %v1013_v38  ;;  %v1090_v56 = vmul.f32 %v1081_v15, %v1014_v32  ;;  %v1093_v48 = vmul.f32 %v1081_v15, %v1017_v21 }
 0x207   : > { %v1094_v33 = vmul.f32 %v1081_v15, %v1018_v53  ;;  %v1097_v49 = vmul.f32 %v1081_v15, %v1021_v58  ;;  %v1098_v51 = vmul.f32 %v1081_v15, %v1022_v2  ;;  %v1101_v35 = vmul.f32 %v1081_v15, %v1025_v22 }
 0x208   : > { %v1102_v52 = vmul.f32 %v1081_v15, %v1026_v43  ;;  %v1105_v31 = vmul.f32 %v1081_v15, %v1029_v44  ;;  %v1106_v40 = vmul.f32 %v1081_v15, %v1030_v55  ;;  %v1109_v39 = vmul.f32 %v1081_v15, %v1033_v3 }
 0x209   : > { %v1110_v47 = vmul.f32 %v1081_v15, %v1034_v36  ;;  %v1113_v42 = vmul.f32 %v1081_v15, %v1037_v45  ;;  %v1114_v37 = vmul.f32 %v1081_v15, %v1038_v16  ;;  %v1117_v34 = vsel %vm1041_vm1, %v1009_v61, %v1085_v18  ;;  %v3819_v61 = vld [vmem:[#allocation91_spill] sm:$0xff]  ;;  %v3827_v15 = vld [vmem:[#allocation92_spill] sm:$0xff]  ;;  %v3828_v18 = vld [vmem:[#allocation93_spill] sm:$0xff] }
 0x20a   : > { %v1118_v25 = vsel %vm1042_vm2, %v1010_v57, %v1086_v0  ;;  %v1121_v50 = vsel %vm1045_vm3, %v1013_v38, %v1089_v24  ;;  %v1122_v63 = vsel %vm1046_vm4, %v1014_v32, %v1090_v56  ;;  %v1125_v60 = vsel %vm1049_vm5, %v1017_v21, %v1093_v48  ;;  %1150 = vst [vmem:[%s3231_s26 + $0x10] sm:$0xff] %v1117_v34  ;;  %v3820_v38 = vld [vmem:[#allocation27_spill] sm:$0xff]  ;;  %v3821_v21 = vld [vmem:[#allocation28_spill] sm:$0xff]  ;;  %v3829_v0 = vld [vmem:[#allocation94_spill] sm:$0xff] }
 0x20b   : > { %v1126_v62 = vsel %vm1050_vm6, %v1018_v53, %v1094_v33  ;;  %v1129_v5 = vsel %vm1053_vm7, %v1021_v58, %v1097_v49  ;;  %v1130_v9 = vsel %vm1054_vm8, %v1022_v2, %v1098_v51  ;;  %vm3808_vm1 = vcmask 130048   ;;  %1154 = vst [vmem:[%s3231_s26 + $0x30] sm:$0xff] %v1121_v50  ;;  %1158 = vst [vmem:[%s3231_s26 + $0x50] sm:$0xff] %v1125_v60  ;;  %v3822_v58 = vld [vmem:[#allocation29_spill] sm:$0xff]  ;;  %v3830_v24 = vld [vmem:[#allocation95_spill] sm:$0xff] }
 0x20c   : > { %1151 = vst.msk [vmem:[%s3231_s26 + $0x18] sm:$0xff] %vm3808_vm1, %v1118_v25  ;;  %vm3809_vm2 = vmmov %vm3808_vm1  ;;  %v1133_v17 = vsel %vm1057_vm9, %v1025_v22, %v1101_v35  ;;  %v1134_v26 = vsel %vm1058_vm10, %v1026_v43, %v1102_v52  ;;  %v1137_v10 = vsel %vm1061_vm11, %v1029_v44, %v1105_v31  ;;  %v1138_v19 = vsel %vm1062_vm12, %v1030_v55, %v1106_v40  ;;  %v3816_v55 = vld [vmem:[#allocation63_spill] sm:$0xff]  ;;  %v3823_v22 = vld [vmem:[#allocation30_spill] sm:$0xff] }
 0x20d   : > { %1155 = vst.msk [vmem:[%s3231_s26 + $0x38] sm:$0xff] %vm3809_vm2, %v1122_v63  ;;  %vm3810_vm3 = vmmov %vm3808_vm1  ;;  %v1141_v59 = vsel %vm1065_vm13, %v1033_v3, %v1109_v39  ;;  %v1142_v8 = vsel %vm1066_vm14, %v1034_v36, %v1110_v47  ;;  %v1145_v20 = vsel %vm1069_vm15, %v1037_v45, %v1113_v42  ;;  %v1146_v46 = vsel %vm1070_vm0, %v1038_v16, %v1114_v37  ;;  %v3817_v3 = vld [vmem:[#allocation64_spill] sm:$0xff]  ;;  %v3818_v16 = vld [vmem:[#allocation90_spill] sm:$0xff] }
 0x20e   : > { %1159 = vst.msk [vmem:[%s3231_s26 + $0x58] sm:$0xff] %vm3810_vm3, %v1126_v62  ;;  %1162 = vst [vmem:[%s3231_s26 + $0x70] sm:$0xff] %v1129_v5  ;;  %vm899_vm9 = vcmp.gt.f32.partialorder %v3816_v55, 0.0  ;;  %vm900_vm10 = vcmp.gt.f32.partialorder %v3817_v3, 0.0  ;;  %vm903_vm11 = vcmp.gt.f32.partialorder %v3765_v6, 0.0  ;;  %vm904_vm0 = vcmp.gt.f32.partialorder %v3767_v14, 0.0 }
 0x20f   : > { %vm3811_vm4 = vmmov %vm3808_vm1  ;;  %1166 = vst [vmem:[%s3231_s26 + $0x90] sm:$0xff] %v1133_v17  ;;  %vm907_vm12 = vcmp.gt.f32.partialorder %v3769_v29, 0.0  ;;  %vm908_vm13 = vcmp.gt.f32.partialorder %v3771_v27, 0.0  ;;  %vm911_vm14 = vcmp.gt.f32.partialorder %v3773_v11, 0.0  ;;  %vm912_vm15 = vcmp.gt.f32.partialorder %v3775_v13, 0.0  ;;  %v3824_v44 = vld [vmem:[#allocation31_spill] sm:$0xff] }
 0x210   : > { %1163 = vst.msk [vmem:[%s3231_s26 + $0x78] sm:$0xff] %vm3811_vm4, %v1130_v9  ;;  %vm3812_vm5 = vmmov %vm3808_vm1  ;;  %vm916_vm2 = vcmp.gt.f32.partialorder %v2898_v7, 0.0  ;;  %vm919_vm3 = vcmp.gt.f32.partialorder %v2901_v12, 0.0  ;;  %vm920_vm4 = vcmp.gt.f32.partialorder %v2904_v1, 0.0  ;;  %v975_v41 = vsel %vm899_vm9, %v3816_v55, %v3818_v16  ;;  %v3825_v36 = vld [vmem:[#allocation32_spill] sm:$0xff]  ;;  %v3826_v45 = vld [vmem:[#allocation33_spill] sm:$0xff] }
 0x211   : > { %1167 = vst.msk [vmem:[%s3231_s26 + $0x98] sm:$0xff] %vm3812_vm5, %v1134_v26  ;;  %1170 = vst [vmem:[%s3231_s26 + $0xb0] sm:$0xff] %v1137_v10  ;;  %vm923_vm5 = vcmp.gt.f32.partialorder %v2907_v28, 0.0  ;;  %v976_v57 = vsel %vm900_vm10, %v3817_v3, %v3819_v61  ;;  %v979_v32 = vsel %vm903_vm11, %v3765_v6, %v3820_v38  ;;  %v980_v53 = vsel %vm904_vm0, %v3767_v14, %v3821_v21  ;;  %v3831_v56 = vld [vmem:[#allocation96_spill] sm:$0xff]  ;;  %v3832_v48 = vld [vmem:[#allocation97_spill] sm:$0xff] }
 0x212   : > { %vm3813_vm6 = vmmov %vm3808_vm1  ;;  %1174 = vst [vmem:[%s3231_s26 + $0xd0] sm:$0xff] %v1141_v59  ;;  %v983_v2 = vsel %vm907_vm12, %v3769_v29, %v3822_v58  ;;  %v984_v43 = vsel %vm908_vm13, %v3771_v27, %v3823_v22  ;;  %v987_v6 = vsel %vm911_vm14, %v3773_v11, %v3824_v44  ;;  %v988_v14 = vsel %vm912_vm15, %v3775_v13, %v3825_v36  ;;  %v3833_v33 = vld [vmem:[#allocation98_spill] sm:$0xff]  ;;  %v3834_v49 = vld [vmem:[#allocation47_spill] sm:$0xff] }
 0x213   : > { %1171 = vst.msk [vmem:[%s3231_s26 + $0xb8] sm:$0xff] %vm3813_vm6, %v1138_v19  ;;  %vm3814_vm7 = vmmov %vm3808_vm1  ;;  %vm924_vm6 = vcmp.gt.f32.partialorder %v2910_v4, 0.0  ;;  %v992_v27 = vsel %vm916_vm2, %v2898_v7, %v3827_v15  ;;  %v995_v11 = vsel %vm919_vm3, %v2901_v12, %v3828_v18  ;;  %v996_v13 = vsel %vm920_vm4, %v2904_v1, %v3829_v0  ;;  %v3835_v51 = vld [vmem:[#allocation48_spill] sm:$0xff]  ;;  %v3837_v35 = vld [vmem:[#allocation50_spill] sm:$0xff] }
 0x214   : > { %1175 = vst.msk [vmem:[%s3231_s26 + $0xd8] sm:$0xff] %vm3814_vm7, %v1142_v8  ;;  %1178 = vst [vmem:[%s3231_s26 + $0xf0] sm:$0xff] %v1145_v20  ;;  %vm927_vm7 = vcmp.gt.f32.partialorder %v2913_v30, 0.0  ;;  %v1000_v7 = vsel %vm924_vm6, %v2910_v4, %v3831_v56  ;;  %vm655_vm9 = vcmp.gt.f32.partialorder %v3834_v49, 0.0  ;;  %vm656_vm10 = vcmp.gt.f32.partialorder %v3835_v51, 0.0  ;;  %v3838_v52 = vld [vmem:[#allocation51_spill] sm:$0xff] }
 0x215   : > { %vm3815_vm8 = vmmov %vm3808_vm1  ;;  %vm915_vm1 = vcmp.gt.f32.partialorder %v3777_v23, 0.0  ;;  %v1003_v12 = vsel %vm927_vm7, %v2913_v30, %v3832_v48  ;;  %vm660_vm0 = vcmp.gt.f32.partialorder %v3837_v35, 0.0  ;;  %vm663_vm12 = vcmp.gt.f32.partialorder %v3838_v52, 0.0  ;;  %v3839_v4 = vld [vmem:[#allocation52_spill] sm:$0xff]  ;;  %v3840_v31 = vld [vmem:[#allocation53_spill] sm:$0xff] }
 0x216   : > { %1179 = vst.msk [vmem:[%s3231_s26 + $0xf8] sm:$0xff] %vm3815_vm8, %v1146_v46  ;;  %vm928_vm8 = vcmp.gt.f32.partialorder %v2916_v54, 0.0  ;;  %v991_v29 = vsel %vm915_vm1, %v3777_v23, %v3826_v45  ;;  %v999_v23 = vsel %vm923_vm5, %v2907_v28, %v3830_v24  ;;  %v3836_v28 = vld [vmem:[#allocation49_spill] sm:$0xff]  ;;  %vm664_vm13 = vcmp.gt.f32.partialorder %v3839_v4, 0.0  ;;  %v3841_v30 = vld [vmem:[#allocation54_spill] sm:$0xff]  ;;  %v3842_v40 = vld [vmem:[#allocation55_spill] sm:$0xff] }
 0x217   : > { %v1004_v1 = vsel %vm928_vm8, %v2916_v54, %v3833_v33  ;;  %vm659_vm11 = vcmp.gt.f32.partialorder %v3836_v28, 0.0  ;;  %vm667_vm14 = vcmp.gt.f32.partialorder %v3840_v31, 0.0  ;;  %vm668_vm15 = vcmp.gt.f32.partialorder %v3841_v30, 0.0  ;;  %v3843_v39 = vld [vmem:[#allocation56_spill] sm:$0xff]  ;;  %v3844_v54 = vld [vmem:[#allocation57_spill] sm:$0xff]  ;;  %v3845_v47 = vld [vmem:[#allocation58_spill] sm:$0xff] }
 0x218   : > { %vm671_vm1 = vcmp.gt.f32.partialorder %v3842_v40, 0.0  ;;  %vm672_vm2 = vcmp.gt.f32.partialorder %v3843_v39, 0.0  ;;  %vm675_vm3 = vcmp.gt.f32.partialorder %v3844_v54, 0.0  ;;  %vm676_vm4 = vcmp.gt.f32.partialorder %v3845_v47, 0.0  ;;  %v3846_v42 = vld [vmem:[#allocation59_spill] sm:$0xff]  ;;  %v3847_v37 = vld [vmem:[#allocation60_spill] sm:$0xff] }
 0x219   : > { %vm679_vm5 = vcmp.gt.f32.partialorder %v3846_v42, 0.0  ;;  %vm680_vm6 = vcmp.gt.f32.partialorder %v3847_v37, 0.0  ;;  %v3848_v34 = vld [vmem:[#allocation61_spill] sm:$0xff]  ;;  %v3849_v25 = vld [vmem:[#allocation62_spill] sm:$0xff]  ;;  %v3851_v60 = vld [vmem:[#allocation75_spill] sm:$0xff] }
 0x21a   : > { %vm683_vm7 = vcmp.gt.f32.partialorder %v3848_v34, 0.0  ;;  %vm684_vm8 = vcmp.gt.f32.partialorder %v3849_v25, 0.0  ;;  %v3850_v50 = vld [vmem:[#allocation74_spill] sm:$0xff]  ;;  %v732_v62 = vsel %vm656_vm10, %v3835_v51, %v3851_v60  ;;  %v3852_v5 = vld [vmem:[#allocation76_spill] sm:$0xff]  ;;  %v3853_v17 = vld [vmem:[#allocation77_spill] sm:$0xff] }
 0x21b   : > { %v731_v63 = vsel %vm655_vm9, %v3834_v49, %v3850_v50  ;;  %v735_v9 = vsel %vm659_vm11, %v3836_v28, %v3852_v5  ;;  %v736_v26 = vsel %vm660_vm0, %v3837_v35, %v3853_v17  ;;  %v3854_v10 = vld [vmem:[#allocation78_spill] sm:$0xff]  ;;  %v3855_v59 = vld [vmem:[#allocation79_spill] sm:$0xff]  ;;  %v3856_v20 = vld [vmem:[#allocation80_spill] sm:$0xff]  ;;  %v1008_v51 = vadd.f32 %v976_v57, %v732_v62 }
 0x21c   : > { %v739_v19 = vsel %vm663_vm12, %v3838_v52, %v3854_v10  ;;  %v740_v8 = vsel %vm664_vm13, %v3839_v4, %v3855_v59  ;;  %v743_v46 = vsel %vm667_vm14, %v3840_v31, %v3856_v20  ;;  %v3857_v55 = vld [vmem:[#allocation81_spill] sm:$0xff]  ;;  %v3858_v16 = vld [vmem:[#allocation82_spill] sm:$0xff]  ;;  %v3859_v38 = vld [vmem:[#allocation83_spill] sm:$0xff]  ;;  %v1007_v49 = vadd.f32 %v975_v41, %v731_v63  ;;  %v1076_v41 = vpop.permute.xlu0 %1075 }
 0x21d   : > { %v744_v3 = vsel %vm668_vm15, %v3841_v30, %v3857_v55  ;;  %v747_v61 = vsel %vm671_vm1, %v3842_v40, %v3858_v16  ;;  %v748_v21 = vsel %vm672_vm2, %v3843_v39, %v3859_v38  ;;  %v3860_v58 = vld [vmem:[#allocation84_spill] sm:$0xff]  ;;  %v3861_v44 = vld [vmem:[#allocation85_spill] sm:$0xff]  ;;  %v3862_v45 = vld [vmem:[#allocation86_spill] sm:$0xff]  ;;  %v1011_v28 = vadd.f32 %v979_v32, %v735_v9 }
 0x21e   : > { %v751_v22 = vsel %vm675_vm3, %v3844_v54, %v3860_v58  ;;  %v752_v36 = vsel %vm676_vm4, %v3845_v47, %v3861_v44  ;;  %v755_v15 = vsel %vm679_vm5, %v3846_v42, %v3862_v45  ;;  %v3863_v18 = vld [vmem:[#allocation87_spill] sm:$0xff]  ;;  %v3864_v24 = vld [vmem:[#allocation88_spill] sm:$0xff]  ;;  %v3865_v48 = vld [vmem:[#allocation89_spill] sm:$0xff]  ;;  %v1012_v35 = vadd.f32 %v980_v53, %v736_v26 }
 0x21f   : > { %v756_v0 = vsel %vm680_vm6, %v3847_v37, %v3863_v18  ;;  %v759_v56 = vsel %vm683_vm7, %v3848_v34, %v3864_v24  ;;  %v760_v33 = vsel %vm684_vm8, %v3849_v25, %v3865_v48  ;;  %v1015_v52 = vadd.f32 %v983_v2, %v739_v19 }
 0x220   : > { %v1016_v4 = vadd.f32 %v984_v43, %v740_v8  ;;  %v1019_v31 = vadd.f32 %v987_v6, %v743_v46  ;;  %v1020_v30 = vadd.f32 %v988_v14, %v744_v3  ;;  %v1023_v40 = vadd.f32 %v991_v29, %v747_v61 }
 0x221   : > { %v1024_v39 = vadd.f32 %v992_v27, %v748_v21  ;;  %v1027_v54 = vadd.f32 %v995_v11, %v751_v22  ;;  %v1028_v47 = vadd.f32 %v996_v13, %v752_v36  ;;  %v1031_v42 = vadd.f32 %v999_v23, %v755_v15 }
 0x222   : > { %v1032_v37 = vadd.f32 %v1000_v7, %v756_v0  ;;  %v1035_v34 = vadd.f32 %v1003_v12, %v759_v56  ;;  %v1036_v50 = vadd.f32 %v1004_v1, %v760_v33  ;;  %vm1039_vm9 = vcmp.gt.f32.partialorder %v1007_v49, 0.0 }
 0x223   : > { %vm1040_vm10 = vcmp.gt.f32.partialorder %v1008_v51, 0.0  ;;  %vm1043_vm11 = vcmp.gt.f32.partialorder %v1011_v28, 0.0  ;;  %vm1044_vm0 = vcmp.gt.f32.partialorder %v1012_v35, 0.0  ;;  %vm1047_vm12 = vcmp.gt.f32.partialorder %v1015_v52, 0.0 }
 0x224   : > { %vm1048_vm13 = vcmp.gt.f32.partialorder %v1016_v4, 0.0  ;;  %vm1051_vm14 = vcmp.gt.f32.partialorder %v1019_v31, 0.0  ;;  %vm1052_vm15 = vcmp.gt.f32.partialorder %v1020_v30, 0.0  ;;  %vm1055_vm1 = vcmp.gt.f32.partialorder %v1023_v40, 0.0 }
 0x225   : > { %vm1056_vm2 = vcmp.gt.f32.partialorder %v1024_v39, 0.0  ;;  %vm1059_vm3 = vcmp.gt.f32.partialorder %v1027_v54, 0.0  ;;  %vm1060_vm4 = vcmp.gt.f32.partialorder %v1028_v47, 0.0  ;;  %vm1063_vm5 = vcmp.gt.f32.partialorder %v1031_v42, 0.0 }
 0x226   : > { %vm1064_vm6 = vcmp.gt.f32.partialorder %v1032_v37, 0.0  ;;  %vm1067_vm7 = vcmp.gt.f32.partialorder %v1035_v34, 0.0  ;;  %vm1068_vm8 = vcmp.gt.f32.partialorder %v1036_v50, 0.0  ;;  %v1083_v57 = vmul.f32 %v1076_v41, %v1007_v49 }
 0x227   : > { %v1084_v32 = vmul.f32 %v1076_v41, %v1008_v51  ;;  %v1087_v53 = vmul.f32 %v1076_v41, %v1011_v28  ;;  %v1088_v2 = vmul.f32 %v1076_v41, %v1012_v35  ;;  %v1091_v43 = vmul.f32 %v1076_v41, %v1015_v52 }
 0x228   : > { %v1092_v6 = vmul.f32 %v1076_v41, %v1016_v4  ;;  %v1095_v14 = vmul.f32 %v1076_v41, %v1019_v31  ;;  %v1096_v29 = vmul.f32 %v1076_v41, %v1020_v30  ;;  %v1099_v27 = vmul.f32 %v1076_v41, %v1023_v40 }
 0x229   : > { %v1100_v11 = vmul.f32 %v1076_v41, %v1024_v39  ;;  %v1103_v13 = vmul.f32 %v1076_v41, %v1027_v54  ;;  %v1104_v23 = vmul.f32 %v1076_v41, %v1028_v47  ;;  %v1107_v7 = vmul.f32 %v1076_v41, %v1031_v42 }
 0x22a   : > { %v1108_v12 = vmul.f32 %v1076_v41, %v1032_v37  ;;  %v1111_v1 = vmul.f32 %v1076_v41, %v1035_v34  ;;  %v1112_v25 = vmul.f32 %v1076_v41, %v1036_v50  ;;  %v1115_v63 = vsel %vm1039_vm9, %v1007_v49, %v1083_v57 }
 0x22b   : > { %v1116_v60 = vsel %vm1040_vm10, %v1008_v51, %v1084_v32  ;;  %v1119_v62 = vsel %vm1043_vm11, %v1011_v28, %v1087_v53  ;;  %v1120_v5 = vsel %vm1044_vm0, %v1012_v35, %v1088_v2  ;;  %v1123_v9 = vsel %vm1047_vm12, %v1015_v52, %v1091_v43  ;;  %1147 = vst [vmem:[%s3231_s26] sm:$0xff] %v1115_v63 }
 0x22c   : > { %v1124_v17 = vsel %vm1048_vm13, %v1016_v4, %v1092_v6  ;;  %v1127_v26 = vsel %vm1051_vm14, %v1019_v31, %v1095_v14  ;;  %v1128_v10 = vsel %vm1052_vm15, %v1020_v30, %v1096_v29  ;;  %vm3867_vm9 = vcmask 130048   ;;  %1152 = vst [vmem:[%s3231_s26 + $0x20] sm:$0xff] %v1119_v62  ;;  %1156 = vst [vmem:[%s3231_s26 + $0x40] sm:$0xff] %v1123_v9 }
 0x22d   : > { %1149 = vst.msk [vmem:[%s3231_s26 + $0x8] sm:$0xff] %vm3867_vm9, %v1116_v60  ;;  %vm3868_vm10 = vmmov %vm3867_vm9  ;;  %v1131_v19 = vsel %vm1055_vm1, %v1023_v40, %v1099_v27  ;;  %v1132_v59 = vsel %vm1056_vm2, %v1024_v39, %v1100_v11  ;;  %v1135_v8 = vsel %vm1059_vm3, %v1027_v54, %v1103_v13  ;;  %v1136_v20 = vsel %vm1060_vm4, %v1028_v47, %v1104_v23 }
 0x22e   : > { %1153 = vst.msk [vmem:[%s3231_s26 + $0x28] sm:$0xff] %vm3868_vm10, %v1120_v5  ;;  %vm3870_vm11 = vmmov %vm3867_vm9  ;;  %v1139_v46 = vsel %vm1063_vm5, %v1031_v42, %v1107_v7  ;;  %v1140_v55 = vsel %vm1064_vm6, %v1032_v37, %v1108_v12  ;;  %v1143_v3 = vsel %vm1067_vm7, %v1035_v34, %v1111_v1  ;;  %v1144_v16 = vsel %vm1068_vm8, %v1036_v50, %v1112_v25 }
 0x22f   : > { %1157 = vst.msk [vmem:[%s3231_s26 + $0x48] sm:$0xff] %vm3870_vm11, %v1124_v17  ;;  %1160 = vst [vmem:[%s3231_s26 + $0x60] sm:$0xff] %v1127_v26 }
 0x230   : > { %vm3871_vm0 = vmmov %vm3867_vm9  ;;  %1164 = vst [vmem:[%s3231_s26 + $0x80] sm:$0xff] %v1131_v19 }
 0x231   : > { %1161 = vst.msk [vmem:[%s3231_s26 + $0x68] sm:$0xff] %vm3871_vm0, %v1128_v10  ;;  %vm3872_vm12 = vmmov %vm3871_vm0 }
 0x232   : > { %1165 = vst.msk [vmem:[%s3231_s26 + $0x88] sm:$0xff] %vm3872_vm12, %v1132_v59  ;;  %1168 = vst [vmem:[%s3231_s26 + $0xa0] sm:$0xff] %v1135_v8 }
 0x233   : > { %vm3873_vm13 = vmmov %vm3871_vm0  ;;  %1172 = vst [vmem:[%s3231_s26 + $0xc0] sm:$0xff] %v1139_v46 }
 0x234   : > { %1169 = vst.msk [vmem:[%s3231_s26 + $0xa8] sm:$0xff] %vm3873_vm13, %v1136_v20  ;;  %vm3874_vm14 = vmmov %vm3871_vm0 }
 0x235   : > { %1173 = vst.msk [vmem:[%s3231_s26 + $0xc8] sm:$0xff] %vm3874_vm14, %v1140_v55  ;;  %1176 = vst [vmem:[%s3231_s26 + $0xe0] sm:$0xff] %v1143_v3 }
 0x236   : > { %vm3875_vm15 = vmmov %vm3871_vm0 }
 0x237   : > { %1177 = vst.msk [vmem:[%s3231_s26 + $0xe8] sm:$0xff] %vm3875_vm15, %v1144_v16 }
 0x238   : > { %1826 = shalt.err (!%p1823_p11)
}
 0x239   : > { %s1827_s3 = scalar_lea.hbm %s3444_s12, 4096  ;;  %s1831_s15 = scalar_lea.hbm %s3869_s27, 8192 }
 0x23a   : > { %p1828_p8 = scmp.ne.s32.totalorder %s3444_s12, %s1827_s3  ;;  %p1832_p13 = scmp.lt.u32.totalorder %s3444_s12, %s3869_s27 }
 0x23b   : > { %p1833_p6 = scmp.lt.u32.totalorder %s1831_s15, %s1827_s3  ;;  %p1835_p7 = scmp.lt.u32.totalorder %s1827_s3, %s3444_s12 }
 0x23c   : > { %p1829_p3 = pnand %p1828_p8, %p3876_p5 }
 0x23d   : > { %p1834_p0 = por %p1833_p6, %p1832_p13 }
 0x23e   : > { %p1830_p12 = pneg %p1829_p3 }
 0x23f   : > { %p1836_p2 = por %p1835_p7, %p1834_p0 }
 0x241   : > { %p1837_p4 = pnand %p1836_p2, %p1830_p12 }
 0x243   : > { %1840 = shalt.err (!%p1837_p4)
}
 0x244   : > { %s1930_s2 = smov 256   ;;  %s1931_s9 = smov 16  }
 0x245   : > { %1444 = dma.vmem_to_hbm [thread:$0]  (%p3876_p5), %s3446_s25, 4096, %s3444_s12, %s1181_s0, %s1930_s2, %s1930_s2, %s1931_s9  }
 0x246 PF: > { %s1212_s4 = sand.u32 1, %s1895_s30   ;;  %p3877_p9 = scmp.ne.s32.totalorder %s3612_s20, 0 }
 0x247   : > { %p3878_p1 = scmp.ge.s32.totalorder %s1915_s14, 2  ;;  %s1213_s24 = scalar_lea.sflag [#allocation4], %s1212_s4 }
 0x249   : > { %p1476_p10 = pnand %p3878_p1, %p3877_p9 }
 0x24b   : > { %1890 = dma.done.wait (!%p1476_p10), %s1213_s24, 4096  }
 0x24c   : > { %1892 = vsyncadd (!%p1476_p10), %s1213_s24, 4294963200  ;;  %s31_s14 = sadd.s32 1, %s1915_s14   ;;  %s3879_s30 = smov %s1899_s10 }
 0x24d   : > { %p28_p11 = scmp.ge.s32.totalorder %s31_s14, 4   ;;  %s3880_s10 = smov %s1903_s11 }
 0x24e   : > { %s3881_s11 = smov %s2230_s17  ;;  %s3882_s12 = smov %s1911_s13 }
 0x24f   : > { %s3883_s13 = smov %s3885_s29  ;;  %30 = sbr.rel (!%p28_p11) target bundleno = 18 (0x12), region = 142 }
 0x256   :  { %1218 = vsyncpa [#allocation3], 1 }
 0x257   :  { %1220 = vsyncpa [#allocation3 + $0x1], 1 }
 0x258   :  { %1221 = vsyncpa [#allocation6], 1 }
 0x259   :  { %1223 = vsyncpa [#allocation6 + $0x1], 1 }
 0x25a   :  { %1224 = vsyncpa [#allocation9], 1 }
 0x25b   :  { %1225 = vsyncpa [#allocation12], 1 }
 0x25c   :  { %1226 = vsyncpa [#allocation15], 1 }
 0x25d   :  { %1227 = vsyncpa [#allocation4], 1 }
 0x25e   :  { %1229 = vsyncpa [#allocation4 + $0x1], 1 }

// kernel: vnet_downward_transition.5
= control target key start
LH: loop header
LB: loop body
LE: loop exit
PB: predicated region body
PF: predicated region fallthrough
CT: control target
= control target key end

     0   :  { %s5326_s0 = inlined_call_operand.hbm [shape: bf16[2,8,16,144], index: 0, kind: input, shape index: {}, may-alias: {0,1,2}]   ;;  %s5327_s1 = inlined_call_operand.hbm [shape: bf16[2,8,16,144], index: 1, kind: input, shape index: {}, may-alias: {0,1,2}]   ;;  %s5328_s2 = inlined_call_operand.hbm [shape: bf16[2,8,16,144], index: 2, kind: input, shape index: {}, may-alias: {0,1,2}]   ;;  %s5329_s3 = inlined_call_operand.hbm [shape: bf16[5,16,400], index: 3, kind: input, shape index: {}]   ;;  %s5330_s4 = inlined_call_operand.hbm [shape: f32[16,1], index: 4, kind: input, shape index: {}]   ;;  %s5331_s5 = inlined_call_operand.hbm [shape: f32[16,1], index: 5, kind: input, shape index: {}]   ;;  %s5332_s6 = inlined_call_operand.hbm [shape: f32[16,1], index: 6, kind: input, shape index: {}]   ;;  %s5333_s7 = inlined_call_operand.hbm [shape: f32[1,144], index: 7, kind: input, shape index: {}]   ;;  %s5334_s8 = inlined_call_operand.hbm [shape: bf16[2,8,16,144], index: 8, kind: output, shape index: {0}]   ;;  %s5335_s9 = inlined_call_operand.hbm [shape: f32[2,1,16,2], index: 9, kind: output, shape index: {1}]  }
   0x1   :  { %5397 = sst [smem:[#allocation39_spill]] %s5327_s1 }
   0x2   :  { %5398 = sst [smem:[#allocation40_spill]] %s5329_s3 }
   0x3   :  { %5399 = sst [smem:[#allocation41_spill]] %s5331_s5 }
   0x4   :  { %5400 = sst [smem:[#allocation42_spill]] %s5334_s8 }
   0x5   :  { %5401 = sst [smem:[#allocation43_spill]] %s5335_s9 }
   0x6   :  { %15 = vsyncpa [#allocation6], 0 }
   0x7   :  { %17 = vsyncpa [#allocation6 + $0x1], 0 }
   0x8   :  { %18 = vsyncpa [#allocation9], 0 }
   0x9   :  { %20 = vsyncpa [#allocation9 + $0x1], 0 }
   0xa   :  { %21 = vsyncpa [#allocation12], 0 }
   0xb   :  { %22 = vsyncpa [#allocation15], 0 }
   0xc   :  { %23 = vsyncpa [#allocation18], 0 }
   0xd   :  { %24 = vsyncpa [#allocation7], 0 }
   0xe   :  { %26 = vsyncpa [#allocation7 + $0x1], 0 }
   0xf   :  { %27 = vsyncpa [#allocation21], 0 }
  0x10   :  { %29 = vsyncpa [#allocation21 + $0x1], 0  ;;  %s4108_s30 = smov 0   ;;  %s4110_s10 = smov 0  }
  0x11   :  { %s4112_s11 = smov 0   ;;  %s4114_s12 = smov 0  }
  0x12   :  { %s4116_s13 = smov 0   ;;  %s4118_s14 = smov 0  }
  0x13 LB: > { %5402 = sst [smem:[#allocation29_spill]] %s3967_s30  ;;  %s4139_s15 = sadd.s32 4294967295, %s3987_s14   ;;  %s3987_s14 = sphi %s4118_s14, %s35_s14   ;;  %s3983_s13 = sphi %s4116_s13, %s5477_s13   ;;  %s3979_s12 = sphi %s4114_s12, %s5476_s12   ;;  %s3975_s11 = sphi %s4112_s11, %s5475_s11   ;;  %s3971_s10 = sphi %s4110_s10, %s5479_s10   ;;  %s3967_s30 = sphi %s4108_s30, %s5478_s30  }
  0x14   : > { %5403 = sst [smem:[#allocation30_spill]] %s3975_s11  ;;  %p3023_p0 = scmp.ge.s32.totalorder %s3987_s14, 1 }
  0x15   : > { %5404 = sst [smem:[#allocation31_spill]] %s3979_s12  ;;  %p5347_p1 = scmp.eq.s32.totalorder %s4139_s15, 0 }
  0x16   : > { %5405 = sst [smem:[#allocation32_spill]] %s3983_s13  ;;  %p313_p3 = scmp.lt.s32.totalorder %s3987_s14, 3 }
  0x17   : > { %5406 = sst [smem:[#allocation33_spill]] %s3987_s14  ;;  %s4013_s17 = smov [#allocation11]  }
  0x18   : > { %5407 = sst [smem:[#allocation34_spill]] %s4139_s15  ;;  %p4145_p4 = pnand %p3023_p0, %p313_p3 }
  0x19   : > { %s325_s18 = sshll.u32 %s4013_s17, 4  ;;  %s4014_s20 = smov [#allocation14]   ;;  %s4149_s18 = int_to_ptr.vmem [resolvable:$true] %s325_s18 }
  0x1a   : > { %s5408_s16 = scalar_select %p4145_p4, 1, 0 }
  0x1b   : > { %p3390_p5 = pneg %p4145_p4  ;;  %s351_s21 = sshll.u32 %s4014_s20, 4  ;;  %s4160_s21 = int_to_ptr.vmem [resolvable:$true] %s351_s21 }
  0x1c   : > { %s5410_s3 = sld [smem:[#allocation40_spill]] }
  0x1d   : > { %p4156_p7 = pnand %p3390_p5, %p5347_p1 }
  0x1f   : > { %s5409_s19 = scalar_select %p4156_p7, 1, 0 }
  0x20   : > { %p4170_p9 = pneg %p4156_p7 }
  0x22   : > { %s3603_s24 = scalar_lea.hbm %s5410_s3, 2560 }
  0x23   : > { %p3604_p8 = scmp.ne.s32.totalorder %s5410_s3, %s3603_s24  ;;  %p3610_p12 = scmp.lt.u32.totalorder %s3603_s24, %s5410_s3 }
  0x24   : > { %s5411_s27 = scalar_select %p4170_p9, 1, 0 }
  0x25   : > { %p3606_p10 = pnand %p4170_p9, %p3604_p8 }
  0x27   : > { %p3607_p11 = pneg %p3606_p10 }
  0x29   : > { %p3612_p13 = pnand %p3610_p12, %p3607_p11 }
  0x2b   : > { %3615 = shalt.err (!%p3612_p13)
}
  0x2c   : > { %s3616_s17 = scalar_lea.vmem %s4149_s18, 2560  ;;  %p3624_p6 = scmp.lt.s32.totalorder %s4149_s18, %s4149_s18 }
  0x2d   : > { %p3617_p0 = scmp.ne.s32.totalorder %s4149_s18, %s3616_s17  ;;  %p3625_p2 = scmp.lt.s32.totalorder %s3616_s17, %s3616_s17 }
  0x2f   : > { %p3619_p3 = pnand %p3617_p0, %p4170_p9  ;;  %p3626_p8 = por %p3625_p2, %p3624_p6 }
  0x31   : > { %p3620_p5 = pneg %p3619_p3 }
  0x33   : > { %p3627_p10 = pnand %p3626_p8, %p3620_p5 }
  0x35   : > { %3630 = shalt.err (!%p3627_p10)
}
  0x36   : > { %s4015_s20 = smov 256   ;;  %s4016_s22 = smov 16  }
  0x37   : > { %3393 = dma.hbm_to_vmem [thread:$0]  (!%p4156_p7), %s5410_s3, 2560, %s4149_s18, [#allocation12], %s4015_s20, %s4015_s20, %s4016_s22  }
  0x38   : > { %s5412_s5 = sld [smem:[#allocation41_spill]] }
  0x3e   : > { %s3631_s28 = scalar_lea.hbm %s5412_s5, 256 }
  0x3f   : > { %p3632_p2 = scmp.ne.s32.totalorder %s5412_s5, %s3631_s28  ;;  %p3638_p12 = scmp.lt.u32.totalorder %s3631_s28, %s5412_s5 }
  0x41   : > { %p3634_p6 = pnand %p3632_p2, %p4170_p9 }
  0x43   : > { %p3635_p11 = pneg %p3634_p6 }
  0x45   : > { %p3640_p13 = pnand %p3638_p12, %p3635_p11 }
  0x47   : > { %3643 = shalt.err (!%p3640_p13)
}
  0x48   : > { %s3644_s18 = scalar_lea.vmem %s4160_s21, 256  ;;  %p3652_p8 = scmp.lt.s32.totalorder %s4160_s21, %s4160_s21 }
  0x49   : > { %p3645_p0 = scmp.ne.s32.totalorder %s4160_s21, %s3644_s18  ;;  %p3653_p10 = scmp.lt.s32.totalorder %s3644_s18, %s3644_s18 }
  0x4b   : > { %p3647_p3 = pnand %p3645_p0, %p4170_p9  ;;  %p3654_p2 = por %p3653_p10, %p3652_p8 }
  0x4d   : > { %p3648_p5 = pneg %p3647_p3 }
  0x4f   : > { %p3655_p6 = pnand %p3654_p2, %p3648_p5 }
  0x51   : > { %3658 = shalt.err (!%p3655_p6)
}
  0x52   : > { %s5339_s9 = smov 128   ;;  %s5341_s8 = smov 8  }
  0x53   : > { %3399 = dma.hbm_to_vmem [thread:$0]  (!%p4156_p7), %s5412_s5, 256, %s4160_s21, [#allocation15], %s5339_s9, %s5339_s9, %s5341_s8  }
  0x54   : > { %s3022_s23 = sadd.s32 4294967294, %s3987_s14   ;;  %s47_s24 = sadd.s32 1, %s3983_s13 }
  0x55   : > { %s56_s25 = sadd.s32 1, %s3975_s11  ;;  %p49_p11 = scmp.ge.s32.totalorder %s47_s24, 2 }
  0x56   : > { %p63_p12 = scmp.ne.s32.totalorder %s3975_s11, %s3971_s10  ;;  %p64_p13 = scmp.eq.s32.totalorder %s3987_s14, 0 }
  0x57   : > { %p69_p0 = scmp.ne.s32.totalorder %s3971_s10, %s3967_s30  ;;  %s5481_s24 = smov (%p49_p11, %s47_s24), 0 }
  0x58   : > { %5413 = sst [smem:[#allocation35_spill]] %s5481_s24  ;;  %p65_p3 = por %p64_p13, %p63_p12 }
  0x59   : > { %p4229_p5 = por %p5347_p1, %p69_p0  ;;  %s51_s21 = ssub.s32 %s3983_s13, %s5481_s24 }
  0x5a   : > { %p5415_p8 = scmp.eq.s32.totalorder %s4139_s15, 1  ;;  %p54_p2 = scmp.eq.s32.totalorder %s51_s21, 0 }
  0x5b   : > { %s5414_s26 = scalar_select %p4229_p5, 1, 0 }
  0x5c   : > { %p4237_p10 = por %p5415_p8, %p63_p12  ;;  %p278_p6 = scmp.eq.s32.totalorder %s3022_s23, 1 }
  0x5d   : > { %p3428_p4 = scmp.lt.s32.totalorder %s3987_s14, 2  ;;  %s4243_s29 = sand.u32 1, %s3975_s11  }
  0x5e   : > { %s5416_s28 = scalar_select %p4237_p10, 1, 0 }
  0x5f   : > { %s4246_s17 = scalar_select %p54_p2, %s3975_s11, %s56_s25  }
  0x60   : > { %5417 = sst [smem:[#allocation36_spill]] %s5416_s28  ;;  %p4248_p11 = por %p278_p6, %p69_p0 }
  0x61   : > { %5418 = sst [smem:[#allocation37_spill]] %s4246_s17  ;;  %s4253_s20 = sshll.u32 %s3983_s13, 11 }
  0x62   : > { %s5419_s18 = scalar_select %p4248_p11, 1, 0 }
  0x63   : > { %p4255_p12 = pnand %p3428_p4, %p65_p3  ;;  %s413_s23 = sand.u32 1, %s3987_s14  }
  0x64   : > { %5420 = sst [smem:[#allocation38_spill]] %s5419_s18  ;;  %s5345_s21 = sshll.u32 %s4243_s29, 5 }
  0x65   : > { %s5421_s22 = scalar_select %p4255_p12, 1, 0 }
  0x66   : > { %s5422_s1 = sld [smem:[#allocation39_spill]]  ;;  %s417_s25 = scalar_lea.vmem [#allocation8], %s5345_s21 }
  0x67   : > { %s431_s5 = sshll.u32 %s417_s25, 4  ;;  %s4271_s24 = scalar_lea.sflag [#allocation9], %s413_s23  ;;  %s4269_s5 = int_to_ptr.vmem [resolvable:$true] %s431_s5 }
  0x68   : > { %p4277_p13 = pneg %p4255_p12 }
  0x6a   : > { %s5423_s17 = scalar_select %p4277_p13, 1, 0 }
  0x6c   : > { %s4265_s3 = scalar_lea.hbm %s5422_s1, %s4253_s20  ;;  %s3664_s21 = scalar_lea.hbm %s5422_s1, 4096 }
  0x6d   : > { %s3659_s13 = scalar_lea.hbm %s4265_s3, 512  ;;  %p3665_p8 = scmp.lt.u32.totalorder %s4265_s3, %s5422_s1 }
  0x6e   : > { %p3660_p4 = scmp.ne.s32.totalorder %s4265_s3, %s3659_s13  ;;  %p3666_p2 = scmp.lt.u32.totalorder %s3664_s21, %s3659_s13 }
  0x6f   : > { %p3668_p1 = scmp.lt.u32.totalorder %s3659_s13, %s4265_s3 }
  0x70   : > { %p3662_p0 = pnand %p4277_p13, %p3660_p4  ;;  %p3667_p6 = por %p3666_p2, %p3665_p8 }
  0x72   : > { %p3663_p3 = pneg %p3662_p0  ;;  %p3669_p11 = por %p3668_p1, %p3667_p6 }
  0x74   : > { %p3670_p10 = pnand %p3669_p11, %p3663_p3 }
  0x76   : > { %3673 = shalt.err (!%p3670_p10)
}
  0x77   : > { %s3674_s23 = scalar_lea.vmem %s4269_s5, 512  ;;  %s4019_s9 = smov [#allocation8]  }
  0x78   : > { %p3675_p4 = scmp.ne.s32.totalorder %s4269_s5, %s3674_s23  ;;  %s3679_s8 = sshll.u32 %s4019_s9, 4  ;;  %s3680_s8 = int_to_ptr.vmem [resolvable:$false] %s3679_s8 }
  0x79   : > { %s3681_s11 = scalar_lea.vmem %s3680_s8, 1024  ;;  %p3682_p7 = scmp.lt.s32.totalorder %s4269_s5, %s3680_s8 }
  0x7a   : > { %p3677_p0 = pnand %p3675_p4, %p4277_p13  ;;  %p3683_p9 = scmp.lt.s32.totalorder %s3681_s11, %s3674_s23 }
  0x7c   : > { %p3678_p5 = pneg %p3677_p0  ;;  %p3684_p8 = por %p3683_p9, %p3682_p7 }
  0x7e   : > { %p3685_p2 = pnand %p3684_p8, %p3678_p5 }
  0x80   : > { %3688 = shalt.err (!%p3685_p2)
}
  0x81   : > { %s5424_s13 = smov 8   ;;  %s5425_s21 = smov 128  }
  0x82   : > { %3412 = dma.hbm_to_vmem [thread:$0]  (!%p4255_p12), %s4265_s3, 512, %s4269_s5, %s4271_s24, %s5425_s21, %s5425_s21, %s5424_s13  }
  0x83   : > { %s5426_s25 = sshll.u32 %s4243_s29, 5  ;;  %s4020_s23 = smov [#allocation13]  }
  0x84   : > { %s445_s9 = scalar_lea.vmem [#allocation10], %s5426_s25  ;;  %s338_s8 = sshll.u32 %s4020_s23, 4  ;;  %s339_s8 = int_to_ptr.vmem [resolvable:$true] %s338_s8 }
  0x85   : > { %s459_s1 = sshll.u32 %s445_s9, 4  ;;  %s3689_s18 = scalar_lea.hbm %s5330_s4, 256  ;;  %s4306_s1 = int_to_ptr.vmem [resolvable:$true] %s459_s1 }
  0x86   : > { %p3690_p1 = scmp.ne.s32.totalorder %s5330_s4, %s3689_s18  ;;  %p5427_p7 = scmp.ne.s32.totalorder %s5411_s27, 0 }
  0x87   : > { %p3696_p10 = scmp.lt.u32.totalorder %s3689_s18, %s5330_s4 }
  0x88   : > { %p3692_p9 = pnand %p3690_p1, %p5427_p7 }
  0x8a   : > { %p3693_p5 = pneg %p3692_p9 }
  0x8c   : > { %p3698_p11 = pnand %p3696_p10, %p3693_p5 }
  0x8e   : > { %3701 = shalt.err (!%p3698_p11)
}
  0x8f   : > { %s3702_s25 = scalar_lea.vmem %s339_s8, 256  ;;  %p3710_p0 = scmp.lt.s32.totalorder %s339_s8, %s339_s8 }
  0x90   : > { %p3703_p3 = scmp.ne.s32.totalorder %s339_s8, %s3702_s25  ;;  %p3711_p8 = scmp.lt.s32.totalorder %s3702_s25, %s3702_s25 }
  0x92   : > { %p3705_p6 = pnand %p3703_p3, %p5427_p7  ;;  %p3712_p2 = por %p3711_p8, %p3710_p0 }
  0x94   : > { %p3706_p4 = pneg %p3705_p6 }
  0x96   : > { %p3713_p12 = pnand %p3712_p2, %p3706_p4 }
  0x98   : > { %3716 = shalt.err (!%p3713_p12)
}
  0x99   : > { %p5428_p1 = scmp.ne.s32.totalorder %s5409_s19, 0  ;;  %s4021_s28 = smov [#allocation16]  }
  0x9a   : > { %s364_s18 = sshll.u32 %s4021_s28, 4  ;;  %s4022_s9 = smov [#allocation17]   ;;  %s365_s18 = int_to_ptr.vmem [resolvable:$true] %s364_s18 }
  0x9b   : > { %3396 = dma.hbm_to_vmem [thread:$0]  (!%p5428_p1), %s5330_s4, 256, %s339_s8, [#allocation12], %s5425_s21, %s5425_s21, %s5424_s13  }
  0x9c   : > { %s378_s23 = sshll.u32 %s4022_s9, 4  ;;  %s3717_s5 = scalar_lea.hbm %s5332_s6, 256  ;;  %s379_s23 = int_to_ptr.vmem [resolvable:$true] %s378_s23 }
  0x9d   : > { %p3718_p12 = scmp.ne.s32.totalorder %s5332_s6, %s3717_s5  ;;  %p3724_p10 = scmp.lt.u32.totalorder %s3717_s5, %s5332_s6 }
  0x9f   : > { %p3720_p9 = pnand %p3718_p12, %p5427_p7 }
  0xa1   : > { %p3721_p5 = pneg %p3720_p9 }
  0xa3   : > { %p3726_p11 = pnand %p3724_p10, %p3721_p5 }
  0xa5   : > { %3729 = shalt.err (!%p3726_p11)
}
  0xa6   : > { %s3730_s8 = scalar_lea.vmem %s365_s18, 256  ;;  %p3738_p0 = scmp.lt.s32.totalorder %s365_s18, %s365_s18 }
  0xa7   : > { %p3731_p3 = scmp.ne.s32.totalorder %s365_s18, %s3730_s8  ;;  %p3739_p8 = scmp.lt.s32.totalorder %s3730_s8, %s3730_s8 }
  0xa9   : > { %p3733_p6 = pnand %p3731_p3, %p5427_p7  ;;  %p3740_p2 = por %p3739_p8, %p3738_p0 }
  0xab   : > { %p3734_p4 = pneg %p3733_p6 }
  0xad   : > { %p3741_p13 = pnand %p3740_p2, %p3734_p4 }
  0xaf   : > { %3744 = shalt.err (!%p3741_p13)
}
  0xb0   : > { %3402 = dma.hbm_to_vmem [thread:$0]  (!%p5428_p1), %s5332_s6, 256, %s365_s18, [#allocation15], %s5425_s21, %s5425_s21, %s5424_s13  }
  0xb1   : > { %s3745_s9 = scalar_lea.hbm %s5333_s7, 32 }
  0xb2   : > { %p3746_p12 = scmp.ne.s32.totalorder %s5333_s7, %s3745_s9  ;;  %p3752_p5 = scmp.lt.u32.totalorder %s3745_s9, %s5333_s7 }
  0xb4   : > { %p3748_p13 = pnand %p3746_p12, %p5427_p7 }
  0xb6   : > { %p3749_p9 = pneg %p3748_p13 }
  0xb8   : > { %p3754_p10 = pnand %p3752_p5, %p3749_p9 }
  0xba   : > { %3757 = shalt.err (!%p3754_p10)
}
  0xbb   : > { %s3758_s30 = scalar_lea.vmem %s379_s23, 32  ;;  %p3766_p4 = scmp.lt.s32.totalorder %s379_s23, %s379_s23 }
  0xbc   : > { %p3759_p11 = scmp.ne.s32.totalorder %s379_s23, %s3758_s30  ;;  %p3767_p0 = scmp.lt.s32.totalorder %s3758_s30, %s3758_s30 }
  0xbe   : > { %p3761_p3 = pnand %p3759_p11, %p5427_p7  ;;  %p3768_p8 = por %p3767_p0, %p3766_p4 }
  0xc0   : > { %p3762_p6 = pneg %p3761_p3 }
  0xc2   : > { %p3769_p2 = pnand %p3768_p8, %p3762_p6 }
  0xc4   : > { %3772 = shalt.err (!%p3769_p2)
}
  0xc5   : > { %3405 = dma.hbm_to_vmem [thread:$0]  (!%p5428_p1), %s5333_s7, 32, %s379_s23, [#allocation18]  }
  0xc6   : > { %s3030_s12 = sshll.u32 %s4243_s29, 7  ;;  %s4373_s14 = scalar_lea.hbm %s5326_s0, %s4253_s20 }
  0xc7   : > { %s3241_s19 = sadd.s32 1536, %s4253_s20  ;;  %s393_s28 = scalar_lea.vmem [#allocation5], %s3030_s12 }
  0xc8   : > { %s403_s9 = sshll.u32 %s393_s28, 4  ;;  %s4379_s5 = scalar_lea.hbm %s5328_s2, %s3241_s19  ;;  %s4381_s9 = int_to_ptr.vmem [resolvable:$true] %s403_s9 }
  0xc9   : > { %s390_s23 = scalar_lea.sflag [#allocation6], %s4243_s29  ;;  %s3773_s25 = scalar_lea.hbm %s4373_s14, 2048 }
  0xca   : > { %p3774_p7 = scmp.ne.s32.totalorder %s4373_s14, %s3773_s25  ;;  %p5429_p1 = scmp.ne.s32.totalorder %s5423_s17, 0 }
  0xcb   : > { %s3778_s8 = scalar_lea.hbm %s5326_s0, 4096  ;;  %p3779_p9 = scmp.lt.u32.totalorder %s4373_s14, %s5326_s0 }
  0xcc   : > { %p3776_p12 = pnand %p3774_p7, %p5429_p1  ;;  %p3780_p5 = scmp.lt.u32.totalorder %s3778_s8, %s3773_s25 }
  0xcd   : > { %p3782_p11 = scmp.lt.u32.totalorder %s3773_s25, %s4373_s14 }
  0xce   : > { %p3777_p13 = pneg %p3776_p12  ;;  %p3781_p10 = por %p3780_p5, %p3779_p9 }
  0xd0   : > { %p3783_p3 = por %p3782_p11, %p3781_p10 }
  0xd2   : > { %p3784_p6 = pnand %p3783_p3, %p3777_p13 }
  0xd4   : > { %3787 = shalt.err (!%p3784_p6)
}
  0xd5   : > { %s3788_s27 = scalar_lea.vmem %s4381_s9, 2048  ;;  %s4023_s15 = smov [#allocation5]  }
  0xd6   : > { %p3789_p4 = scmp.ne.s32.totalorder %s4381_s9, %s3788_s27  ;;  %s3793_s19 = sshll.u32 %s4023_s15, 4  ;;  %s3794_s19 = int_to_ptr.vmem [resolvable:$false] %s3793_s19 }
  0xd7   : > { %s3795_s28 = scalar_lea.vmem %s3794_s19, 4096  ;;  %p3796_p2 = scmp.lt.s32.totalorder %s4381_s9, %s3794_s19 }
  0xd8   : > { %p3791_p0 = pnand %p3789_p4, %p5429_p1  ;;  %p3797_p7 = scmp.lt.s32.totalorder %s3795_s28, %s3788_s27 }
  0xda   : > { %p3792_p8 = pneg %p3791_p0  ;;  %p3798_p12 = por %p3797_p7, %p3796_p2 }
  0xdc   : > { %p3799_p9 = pnand %p3798_p12, %p3792_p8 }
  0xde   : > { %3802 = shalt.err (!%p3799_p9)
}
  0xdf   : > { %p5430_p13 = scmp.ne.s32.totalorder %s5421_s22, 0  ;;  %s3803_s11 = scalar_lea.hbm %s4379_s5, 512 }
  0xe0   : > { %p3804_p5 = scmp.ne.s32.totalorder %s4379_s5, %s3803_s11  ;;  %s3808_s30 = scalar_lea.hbm %s5328_s2, 4096 }
  0xe1   : > { %3409 = dma.hbm_to_vmem [thread:$0]  (!%p5430_p13), %s4373_s14, 2048, %s4381_s9, %s390_s23, %s5425_s21, %s5425_s21, %s5424_s13  }
  0xe2   : > { %p3806_p10 = pnand %p3804_p5, %p5429_p1  ;;  %p3809_p3 = scmp.lt.u32.totalorder %s4379_s5, %s5328_s2 }
  0xe3   : > { %p3810_p6 = scmp.lt.u32.totalorder %s3808_s30, %s3803_s11  ;;  %p3812_p0 = scmp.lt.u32.totalorder %s3803_s11, %s4379_s5 }
  0xe4   : > { %p3807_p11 = pneg %p3806_p10 }
  0xe5   : > { %p3811_p4 = por %p3810_p6, %p3809_p3 }
  0xe7   : > { %p3813_p8 = por %p3812_p0, %p3811_p4 }
  0xe9   : > { %p3814_p2 = pnand %p3813_p8, %p3807_p11 }
  0xeb   : > { %3817 = shalt.err (!%p3814_p2)
}
  0xec   : > { %s3818_s29 = scalar_lea.vmem %s4306_s1, 512  ;;  %s4024_s14 = smov [#allocation10]  }
  0xed   : > { %p3819_p7 = scmp.ne.s32.totalorder %s4306_s1, %s3818_s29  ;;  %s3823_s9 = sshll.u32 %s4024_s14, 4  ;;  %s3824_s9 = int_to_ptr.vmem [resolvable:$false] %s3823_s9 }
  0xee   : > { %s3825_s23 = scalar_lea.vmem %s3824_s9, 1024  ;;  %p3826_p5 = scmp.lt.s32.totalorder %s4306_s1, %s3824_s9 }
  0xef   : > { %p3821_p12 = pnand %p3819_p7, %p5429_p1  ;;  %p3827_p10 = scmp.lt.s32.totalorder %s3825_s23, %s3818_s29 }
  0xf1   : > { %p3822_p9 = pneg %p3821_p12  ;;  %p3828_p3 = por %p3827_p10, %p3826_p5 }
  0xf3   : > { %p3829_p6 = pnand %p3828_p3, %p3822_p9 }
  0xf5   : > { %3832 = shalt.err (!%p3829_p6)
}
  0xf6   : > { %3415 = dma.hbm_to_vmem [thread:$0]  (!%p5430_p13), %s4379_s5, 512, %s4306_s1, %s4271_s24, %s5425_s21, %s5425_s21, %s5424_s13  }
  0xf7   : > { %p5431_p1 = scmp.ne.s32.totalorder %s5408_s16, 0 }
  0xf8   : > { %s4438_s17 = sand.u32 (!%p5431_p1), 1, %s3971_s10   ;;  %p5432_p11 = scmp.ne.s32.totalorder (!%p5431_p1), %s5414_s26, 0 }
  0xf9   : > { %471 = sbr.rel (%p5431_p1) target bundleno = 1546 (0x60a), region = 52  ;;  %s3040_s20 = sshll.u32 (!%p5431_p1), %s4438_s17, 7 }
  0xfa   : > { %s474_s12 = scalar_lea.sflag (!%p5431_p1), [#allocation6], %s4438_s17  ;;  %s4442_s27 = scalar_lea.vmem (!%p5431_p1), [#allocation5], %s3040_s20 }
 0x100   : > { %3938 = dma.done.wait (%p5432_p11), %s474_s12, 2048  }
 0x101   : > { %3940 = vsyncadd (%p5432_p11), %s474_s12, 4294965248  ;;  %s5433_s22 = sld [smem:[#allocation34_spill]] }
 0x107   : > { %s482_s1 = sand.u32 1, %s5433_s22  }
 0x108   : > { %s483_s16 = scalar_lea.sflag [#allocation9], %s482_s1 }
 0x109   : > { %3942 = dma.done.wait (%p5432_p11), %s483_s16, 1024  }
 0x10a   : > { %3944 = vsyncadd (%p5432_p11), %s483_s16, 4294966272  ;;  %p5434_p13 = scmp.eq.s32.totalorder %s5433_s22, 0 }
 0x10c   : > { %3946 = dma.done.wait (%p5434_p13), [#allocation12], 2816   ;;  %p5435_p4 = pmov %p5434_p13 }
 0x10e   : > { %3948 = vsyncadd (%p5435_p4), [#allocation12], 4294964480  ;;  %p5436_p0 = pmov %p5435_p4 }
 0x110   : > { %3950 = dma.done.wait (%p5436_p0), [#allocation15], 512   ;;  %p5437_p8 = pmov %p5436_p0 }
 0x111   : > { %p5438_p2 = pmov %p5436_p0 }
 0x112   : > { %3952 = vsyncadd (%p5437_p8), [#allocation15], 4294966784 }
 0x113   : > { %3954 = dma.done.wait (%p5438_p2), [#allocation18], 32   ;;  %p5439_p7 = pmov %p5436_p0 }
 0x114   : > { %s3049_s24 = sshll.u32 %s4438_s17, 4  ;;  %vm586_vm0 = vcmask 1043456   ;;  %vm587_vm1 = vcmask 130052   ;;  %vm727_vm3 = vcmask 130048   ;;  %s4470_s26 = scalar_lea.vmem [#allocation19], %s3040_s20  ;;  %v4025_v1 = vmov 0  }
 0x115   : > { %3956 = vsyncadd (%p5439_p7), [#allocation18], 4294967264  ;;  %726 = vst [vmem:[#allocation2] sm:$0xff] %v4025_v1  ;;  %v4524_v2 = vld [vmem:[#allocation13] sm:$0xff]  ;;  %v4526_v3 = vld [vmem:[#allocation13 + $0x8] sm:$0xff]  ;;  %s4542_s13 = scalar_lea.vmem [#allocation20], %s3049_s24 }
 0x116   : > { %vm4466_vm2 = vmor %vm587_vm1, %vm586_vm0  ;;  %730 = vst [vmem:[#allocation2 + $0x10] sm:$0xff] %v4025_v1  ;;  %v4528_v4 = vld [vmem:[#allocation14] sm:$0xff]  ;;  %v4530_v5 = vld [vmem:[#allocation14 + $0x8] sm:$0xff]  ;;  %s4544_s21 = smov 0  }
 0x117   : > { %589 = vst.msk [vmem:[%s4470_s26] sm:$0xff] %vm4466_vm2, %v4025_v1  ;;  %590 = vst.msk [vmem:[%s4470_s26 + $0x8] sm:$0xff] %vm4466_vm2, %v4025_v1  ;;  %v4532_v6 = vld [vmem:[#allocation16] sm:$0xff]  ;;  %v4534_v7 = vld [vmem:[#allocation16 + $0x8] sm:$0xff] }
 0x118   : > { %591 = vst.msk [vmem:[%s4470_s26 + $0x10] sm:$0xff] %vm4466_vm2, %v4025_v1  ;;  %592 = vst.msk [vmem:[%s4470_s26 + $0x18] sm:$0xff] %vm4466_vm2, %v4025_v1  ;;  %v4536_v8 = vld [vmem:[#allocation17] sm:$0x3] }
 0x119   : > { %593 = vst.msk [vmem:[%s4470_s26 + $0x20] sm:$0xff] %vm4466_vm2, %v4025_v1  ;;  %594 = vst.msk [vmem:[%s4470_s26 + $0x28] sm:$0xff] %vm4466_vm2, %v4025_v1  ;;  %v4538_v9 = vld [vmem:[#allocation17] sm:$0x1] }
 0x11a   : > { %595 = vst.msk [vmem:[%s4470_s26 + $0x30] sm:$0xff] %vm4466_vm2, %v4025_v1  ;;  %596 = vst.msk [vmem:[%s4470_s26 + $0x38] sm:$0xff] %vm4466_vm2, %v4025_v1 }
 0x11b   : > { %597 = vst.msk [vmem:[%s4470_s26 + $0x40] sm:$0xff] %vm4466_vm2, %v4025_v1  ;;  %598 = vst.msk [vmem:[%s4470_s26 + $0x48] sm:$0xff] %vm4466_vm2, %v4025_v1 }
 0x11c   : > { %599 = vst.msk [vmem:[%s4470_s26 + $0x50] sm:$0xff] %vm4466_vm2, %v4025_v1  ;;  %600 = vst.msk [vmem:[%s4470_s26 + $0x58] sm:$0xff] %vm4466_vm2, %v4025_v1 }
 0x11d   : > { %601 = vst.msk [vmem:[%s4470_s26 + $0x60] sm:$0xff] %vm4466_vm2, %v4025_v1  ;;  %602 = vst.msk [vmem:[%s4470_s26 + $0x68] sm:$0xff] %vm4466_vm2, %v4025_v1 }
 0x11e   : > { %603 = vst.msk [vmem:[%s4470_s26 + $0x70] sm:$0xff] %vm4466_vm2, %v4025_v1  ;;  %604 = vst.msk [vmem:[%s4470_s26 + $0x78] sm:$0xff] %vm4466_vm2, %v4025_v1 }
 0x11f   : > { %854 = vst [vmem:[#allocation2 + $0xa0] sm:$0xff] %v4025_v1  ;;  %858 = vst [vmem:[#allocation2 + $0xb0] sm:$0xff] %v4025_v1 }
 0x120   : > { %728 = vst.msk [vmem:[#allocation2 + $0x8] sm:$0xff] %vm727_vm3, %v4025_v1  ;;  %731 = vst.msk [vmem:[#allocation2 + $0x18] sm:$0xff] %vm727_vm3, %v4025_v1 }
 0x121   : > { %856 = vst.msk [vmem:[#allocation2 + $0xa8] sm:$0xff] %vm727_vm3, %v4025_v1  ;;  %859 = vst.msk [vmem:[#allocation2 + $0xb8] sm:$0xff] %vm727_vm3, %v4025_v1 }
 0x122 LB: >> { %v4026_v10 = vmov 0   ;;  %s3242_s5 = sshll.u32 %s3991_s21, 4  ;;  %v927_v11 = vlaneseq  ;;  %vm925_vm4 = vcmp.gt.f32.partialorder %v4536_v8, 0.0  ;;  %s865_s21 = sadd.s32 1, %s3991_s21   ;;  %s3991_s21 = sphi %s4544_s21, %s865_s21  }
 0x123   : >> { %3572 = vset.pattern.permute.xlu1 %v4026_v10  ;;  %3571 = vset.pattern.permute.xlu0 %v4026_v10  ;;  %s868_s15 = scalar_lea.vmem %s4442_s27, %s3242_s5 [#allocation5]  ;;  %v926_v21 = vsel %vm925_vm4, 1, %v4026_v10  ;;  %s2855_s19 = scalar_lea.vmem [#allocation2], %s3242_s5 }
 0x124   : >> { %891 = vperm.xlu1 %3572, %v4528_v4   ;;  %877 = vperm.xlu0 %3571, %v4524_v2   ;;  %v4559_v12 = vshrl.u32 %v927_v11, 7  ;;  %v869_v13 = vld [vmem:[%s868_s15] sm:$0xff]  ;;  %v870_v14 = vld [vmem:[%s868_s15 + $0x8] sm:$0xff]  ;;  %p862_p12 = scmp.ge.s32.totalorder %s865_s21, 8  }
 0x125   : >> { %v871_v15 = vunpack.c.l.bf16 %v869_v13  ;;  %v872_v16 = vunpack.c.h.bf16 %v869_v13  ;;  %v873_v22 = vunpack.c.l.bf16 %v870_v14  ;;  %v874_v23 = vunpack.c.h.bf16 %v870_v14  ;;  %s4584_s28 = smov (%p862_p12), 0  }
 0x126   : >> { %v929_v17 = vsub.s32 0, %v4559_v12  ;;  %v933_v18 = vsub.s32 1, %v4559_v12  ;;  %v4576_v52 = vmov (%p862_p12), 0.0   ;;  %v4578_v53 = vmov (%p862_p12), 0.0  }
 0x127   : > { %v4580_v54 = vmov (%p862_p12), 0.0   ;;  %v4582_v55 = vmov (%p862_p12), 0.0  }
 0x128   : >> { %896 = vperm.xlu1 %3572, %v4530_v5   ;;  %882 = vperm.xlu0 %3571, %v4526_v3   ;;  %v930_v26 = vrot.slane %v926_v21, %v929_v17  ;;  %v934_v27 = vrot.slane %v926_v21, %v933_v18 }
 0x12a   : >> { %vm935_vm5 = vcmp.eq.s32.totalorder %v930_v26, 1  ;;  %vm936_vm6 = vcmp.eq.s32.totalorder %v934_v27, 1 }
 0x12c   : >> { %914 = vperm.xlu1 %3572, %v4534_v7   ;;  %909 = vperm.xlu0 %3571, %v4532_v6  }
 0x1a3   : >> { %v892_v19 = vpop.permute.xlu1 %891  ;;  %v878_v20 = vpop.permute.xlu0 %877 }
 0x1a4   : >> { %v885_v24 = vmul.f32 %v878_v20, %v871_v15  ;;  %v886_v25 = vmul.f32 %v878_v20, %v872_v16 }
 0x1a6   : >> { %v899_v32 = vadd.f32 %v892_v19, %v885_v24  ;;  %v900_v33 = vadd.f32 %v892_v19, %v886_v25 }
 0x1a7   : >> { %v897_v28 = vpop.permute.xlu1 %896  ;;  %v883_v29 = vpop.permute.xlu0 %882 }
 0x1a8   : >> { %v887_v30 = vmul.f32 %v883_v29, %v873_v22  ;;  %v888_v31 = vmul.f32 %v883_v29, %v874_v23  ;;  %vm903_vm9 = vcmp.gt.f32.partialorder %v899_v32, 0.0  ;;  %vm904_vm10 = vcmp.gt.f32.partialorder %v900_v33, 0.0 }
 0x1aa   : >> { %v901_v34 = vadd.f32 %v897_v28, %v887_v30  ;;  %v902_v35 = vadd.f32 %v897_v28, %v888_v31 }
 0x1ab   : >> { %v915_v36 = vpop.permute.xlu1 %914  ;;  %v910_v37 = vpop.permute.xlu0 %909 }
 0x1ac   : >> { %vm905_vm7 = vcmp.gt.f32.partialorder %v901_v34, 0.0  ;;  %vm906_vm8 = vcmp.gt.f32.partialorder %v902_v35, 0.0  ;;  %v919_v38 = vmul.f32 %v915_v36, %v901_v34  ;;  %v920_v39 = vmul.f32 %v915_v36, %v902_v35 }
 0x1ad   : >> { %v917_v40 = vmul.f32 %v910_v37, %v899_v32  ;;  %v918_v41 = vmul.f32 %v910_v37, %v900_v33  ;;  %864 = sbr.rel (!%p862_p12) target bundleno = 290 (0x122), region = 208 }
 0x1ae   : >> { %v923_v42 = vsel %vm905_vm7, %v901_v34, %v919_v38  ;;  %v924_v43 = vsel %vm906_vm8, %v902_v35, %v920_v39 }
 0x1af   : >> { %v939_v44 = vsel %vm935_vm5, %v923_v42, 0.0  ;;  %v940_v45 = vsel %vm936_vm6, %v924_v43, 0.0  ;;  %v921_v46 = vsel %vm903_vm9, %v899_v32, %v917_v40  ;;  %v922_v47 = vsel %vm904_vm10, %v900_v33, %v918_v41 }
 0x1b0   : >> { %v937_v48 = vsel %vm935_vm5, %v921_v46, 0.0  ;;  %v938_v49 = vsel %vm936_vm6, %v922_v47, 0.0 }
 0x1b1   : >> { %v941_v50 = vpack.c.bf16 %v939_v44, %v937_v48  ;;  %v942_v51 = vpack.c.bf16 %v940_v45, %v938_v49 }
 0x1b3   : >> { %3057 = vst [vmem:[%s2855_s19 + $0x20] sm:$0xff] %v941_v50  ;;  %3058 = vst.msk [vmem:[%s2855_s19 + $0x28] sm:$0xff] %vm727_vm3, %v942_v51 }
 0x1b4 LB: >> { %s5367_s11 = sshll.u32 %s4011_s28, 4  ;;  %vm960_vm11 = vcmask 752640   ;;  %v4027_v57 = vmov 0   ;;  %s4028_s25 = smov 90   ;;  %v3575_v61 = vld [vmem:[#allocation11 + $0xc] ss:$16 sps:$4 sm:$0xff]   ;;  %s4011_s28 = sphi %s4584_s28, %s955_s28   ;;  %v4007_v55 = vphi %v4582_v55, %v5462_v55   ;;  %v4003_v54 = vphi %v4580_v54, %v5461_v54   ;;  %v3999_v53 = vphi %v4578_v53, %v5460_v53   ;;  %v3995_v52 = vphi %v4576_v52, %v5459_v52  }
 0x1b5   : >> { %s4604_s3 = scalar_lea.vmem [#allocation2], %s5367_s11  ;;  %1261 = vmatprep.subr.bf16.mxu1 %v4027_v57  ;;  %s5372_s30 = smov 91   ;;  %3065 = vmatprep.mubr.msk.bf16.mxu1 %vm727_vm3, %v3575_v61  ;;  %v3578_v63 = vld [vmem:[#allocation11 + $0x4] ss:$16 sps:$4 sm:$0xff]   ;;  %vm1078_vm12 = vcmask 736256   ;;  %vm1066_vm13 = vcmask 744448  }
 0x1b6   : >> { %s4030_s18 = smov 89   ;;  %s5392_s8 = smov 88   ;;  %1252 = vmatprep.mubr.bf16.mxu0 %v3578_v63  ;;  %vm1090_vm14 = vcmask 728064   ;;  %vm1102_vm15 = vcmask 719872   ;;  %vm1114_vm0 = vcmask 654336   ;;  %vm1126_vm1 = vcmask 646144  }
 0x1b7   : >> { %s5384_s29 = smov 80   ;;  %s5386_s14 = smov 79   ;;  %vm1138_vm2 = vcmask 637952   ;;  %vm1150_vm4 = vcmask 629760   ;;  %vm1162_vm5 = vcmask 621568   ;;  %vm2646_vm6 = vcmp.gt.f32.partialorder %v4538_v9, 0.0 }
 0x1b8   : >> { %s4034_s9 = smov 113   ;;  %s4035_s23 = smov 112   ;;  %vm2676_vm8 = vcmask 961744  }
 0x1b9   : >> { %s5376_s20 = smov 78   ;;  %s5396_s12 = smov 127  }
 0x1ba   : >> { %v4607_v56 = vld [vmem:[%s4604_s3] sm:$0xff]  ;;  %v1071_v58 = vld [vmem:[%s4604_s3 + $0x8] sm:$0xff]  ;;  %v4629_v59 = vld [vmem:[%s4604_s3 + $0x10] sm:$0xff]  ;;  %s5395_s27 = smov 104   ;;  %s5380_s22 = smov 77  }
 0x1bb   : >> { %1074 = vrot.lane.b32.xlu1 %v4607_v56, %s4028_s25  ;;  %1062 = vrot.lane.b32.xlu0 %v4607_v56, %s5372_s30  ;;  %967 = vst.msk [vmem:[#allocation3] sm:$0xff] %vm960_vm11, %v4607_v56  ;;  %s5394_s1 = smov 126   ;;  %s5388_s16 = smov 103   ;;  %v3084_v62 = vld [vmem:[%s4604_s3 + $0x18] sm:$0xff]  ;;  %v4694_v0 = vld [vmem:[%s4604_s3 + $0x20] sm:$0xff] }
 0x1bc   : >> { %s5368_s24 = smov 76   ;;  %s5390_s21 = smov 125   ;;  %v4740_v8 = vld [vmem:[%s4604_s3 + $0x28] sm:$0xff]  ;;  %v4778_v34 = vld [vmem:[%s4604_s3 + $0x30] sm:$0xff] }
 0x1bd   : >> { %s5382_s5 = smov 102   ;;  %s5378_s15 = smov 124  }
 0x1be   : >> { %s5370_s19 = smov 101   ;;  %s5374_s11 = smov 116  }
 0x1bf   : >> { %1076 = vrot.lane.b32.xlu1 %v1071_v58, %s4028_s25  ;;  %1064 = vrot.lane.b32.xlu0 %v1071_v58, %s5372_s30 }
 0x1c2   : >> { %v4631_v60 = vld [vmem:[#allocation3] sm:$0xff] }
 0x1c3   : >> { %1088 = vrot.lane.b32.xlu1 %v1071_v58, %s4030_s18  ;;  %1086 = vrot.lane.b32.xlu0 %v4607_v56, %s4030_s18  ;;  %1311 = vst.msk [vmem:[#allocation3] sm:$0xff] %vm960_vm11, %v4629_v59 }
 0x1c7   : >> { %1100 = vrot.lane.b32.xlu1 %v1071_v58, %s5392_s8  ;;  %1098 = vrot.lane.b32.xlu0 %v4607_v56, %s5392_s8 }
 0x1ca   : >> { %v4696_v1 = vld [vmem:[#allocation3] sm:$0xff] }
 0x1cb   : >> { %1112 = vrot.lane.b32.xlu1 %v1071_v58, %s5384_s29  ;;  %1110 = vrot.lane.b32.xlu0 %v4607_v56, %s5384_s29  ;;  %1646 = vst.msk [vmem:[#allocation3] sm:$0xff] %vm960_vm11, %v4694_v0 }
 0x1cf   : >> { %1122 = vrot.lane.b32.xlu1 %v4607_v56, %s5386_s14  ;;  %1012 = vrot.lane.b32.xlu0 %v4607_v56, %s4034_s9 }
 0x1d2   : >> { %v4780_v35 = vld [vmem:[#allocation3] sm:$0xff] }
 0x1d3   : >> { %1018 = vrot.lane.b32.xlu1 %v4607_v56, %s4035_s23  ;;  %1124 = vrot.lane.b32.xlu0 %v1071_v58, %s5386_s14  ;;  %1981 = vst.msk [vmem:[#allocation3] sm:$0xff] %vm960_vm11, %v4778_v34 }
 0x1d7   : >> { %1134 = vrot.lane.b32.xlu1 %v4607_v56, %s5376_s20  ;;  %970 = vrot.lane.b32.xlu0 %v4607_v56, %s5396_s12 }
 0x1db   : >> { %1024 = vrot.lane.b32.xlu1 %v4607_v56, %s5395_s27  ;;  %1136 = vrot.lane.b32.xlu0 %v1071_v58, %s5376_s20 }
 0x1df   : >> { %1146 = vrot.lane.b32.xlu1 %v4607_v56, %s5380_s22  ;;  %976 = vrot.lane.b32.xlu0 %v4607_v56, %s5394_s1 }
 0x1e3   : >> { %1030 = vrot.lane.b32.xlu1 %v4607_v56, %s5388_s16  ;;  %1148 = vrot.lane.b32.xlu0 %v1071_v58, %s5380_s22 }
 0x1e7   : >> { %1158 = vrot.lane.b32.xlu1 %v4607_v56, %s5368_s24  ;;  %982 = vrot.lane.b32.xlu0 %v4607_v56, %s5390_s21 }
 0x1eb   : >> { %1036 = vrot.lane.b32.xlu1 %v4607_v56, %s5382_s5  ;;  %1160 = vrot.lane.b32.xlu0 %v1071_v58, %s5368_s24  ;;  %s4048_s24 = smov 100  }
 0x1ef   : >> { %1406 = vrot.lane.b32.xlu1 %v4629_v59, %s5372_s30  ;;  %988 = vrot.lane.b32.xlu0 %v4607_v56, %s5378_s15 }
 0x1f3   : >> { %1042 = vrot.lane.b32.xlu1 %v4607_v56, %s5370_s19  ;;  %1408 = vrot.lane.b32.xlu0 %v3084_v62, %s5372_s30  ;;  %s4049_s19 = smov 115   ;;  %s4050_s30 = smov 92  }
 0x1f7   : >> { %1417 = vrot.lane.b32.xlu1 %v4629_v59, %s4028_s25  ;;  %994 = vrot.lane.b32.xlu0 %v4607_v56, %s5374_s11  ;;  %s4051_s11 = smov 114  }
 0x1fb   : >> { %1048 = vrot.lane.b32.xlu1 %v4607_v56, %s4048_s24  ;;  %1419 = vrot.lane.b32.xlu0 %v3084_v62, %s4028_s25 }
 0x1ff   : >> { %1428 = vrot.lane.b32.xlu1 %v4629_v59, %s4030_s18  ;;  %1000 = vrot.lane.b32.xlu0 %v4607_v56, %s4049_s19 }
 0x203   : >> { %1054 = vrot.lane.b32.xlu1 %v4607_v56, %s4050_s30  ;;  %1430 = vrot.lane.b32.xlu0 %v3084_v62, %s4030_s18 }
 0x207   : >> { %1439 = vrot.lane.b32.xlu1 %v4629_v59, %s5392_s8  ;;  %1006 = vrot.lane.b32.xlu0 %v4607_v56, %s4051_s11 }
 0x20b   : >> { %1356 = vrot.lane.b32.xlu1 %v4629_v59, %s4034_s9  ;;  %1441 = vrot.lane.b32.xlu0 %v3084_v62, %s5392_s8 }
 0x20f   : >> { %1452 = vrot.lane.b32.xlu1 %v3084_v62, %s5384_s29  ;;  %1450 = vrot.lane.b32.xlu0 %v4629_v59, %s5384_s29 }
 0x213   : >> { %1314 = vrot.lane.b32.xlu1 %v4629_v59, %s5396_s12  ;;  %1362 = vrot.lane.b32.xlu0 %v4629_v59, %s4035_s23 }
 0x217   : >> { %1463 = vrot.lane.b32.xlu1 %v3084_v62, %s5386_s14  ;;  %1461 = vrot.lane.b32.xlu0 %v4629_v59, %s5386_s14 }
 0x21b   : >> { %1320 = vrot.lane.b32.xlu1 %v4629_v59, %s5394_s1  ;;  %1368 = vrot.lane.b32.xlu0 %v4629_v59, %s5395_s27 }
 0x21f   : >> { %1474 = vrot.lane.b32.xlu1 %v3084_v62, %s5376_s20  ;;  %1472 = vrot.lane.b32.xlu0 %v4629_v59, %s5376_s20  ;;  %s5442_s20 = smov 76  }
 0x223   : >> { %1326 = vrot.lane.b32.xlu1 %v4629_v59, %s5390_s21  ;;  %1374 = vrot.lane.b32.xlu0 %v4629_v59, %s5388_s16 }
 0x227   : >> { %1485 = vrot.lane.b32.xlu1 %v3084_v62, %s5380_s22  ;;  %1483 = vrot.lane.b32.xlu0 %v4629_v59, %s5380_s22  ;;  %s5444_s22 = smov 101  }
 0x22b   : >> { %1332 = vrot.lane.b32.xlu1 %v4629_v59, %s5378_s15  ;;  %1380 = vrot.lane.b32.xlu0 %v4629_v59, %s5382_s5  ;;  %s5443_s15 = smov 116   ;;  %s5445_s5 = smov 91  }
 0x22d   : >> { %v1075_v2 = vpop.permute.xlu1 %1074  ;;  %v1063_v3 = vpop.permute.xlu0 %1062 }
 0x22f   : >> { %1496 = vrot.lane.b32.xlu1 %v3084_v62, %s5442_s20  ;;  %1494 = vrot.lane.b32.xlu0 %v4629_v59, %s5442_s20 }
 0x231   : >> { %v1077_v4 = vpop.permute.xlu1 %1076  ;;  %v1065_v5 = vpop.permute.xlu0 %1064 }
 0x232   : >> { %v1079_v6 = vsel %vm1078_vm12, %v1075_v2, %v1077_v4  ;;  %v1067_v7 = vsel %vm1066_vm13, %v1063_v3, %v1065_v5 }
 0x233   : >> { %1081 = vst.msk [vmem:[#allocation3 + $0x88] sm:$0xff] %vm960_vm11, %v1079_v6  ;;  %1069 = vst.msk [vmem:[#allocation3 + $0x80] sm:$0xff] %vm960_vm11, %v1067_v7  ;;  %1338 = vrot.lane.b32.xlu1 %v4629_v59, %s5443_s15  ;;  %1386 = vrot.lane.b32.xlu0 %v4629_v59, %s5444_s22 }
 0x235   : >> { %v1089_v10 = vpop.permute.xlu1 %1088  ;;  %v1087_v11 = vpop.permute.xlu0 %1086 }
 0x236   : >> { %v1091_v13 = vsel %vm1090_vm14, %v1087_v11, %v1089_v10  ;;  %v3573_v10 = vld [vmem:[#allocation11 + $0x8] ss:$16 sps:$4 sm:$0xff]   ;;  %v3581_v11 = vld [vmem:[#allocation11 + $0x2c] ss:$16 sps:$4 sm:$0xff]  }
 0x237   : >> { %1093 = vst.msk [vmem:[#allocation3 + $0x90] sm:$0xff] %vm960_vm11, %v1091_v13  ;;  %1743 = vrot.lane.b32.xlu1 %v4740_v8, %s5445_s5  ;;  %1741 = vrot.lane.b32.xlu0 %v4694_v0, %s5445_s5 }
 0x239   : >> { %v1101_v14 = vpop.permute.xlu1 %1100  ;;  %v1099_v15 = vpop.permute.xlu0 %1098 }
 0x23a   : >> { %v1103_v16 = vsel %vm1102_vm15, %v1099_v15, %v1101_v14  ;;  %v1188_v18 = vld [vmem:[#allocation3 + $0x80] sm:$0xff]  ;;  %v1189_v22 = vld [vmem:[#allocation3 + $0x88] sm:$0xff] }
 0x23b   : >> { %1105 = vst.msk [vmem:[#allocation3 + $0x98] sm:$0xff] %vm960_vm11, %v1103_v16  ;;  %1262 = vmatpush1.bf16.msra.mxu1 %v1188_v18  ;;  %1344 = vrot.lane.b32.xlu1 %v4629_v59, %s4049_s19 }
 0x23c   : >> { %1392 = vrot.lane.b32.xlu0 %v4629_v59, %s4048_s24  ;;  %1263 = vmatprep.subr.bf16.mxu1 %v4027_v57 }
 0x23d   : >> { %v1113_v19 = vpop.permute.xlu1 %1112  ;;  %v1111_v20 = vpop.permute.xlu0 %1110 }
 0x23e   : >> { %v1115_v21 = vsel %vm1114_vm0, %v1111_v20, %v1113_v19  ;;  %v1190_v25 = vld [vmem:[#allocation3 + $0x90] sm:$0xff] }
 0x23f   : >> { %1117 = vst.msk [vmem:[#allocation3 + $0xa0] sm:$0xff] %vm960_vm11, %v1115_v21  ;;  %1264 = vmatpush1.bf16.msra.mxu1 %v1189_v22  ;;  %1754 = vrot.lane.b32.xlu1 %v4740_v8, %s4028_s25 }
 0x240   : >> { %1752 = vrot.lane.b32.xlu0 %v4694_v0, %s4028_s25  ;;  %1265 = vmatprep.subr.bf16.mxu1 %v4027_v57 }
 0x241   : >> { %v1123_v23 = vpop.permute.xlu1 %1122  ;;  %v1013_v24 = vpop.permute.xlu0 %1012 }
 0x242   : >> { %1015 = vst.msk [vmem:[#allocation3 + $0x40] sm:$0xff] %vm960_vm11, %v1013_v24  ;;  %v1191_v29 = vld [vmem:[#allocation3 + $0x98] sm:$0xff] }
 0x243   : >> { %1266 = vmatpush1.bf16.msra.mxu1 %v1190_v25  ;;  %1350 = vrot.lane.b32.xlu1 %v4629_v59, %s4051_s11 }
 0x244   : >> { %1398 = vrot.lane.b32.xlu0 %v4629_v59, %s4050_s30  ;;  %1267 = vmatprep.subr.bf16.mxu1 %v4027_v57 }
 0x245   : >> { %v1019_v26 = vpop.permute.xlu1 %1018  ;;  %v1125_v27 = vpop.permute.xlu0 %1124 }
 0x246   : >> { %1021 = vst.msk [vmem:[#allocation3 + $0x48] sm:$0xff] %vm960_vm11, %v1019_v26  ;;  %v1127_v28 = vsel %vm1126_vm1, %v1123_v23, %v1125_v27  ;;  %v1192_v33 = vld [vmem:[#allocation3 + $0xa0] sm:$0xff] }
 0x247   : >> { %1129 = vst.msk [vmem:[#allocation3 + $0xa8] sm:$0xff] %vm960_vm11, %v1127_v28  ;;  %1268 = vmatpush1.bf16.msra.mxu1 %v1191_v29  ;;  %1765 = vrot.lane.b32.xlu1 %v4740_v8, %s4030_s18 }
 0x248   : >> { %1763 = vrot.lane.b32.xlu0 %v4694_v0, %s4030_s18  ;;  %1269 = vmatprep.subr.bf16.mxu1 %v4027_v57 }
 0x249   : >> { %v1135_v30 = vpop.permute.xlu1 %1134  ;;  %v971_v31 = vpop.permute.xlu0 %970  ;;  %v1180_v32 = vld [vmem:[#allocation3 + $0x40] sm:$0xff] }
 0x24a   : >> { %973 = vst.msk [vmem:[#allocation3 + $0x8] sm:$0xff] %vm960_vm11, %v971_v31  ;;  %3250 = vmatprep.subr.bf16.mxu0 %v1180_v32 }
 0x24b   : >> { %1270 = vmatpush1.bf16.msra.mxu1 %v1192_v33  ;;  %1774 = vrot.lane.b32.xlu1 %v4694_v0, %s5392_s8 }
 0x24c   : >> { %1691 = vrot.lane.b32.xlu0 %v4694_v0, %s4034_s9  ;;  %3251 = vmatpush3.bf16.msra.mxu0 %v4631_v60 }
 0x24d   : >> { %v1025_v36 = vpop.permute.xlu1 %1024  ;;  %v1137_v37 = vpop.permute.xlu0 %1136  ;;  %1271 = vmatprep.subr.bf16.mxu1 %v4027_v57  ;;  %v1181_v38 = vld [vmem:[#allocation3 + $0x48] sm:$0xff] }
 0x24e   : >> { %1027 = vst.msk [vmem:[#allocation3 + $0x50] sm:$0xff] %vm960_vm11, %v1025_v36  ;;  %v1139_v39 = vsel %vm1138_vm2, %v1135_v30, %v1137_v37  ;;  %v1193_v40 = vld [vmem:[#allocation3 + $0xa8] sm:$0xff]  ;;  %3252 = vmatprep.subr.bf16.mxu0 %v1181_v38  ;;  %v4870_v37 = vld [vmem:[%s4604_s3 + $0x38] sm:$0xff] }
 0x24f   : >> { %1141 = vst.msk [vmem:[#allocation3 + $0xb0] sm:$0xff] %vm960_vm11, %v1139_v39  ;;  %1697 = vrot.lane.b32.xlu1 %v4694_v0, %s4035_s23  ;;  %1272 = vmatpush1.bf16.msra.mxu1 %v1193_v40 }
 0x250   : >> { %1776 = vrot.lane.b32.xlu0 %v4740_v8, %s5392_s8  ;;  %1273 = vmatprep.subr.bf16.mxu1 %v4027_v57 }
 0x251   : >> { %v1147_v41 = vpop.permute.xlu1 %1146  ;;  %v977_v42 = vpop.permute.xlu0 %976  ;;  %v1173_v43 = vld [vmem:[#allocation3 + $0x8] sm:$0xff] }
 0x252   : >> { %979 = vst.msk [vmem:[#allocation3 + $0x10] sm:$0xff] %vm960_vm11, %v977_v42  ;;  %3253 = vmatpush3.bf16.msra.mxu0 %v1173_v43  ;;  %v3576_v43 = vld [vmem:[#allocation11] ss:$16 sps:$4 sm:$0xff]  }
 0x253   : >> { %1785 = vrot.lane.b32.xlu1 %v4694_v0, %s5384_s29 }
 0x254   : >> { %1649 = vrot.lane.b32.xlu0 %v4694_v0, %s5396_s12 }
 0x255   : >> { %v1031_v44 = vpop.permute.xlu1 %1030  ;;  %v1149_v45 = vpop.permute.xlu0 %1148  ;;  %v1182_v46 = vld [vmem:[#allocation3 + $0x50] sm:$0xff] }
 0x256   : >> { %1033 = vst.msk [vmem:[#allocation3 + $0x58] sm:$0xff] %vm960_vm11, %v1031_v44  ;;  %v1151_v47 = vsel %vm1150_vm4, %v1147_v41, %v1149_v45  ;;  %v1194_v48 = vld [vmem:[#allocation3 + $0xb0] sm:$0xff]  ;;  %3254 = vmatprep.subr.bf16.mxu0 %v1182_v46  ;;  %v3584_v45 = vld [vmem:[#allocation11 + $0x24] ss:$16 sps:$4 sm:$0xff]  }
 0x257   : >> { %1153 = vst.msk [vmem:[#allocation3 + $0xb8] sm:$0xff] %vm960_vm11, %v1151_v47  ;;  %1703 = vrot.lane.b32.xlu1 %v4694_v0, %s5395_s27  ;;  %1274 = vmatpush1.bf16.msra.mxu1 %v1194_v48 }
 0x258   : >> { %1787 = vrot.lane.b32.xlu0 %v4740_v8, %s5384_s29  ;;  %1275 = vmatprep.subr.bf16.mxu1 %v4027_v57  ;;  %s5446_s29 = smov 78  }
 0x259   : >> { %v1159_v49 = vpop.permute.xlu1 %1158  ;;  %v983_v50 = vpop.permute.xlu0 %982  ;;  %v1174_v51 = vld [vmem:[#allocation3 + $0x10] sm:$0xff] }
 0x25a   : >> { %985 = vst.msk [vmem:[#allocation3 + $0x18] sm:$0xff] %vm960_vm11, %v983_v50  ;;  %3255 = vmatpush3.bf16.msra.mxu0 %v1174_v51  ;;  %v4895_v51 = vld [vmem:[%s4604_s3 + $0x40] sm:$0xff] }
 0x25b   : >> { %1796 = vrot.lane.b32.xlu1 %v4694_v0, %s5386_s14 }
 0x25c   : >> { %1655 = vrot.lane.b32.xlu0 %v4694_v0, %s5394_s1 }
 0x25d   : >> { %v1037_v56 = vpop.permute.xlu1 %1036  ;;  %v1161_v58 = vpop.permute.xlu0 %1160  ;;  %v1183_v59 = vld [vmem:[#allocation3 + $0x58] sm:$0xff] }
 0x25e   : >> { %1039 = vst.msk [vmem:[#allocation3 + $0x60] sm:$0xff] %vm960_vm11, %v1037_v56  ;;  %v1163_v60 = vsel %vm1162_vm5, %v1159_v49, %v1161_v58  ;;  %v1195_v61 = vld [vmem:[#allocation3 + $0xb8] sm:$0xff]  ;;  %3256 = vmatprep.subr.bf16.mxu0 %v1183_v59  ;;  %v4897_v56 = vld [vmem:[#allocation3] sm:$0xff] }
 0x25f   : >> { %1165 = vst.msk [vmem:[#allocation3 + $0xc0] sm:$0xff] %vm960_vm11, %v1163_v60  ;;  %1709 = vrot.lane.b32.xlu1 %v4694_v0, %s5388_s16  ;;  %1276 = vmatpush1.bf16.msra.mxu1 %v1195_v61  ;;  %s5448_s16 = smov 77   ;;  %2316 = vst.msk [vmem:[#allocation3] sm:$0xff] %vm960_vm11, %v4895_v51 }
 0x260   : >> { %1798 = vrot.lane.b32.xlu0 %v4740_v8, %s5386_s14  ;;  %1277 = vmatprep.subr.bf16.mxu1 %v4027_v57  ;;  %s5447_s14 = smov 102  }
 0x261   : >> { %v1407_v62 = vpop.permute.xlu1 %1406  ;;  %v989_v63 = vpop.permute.xlu0 %988  ;;  %v1175_v2 = vld [vmem:[#allocation3 + $0x18] sm:$0xff] }
 0x262   : >> { %991 = vst.msk [vmem:[#allocation3 + $0x20] sm:$0xff] %vm960_vm11, %v989_v63  ;;  %3257 = vmatpush3.bf16.msra.mxu0 %v1175_v2 }
 0x263   : >> { %1807 = vrot.lane.b32.xlu1 %v4694_v0, %s5446_s29 }
 0x264   : >> { %1661 = vrot.lane.b32.xlu0 %v4694_v0, %s5390_s21  ;;  %s5449_s21 = smov 124  }
 0x265   : >> { %v1043_v3 = vpop.permute.xlu1 %1042  ;;  %v1409_v4 = vpop.permute.xlu0 %1408  ;;  %v1184_v5 = vld [vmem:[#allocation3 + $0x60] sm:$0xff] }
 0x266   : >> { %1045 = vst.msk [vmem:[#allocation3 + $0x68] sm:$0xff] %vm960_vm11, %v1043_v3  ;;  %v1410_v6 = vsel %vm1066_vm13, %v1407_v62, %v1409_v4  ;;  %v1196_v7 = vld [vmem:[#allocation3 + $0xc0] sm:$0xff]  ;;  %3258 = vmatprep.subr.bf16.mxu0 %v1184_v5 }
 0x267   : >> { %1412 = vst.msk [vmem:[#allocation3 + $0x80] sm:$0xff] %vm960_vm11, %v1410_v6  ;;  %1715 = vrot.lane.b32.xlu1 %v4694_v0, %s5447_s14  ;;  %1278 = vmatpush1.bf16.msra.mxu1 %v1196_v7 }
 0x268   : >> { %1809 = vrot.lane.b32.xlu0 %v4740_v8, %s5446_s29  ;;  %1596 = vmatprep.subr.bf16.mxu1 %v4027_v57 }
 0x269   : >> { %v1418_v13 = vpop.permute.xlu1 %1417  ;;  %v995_v14 = vpop.permute.xlu0 %994  ;;  %v1176_v15 = vld [vmem:[#allocation3 + $0x20] sm:$0xff] }
 0x26a   : >> { %997 = vst.msk [vmem:[#allocation3 + $0x28] sm:$0xff] %vm960_vm11, %v995_v14  ;;  %3259 = vmatpush3.bf16.msra.mxu0 %v1176_v15  ;;  %1294 = vmatmul.mubr.bf16.vlgmr.msra.gmra.mrb[0].mxu1 %v3573_v10 }
 0x26b   : >> { %1818 = vrot.lane.b32.xlu1 %v4694_v0, %s5448_s16  ;;  %3105 = vmatprep.mubr.msk.bf16.mxu1 %vm727_vm3, %v3581_v11 }
 0x26c   : >> { %1667 = vrot.lane.b32.xlu0 %v4694_v0, %s5449_s21 }
 0x26d   : >> { %v1049_v16 = vpop.permute.xlu1 %1048  ;;  %v1420_v18 = vpop.permute.xlu0 %1419  ;;  %v1185_v19 = vld [vmem:[#allocation3 + $0x68] sm:$0xff] }
 0x26e   : >> { %1051 = vst.msk [vmem:[#allocation3 + $0x70] sm:$0xff] %vm960_vm11, %v1049_v16  ;;  %v1421_v20 = vsel %vm1078_vm12, %v1418_v13, %v1420_v18  ;;  %v1524_v21 = vld [vmem:[#allocation3 + $0x80] sm:$0xff]  ;;  %3260 = vmatprep.subr.bf16.mxu0 %v1185_v19 }
 0x26f   : >> { %1423 = vst.msk [vmem:[#allocation3 + $0x88] sm:$0xff] %vm960_vm11, %v1421_v20  ;;  %1721 = vrot.lane.b32.xlu1 %v4694_v0, %s5444_s22  ;;  %1597 = vmatpush1.bf16.msra.mxu1 %v1524_v21 }
 0x270   : >> { %1820 = vrot.lane.b32.xlu0 %v4740_v8, %s5448_s16  ;;  %1598 = vmatprep.subr.bf16.mxu1 %v4027_v57 }
 0x271   : >> { %v1429_v22 = vpop.permute.xlu1 %1428  ;;  %v1001_v23 = vpop.permute.xlu0 %1000  ;;  %v1177_v24 = vld [vmem:[#allocation3 + $0x28] sm:$0xff] }
 0x272   : >> { %1003 = vst.msk [vmem:[#allocation3 + $0x30] sm:$0xff] %vm960_vm11, %v1001_v23  ;;  %3261 = vmatpush3.bf16.msra.mxu0 %v1177_v24 }
 0x273   : >> { %1829 = vrot.lane.b32.xlu1 %v4694_v0, %s5442_s20 }
 0x274   : >> { %1673 = vrot.lane.b32.xlu0 %v4694_v0, %s5443_s15 }
 0x275   : >> { %v1055_v25 = vpop.permute.xlu1 %1054  ;;  %v1431_v26 = vpop.permute.xlu0 %1430  ;;  %v1186_v27 = vld [vmem:[#allocation3 + $0x70] sm:$0xff] }
 0x276   : >> { %1057 = vst.msk [vmem:[#allocation3 + $0x78] sm:$0xff] %vm960_vm11, %v1055_v25  ;;  %v1432_v28 = vsel %vm1090_vm14, %v1429_v22, %v1431_v26  ;;  %v1525_v29 = vld [vmem:[#allocation3 + $0x88] sm:$0xff]  ;;  %3262 = vmatprep.subr.bf16.mxu0 %v1186_v27 }
 0x277   : >> { %1434 = vst.msk [vmem:[#allocation3 + $0x90] sm:$0xff] %vm960_vm11, %v1432_v28  ;;  %1727 = vrot.lane.b32.xlu1 %v4694_v0, %s4048_s24  ;;  %1599 = vmatpush1.bf16.msra.mxu1 %v1525_v29 }
 0x278   : >> { %1831 = vrot.lane.b32.xlu0 %v4740_v8, %s5442_s20  ;;  %1600 = vmatprep.subr.bf16.mxu1 %v4027_v57 }
 0x279   : >> { %v1440_v30 = vpop.permute.xlu1 %1439  ;;  %v1007_v31 = vpop.permute.xlu0 %1006  ;;  %v1178_v32 = vld [vmem:[#allocation3 + $0x30] sm:$0xff] }
 0x27a   : >> { %1009 = vst.msk [vmem:[#allocation3 + $0x38] sm:$0xff] %vm960_vm11, %v1007_v31  ;;  %3263 = vmatpush3.bf16.msra.mxu0 %v1178_v32 }
 0x27b   : >> { %2076 = vrot.lane.b32.xlu1 %v4778_v34, %s5445_s5 }
 0x27c   : >> { %1679 = vrot.lane.b32.xlu0 %v4694_v0, %s4049_s19 }
 0x27d   : >> { %v1357_v33 = vpop.permute.xlu1 %1356  ;;  %v1442_v36 = vpop.permute.xlu0 %1441  ;;  %v1187_v38 = vld [vmem:[#allocation3 + $0x78] sm:$0xff] }
 0x27e   : >> { %1359 = vst.msk [vmem:[#allocation3 + $0x40] sm:$0xff] %vm960_vm11, %v1357_v33  ;;  %v1443_v8 = vsel %vm1102_vm15, %v1440_v30, %v1442_v36  ;;  %v1526_v39 = vld [vmem:[#allocation3 + $0x90] sm:$0xff]  ;;  %3264 = vmatprep.subr.bf16.mxu0 %v1187_v38 }
 0x27f   : >> { %1445 = vst.msk [vmem:[#allocation3 + $0x98] sm:$0xff] %vm960_vm11, %v1443_v8  ;;  %1733 = vrot.lane.b32.xlu1 %v4694_v0, %s4050_s30  ;;  %1601 = vmatpush1.bf16.msra.mxu1 %v1526_v39  ;;  %v3579_v33 = vld [vmem:[#allocation11 + $0x28] ss:$16 sps:$4 sm:$0xff]   ;;  %v3587_v36 = vld [vmem:[#allocation11 + $0x4c] ss:$16 sps:$4 sm:$0xff]  }
 0x280   : >> { %2078 = vrot.lane.b32.xlu0 %v4870_v37, %s5445_s5  ;;  %1602 = vmatprep.subr.bf16.mxu1 %v4027_v57 }
 0x281   : >> { %v1453_v40 = vpop.permute.xlu1 %1452  ;;  %v1451_v41 = vpop.permute.xlu0 %1450  ;;  %v1179_v42 = vld [vmem:[#allocation3 + $0x38] sm:$0xff] }
 0x282   : >> { %v1454_v44 = vsel %vm1114_vm0, %v1451_v41, %v1453_v40  ;;  %3265 = vmatpush3.bf16.msra.mxu0 %v1179_v42 }
 0x283   : >> { %1456 = vst.msk [vmem:[#allocation3 + $0xa0] sm:$0xff] %vm960_vm11, %v1454_v44  ;;  %2087 = vrot.lane.b32.xlu1 %v4778_v34, %s4028_s25 }
 0x284   : >> { %1685 = vrot.lane.b32.xlu0 %v4694_v0, %s4051_s11 }
 0x285   : >> { %v1315_v46 = vpop.permute.xlu1 %1314  ;;  %v1363_v47 = vpop.permute.xlu0 %1362  ;;  %v1516_v48 = vld [vmem:[#allocation3 + $0x40] sm:$0xff]  ;;  %1253 = vmatmul.mubr.bf16.vlgmr.msra.gmra.mrb[0].mxu0 %v3576_v43 }
 0x286   : >> { %1317 = vst.msk [vmem:[#allocation3 + $0x8] sm:$0xff] %vm960_vm11, %v1315_v46  ;;  %1365 = vst.msk [vmem:[#allocation3 + $0x48] sm:$0xff] %vm960_vm11, %v1363_v47  ;;  %v1527_v49 = vld [vmem:[#allocation3 + $0x98] sm:$0xff]  ;;  %3272 = vmatprep.subr.bf16.mxu0 %v1516_v48  ;;  %1587 = vmatprep.mubr.bf16.mxu0 %v3584_v45 }
 0x287   : >> { %2026 = vrot.lane.b32.xlu1 %v4778_v34, %s4034_s9  ;;  %1603 = vmatpush1.bf16.msra.mxu1 %v1527_v49 }
 0x288   : >> { %2089 = vrot.lane.b32.xlu0 %v4870_v37, %s4028_s25  ;;  %1604 = vmatprep.subr.bf16.mxu1 %v4027_v57 }
 0x289   : >> { %v1464_v0 = vpop.permute.xlu1 %1463  ;;  %v1462_v50 = vpop.permute.xlu0 %1461  ;;  %3273 = vmatpush3.bf16.msra.mxu0 %v4696_v1 }
 0x28a   : >> { %v1465_v58 = vsel %vm1126_vm1, %v1462_v50, %v1464_v0  ;;  %v1528_v59 = vld [vmem:[#allocation3 + $0xa0] sm:$0xff] }
 0x28b   : >> { %1467 = vst.msk [vmem:[#allocation3 + $0xa8] sm:$0xff] %vm960_vm11, %v1465_v58  ;;  %2100 = vrot.lane.b32.xlu1 %v4870_v37, %s4030_s18  ;;  %1605 = vmatpush1.bf16.msra.mxu1 %v1528_v59 }
 0x28c   : >> { %2098 = vrot.lane.b32.xlu0 %v4778_v34, %s4030_s18  ;;  %1606 = vmatprep.subr.bf16.mxu1 %v4027_v57 }
 0x28d   : >> { %v1321_v1 = vpop.permute.xlu1 %1320  ;;  %v1369_v60 = vpop.permute.xlu0 %1368  ;;  %v1517_v61 = vld [vmem:[#allocation3 + $0x48] sm:$0xff] }
 0x28e   : >> { %v1509_v62 = vld [vmem:[#allocation3 + $0x8] sm:$0xff]  ;;  %1323 = vst.msk [vmem:[#allocation3 + $0x10] sm:$0xff] %vm960_vm11, %v1321_v1  ;;  %1371 = vst.msk [vmem:[#allocation3 + $0x50] sm:$0xff] %vm960_vm11, %v1369_v60  ;;  %3274 = vmatprep.subr.bf16.mxu0 %v1517_v61 }
 0x28f   : >> { %1984 = vrot.lane.b32.xlu1 %v4778_v34, %s5396_s12  ;;  %3275 = vmatpush3.bf16.msra.mxu0 %v1509_v62  ;;  %s5453_s12 = smov 79   ;;  %v4993_v62 = vld [vmem:[%s4604_s3 + $0x48] sm:$0xff]  ;;  %s5454_s3 = smov 127  }
 0x290   : >> { %2032 = vrot.lane.b32.xlu0 %v4778_v34, %s4035_s23 }
 0x291   : >> { %v1475_v63 = vpop.permute.xlu1 %1474  ;;  %v1473_v2 = vpop.permute.xlu0 %1472 }
 0x292   : >> { %v1476_v3 = vsel %vm1138_vm2, %v1473_v2, %v1475_v63  ;;  %v1529_v4 = vld [vmem:[#allocation3 + $0xa8] sm:$0xff] }
 0x293   : >> { %1478 = vst.msk [vmem:[#allocation3 + $0xb0] sm:$0xff] %vm960_vm11, %v1476_v3  ;;  %2111 = vrot.lane.b32.xlu1 %v4870_v37, %s5392_s8  ;;  %1607 = vmatpush1.bf16.msra.mxu1 %v1529_v4  ;;  %v3590_v2 = vld [vmem:[#allocation11 + $0x44] ss:$16 sps:$4 sm:$0xff]  }
 0x294   : >> { %2109 = vrot.lane.b32.xlu0 %v4778_v34, %s5392_s8  ;;  %1608 = vmatprep.subr.bf16.mxu1 %v4027_v57  ;;  %s5450_s8 = smov 80  }
 0x295   : >> { %v1327_v5 = vpop.permute.xlu1 %1326  ;;  %v1375_v6 = vpop.permute.xlu0 %1374  ;;  %v1518_v7 = vld [vmem:[#allocation3 + $0x50] sm:$0xff] }
 0x296   : >> { %v1510_v10 = vld [vmem:[#allocation3 + $0x10] sm:$0xff]  ;;  %1329 = vst.msk [vmem:[#allocation3 + $0x18] sm:$0xff] %vm960_vm11, %v1327_v5  ;;  %1377 = vst.msk [vmem:[#allocation3 + $0x58] sm:$0xff] %vm960_vm11, %v1375_v6  ;;  %3276 = vmatprep.subr.bf16.mxu0 %v1518_v7 }
 0x297   : >> { %1990 = vrot.lane.b32.xlu1 %v4778_v34, %s5394_s1  ;;  %3277 = vmatpush3.bf16.msra.mxu0 %v1510_v10  ;;  %s5451_s1 = smov 125  }
 0x298   : >> { %2038 = vrot.lane.b32.xlu0 %v4778_v34, %s5395_s27  ;;  %s5452_s27 = smov 103  }
 0x299   : >> { %v1486_v11 = vpop.permute.xlu1 %1485  ;;  %v1484_v13 = vpop.permute.xlu0 %1483 }
 0x29a   : >> { %v1487_v14 = vsel %vm1150_vm4, %v1484_v13, %v1486_v11  ;;  %v1530_v15 = vld [vmem:[#allocation3 + $0xb0] sm:$0xff] }
 0x29b   : >> { %1489 = vst.msk [vmem:[#allocation3 + $0xb8] sm:$0xff] %vm960_vm11, %v1487_v14  ;;  %2122 = vrot.lane.b32.xlu1 %v4870_v37, %s5450_s8  ;;  %1609 = vmatpush1.bf16.msra.mxu1 %v1530_v15 }
 0x29c   : >> { %2120 = vrot.lane.b32.xlu0 %v4778_v34, %s5450_s8  ;;  %1610 = vmatprep.subr.bf16.mxu1 %v4027_v57 }
 0x29d   : >> { %v1333_v16 = vpop.permute.xlu1 %1332  ;;  %v1381_v18 = vpop.permute.xlu0 %1380  ;;  %v1519_v19 = vld [vmem:[#allocation3 + $0x58] sm:$0xff] }
 0x29e   : >> { %v1511_v20 = vld [vmem:[#allocation3 + $0x18] sm:$0xff]  ;;  %1335 = vst.msk [vmem:[#allocation3 + $0x20] sm:$0xff] %vm960_vm11, %v1333_v16  ;;  %1383 = vst.msk [vmem:[#allocation3 + $0x60] sm:$0xff] %vm960_vm11, %v1381_v18  ;;  %3278 = vmatprep.subr.bf16.mxu0 %v1519_v19 }
 0x29f   : >> { %1996 = vrot.lane.b32.xlu1 %v4778_v34, %s5451_s1  ;;  %3279 = vmatpush3.bf16.msra.mxu0 %v1511_v20 }
 0x2a0   : >> { %2044 = vrot.lane.b32.xlu0 %v4778_v34, %s5452_s27 }
 0x2a1   : >> { %v1497_v21 = vpop.permute.xlu1 %1496  ;;  %v1495_v22 = vpop.permute.xlu0 %1494 }
 0x2a2   : >> { %v1498_v23 = vsel %vm1162_vm5, %v1495_v22, %v1497_v21  ;;  %v1531_v24 = vld [vmem:[#allocation3 + $0xb8] sm:$0xff] }
 0x2a3   : >> { %1500 = vst.msk [vmem:[#allocation3 + $0xc0] sm:$0xff] %vm960_vm11, %v1498_v23  ;;  %2133 = vrot.lane.b32.xlu1 %v4870_v37, %s5453_s12  ;;  %1611 = vmatpush1.bf16.msra.mxu1 %v1531_v24 }
 0x2a4   : >> { %2131 = vrot.lane.b32.xlu0 %v4778_v34, %s5453_s12  ;;  %1612 = vmatprep.subr.bf16.mxu1 %v4027_v57 }
 0x2a5   : >> { %v1339_v25 = vpop.permute.xlu1 %1338  ;;  %v1387_v26 = vpop.permute.xlu0 %1386  ;;  %v1520_v27 = vld [vmem:[#allocation3 + $0x60] sm:$0xff] }
 0x2a6   : >> { %v1512_v28 = vld [vmem:[#allocation3 + $0x20] sm:$0xff]  ;;  %1341 = vst.msk [vmem:[#allocation3 + $0x28] sm:$0xff] %vm960_vm11, %v1339_v25  ;;  %1389 = vst.msk [vmem:[#allocation3 + $0x68] sm:$0xff] %vm960_vm11, %v1387_v26  ;;  %3280 = vmatprep.subr.bf16.mxu0 %v1520_v27 }
 0x2a7   : >> { %2002 = vrot.lane.b32.xlu1 %v4778_v34, %s5449_s21  ;;  %3281 = vmatpush3.bf16.msra.mxu0 %v1512_v28 }
 0x2a8   : >> { %2050 = vrot.lane.b32.xlu0 %v4778_v34, %s5447_s14 }
 0x2a9   : >> { %v1744_v29 = vpop.permute.xlu1 %1743  ;;  %v1742_v30 = vpop.permute.xlu0 %1741 }
 0x2aa   : >> { %v1745_v31 = vsel %vm1066_vm13, %v1742_v30, %v1744_v29  ;;  %v1532_v32 = vld [vmem:[#allocation3 + $0xc0] sm:$0xff] }
 0x2ab   : >> { %1747 = vst.msk [vmem:[#allocation3 + $0x80] sm:$0xff] %vm960_vm11, %v1745_v31  ;;  %2144 = vrot.lane.b32.xlu1 %v4870_v37, %s5446_s29  ;;  %1613 = vmatpush1.bf16.msra.mxu1 %v1532_v32 }
 0x2ac   : >> { %2142 = vrot.lane.b32.xlu0 %v4778_v34, %s5446_s29  ;;  %1931 = vmatprep.subr.bf16.mxu1 %v4027_v57 }
 0x2ad   : >> { %v1345_v38 = vpop.permute.xlu1 %1344  ;;  %v1521_v8 = vld [vmem:[#allocation3 + $0x68] sm:$0xff] }
 0x2ae   : >> { %v1513_v39 = vld [vmem:[#allocation3 + $0x28] sm:$0xff]  ;;  %1347 = vst.msk [vmem:[#allocation3 + $0x30] sm:$0xff] %vm960_vm11, %v1345_v38  ;;  %v1393_v40 = vpop.permute.xlu0 %1392  ;;  %3282 = vmatprep.subr.bf16.mxu0 %v1521_v8  ;;  %1629 = vmatmul.mubr.bf16.vlgmr.msra.gmra.mrb[4].mxu1 %v3579_v33 }
 0x2af   : >> { %1395 = vst.msk [vmem:[#allocation3 + $0x70] sm:$0xff] %vm960_vm11, %v1393_v40  ;;  %2008 = vrot.lane.b32.xlu1 %v4778_v34, %s5443_s15  ;;  %3283 = vmatpush3.bf16.msra.mxu0 %v1513_v39 }
 0x2b0   : >> { %2056 = vrot.lane.b32.xlu0 %v4778_v34, %s5444_s22  ;;  %3145 = vmatprep.mubr.msk.bf16.mxu1 %vm727_vm3, %v3587_v36 }
 0x2b1   : >> { %v1755_v41 = vpop.permute.xlu1 %1754 }
 0x2b2   : >> { %v1753_v42 = vpop.permute.xlu0 %1752  ;;  %v1859_v43 = vld [vmem:[#allocation3 + $0x80] sm:$0xff] }
 0x2b3   : >> { %v1756_v44 = vsel %vm1078_vm12, %v1753_v42, %v1755_v41  ;;  %2155 = vrot.lane.b32.xlu1 %v4870_v37, %s5448_s16  ;;  %1932 = vmatpush1.bf16.msra.mxu1 %v1859_v43 }
 0x2b4   : >> { %1758 = vst.msk [vmem:[#allocation3 + $0x88] sm:$0xff] %vm960_vm11, %v1756_v44  ;;  %2153 = vrot.lane.b32.xlu0 %v4778_v34, %s5448_s16  ;;  %1933 = vmatprep.subr.bf16.mxu1 %v4027_v57 }
 0x2b5   : >> { %v1351_v45 = vpop.permute.xlu1 %1350  ;;  %v1514_v46 = vld [vmem:[#allocation3 + $0x30] sm:$0xff] }
 0x2b6   : >> { %1353 = vst.msk [vmem:[#allocation3 + $0x38] sm:$0xff] %vm960_vm11, %v1351_v45  ;;  %v1399_v47 = vpop.permute.xlu0 %1398  ;;  %v1522_v48 = vld [vmem:[#allocation3 + $0x70] sm:$0xff] }
 0x2b7   : >> { %1401 = vst.msk [vmem:[#allocation3 + $0x78] sm:$0xff] %vm960_vm11, %v1399_v47  ;;  %3284 = vmatprep.subr.bf16.mxu0 %v1522_v48  ;;  %2014 = vrot.lane.b32.xlu1 %v4778_v34, %s4049_s19 }
 0x2b8   : >> { %2062 = vrot.lane.b32.xlu0 %v4778_v34, %s4048_s24  ;;  %3285 = vmatpush3.bf16.msra.mxu0 %v1514_v46 }
 0x2b9   : >> { %v1766_v49 = vpop.permute.xlu1 %1765 }
 0x2ba   : >> { %v1764_v0 = vpop.permute.xlu0 %1763 }
 0x2bb   : >> { %v1767_v50 = vsel %vm1090_vm14, %v1764_v0, %v1766_v49  ;;  %2166 = vrot.lane.b32.xlu1 %v4870_v37, %s5442_s20  ;;  %v1860_v58 = vld [vmem:[#allocation3 + $0x88] sm:$0xff] }
 0x2bc   : >> { %1769 = vst.msk [vmem:[#allocation3 + $0x90] sm:$0xff] %vm960_vm11, %v1767_v50  ;;  %2164 = vrot.lane.b32.xlu0 %v4778_v34, %s5442_s20  ;;  %1934 = vmatpush1.bf16.msra.mxu1 %v1860_v58  ;;  %v3582_v37 = vld [vmem:[#allocation11 + $0x20] ss:$16 sps:$4 sm:$0xff]  }
 0x2bd   : >> { %v1775_v59 = vpop.permute.xlu1 %1774  ;;  %v1515_v1 = vld [vmem:[#allocation3 + $0x38] sm:$0xff]  ;;  %1935 = vmatprep.subr.bf16.mxu1 %v4027_v57 }
 0x2be   : >> { %v1692_v60 = vpop.permute.xlu0 %1691  ;;  %v1523_v61 = vld [vmem:[#allocation3 + $0x78] sm:$0xff] }
 0x2bf   : >> { %1694 = vst.msk [vmem:[#allocation3 + $0x40] sm:$0xff] %vm960_vm11, %v1692_v60  ;;  %3286 = vmatprep.subr.bf16.mxu0 %v1523_v61  ;;  %2020 = vrot.lane.b32.xlu1 %v4778_v34, %s4051_s11 }
 0x2c0   : >> { %2068 = vrot.lane.b32.xlu0 %v4778_v34, %s4050_s30  ;;  %3287 = vmatpush3.bf16.msra.mxu0 %v1515_v1 }
 0x2c1   : >> { %v1698_v63 = vpop.permute.xlu1 %1697 }
 0x2c2   : >> { %1700 = vst.msk [vmem:[#allocation3 + $0x48] sm:$0xff] %vm960_vm11, %v1698_v63  ;;  %v1777_v3 = vpop.permute.xlu0 %1776  ;;  %v3585_v63 = vld [vmem:[#allocation11 + $0x48] ss:$16 sps:$4 sm:$0xff]  }
 0x2c3   : >> { %v1778_v4 = vsel %vm1102_vm15, %v1775_v59, %v1777_v3  ;;  %2413 = vrot.lane.b32.xlu1 %v4993_v62, %s5445_s5  ;;  %v1861_v5 = vld [vmem:[#allocation3 + $0x90] sm:$0xff]  ;;  %1588 = vmatmul.mubr.bf16.vlgmr.msra.gmra.mrb[4].mxu0 %v3582_v37 }
 0x2c4   : >> { %1780 = vst.msk [vmem:[#allocation3 + $0x98] sm:$0xff] %vm960_vm11, %v1778_v4  ;;  %2411 = vrot.lane.b32.xlu0 %v4895_v51, %s5445_s5  ;;  %1936 = vmatpush1.bf16.msra.mxu1 %v1861_v5  ;;  %v3596_v3 = vld [vmem:[#allocation11 + $0x6c] ss:$16 sps:$4 sm:$0xff]  }
 0x2c5   : >> { %v1786_v34 = vpop.permute.xlu1 %1785  ;;  %1937 = vmatprep.subr.bf16.mxu1 %v4027_v57  ;;  %1922 = vmatprep.mubr.bf16.mxu0 %v3590_v2 }
 0x2c6   : >> { %v1650_v6 = vpop.permute.xlu0 %1649  ;;  %v1851_v7 = vld [vmem:[#allocation3 + $0x40] sm:$0xff] }
 0x2c7   : >> { %1652 = vst.msk [vmem:[#allocation3 + $0x8] sm:$0xff] %vm960_vm11, %v1650_v6  ;;  %3294 = vmatprep.subr.bf16.mxu0 %v1851_v7  ;;  %2422 = vrot.lane.b32.xlu1 %v4895_v51, %s4028_s25 }
 0x2c8   : >> { %2361 = vrot.lane.b32.xlu0 %v4895_v51, %s4034_s9  ;;  %3295 = vmatpush3.bf16.msra.mxu0 %v4780_v35  ;;  %s5456_s9 = smov 88  }
 0x2c9   : >> { %v1704_v10 = vpop.permute.xlu1 %1703  ;;  %v1852_v11 = vld [vmem:[#allocation3 + $0x48] sm:$0xff] }
 0x2ca   : >> { %1706 = vst.msk [vmem:[#allocation3 + $0x50] sm:$0xff] %vm960_vm11, %v1704_v10  ;;  %v1788_v13 = vpop.permute.xlu0 %1787  ;;  %3296 = vmatprep.subr.bf16.mxu0 %v1852_v11 }
 0x2cb   : >> { %v1789_v14 = vsel %vm1114_vm0, %v1786_v34, %v1788_v13  ;;  %v1862_v15 = vld [vmem:[#allocation3 + $0x98] sm:$0xff]  ;;  %2367 = vrot.lane.b32.xlu1 %v4895_v51, %s4035_s23  ;;  %s5457_s23 = smov 126  }
 0x2cc   : >> { %1791 = vst.msk [vmem:[#allocation3 + $0xa0] sm:$0xff] %vm960_vm11, %v1789_v14  ;;  %2424 = vrot.lane.b32.xlu0 %v4993_v62, %s4028_s25  ;;  %1938 = vmatpush1.bf16.msra.mxu1 %v1862_v15  ;;  %s5455_s25 = smov 104  }
 0x2cd   : >> { %v1797_v16 = vpop.permute.xlu1 %1796  ;;  %1939 = vmatprep.subr.bf16.mxu1 %v4027_v57 }
 0x2ce   : >> { %v1656_v35 = vpop.permute.xlu0 %1655  ;;  %v1844_v18 = vld [vmem:[#allocation3 + $0x8] sm:$0xff] }
 0x2cf   : >> { %1658 = vst.msk [vmem:[#allocation3 + $0x10] sm:$0xff] %vm960_vm11, %v1656_v35  ;;  %3297 = vmatpush3.bf16.msra.mxu0 %v1844_v18  ;;  %2433 = vrot.lane.b32.xlu1 %v4895_v51, %s4030_s18  ;;  %v3593_v18 = vld [vmem:[#allocation11 + $0x64] ss:$16 sps:$4 sm:$0xff]  }
 0x2d0   : >> { %2319 = vrot.lane.b32.xlu0 %v4895_v51, %s5454_s3 }
 0x2d1   : >> { %v1710_v19 = vpop.permute.xlu1 %1709  ;;  %v1853_v20 = vld [vmem:[#allocation3 + $0x50] sm:$0xff] }
 0x2d2   : >> { %1712 = vst.msk [vmem:[#allocation3 + $0x58] sm:$0xff] %vm960_vm11, %v1710_v19  ;;  %v1799_v21 = vpop.permute.xlu0 %1798  ;;  %3298 = vmatprep.subr.bf16.mxu0 %v1853_v20 }
 0x2d3   : >> { %v1800_v22 = vsel %vm1126_vm1, %v1797_v16, %v1799_v21  ;;  %v1863_v23 = vld [vmem:[#allocation3 + $0xa0] sm:$0xff]  ;;  %2373 = vrot.lane.b32.xlu1 %v4895_v51, %s5455_s25  ;;  %v3588_v16 = vld [vmem:[#allocation11 + $0x40] ss:$16 sps:$4 sm:$0xff]  }
 0x2d4   : >> { %1802 = vst.msk [vmem:[#allocation3 + $0xa8] sm:$0xff] %vm960_vm11, %v1800_v22  ;;  %2435 = vrot.lane.b32.xlu0 %v4993_v62, %s4030_s18  ;;  %1940 = vmatpush1.bf16.msra.mxu1 %v1863_v23  ;;  %v4052_v23 = vmov 0.0  }
 0x2d5   : >> { %v1808_v24 = vpop.permute.xlu1 %1807  ;;  %1941 = vmatprep.subr.bf16.mxu1 %v4027_v57  ;;  %961 = vst.msk [vmem:[#allocation4] sm:$0xff] %vm960_vm11, %v4052_v23  ;;  %962 = vst.msk [vmem:[#allocation4 + $0x8] sm:$0xff] %vm960_vm11, %v4052_v23 }
 0x2d6   : >> { %v1662_v25 = vpop.permute.xlu0 %1661  ;;  %v1845_v26 = vld [vmem:[#allocation3 + $0x10] sm:$0xff] }
 0x2d7   : >> { %1664 = vst.msk [vmem:[#allocation3 + $0x18] sm:$0xff] %vm960_vm11, %v1662_v25  ;;  %3299 = vmatpush3.bf16.msra.mxu0 %v1845_v26  ;;  %2444 = vrot.lane.b32.xlu1 %v4895_v51, %s5456_s9 }
 0x2d8   : >> { %2325 = vrot.lane.b32.xlu0 %v4895_v51, %s5457_s23 }
 0x2d9   : >> { %v1716_v27 = vpop.permute.xlu1 %1715  ;;  %v1854_v28 = vld [vmem:[#allocation3 + $0x58] sm:$0xff] }
 0x2da   : >> { %1718 = vst.msk [vmem:[#allocation3 + $0x60] sm:$0xff] %vm960_vm11, %v1716_v27  ;;  %v1810_v29 = vpop.permute.xlu0 %1809  ;;  %3300 = vmatprep.subr.bf16.mxu0 %v1854_v28 }
 0x2db   : >> { %v1811_v30 = vsel %vm1138_vm2, %v1808_v24, %v1810_v29  ;;  %v1864_v31 = vld [vmem:[#allocation3 + $0xa8] sm:$0xff]  ;;  %2379 = vrot.lane.b32.xlu1 %v4895_v51, %s5452_s27 }
 0x2dc   : >> { %1813 = vst.msk [vmem:[#allocation3 + $0xb0] sm:$0xff] %vm960_vm11, %v1811_v30  ;;  %2446 = vrot.lane.b32.xlu0 %v4993_v62, %s5456_s9  ;;  %1942 = vmatpush1.bf16.msra.mxu1 %v1864_v31 }
 0x2dd   : >> { %v1819_v32 = vpop.permute.xlu1 %1818  ;;  %1943 = vmatprep.subr.bf16.mxu1 %v4027_v57 }
 0x2de   : >> { %v1668_v33 = vpop.permute.xlu0 %1667  ;;  %v1846_v36 = vld [vmem:[#allocation3 + $0x18] sm:$0xff] }
 0x2df   : >> { %1670 = vst.msk [vmem:[#allocation3 + $0x20] sm:$0xff] %vm960_vm11, %v1668_v33  ;;  %3301 = vmatpush3.bf16.msra.mxu0 %v1846_v36  ;;  %2455 = vrot.lane.b32.xlu1 %v4895_v51, %s5450_s8 }
 0x2e0   : >> { %2331 = vrot.lane.b32.xlu0 %v4895_v51, %s5451_s1 }
 0x2e1   : >> { %v1722_v38 = vpop.permute.xlu1 %1721  ;;  %v1855_v8 = vld [vmem:[#allocation3 + $0x60] sm:$0xff] }
 0x2e2   : >> { %1724 = vst.msk [vmem:[#allocation3 + $0x68] sm:$0xff] %vm960_vm11, %v1722_v38  ;;  %v1821_v39 = vpop.permute.xlu0 %1820  ;;  %3302 = vmatprep.subr.bf16.mxu0 %v1855_v8 }
 0x2e3   : >> { %v1822_v40 = vsel %vm1150_vm4, %v1819_v32, %v1821_v39  ;;  %v1865_v41 = vld [vmem:[#allocation3 + $0xb0] sm:$0xff]  ;;  %2385 = vrot.lane.b32.xlu1 %v4895_v51, %s5447_s14 }
 0x2e4   : >> { %1824 = vst.msk [vmem:[#allocation3 + $0xb8] sm:$0xff] %vm960_vm11, %v1822_v40  ;;  %2457 = vrot.lane.b32.xlu0 %v4993_v62, %s5450_s8  ;;  %1944 = vmatpush1.bf16.msra.mxu1 %v1865_v41 }
 0x2e5   : >> { %v1830_v42 = vpop.permute.xlu1 %1829  ;;  %1945 = vmatprep.subr.bf16.mxu1 %v4027_v57 }
 0x2e6   : >> { %v1674_v43 = vpop.permute.xlu0 %1673  ;;  %v1847_v44 = vld [vmem:[#allocation3 + $0x20] sm:$0xff] }
 0x2e7   : >> { %1676 = vst.msk [vmem:[#allocation3 + $0x28] sm:$0xff] %vm960_vm11, %v1674_v43  ;;  %3303 = vmatpush3.bf16.msra.mxu0 %v1847_v44  ;;  %2466 = vrot.lane.b32.xlu1 %v4895_v51, %s5453_s12 }
 0x2e8   : >> { %2337 = vrot.lane.b32.xlu0 %v4895_v51, %s5449_s21 }
 0x2e9   : >> { %v1728_v45 = vpop.permute.xlu1 %1727  ;;  %v1856_v46 = vld [vmem:[#allocation3 + $0x68] sm:$0xff] }
 0x2ea   : >> { %1730 = vst.msk [vmem:[#allocation3 + $0x70] sm:$0xff] %vm960_vm11, %v1728_v45  ;;  %v1832_v47 = vpop.permute.xlu0 %1831  ;;  %3304 = vmatprep.subr.bf16.mxu0 %v1856_v46 }
 0x2eb   : >> { %v1833_v48 = vsel %vm1162_vm5, %v1830_v42, %v1832_v47  ;;  %v1866_v49 = vld [vmem:[#allocation3 + $0xb8] sm:$0xff]  ;;  %2391 = vrot.lane.b32.xlu1 %v4895_v51, %s5444_s22 }
 0x2ec   : >> { %1835 = vst.msk [vmem:[#allocation3 + $0xc0] sm:$0xff] %vm960_vm11, %v1833_v48  ;;  %2468 = vrot.lane.b32.xlu0 %v4993_v62, %s5453_s12  ;;  %1946 = vmatpush1.bf16.msra.mxu1 %v1866_v49 }
 0x2ed   : >> { %v2077_v0 = vpop.permute.xlu1 %2076  ;;  %1947 = vmatprep.subr.bf16.mxu1 %v4027_v57 }
 0x2ee   : >> { %v1680_v50 = vpop.permute.xlu0 %1679  ;;  %v1848_v58 = vld [vmem:[#allocation3 + $0x28] sm:$0xff] }
 0x2ef   : >> { %1682 = vst.msk [vmem:[#allocation3 + $0x30] sm:$0xff] %vm960_vm11, %v1680_v50  ;;  %3305 = vmatpush3.bf16.msra.mxu0 %v1848_v58  ;;  %2477 = vrot.lane.b32.xlu1 %v4895_v51, %s5446_s29 }
 0x2f0   : >> { %2343 = vrot.lane.b32.xlu0 %v4895_v51, %s5443_s15 }
 0x2f1   : >> { %v1734_v59 = vpop.permute.xlu1 %1733  ;;  %v1857_v1 = vld [vmem:[#allocation3 + $0x70] sm:$0xff] }
 0x2f2   : >> { %1736 = vst.msk [vmem:[#allocation3 + $0x78] sm:$0xff] %vm960_vm11, %v1734_v59  ;;  %v2079_v60 = vpop.permute.xlu0 %2078  ;;  %3306 = vmatprep.subr.bf16.mxu0 %v1857_v1 }
 0x2f3   : >> { %v2080_v61 = vsel %vm1066_vm13, %v2077_v0, %v2079_v60  ;;  %v1867_v37 = vld [vmem:[#allocation3 + $0xc0] sm:$0xff]  ;;  %2397 = vrot.lane.b32.xlu1 %v4895_v51, %s4048_s24 }
 0x2f4   : >> { %2082 = vst.msk [vmem:[#allocation3 + $0x80] sm:$0xff] %vm960_vm11, %v2080_v61  ;;  %2479 = vrot.lane.b32.xlu0 %v4993_v62, %s5446_s29  ;;  %1948 = vmatpush1.bf16.msra.mxu1 %v1867_v37 }
 0x2f5   : >> { %v2088_v2 = vpop.permute.xlu1 %2087  ;;  %2266 = vmatprep.subr.bf16.mxu1 %v4027_v57 }
 0x2f6   : >> { %v1686_v4 = vpop.permute.xlu0 %1685  ;;  %v1849_v5 = vld [vmem:[#allocation3 + $0x30] sm:$0xff] }
 0x2f7   : >> { %1688 = vst.msk [vmem:[#allocation3 + $0x38] sm:$0xff] %vm960_vm11, %v1686_v4  ;;  %3307 = vmatpush3.bf16.msra.mxu0 %v1849_v5  ;;  %2488 = vrot.lane.b32.xlu1 %v4895_v51, %s5448_s16 }
 0x2f8   : >> { %2349 = vrot.lane.b32.xlu0 %v4895_v51, %s4049_s19  ;;  %1964 = vmatmul.mubr.bf16.vlgmr.msra.gmra.mrb[8].mxu1 %v3585_v63 }
 0x2f9   : >> { %v2027_v34 = vpop.permute.xlu1 %2026  ;;  %v1858_v6 = vld [vmem:[#allocation3 + $0x78] sm:$0xff]  ;;  %3185 = vmatprep.mubr.msk.bf16.mxu1 %vm727_vm3, %v3596_v3 }
 0x2fa   : >> { %2029 = vst.msk [vmem:[#allocation3 + $0x40] sm:$0xff] %vm960_vm11, %v2027_v34  ;;  %v2090_v7 = vpop.permute.xlu0 %2089  ;;  %3308 = vmatprep.subr.bf16.mxu0 %v1858_v6 }
 0x2fb   : >> { %v2091_v10 = vsel %vm1078_vm12, %v2088_v2, %v2090_v7  ;;  %v2194_v11 = vld [vmem:[#allocation3 + $0x80] sm:$0xff]  ;;  %2403 = vrot.lane.b32.xlu1 %v4895_v51, %s4050_s30  ;;  %s5458_s30 = sshll.u32 %s4011_s28, 4  ;;  %s955_s28 = sadd.s32 1, %s4011_s28  }
 0x2fc   : >> { %2093 = vst.msk [vmem:[#allocation3 + $0x88] sm:$0xff] %vm960_vm11, %v2091_v10  ;;  %2490 = vrot.lane.b32.xlu0 %v4993_v62, %s5448_s16  ;;  %2267 = vmatpush1.bf16.msra.mxu1 %v2194_v11  ;;  %s2675_s18 = scalar_lea.vmem %s4470_s26, %s5458_s30 [#allocation19]  ;;  %p952_p9 = scmp.ge.s32.totalorder %s955_s28, 8  }
 0x2fd   : >> { %v2101_v13 = vpop.permute.xlu1 %2100  ;;  %2268 = vmatprep.subr.bf16.mxu1 %v4027_v57  ;;  %vm2713_vm9 = vcmask (%p952_p9), 7168   ;;  %s5463_s8 = sld [smem:[#allocation31_spill]] (%p952_p9)  ;;  %s5464_s29 = sld [smem:[#allocation36_spill]] (%p952_p9)  ;;  %vm2716_vm10 = vcmask (%p952_p9), 15360  }
 0x2fe   : >> { %v2099_v14 = vpop.permute.xlu0 %2098  ;;  %v1850_v15 = vld [vmem:[#allocation3 + $0x38] sm:$0xff]  ;;  %s5465_s27 = sld [smem:[#allocation42_spill]] (%p952_p9)  ;;  %s2741_s1 = sshll.u32 (%p952_p9), %s4470_s26, 4  ;;  %s5238_s1 = int_to_ptr.vmem [resolvable:$true] %s2741_s1 }
 0x2ff   : >> { %v2102_v35 = vsel %vm1090_vm14, %v2099_v14, %v2101_v13  ;;  %3309 = vmatpush3.bf16.msra.mxu0 %v1850_v15  ;;  %2499 = vrot.lane.b32.xlu1 %v4895_v51, %s5442_s20  ;;  %s2720_s28 = scalar_lea.sflag (%p952_p9), [#allocation7], %s4438_s17  ;;  %s3833_s16 = scalar_lea.vmem (%p952_p9), %s5238_s1, 2048 }
 0x300   : >> { %2104 = vst.msk [vmem:[#allocation3 + $0x90] sm:$0xff] %vm960_vm11, %v2102_v35  ;;  %2355 = vrot.lane.b32.xlu0 %v4895_v51, %s4051_s11  ;;  %s4053_s11 = smov 26   ;;  %p3834_p5 = scmp.ne.s32.totalorder (%p952_p9), %s5238_s1, %s3833_s16 }
 0x301   : >> { %v1985_v19 = vpop.permute.xlu1 %1984  ;;  %v2186_v20 = vld [vmem:[#allocation3 + $0x40] sm:$0xff]  ;;  %s4054_s24 = smov (%p952_p9), [#allocation19]  }
 0x302   : >> { %1987 = vst.msk [vmem:[#allocation3 + $0x8] sm:$0xff] %vm960_vm11, %v1985_v19  ;;  %v2033_v21 = vpop.permute.xlu0 %2032  ;;  %1923 = vmatmul.mubr.bf16.vlgmr.msra.gmra.mrb[8].mxu0 %v3588_v16  ;;  %3316 = vmatprep.subr.bf16.mxu0 %v2186_v20  ;;  %v3594_v20 = vld [vmem:[#allocation11 + $0x68] ss:$16 sps:$4 sm:$0xff]   ;;  %s3837_s21 = sshll.u32 (%p952_p9), %s4054_s24, 4  ;;  %s3838_s21 = int_to_ptr.vmem [resolvable:$false] %s3837_s21 }
 0x303   : >> { %2035 = vst.msk [vmem:[#allocation3 + $0x48] sm:$0xff] %vm960_vm11, %v2033_v21  ;;  %v2195_v22 = vld [vmem:[#allocation3 + $0x88] sm:$0xff]  ;;  %3317 = vmatpush3.bf16.msra.mxu0 %v4897_v56  ;;  %2257 = vmatprep.mubr.bf16.mxu0 %v3593_v18  ;;  %v3602_v21 = vld [vmem:[#allocation11 + $0x8c] ss:$16 sps:$4 sm:$0xff]   ;;  %p5466_p10 = scmp.ne.s32.totalorder (%p952_p9), %s5464_s29, 0  ;;  %s3839_s5 = scalar_lea.vmem (%p952_p9), %s3838_s21, 4096 }
 0x304   : >> { %2501 = vrot.lane.b32.xlu0 %v4993_v62, %s5442_s20  ;;  %2269 = vmatpush1.bf16.msra.mxu1 %v2195_v22  ;;  %p3840_p1 = scmp.lt.s32.totalorder (%p952_p9), %s5238_s1, %s3838_s21  ;;  %p3841_p11 = scmp.lt.s32.totalorder (%p952_p9), %s3839_s5, %s3833_s16 }
 0x305   : >> { %v2112_v51 = vpop.permute.xlu1 %2111  ;;  %2270 = vmatprep.subr.bf16.mxu1 %v4027_v57  ;;  %p3835_p3 = pnand (%p952_p9), %p3834_p5, %p5466_p10 }
 0x306   : >> { %v2110_v24 = vpop.permute.xlu0 %2109  ;;  %p3842_p13 = por (%p952_p9), %p3841_p11, %p3840_p1 }
 0x307   : >> { %v2113_v25 = vsel %vm1102_vm15, %v2110_v24, %v2112_v51  ;;  %v2196_v26 = vld [vmem:[#allocation3 + $0x90] sm:$0xff]  ;;  %p3836_p6 = pneg (%p952_p9), %p3835_p3 }
 0x308   : >> { %2115 = vst.msk [vmem:[#allocation3 + $0x98] sm:$0xff] %vm960_vm11, %v2113_v25  ;;  %2271 = vmatpush1.bf16.msra.mxu1 %v2196_v26  ;;  %v3591_v25 = vld [vmem:[#allocation11 + $0x60] ss:$16 sps:$4 sm:$0xff]   ;;  %v3599_v26 = vld [vmem:[#allocation11 + $0x84] ss:$16 sps:$4 sm:$0xff]  }
 0x309   : >> { %v1991_v56 = vpop.permute.xlu1 %1990  ;;  %v2179_v27 = vld [vmem:[#allocation3 + $0x8] sm:$0xff]  ;;  %2272 = vmatprep.subr.bf16.mxu1 %v4027_v57  ;;  %p3843_p4 = pnand (%p952_p9), %p3842_p13, %p3836_p6 }
 0x30a   : >> { %1993 = vst.msk [vmem:[#allocation3 + $0x10] sm:$0xff] %vm960_vm11, %v1991_v56  ;;  %v2039_v62 = vpop.permute.xlu0 %2038  ;;  %v2187_v28 = vld [vmem:[#allocation3 + $0x48] sm:$0xff] }
 0x30b   : >> { %2041 = vst.msk [vmem:[#allocation3 + $0x50] sm:$0xff] %vm960_vm11, %v2039_v62  ;;  %3318 = vmatprep.subr.bf16.mxu0 %v2187_v28 }
 0x30c   : >> { %3319 = vmatpush3.bf16.msra.mxu0 %v2179_v27 }
 0x30d   : >> { %v2123_v29 = vpop.permute.xlu1 %2122 }
 0x30e   : >> { %v2121_v30 = vpop.permute.xlu0 %2120 }
 0x30f   : >> { %v2124_v31 = vsel %vm1114_vm0, %v2121_v30, %v2123_v29  ;;  %v2197_v32 = vld [vmem:[#allocation3 + $0x98] sm:$0xff] }
 0x310   : >> { %2126 = vst.msk [vmem:[#allocation3 + $0xa0] sm:$0xff] %vm960_vm11, %v2124_v31  ;;  %2273 = vmatpush1.bf16.msra.mxu1 %v2197_v32 }
 0x311   : >> { %v1997_v33 = vpop.permute.xlu1 %1996  ;;  %v2180_v36 = vld [vmem:[#allocation3 + $0x10] sm:$0xff]  ;;  %2274 = vmatprep.subr.bf16.mxu1 %v4027_v57 }
 0x312   : >> { %1999 = vst.msk [vmem:[#allocation3 + $0x18] sm:$0xff] %vm960_vm11, %v1997_v33  ;;  %v2045_v38 = vpop.permute.xlu0 %2044  ;;  %v2188_v8 = vld [vmem:[#allocation3 + $0x50] sm:$0xff] }
 0x313   : >> { %2047 = vst.msk [vmem:[#allocation3 + $0x58] sm:$0xff] %vm960_vm11, %v2045_v38  ;;  %3320 = vmatprep.subr.bf16.mxu0 %v2188_v8 }
 0x314   : >> { %3321 = vmatpush3.bf16.msra.mxu0 %v2180_v36  ;;  %v2513_v36 = vld [vmem:[#allocation3] sm:$0xff] }
 0x315   : >> { %v2134_v39 = vpop.permute.xlu1 %2133 }
 0x316   : >> { %v2132_v40 = vpop.permute.xlu0 %2131 }
 0x317   : >> { %v2135_v41 = vsel %vm1126_vm1, %v2132_v40, %v2134_v39  ;;  %v2198_v42 = vld [vmem:[#allocation3 + $0xa0] sm:$0xff] }
 0x318   : >> { %2137 = vst.msk [vmem:[#allocation3 + $0xa8] sm:$0xff] %vm960_vm11, %v2135_v41  ;;  %2275 = vmatpush1.bf16.msra.mxu1 %v2198_v42 }
 0x319   : >> { %v2003_v43 = vpop.permute.xlu1 %2002  ;;  %v2181_v44 = vld [vmem:[#allocation3 + $0x18] sm:$0xff]  ;;  %2276 = vmatprep.subr.bf16.mxu1 %v4027_v57 }
 0x31a   : >> { %2005 = vst.msk [vmem:[#allocation3 + $0x20] sm:$0xff] %vm960_vm11, %v2003_v43  ;;  %v2051_v45 = vpop.permute.xlu0 %2050  ;;  %v2189_v46 = vld [vmem:[#allocation3 + $0x58] sm:$0xff] }
 0x31b   : >> { %2053 = vst.msk [vmem:[#allocation3 + $0x60] sm:$0xff] %vm960_vm11, %v2051_v45  ;;  %3322 = vmatprep.subr.bf16.mxu0 %v2189_v46 }
 0x31c   : >> { %3323 = vmatpush3.bf16.msra.mxu0 %v2181_v44 }
 0x31d   : >> { %v2145_v47 = vpop.permute.xlu1 %2144 }
 0x31e   : >> { %v2143_v48 = vpop.permute.xlu0 %2142 }
 0x31f   : >> { %v2146_v49 = vsel %vm1138_vm2, %v2143_v48, %v2145_v47  ;;  %v2199_v0 = vld [vmem:[#allocation3 + $0xa8] sm:$0xff] }
 0x320   : >> { %2148 = vst.msk [vmem:[#allocation3 + $0xb0] sm:$0xff] %vm960_vm11, %v2146_v49  ;;  %2277 = vmatpush1.bf16.msra.mxu1 %v2199_v0 }
 0x321   : >> { %v2009_v50 = vpop.permute.xlu1 %2008  ;;  %v2182_v58 = vld [vmem:[#allocation3 + $0x20] sm:$0xff]  ;;  %2278 = vmatprep.subr.bf16.mxu1 %v4027_v57 }
 0x322   : >> { %2011 = vst.msk [vmem:[#allocation3 + $0x28] sm:$0xff] %vm960_vm11, %v2009_v50  ;;  %v2057_v59 = vpop.permute.xlu0 %2056  ;;  %v2190_v1 = vld [vmem:[#allocation3 + $0x60] sm:$0xff] }
 0x323   : >> { %2059 = vst.msk [vmem:[#allocation3 + $0x68] sm:$0xff] %vm960_vm11, %v2057_v59  ;;  %3324 = vmatprep.subr.bf16.mxu0 %v2190_v1 }
 0x324   : >> { %3325 = vmatpush3.bf16.msra.mxu0 %v2182_v58 }
 0x325   : >> { %v2156_v60 = vpop.permute.xlu1 %2155 }
 0x326   : >> { %v2154_v61 = vpop.permute.xlu0 %2153 }
 0x327   : >> { %v2157_v37 = vsel %vm1150_vm4, %v2154_v61, %v2156_v60  ;;  %v2200_v63 = vld [vmem:[#allocation3 + $0xb0] sm:$0xff] }
 0x328   : >> { %2159 = vst.msk [vmem:[#allocation3 + $0xb8] sm:$0xff] %vm960_vm11, %v2157_v37  ;;  %2279 = vmatpush1.bf16.msra.mxu1 %v2200_v63 }
 0x329   : >> { %v2015_v2 = vpop.permute.xlu1 %2014  ;;  %v2183_v3 = vld [vmem:[#allocation3 + $0x28] sm:$0xff]  ;;  %2280 = vmatprep.subr.bf16.mxu1 %v4027_v57 }
 0x32a   : >> { %2017 = vst.msk [vmem:[#allocation3 + $0x30] sm:$0xff] %vm960_vm11, %v2015_v2  ;;  %v2063_v4 = vpop.permute.xlu0 %2062  ;;  %v2191_v5 = vld [vmem:[#allocation3 + $0x68] sm:$0xff] }
 0x32b   : >> { %2065 = vst.msk [vmem:[#allocation3 + $0x70] sm:$0xff] %vm960_vm11, %v2063_v4  ;;  %3326 = vmatprep.subr.bf16.mxu0 %v2191_v5 }
 0x32c   : >> { %3327 = vmatpush3.bf16.msra.mxu0 %v2183_v3 }
 0x32d   : >> { %v2167_v34 = vpop.permute.xlu1 %2166 }
 0x32e   : >> { %v2165_v6 = vpop.permute.xlu0 %2164 }
 0x32f   : >> { %v2168_v7 = vsel %vm1162_vm5, %v2165_v6, %v2167_v34  ;;  %v2201_v10 = vld [vmem:[#allocation3 + $0xb8] sm:$0xff] }
 0x330   : >> { %2170 = vst.msk [vmem:[#allocation3 + $0xc0] sm:$0xff] %vm960_vm11, %v2168_v7  ;;  %2281 = vmatpush1.bf16.msra.mxu1 %v2201_v10 }
 0x331   : >> { %v2021_v11 = vpop.permute.xlu1 %2020  ;;  %v2184_v13 = vld [vmem:[#allocation3 + $0x30] sm:$0xff]  ;;  %2282 = vmatprep.subr.bf16.mxu1 %v4027_v57 }
 0x332   : >> { %2023 = vst.msk [vmem:[#allocation3 + $0x38] sm:$0xff] %vm960_vm11, %v2021_v11  ;;  %v2069_v14 = vpop.permute.xlu0 %2068  ;;  %v2192_v15 = vld [vmem:[#allocation3 + $0x70] sm:$0xff]  ;;  %v1166_v11 = vld [vmem:[#allocation4] sm:$0xff] }
 0x333   : >> { %2071 = vst.msk [vmem:[#allocation3 + $0x78] sm:$0xff] %vm960_vm11, %v2069_v14  ;;  %3328 = vmatprep.subr.bf16.mxu0 %v2192_v15 }
 0x334   : >> { %3329 = vmatpush3.bf16.msra.mxu0 %v2184_v13 }
 0x335   : >> { %v2414_v16 = vpop.permute.xlu1 %2413 }
 0x336   : >> { %v2412_v35 = vpop.permute.xlu0 %2411 }
 0x337   : >> { %v2415_v18 = vsel %vm1066_vm13, %v2412_v35, %v2414_v16  ;;  %v2202_v19 = vld [vmem:[#allocation3 + $0xc0] sm:$0xff] }
 0x338   : >> { %2417 = vst.msk [vmem:[#allocation3 + $0x80] sm:$0xff] %vm960_vm11, %v2415_v18  ;;  %2283 = vmatpush1.bf16.msra.mxu1 %v2202_v19  ;;  %v1167_v18 = vld [vmem:[#allocation4 + $0x8] sm:$0xff] }
 0x339   : >> { %v2185_v22 = vld [vmem:[#allocation3 + $0x38] sm:$0xff]  ;;  %v2423_v23 = vpop.permute.xlu1 %2422  ;;  %2601 = vmatprep.subr.bf16.mxu1 %v4027_v57 }
 0x33a   : >> { %v2362_v51 = vpop.permute.xlu0 %2361  ;;  %v2193_v24 = vld [vmem:[#allocation3 + $0x78] sm:$0xff] }
 0x33b   : >> { %2364 = vst.msk [vmem:[#allocation3 + $0x40] sm:$0xff] %vm960_vm11, %v2362_v51  ;;  %3330 = vmatprep.subr.bf16.mxu0 %v2193_v24  ;;  %2299 = vmatmul.mubr.bf16.vlgmr.msra.gmra.mrb[12].mxu1 %v3594_v20 }
 0x33c   : >> { %3331 = vmatpush3.bf16.msra.mxu0 %v2185_v22  ;;  %3225 = vmatprep.mubr.msk.bf16.mxu1 %vm727_vm3, %v3602_v21 }
 0x33d   : >> { %v2368_v56 = vpop.permute.xlu1 %2367  ;;  %v5145_v27 = vpop.f32.mrb[0].mxu1 }
 0x33e   : >> { %v2425_v62 = vpop.permute.xlu0 %2424  ;;  %2370 = vst.msk [vmem:[#allocation3 + $0x48] sm:$0xff] %vm960_vm11, %v2368_v56  ;;  %v1297_v28 = vpop.f32.mrb[1].mxu1 }
 0x33f   : >> { %v2426_v29 = vsel %vm1078_vm12, %v2423_v23, %v2425_v62  ;;  %2258 = vmatmul.mubr.bf16.vlgmr.msra.gmra.mrb[12].mxu0 %v3591_v25  ;;  %v2529_v30 = vld [vmem:[#allocation3 + $0x80] sm:$0xff]  ;;  %v5149_v31 = vpop.f32.mrb[2].mxu1 }
 0x340   : >> { %2428 = vst.msk [vmem:[#allocation3 + $0x88] sm:$0xff] %vm960_vm11, %v2426_v29  ;;  %2602 = vmatpush1.bf16.msra.mxu1 %v2529_v30  ;;  %2592 = vmatprep.mubr.bf16.mxu0 %v3599_v26  ;;  %v1300_v32 = vpop.f32.mrb[3].mxu1 }
 0x341   : >> { %v2434_v33 = vpop.permute.xlu1 %2433  ;;  %2603 = vmatprep.subr.bf16.mxu1 %v4027_v57 }
 0x342   : >> { %v2320_v38 = vpop.permute.xlu0 %2319  ;;  %v2521_v8 = vld [vmem:[#allocation3 + $0x40] sm:$0xff] }
 0x343   : >> { %2322 = vst.msk [vmem:[#allocation3 + $0x8] sm:$0xff] %vm960_vm11, %v2320_v38  ;;  %3338 = vmatprep.subr.bf16.mxu0 %v2521_v8 }
 0x344   : >> { %3339 = vmatpush3.bf16.msra.mxu0 %v2513_v36 }
 0x345   : >> { %v2374_v39 = vpop.permute.xlu1 %2373  ;;  %v2522_v40 = vld [vmem:[#allocation3 + $0x48] sm:$0xff] }
 0x346   : >> { %v2436_v41 = vpop.permute.xlu0 %2435  ;;  %2376 = vst.msk [vmem:[#allocation3 + $0x50] sm:$0xff] %vm960_vm11, %v2374_v39  ;;  %3340 = vmatprep.subr.bf16.mxu0 %v2522_v40 }
 0x347   : >> { %v2437_v42 = vsel %vm1090_vm14, %v2434_v33, %v2436_v41  ;;  %v2530_v43 = vld [vmem:[#allocation3 + $0x88] sm:$0xff] }
 0x348   : >> { %2439 = vst.msk [vmem:[#allocation3 + $0x90] sm:$0xff] %vm960_vm11, %v2437_v42  ;;  %2604 = vmatpush1.bf16.msra.mxu1 %v2530_v43 }
 0x349   : >> { %v2445_v44 = vpop.permute.xlu1 %2444  ;;  %2605 = vmatprep.subr.bf16.mxu1 %v4027_v57 }
 0x34a   : >> { %v2326_v45 = vpop.permute.xlu0 %2325  ;;  %v2514_v46 = vld [vmem:[#allocation3 + $0x8] sm:$0xff] }
 0x34b   : >> { %2328 = vst.msk [vmem:[#allocation3 + $0x10] sm:$0xff] %vm960_vm11, %v2326_v45  ;;  %3341 = vmatpush3.bf16.msra.mxu0 %v2514_v46 }
 0x34d   : >> { %v2380_v47 = vpop.permute.xlu1 %2379  ;;  %v2523_v48 = vld [vmem:[#allocation3 + $0x50] sm:$0xff] }
 0x34e   : >> { %v2447_v49 = vpop.permute.xlu0 %2446  ;;  %2382 = vst.msk [vmem:[#allocation3 + $0x58] sm:$0xff] %vm960_vm11, %v2380_v47  ;;  %3342 = vmatprep.subr.bf16.mxu0 %v2523_v48  ;;  %v3597_v48 = vld [vmem:[#allocation11 + $0x80] ss:$16 sps:$4 sm:$0xff]  }
 0x34f   : >> { %v2448_v0 = vsel %vm1102_vm15, %v2445_v44, %v2447_v49  ;;  %v2531_v50 = vld [vmem:[#allocation3 + $0x90] sm:$0xff] }
 0x350   : >> { %2450 = vst.msk [vmem:[#allocation3 + $0x98] sm:$0xff] %vm960_vm11, %v2448_v0  ;;  %2606 = vmatpush1.bf16.msra.mxu1 %v2531_v50  ;;  %v3600_v0 = vld [vmem:[#allocation11 + $0x88] ss:$16 sps:$4 sm:$0xff]  }
 0x351   : >> { %v2456_v58 = vpop.permute.xlu1 %2455  ;;  %2607 = vmatprep.subr.bf16.mxu1 %v4027_v57 }
 0x352   : >> { %v2332_v59 = vpop.permute.xlu0 %2331  ;;  %v2515_v1 = vld [vmem:[#allocation3 + $0x10] sm:$0xff] }
 0x353   : >> { %2334 = vst.msk [vmem:[#allocation3 + $0x18] sm:$0xff] %vm960_vm11, %v2332_v59  ;;  %3343 = vmatpush3.bf16.msra.mxu0 %v2515_v1 }
 0x355   : >> { %v2386_v60 = vpop.permute.xlu1 %2385  ;;  %v2524_v61 = vld [vmem:[#allocation3 + $0x58] sm:$0xff] }
 0x356   : >> { %v2458_v37 = vpop.permute.xlu0 %2457  ;;  %2388 = vst.msk [vmem:[#allocation3 + $0x60] sm:$0xff] %vm960_vm11, %v2386_v60  ;;  %3344 = vmatprep.subr.bf16.mxu0 %v2524_v61 }
 0x357   : >> { %v2459_v63 = vsel %vm1114_vm0, %v2456_v58, %v2458_v37  ;;  %v2532_v2 = vld [vmem:[#allocation3 + $0x98] sm:$0xff] }
 0x358   : >> { %2461 = vst.msk [vmem:[#allocation3 + $0xa0] sm:$0xff] %vm960_vm11, %v2459_v63  ;;  %2608 = vmatpush1.bf16.msra.mxu1 %v2532_v2  ;;  %v3266_v3 = vpop.f32.mrb[0].mxu0 }
 0x359   : >> { %v2467_v4 = vpop.permute.xlu1 %2466  ;;  %2609 = vmatprep.subr.bf16.mxu1 %v4027_v57  ;;  %v3267_v5 = vpop.f32.mrb[1].mxu0 }
 0x35a   : >> { %v2338_v34 = vpop.permute.xlu0 %2337  ;;  %v2516_v6 = vld [vmem:[#allocation3 + $0x18] sm:$0xff]  ;;  %v3268_v7 = vadd.f32 %v3267_v5, %v3266_v3  ;;  %v3269_v10 = vpop.f32.mrb[2].mxu0 }
 0x35b   : >> { %2340 = vst.msk [vmem:[#allocation3 + $0x20] sm:$0xff] %vm960_vm11, %v2338_v34  ;;  %3345 = vmatpush3.bf16.msra.mxu0 %v2516_v6  ;;  %v3270_v13 = vpop.f32.mrb[3].mxu0 }
 0x35c   : >> { %v1296_v14 = vadd.f32 %v3268_v7, %v5145_v27  ;;  %v3271_v15 = vadd.f32 %v3270_v13, %v3269_v10 }
 0x35d   : >> { %v2392_v16 = vpop.permute.xlu1 %2391  ;;  %v2525_v35 = vld [vmem:[#allocation3 + $0x60] sm:$0xff] }
 0x35e   : >> { %v2469_v19 = vpop.permute.xlu0 %2468  ;;  %2394 = vst.msk [vmem:[#allocation3 + $0x68] sm:$0xff] %vm960_vm11, %v2392_v16  ;;  %3346 = vmatprep.subr.bf16.mxu0 %v2525_v35  ;;  %v1302_v20 = vadd.f32 %v1296_v14, %v1166_v11  ;;  %v1299_v21 = vadd.f32 %v3271_v15, %v5149_v31 }
 0x35f   : >> { %v2470_v22 = vsel %vm1126_vm1, %v2467_v4, %v2469_v19  ;;  %v2533_v23 = vld [vmem:[#allocation3 + $0xa0] sm:$0xff] }
 0x360   : >> { %2472 = vst.msk [vmem:[#allocation3 + $0xa8] sm:$0xff] %vm960_vm11, %v2470_v22  ;;  %2610 = vmatpush1.bf16.msra.mxu1 %v2533_v23  ;;  %1304 = vst.msk [vmem:[#allocation4] sm:$0xff] %vm960_vm11, %v1302_v20  ;;  %v1303_v51 = vadd.f32 %v1299_v21, %v1167_v18 }
 0x361   : >> { %v2478_v24 = vpop.permute.xlu1 %2477  ;;  %2611 = vmatprep.subr.bf16.mxu1 %v4027_v57 }
 0x362   : >> { %v2344_v25 = vpop.permute.xlu0 %2343  ;;  %v2517_v26 = vld [vmem:[#allocation3 + $0x20] sm:$0xff]  ;;  %1305 = vst.msk [vmem:[#allocation4 + $0x8] sm:$0xff] %vm960_vm11, %v1303_v51 }
 0x363   : >> { %2346 = vst.msk [vmem:[#allocation3 + $0x28] sm:$0xff] %vm960_vm11, %v2344_v25  ;;  %3347 = vmatpush3.bf16.msra.mxu0 %v2517_v26 }
 0x365   : >> { %v2398_v56 = vpop.permute.xlu1 %2397  ;;  %v2526_v27 = vld [vmem:[#allocation3 + $0x68] sm:$0xff] }
 0x366   : >> { %v2480_v62 = vpop.permute.xlu0 %2479  ;;  %2400 = vst.msk [vmem:[#allocation3 + $0x70] sm:$0xff] %vm960_vm11, %v2398_v56  ;;  %3348 = vmatprep.subr.bf16.mxu0 %v2526_v27 }
 0x367   : >> { %v2481_v28 = vsel %vm1138_vm2, %v2478_v24, %v2480_v62  ;;  %v2534_v29 = vld [vmem:[#allocation3 + $0xa8] sm:$0xff] }
 0x368   : >> { %2483 = vst.msk [vmem:[#allocation3 + $0xb0] sm:$0xff] %vm960_vm11, %v2481_v28  ;;  %2612 = vmatpush1.bf16.msra.mxu1 %v2534_v29  ;;  %v1501_v3 = vld [vmem:[#allocation4] sm:$0xff] }
 0x369   : >> { %v2489_v30 = vpop.permute.xlu1 %2488  ;;  %2613 = vmatprep.subr.bf16.mxu1 %v4027_v57  ;;  %v1502_v34 = vld [vmem:[#allocation4 + $0x8] sm:$0xff] }
 0x36a   : >> { %v2350_v31 = vpop.permute.xlu0 %2349  ;;  %v2518_v32 = vld [vmem:[#allocation3 + $0x28] sm:$0xff] }
 0x36b   : >> { %2352 = vst.msk [vmem:[#allocation3 + $0x30] sm:$0xff] %vm960_vm11, %v2350_v31  ;;  %3349 = vmatpush3.bf16.msra.mxu0 %v2518_v32 }
 0x36d   : >> { %v2404_v33 = vpop.permute.xlu1 %2403  ;;  %v2527_v36 = vld [vmem:[#allocation3 + $0x70] sm:$0xff] }
 0x36e   : >> { %v2491_v38 = vpop.permute.xlu0 %2490  ;;  %2406 = vst.msk [vmem:[#allocation3 + $0x78] sm:$0xff] %vm960_vm11, %v2404_v33  ;;  %3350 = vmatprep.subr.bf16.mxu0 %v2527_v36 }
 0x36f   : >> { %v2492_v8 = vsel %vm1150_vm4, %v2489_v30, %v2491_v38  ;;  %v2535_v39 = vld [vmem:[#allocation3 + $0xb0] sm:$0xff] }
 0x370   : >> { %2494 = vst.msk [vmem:[#allocation3 + $0xb8] sm:$0xff] %vm960_vm11, %v2492_v8  ;;  %2614 = vmatpush1.bf16.msra.mxu1 %v2535_v39 }
 0x371   : >> { %2615 = vmatprep.subr.bf16.mxu1 %v4027_v57  ;;  %v2500_v42 = vpop.permute.xlu1 %2499 }
 0x372   : >> { %v2356_v40 = vpop.permute.xlu0 %2355  ;;  %v2519_v41 = vld [vmem:[#allocation3 + $0x30] sm:$0xff] }
 0x373   : >> { %2358 = vst.msk [vmem:[#allocation3 + $0x38] sm:$0xff] %vm960_vm11, %v2356_v40  ;;  %3351 = vmatpush3.bf16.msra.mxu0 %v2519_v41 }
 0x375   : >> { %v2528_v43 = vld [vmem:[#allocation3 + $0x78] sm:$0xff] }
 0x376   : >> { %v2502_v44 = vpop.permute.xlu0 %2501  ;;  %3352 = vmatprep.subr.bf16.mxu0 %v2528_v43 }
 0x377   : >> { %v2503_v45 = vsel %vm1162_vm5, %v2500_v42, %v2502_v44  ;;  %v2536_v46 = vld [vmem:[#allocation3 + $0xb8] sm:$0xff] }
 0x378   : >> { %2505 = vst.msk [vmem:[#allocation3 + $0xc0] sm:$0xff] %vm960_vm11, %v2503_v45  ;;  %2616 = vmatpush1.bf16.msra.mxu1 %v2536_v46 }
 0x379   : >> { %2617 = vmatprep.subr.bf16.mxu1 %v4027_v57 }
 0x37a   : >> { %v2520_v47 = vld [vmem:[#allocation3 + $0x38] sm:$0xff] }
 0x37b   : >> { %3353 = vmatpush3.bf16.msra.mxu0 %v2520_v47 }
 0x37e   : >> { %2593 = vmatmul.mubr.bf16.vlgmr.msra.gmra.mrb[16].mxu0 %v3597_v48 }
 0x37f   : >> { %v2537_v49 = vld [vmem:[#allocation3 + $0xc0] sm:$0xff] }
 0x380   : >> { %2618 = vmatpush1.bf16.msra.mxu1 %v2537_v49 }
 0x381   : >> { %v1630_v50 = vpop.f32.mrb[4].mxu1 }
 0x382   : >> { %v1632_v58 = vpop.f32.mrb[5].mxu1 }
 0x383   : >> { %2634 = vmatmul.mubr.bf16.vlgmr.msra.gmra.mrb[16].mxu1 %v3600_v0  ;;  %v1633_v59 = vpop.f32.mrb[6].mxu1 }
 0x384   : >> { %v1635_v1 = vpop.f32.mrb[7].mxu1 }
 0x396   : >> { %v3288_v60 = vpop.f32.mrb[4].mxu0 }
 0x397   : >> { %v3289_v61 = vpop.f32.mrb[5].mxu0 }
 0x398   : >> { %v3290_v37 = vadd.f32 %v3289_v61, %v3288_v60  ;;  %v3291_v63 = vpop.f32.mrb[6].mxu0 }
 0x399   : >> { %v3292_v2 = vpop.f32.mrb[7].mxu0 }
 0x39a   : >> { %v3293_v4 = vadd.f32 %v3292_v2, %v3291_v63  ;;  %v1631_v5 = vadd.f32 %v3290_v37, %v1630_v50 }
 0x39c   : >> { %v1637_v6 = vadd.f32 %v1631_v5, %v1501_v3  ;;  %v1634_v7 = vadd.f32 %v3293_v4, %v1633_v59  ;;  %v2649_v4 = vsel %vm2646_vm6, 1, %v4027_v57 }
 0x39d   : >> { %v2653_v5 = vrot.slane %v2649_v4, %v929_v17 }
 0x39e   : >> { %1639 = vst.msk [vmem:[#allocation4] sm:$0xff] %vm960_vm11, %v1637_v6  ;;  %v1638_v10 = vadd.f32 %v1634_v7, %v1502_v34 }
 0x39f   : >> { %vm2654_vm7 = vcmp.eq.s32.totalorder %v2653_v5, 1 }
 0x3a0   : >> { %1640 = vst.msk [vmem:[#allocation4 + $0x8] sm:$0xff] %vm960_vm11, %v1638_v10 }
 0x3a5   : >> { %v1836_v21 = vld [vmem:[#allocation4] sm:$0xff] }
 0x3a7   : >> { %v1837_v51 = vld [vmem:[#allocation4 + $0x8] sm:$0xff] }
 0x3cb   : >> { %v1965_v11 = vpop.f32.mrb[8].mxu1 }
 0x3cc   : >> { %v1967_v13 = vpop.f32.mrb[9].mxu1 }
 0x3cd   : >> { %v1968_v14 = vpop.f32.mrb[10].mxu1 }
 0x3ce   : >> { %v1970_v15 = vpop.f32.mrb[11].mxu1 }
 0x3d5   : >> { %v3310_v16 = vpop.f32.mrb[8].mxu0 }
 0x3d6   : >> { %v3311_v35 = vpop.f32.mrb[9].mxu0 }
 0x3d7   : >> { %v3312_v18 = vadd.f32 %v3311_v35, %v3310_v16  ;;  %v3313_v19 = vpop.f32.mrb[10].mxu0 }
 0x3d8   : >> { %v3314_v20 = vpop.f32.mrb[11].mxu0 }
 0x3d9   : >> { %v3315_v22 = vadd.f32 %v3314_v20, %v3313_v19  ;;  %v1966_v23 = vadd.f32 %v3312_v18, %v1965_v11 }
 0x3db   : >> { %v1972_v24 = vadd.f32 %v1966_v23, %v1836_v21  ;;  %v1969_v25 = vadd.f32 %v3315_v22, %v1968_v14 }
 0x3dd   : >> { %1974 = vst.msk [vmem:[#allocation4] sm:$0xff] %vm960_vm11, %v1972_v24  ;;  %v1973_v26 = vadd.f32 %v1969_v25, %v1837_v51 }
 0x3df   : >> { %1975 = vst.msk [vmem:[#allocation4 + $0x8] sm:$0xff] %vm960_vm11, %v1973_v26 }
 0x3e4   : >> { %v2171_v8 = vld [vmem:[#allocation4] sm:$0xff] }
 0x3e6   : >> { %v2172_v41 = vld [vmem:[#allocation4 + $0x8] sm:$0xff] }
 0x40e   : >> { %v2300_v56 = vpop.f32.mrb[12].mxu1 }
 0x40f   : >> { %v2302_v27 = vpop.f32.mrb[13].mxu1 }
 0x410   : >> { %v2303_v62 = vpop.f32.mrb[14].mxu1 }
 0x411   : >> { %v2305_v28 = vpop.f32.mrb[15].mxu1 }
 0x412   : >> { %v3332_v29 = vpop.f32.mrb[12].mxu0 }
 0x413   : >> { %v3333_v30 = vpop.f32.mrb[13].mxu0 }
 0x414   : >> { %v3334_v31 = vadd.f32 %v3333_v30, %v3332_v29  ;;  %v3335_v32 = vpop.f32.mrb[14].mxu0 }
 0x415   : >> { %v3336_v33 = vpop.f32.mrb[15].mxu0 }
 0x416   : >> { %v3337_v36 = vadd.f32 %v3336_v33, %v3335_v32  ;;  %v2301_v38 = vadd.f32 %v3334_v31, %v2300_v56 }
 0x418   : >> { %v2307_v39 = vadd.f32 %v2301_v38, %v2171_v8  ;;  %v2304_v40 = vadd.f32 %v3337_v36, %v2303_v62 }
 0x41a   : >> { %2309 = vst.msk [vmem:[#allocation4] sm:$0xff] %vm960_vm11, %v2307_v39  ;;  %v2308_v42 = vadd.f32 %v2304_v40, %v2172_v41 }
 0x41c   : >> { %2310 = vst.msk [vmem:[#allocation4 + $0x8] sm:$0xff] %vm960_vm11, %v2308_v42 }
 0x421   : >> { %v2506_v58 = vld [vmem:[#allocation4] sm:$0xff] }
 0x423   : >> { %v2507_v37 = vld [vmem:[#allocation4 + $0x8] sm:$0xff] }
 0x451   : >> { %v3354_v43 = vpop.f32.mrb[16].mxu0 }
 0x452   : >> { %v3355_v44 = vpop.f32.mrb[17].mxu0 }
 0x453   : >> { %v3356_v45 = vadd.f32 %v3355_v44, %v3354_v43  ;;  %v3357_v46 = vpop.f32.mrb[18].mxu0 }
 0x454   : >> { %v3358_v47 = vpop.f32.mrb[19].mxu0 }
 0x455   : >> { %v3359_v48 = vadd.f32 %v3358_v47, %v3357_v46 }
 0x456   : >> { %v2635_v49 = vpop.f32.mrb[16].mxu1 }
 0x457   : >> { %v2636_v0 = vadd.f32 %v3356_v45, %v2635_v49  ;;  %v2637_v50 = vpop.f32.mrb[17].mxu1 }
 0x458   : >> { %v2638_v59 = vpop.f32.mrb[18].mxu1 }
 0x459   : >> { %v2642_v1 = vadd.f32 %v2636_v0, %v2506_v58  ;;  %v2639_v60 = vadd.f32 %v3359_v48, %v2638_v59  ;;  %v2640_v61 = vpop.f32.mrb[19].mxu1 }
 0x45b   : >> { %2644 = vst.msk [vmem:[#allocation4] sm:$0xff] %vm960_vm11, %v2642_v1  ;;  %v2643_v63 = vadd.f32 %v2639_v60, %v2507_v37 }
 0x45d   : >> { %2645 = vst.msk [vmem:[#allocation4 + $0x8] sm:$0xff] %vm960_vm11, %v2643_v63 }
 0x462   : >> { %v2647_v2 = vld [vmem:[#allocation4] sm:$0xff] }
 0x463   : >> { %2657 = vrot.lane.b32.xlu1 %v2647_v2, %s4053_s11 }
 0x464   : >> { %v2648_v3 = vld [vmem:[#allocation4 + $0x8] sm:$0xff] }
 0x465   : >> { %2659 = vrot.lane.b32.xlu0 %v2648_v3, %s4053_s11 }
 0x4d5   : >> { %v2658_v34 = vpop.permute.xlu1 %2657 }
 0x4d6   : >> { %v2663_v6 = vsel %vm2654_vm7, %v2658_v34, 0.0 }
 0x4d7   : >> { %v3244_v7 = vpack.c.bf16 %v2663_v6, %v2663_v6  ;;  %v2660_v10 = vpop.permute.xlu0 %2659  ;;  %2681 = vrot.lane.b32.xlu1 %v2663_v6, %s5447_s14  ;;  %v2695_v13 = vmul.f32 %v2663_v6, %v2663_v6 }
 0x4d8   : >> { %v2664_v11 = vsel %vm2654_vm7, %v2660_v10, 0.0 }
 0x4d9   : >> { %2677 = vst.msk [vmem:[%s2675_s18] sm:$0xf] %vm2676_vm8, %v3244_v7  ;;  %v3245_v14 = vpack.c.bf16 %v2664_v11, %v2664_v11  ;;  %2683 = vrot.lane.b32.xlu0 %v2664_v11, %s5447_s14  ;;  %v2696_v57 = vmul.f32 %v2664_v11, %v2664_v11 }
 0x4db   : >> { %2678 = vst.msk [vmem:[%s2675_s18 + $0x8] sm:$0xf] %vm2676_vm8, %v3245_v14  ;;  %2699 = vrot.lane.b32.xlu1 %v2695_v13, %s5447_s14 }
 0x4dd   : >> { %2701 = vrot.lane.b32.xlu0 %v2696_v57, %s5447_s14  ;;  %s3247_s14 = sshll.u32 (%p952_p9), %s5463_s8, 11 }
 0x4de   : > { %s5233_s22 = scalar_lea.hbm (%p952_p9), %s5465_s27, %s3247_s14 }
 0x549   : >> { %v2682_v15 = vpop.permute.xlu1 %2681 }
 0x54a   : >> { %v2687_v16 = vsel %vm960_vm11, %v2682_v15, 0.0 }
 0x54b   : >> { %v2684_v35 = vpop.permute.xlu0 %2683  ;;  %2688 = vadd.xlane.f32.xlu1 %v2687_v16 }
 0x54c   : >> { %v2690_v18 = vsel %vm960_vm11, %v2684_v35, 0.0 }
 0x54d   : >> { %2691 = vadd.xlane.f32.xlu0 %v2690_v18  ;;  %v2700_v19 = vpop.permute.xlu1 %2699 }
 0x54e   : >> { %v2705_v21 = vsel %vm960_vm11, %v2700_v19, 0.0 }
 0x54f   : >> { %v2702_v20 = vpop.permute.xlu0 %2701 }
 0x550   : >> { %v2708_v22 = vsel %vm960_vm11, %v2702_v20, 0.0 }
 0x551   : >> { %2709 = vadd.xlane.f32.xlu1 %v2708_v22  ;;  %2706 = vadd.xlane.f32.xlu0 %v2705_v21 }
 0x5d8   : >> { %v2689_v23 = vpop.xlane.xlu1 %2688 }
 0x5d9   : >> { %v2693_v51 = vadd.f32 %v4007_v55, %v2689_v23  }
 0x5da   : >> { %v2692_v24 = vpop.xlane.xlu0 %2691 }
 0x5db   : >> { %v2694_v25 = vadd.f32 %v4003_v54, %v2692_v24   ;;  %v5462_v55 = vmov %v2693_v51  ;;  %954 = sbr.rel (!%p952_p9) target bundleno = 436 (0x1b4), region = 219 }
 0x5dd   : >> { %v5461_v54 = vmov %v2694_v25 }
 0x5de   : >> { %v2707_v26 = vpop.xlane.xlu0 %2706  ;;  %v2710_v56 = vpop.xlane.xlu1 %2709 }
 0x5df   : >> { %v2711_v27 = vadd.f32 %v3999_v53, %v2707_v26   ;;  %v2712_v62 = vadd.f32 %v3995_v52, %v2710_v56  }
 0x5e1   : >> { %v5459_v52 = vmov %v2712_v62  ;;  %v5460_v53 = vmov %v2711_v27  ;;  %v2714_v55 = vsel (%p952_p9), %vm2713_vm9, %v2693_v51, %v2711_v27  ;;  %v2715_v28 = vsel (%p952_p9), %vm2713_vm9, %v2694_v25, %v2712_v62 }
 0x5e2   : > { %2717 = vst.msk [vmem:[%s4542_s13] sm:$0xff] %vm2716_vm10, %v2714_v55  ;;  %2718 = vst.msk [vmem:[%s4542_s13 + $0x8] sm:$0xff] %vm2716_vm10, %v2715_v28 }
 0x5e3   : > { %3846 = shalt.err (!%p3843_p4)
}
 0x5e4   : > { %s3847_s26 = scalar_lea.hbm %s5233_s22, 2048  ;;  %s3851_s3 = scalar_lea.hbm %s5465_s27, 4096 }
 0x5e5   : > { %p3848_p0 = scmp.ne.s32.totalorder %s5233_s22, %s3847_s26  ;;  %p3852_p7 = scmp.lt.u32.totalorder %s5233_s22, %s5465_s27 }
 0x5e6   : > { %p3853_p12 = scmp.lt.u32.totalorder %s3851_s3, %s3847_s26  ;;  %p3855_p5 = scmp.lt.u32.totalorder %s3847_s26, %s5233_s22 }
 0x5e7   : > { %p3849_p8 = pnand %p3848_p0, %p5466_p10 }
 0x5e8   : > { %p3854_p9 = por %p3853_p12, %p3852_p7 }
 0x5e9   : > { %p3850_p2 = pneg %p3849_p8 }
 0x5ea   : > { %p3856_p3 = por %p3855_p5, %p3854_p9 }
 0x5ec   : > { %p3857_p6 = pnand %p3856_p3, %p3850_p2 }
 0x5ee   : > { %3860 = shalt.err (!%p3857_p6)
}
 0x5ef   : > { %s4055_s23 = smov 128   ;;  %s4056_s11 = smov 8  }
 0x5f0   : > { %3386 = dma.vmem_to_hbm [thread:$0]  (%p5466_p10), %s5238_s1, 2048, %s5233_s22, %s2720_s28, %s4055_s23, %s4055_s23, %s4056_s11  }
 0x5f1   : > { %s3248_s30 = sshll.u32 %s5463_s8, 8  ;;  %s2759_s18 = sshll.u32 %s4542_s13, 4  ;;  %s5274_s18 = int_to_ptr.vmem [resolvable:$true] %s2759_s18 }
 0x5f2   : > { %s5467_s12 = sld [smem:[#allocation43_spill]]  ;;  %s2725_s21 = scalar_lea.sflag [#allocation21], %s4438_s17 }
 0x5f3   : > { %s3861_s5 = scalar_lea.vmem %s5274_s18, 256  ;;  %s4057_s26 = smov [#allocation20]  }
 0x5f4   : > { %p3862_p1 = scmp.ne.s32.totalorder %s5274_s18, %s3861_s5  ;;  %s3865_s22 = sshll.u32 %s4057_s26, 4  ;;  %s3866_s22 = int_to_ptr.vmem [resolvable:$false] %s3865_s22 }
 0x5f5   : > { %s3867_s13 = scalar_lea.vmem %s3866_s22, 512  ;;  %p3868_p4 = scmp.lt.s32.totalorder %s5274_s18, %s3866_s22 }
 0x5f6   : > { %p3863_p11 = pnand %p3862_p1, %p5466_p10  ;;  %p3869_p0 = scmp.lt.s32.totalorder %s3867_s13, %s3861_s5 }
 0x5f8   : > { %s5468_s16 = smov %s5467_s12  ;;  %s5272_s24 = scalar_lea.hbm %s5467_s12, %s3248_s30 }
 0x5f9   : > { %p3864_p13 = pneg %p3863_p11  ;;  %p3870_p8 = por %p3869_p0, %p3868_p4 }
 0x5fb   : > { %p3871_p2 = pnand %p3870_p8, %p3864_p13 }
 0x5fd   : > { %3874 = shalt.err (!%p3871_p2)
}
 0x5fe   : > { %s3875_s8 = scalar_lea.hbm %s5272_s24, 256  ;;  %s3879_s15 = scalar_lea.hbm %s5468_s16, 512 }
 0x5ff   : > { %p3876_p7 = scmp.ne.s32.totalorder %s5272_s24, %s3875_s8  ;;  %p3880_p5 = scmp.lt.u32.totalorder %s5272_s24, %s5468_s16 }
 0x600   : > { %p3881_p3 = scmp.lt.u32.totalorder %s3879_s15, %s3875_s8  ;;  %p3883_p1 = scmp.lt.u32.totalorder %s3875_s8, %s5272_s24 }
 0x601   : > { %p3877_p12 = pnand %p3876_p7, %p5466_p10 }
 0x602   : > { %p3882_p6 = por %p3881_p3, %p3880_p5 }
 0x603   : > { %p3878_p9 = pneg %p3877_p12 }
 0x604   : > { %p3884_p11 = por %p3883_p1, %p3882_p6 }
 0x606   : > { %p3885_p13 = pnand %p3884_p11, %p3878_p9 }
 0x608   : > { %3888 = shalt.err (!%p3885_p13)
}
 0x609   : > { %3387 = dma.vmem_to_hbm [thread:$0]  (%p5466_p10), %s5274_s18, 256, %s5272_s24, %s2725_s21, %s4055_s23, %s4055_s23, %s4056_s11  }
 0x60a PF: > { %s5469_s25 = sld [smem:[#allocation29_spill]]  ;;  %s5470_s9 = sld [smem:[#allocation38_spill]] }
 0x60b   : > { %s5471_s30 = sld [smem:[#allocation33_spill]] }
 0x610   : > { %s2774_s14 = sand.u32 1, %s5469_s25   ;;  %p5472_p4 = scmp.ne.s32.totalorder %s5470_s9, 0 }
 0x611   : > { %p5473_p0 = scmp.ge.s32.totalorder %s5471_s30, 2  ;;  %s2775_s20 = scalar_lea.sflag [#allocation7], %s2774_s14 }
 0x613   : > { %p3417_p8 = pnand %p5473_p0, %p5472_p4 }
 0x615   : > { %3958 = dma.done.wait (!%p3417_p8), %s2775_s20, 2048  }
 0x616   : > { %3960 = vsyncadd (!%p3417_p8), %s2775_s20, 4294965248  ;;  %s2784_s29 = scalar_lea.sflag [#allocation21], %s2774_s14 }
 0x617   : > { %3962 = dma.done.wait (!%p3417_p8), %s2784_s29, 256  }
 0x618   : > { %3964 = vsyncadd (!%p3417_p8), %s2784_s29, 4294967040  ;;  %s35_s14 = sadd.s32 1, %s5471_s30   ;;  %s5474_s17 = sld [smem:[#allocation30_spill]] }
 0x619   : > { %p32_p2 = scmp.ge.s32.totalorder %s35_s14, 4   ;;  %s5475_s11 = sld [smem:[#allocation37_spill]] }
 0x61a   : > { %s5476_s12 = sld [smem:[#allocation32_spill]]  ;;  %s5477_s13 = sld [smem:[#allocation35_spill]] }
 0x61b   : > { %s5478_s30 = smov %s3971_s10  ;;  %34 = sbr.rel (!%p32_p2) target bundleno = 19 (0x13), region = 230 }
 0x61e   : > { %s5479_s10 = smov %s5474_s17 }
 0x622   :  { %2789 = vsyncpa [#allocation6], 1 }
 0x623   :  { %2791 = vsyncpa [#allocation6 + $0x1], 1 }
 0x624   :  { %2792 = vsyncpa [#allocation9], 1 }
 0x625   :  { %2794 = vsyncpa [#allocation9 + $0x1], 1 }
 0x626   :  { %2795 = vsyncpa [#allocation12], 1 }
 0x627   :  { %2796 = vsyncpa [#allocation15], 1 }
 0x628   :  { %2797 = vsyncpa [#allocation18], 1 }
 0x629   :  { %2798 = vsyncpa [#allocation7], 1 }
 0x62a   :  { %2800 = vsyncpa [#allocation7 + $0x1], 1 }
 0x62b   :  { %2801 = vsyncpa [#allocation21], 1 }
 0x62c   :  { %2803 = vsyncpa [#allocation21 + $0x1], 1 }

</bundles_post_ra>
